<compile_context>
chip_gen: v5e
topology: v5e:2x2
jax: 0.10.0
libtpu: 0.0.40
codegen_flags: <defaults>
</compile_context>

<pallas_src>
import math

import jax
import jax.numpy as jnp
from jax.experimental import pallas as pl
from jax.experimental.pallas import tpu as pltpu


def conv3d_min_softmax(x, conv_weight, conv_bias):
    """x: (B, Cin, D, H, W); conv_weight: (Cout, Cin, KD, KH, KW); conv_bias: (Cout,).

    Returns (B, Cout, H', W') matching
        softmax(min(conv3d(x, w, b), dim=2).values, dim=1)
    """
    B, Cin, D, H, W = x.shape
    Cout, _, KD, KH, KW = conv_weight.shape
    Dp, Hp, Wp = D - KD + 1, H - KH + 1, W - KW + 1
    HW = H * W
    K = KD * KH * KW * Cin

    # Per-depth-plane stride S (multiple of 128): one (H, W) plane plus the largest
    # in-plane (ky, kx) shift, so every shifted read for a *valid* output position stays
    # inside its own plane's real data.  Positions past Hp*Wp are finite garbage and are
    # cropped in the wrapper (softmax/min are per-lane, so they never contaminate valid lanes).
    S = ((HW + (KH - 1) * W + (KW - 1) + 127) // 128) * 128
    N = Dp * S                                        # matmul lane extent, 128-aligned
    max_shift = (KD - 1) * S + (KH - 1) * W + (KW - 1)
    L = ((max_shift + N + 127) // 128) * 128          # padded flat length per (b, ci)

    def kernel(x_ref, w_ref, b_ref, o_ref, p_ref):
        # x_ref: (1, Cin, L)    zero-padded flat input (plane stride S)
        # w_ref: (Cout, K)      flattened conv weight, (kz, ky, kx, ci) row order
        # b_ref: (Cout, 1)      conv bias column
        # o_ref: (1, Cout, S)   lane-dense output block
        # p_ref: (K, N) f32     VMEM scratch: in-kernel im2col slab

        # Fused im2col: KD*KH*KW static shifted copies (no HBM round trip, no grid steps).
        idx = 0
        for kz in range(KD):
            for ky in range(KH):
                for kx in range(KW):
                    shift = kz * S + ky * W + kx          # static per-copy lane shift
                    p_ref[idx * Cin:(idx + 1) * Cin, :] = x_ref[0, :, shift:shift + N]
                    idx += 1

        # ONE matmul per batch element on the MXU: (Cout, K) @ (K, Dp*S), f32 accumulation.
        conv = jnp.dot(w_ref[...], p_ref[...], preferred_element_type=jnp.float32)

        # Min over output depth = chain of lane-aligned S-wide chunk minimums (VPU).
        mn = conv[:, 0:S]
        for d in range(1, Dp):
            mn = jnp.minimum(mn, conv[:, d * S:(d + 1) * S])

        # Bias is depth-invariant -> add once after the min, then softmax over channels.
        logits = mn + b_ref[...]
        m = jnp.max(logits, axis=0, keepdims=True)
        e = jnp.exp(logits - m)
        probs = e / jnp.sum(e, axis=0, keepdims=True)
        o_ref[0] = probs.astype(o_ref.dtype)              # (Cout, S): full-lane unmasked store

    # ---- light wrapper re-layout (reshape + zero-pad only; no 27x patch blob) ----
    xf = x.reshape(B, Cin, D, HW)
    xf = jnp.pad(xf, ((0, 0), (0, 0), (0, 0), (0, S - HW)))
    xf = xf.reshape(B, Cin, D * S)
    xf = jnp.pad(xf, ((0, 0), (0, 0), (0, L - D * S)))

    # Weight flattened to (Cout, K) with (kz, ky, kx, ci) ordering == p_ref row order.
    w_flat = jnp.transpose(conv_weight, (0, 2, 3, 4, 1)).reshape(Cout, K)
    b_col = conv_bias.reshape(Cout, 1)

    out = pl.pallas_call(
        kernel,
        out_shape=jax.ShapeDtypeStruct((B, Cout, S), x.dtype),
        grid_spec=pltpu.PrefetchScalarGridSpec(
            num_scalar_prefetch=0,
            grid=(B,),
            in_specs=[
                pl.BlockSpec((1, Cin, L), lambda b: (b, 0, 0)),
                pl.BlockSpec((Cout, K), lambda b: (0, 0)),
                pl.BlockSpec((Cout, 1), lambda b: (0, 0)),
            ],
            out_specs=pl.BlockSpec((1, Cout, S), lambda b: (b, 0, 0)),
            scratch_shapes=[pltpu.VMEM((K, N), jnp.float32)],
        ),
        compiler_params=pltpu.CompilerParams(
            dimension_semantics=("parallel",)),           # v7x: two TCs split the batch
    )(xf, w_flat, b_col)

    # Crop valid spatial positions: lane p = h*W + w, valid for h < Hp, w < Wp.
    out = out[:, :, :HW].reshape(B, Cout, H, W)[:, :, :Hp, :Wp]
    return out


def _reference(x, conv_weight, conv_bias):
    y = jax.lax.conv_general_dilated(
        x, conv_weight, window_strides=(1, 1, 1), padding="VALID",
        dimension_numbers=("NCDHW", "OIDHW", "NCDHW"),
        precision=jax.lax.Precision.HIGHEST)
    y = y + conv_bias[None, :, None, None, None]
    y = jnp.min(y, axis=2)
    return jax.nn.softmax(y, axis=1)


if __name__ == "__main__":
    in_channels, out_channels, kernel_size = 3, 16, 3
    B, D, H, W = 2, 12, 12, 12

    key = jax.random.PRNGKey(0)
    kw, kb, kx = jax.random.split(key, 3)

    # Deterministic Conv3d-style init (uniform +/- 1/sqrt(fan_in)), bias shifted by 0.02
    fan_in = in_channels * kernel_size ** 3
    bound = 1.0 / math.sqrt(fan_in)
    conv_weight = jax.random.uniform(
        kw, (out_channels, in_channels, kernel_size, kernel_size, kernel_size),
        minval=-bound, maxval=bound, dtype=jnp.float32)
    conv_bias = jax.random.uniform(
        kb, (out_channels,), minval=-bound, maxval=bound, dtype=jnp.float32) + 0.02

    x = jax.random.normal(kx, (B, in_channels, D, H, W), dtype=jnp.float32)

    out = jax.block_until_ready(jax.jit(conv3d_min_softmax)(x, conv_weight, conv_bias))
    ref = jax.block_until_ready(_reference(x, conv_weight, conv_bias))

    assert out.shape == (B, out_channels, H - kernel_size + 1, W - kernel_size + 1), out.shape
    assert jnp.allclose(out, ref, atol=5e-5, rtol=1e-5), float(jnp.max(jnp.abs(out - ref)))
    print("KERNEL_OK")
</pallas_src>

<mosaic_0001>
module attributes {stable_mosaic.version = 11 : i64} {
  func.func @kernel(%arg0: i32, %arg1: memref<1x3x3200xf32, #tpu.memory_space<vmem>>, %arg2: memref<16x81xf32, #tpu.memory_space<vmem>>, %arg3: memref<16x1xf32, #tpu.memory_space<vmem>>, %arg4: memref<1x16x256xf32, #tpu.memory_space<vmem>>, %arg5: memref<81x2560xf32, #tpu.memory_space<vmem>>) attributes {dimension_semantics = [#tpu.dimension_semantics<parallel>], iteration_bounds = array<i64: 2>, scalar_prefetch = 0 : i64, scratch_operands = 1 : i64, tpu.core_type = #tpu.core_type<tc>, window_params = [{transform_indices = @transform_0, window_bounds = array<i64: 1, 3, 3200>}, {pipeline_mode = #tpu.pipeline_mode<synchronous>, transform_indices = @transform_1, window_bounds = array<i64: 16, 81>}, {pipeline_mode = #tpu.pipeline_mode<synchronous>, transform_indices = @transform_2, window_bounds = array<i64: 16, 1>}, {transform_indices = @transform_3, window_bounds = array<i64: 1, 16, 256>}]} {
    %c0 = arith.constant 0 : index
    %c0_0 = arith.constant 0 : index
    %c0_1 = arith.constant 0 : index
    %0 = vector.load %arg1[%c0, %c0_0, %c0_1] : memref<1x3x3200xf32, #tpu.memory_space<vmem>>, vector<1x3x2560xf32>
    %1 = vector.shape_cast %0 : vector<1x3x2560xf32> to vector<3x2560xf32>
    %c0_2 = arith.constant 0 : index
    %c0_3 = arith.constant 0 : index
    %2 = vector.load %arg5[%c0_2, %c0_3] : memref<81x2560xf32, #tpu.memory_space<vmem>>, vector<3x2560xf32>
    tpu.vector_store %arg5[%c0_2, %c0_3], %1 {strides = array<i32>} : memref<81x2560xf32, #tpu.memory_space<vmem>>, vector<3x2560xf32>,
    %c0_4 = arith.constant 0 : index
    %c0_5 = arith.constant 0 : index
    %c1 = arith.constant 1 : index
    %3 = vector.load %arg1[%c0_4, %c0_5, %c1] : memref<1x3x3200xf32, #tpu.memory_space<vmem>>, vector<1x3x2560xf32>
    %4 = vector.shape_cast %3 : vector<1x3x2560xf32> to vector<3x2560xf32>
    %c3 = arith.constant 3 : index
    %c0_6 = arith.constant 0 : index
    %5 = vector.load %arg5[%c3, %c0_6] : memref<81x2560xf32, #tpu.memory_space<vmem>>, vector<3x2560xf32>
    tpu.vector_store %arg5[%c3, %c0_6], %4 {strides = array<i32>} : memref<81x2560xf32, #tpu.memory_space<vmem>>, vector<3x2560xf32>,
    %c0_7 = arith.constant 0 : index
    %c0_8 = arith.constant 0 : index
    %c2 = arith.constant 2 : index
    %6 = vector.load %arg1[%c0_7, %c0_8, %c2] : memref<1x3x3200xf32, #tpu.memory_space<vmem>>, vector<1x3x2560xf32>
    %7 = vector.shape_cast %6 : vector<1x3x2560xf32> to vector<3x2560xf32>
    %c6 = arith.constant 6 : index
    %c0_9 = arith.constant 0 : index
    %8 = vector.load %arg5[%c6, %c0_9] : memref<81x2560xf32, #tpu.memory_space<vmem>>, vector<3x2560xf32>
    tpu.vector_store %arg5[%c6, %c0_9], %7 {strides = array<i32>} : memref<81x2560xf32, #tpu.memory_space<vmem>>, vector<3x2560xf32>,
    %c0_10 = arith.constant 0 : index
    %c0_11 = arith.constant 0 : index
    %c12 = arith.constant 12 : index
    %9 = vector.load %arg1[%c0_10, %c0_11, %c12] : memref<1x3x3200xf32, #tpu.memory_space<vmem>>, vector<1x3x2560xf32>
    %10 = vector.shape_cast %9 : vector<1x3x2560xf32> to vector<3x2560xf32>
    %c9 = arith.constant 9 : index
    %c0_12 = arith.constant 0 : index
    %11 = vector.load %arg5[%c9, %c0_12] : memref<81x2560xf32, #tpu.memory_space<vmem>>, vector<3x2560xf32>
    tpu.vector_store %arg5[%c9, %c0_12], %10 {strides = array<i32>} : memref<81x2560xf32, #tpu.memory_space<vmem>>, vector<3x2560xf32>,
    %c0_13 = arith.constant 0 : index
    %c0_14 = arith.constant 0 : index
    %c13 = arith.constant 13 : index
    %12 = vector.load %arg1[%c0_13, %c0_14, %c13] : memref<1x3x3200xf32, #tpu.memory_space<vmem>>, vector<1x3x2560xf32>
    %13 = vector.shape_cast %12 : vector<1x3x2560xf32> to vector<3x2560xf32>
    %c12_15 = arith.constant 12 : index
    %c0_16 = arith.constant 0 : index
    %14 = vector.load %arg5[%c12_15, %c0_16] : memref<81x2560xf32, #tpu.memory_space<vmem>>, vector<3x2560xf32>
    tpu.vector_store %arg5[%c12_15, %c0_16], %13 {strides = array<i32>} : memref<81x2560xf32, #tpu.memory_space<vmem>>, vector<3x2560xf32>,
    %c0_17 = arith.constant 0 : index
    %c0_18 = arith.constant 0 : index
    %c14 = arith.constant 14 : index
    %15 = vector.load %arg1[%c0_17, %c0_18, %c14] : memref<1x3x3200xf32, #tpu.memory_space<vmem>>, vector<1x3x2560xf32>
    %16 = vector.shape_cast %15 : vector<1x3x2560xf32> to vector<3x2560xf32>
    %c15 = arith.constant 15 : index
    %c0_19 = arith.constant 0 : index
    %17 = vector.load %arg5[%c15, %c0_19] : memref<81x2560xf32, #tpu.memory_space<vmem>>, vector<3x2560xf32>
    tpu.vector_store %arg5[%c15, %c0_19], %16 {strides = array<i32>} : memref<81x2560xf32, #tpu.memory_space<vmem>>, vector<3x2560xf32>,
    %c0_20 = arith.constant 0 : index
    %c0_21 = arith.constant 0 : index
    %c24 = arith.constant 24 : index
    %18 = vector.load %arg1[%c0_20, %c0_21, %c24] : memref<1x3x3200xf32, #tpu.memory_space<vmem>>, vector<1x3x2560xf32>
    %19 = vector.shape_cast %18 : vector<1x3x2560xf32> to vector<3x2560xf32>
    %c18 = arith.constant 18 : index
    %c0_22 = arith.constant 0 : index
    %20 = vector.load %arg5[%c18, %c0_22] : memref<81x2560xf32, #tpu.memory_space<vmem>>, vector<3x2560xf32>
    tpu.vector_store %arg5[%c18, %c0_22], %19 {strides = array<i32>} : memref<81x2560xf32, #tpu.memory_space<vmem>>, vector<3x2560xf32>,
    %c0_23 = arith.constant 0 : index
    %c0_24 = arith.constant 0 : index
    %c25 = arith.constant 25 : index
    %21 = vector.load %arg1[%c0_23, %c0_24, %c25] : memref<1x3x3200xf32, #tpu.memory_space<vmem>>, vector<1x3x2560xf32>
    %22 = vector.shape_cast %21 : vector<1x3x2560xf32> to vector<3x2560xf32>
    %c21 = arith.constant 21 : index
    %c0_25 = arith.constant 0 : index
    %23 = vector.load %arg5[%c21, %c0_25] : memref<81x2560xf32, #tpu.memory_space<vmem>>, vector<3x2560xf32>
    tpu.vector_store %arg5[%c21, %c0_25], %22 {strides = array<i32>} : memref<81x2560xf32, #tpu.memory_space<vmem>>, vector<3x2560xf32>,
    %c0_26 = arith.constant 0 : index
    %c0_27 = arith.constant 0 : index
    %c26 = arith.constant 26 : index
    %24 = vector.load %arg1[%c0_26, %c0_27, %c26] : memref<1x3x3200xf32, #tpu.memory_space<vmem>>, vector<1x3x2560xf32>
    %25 = vector.shape_cast %24 : vector<1x3x2560xf32> to vector<3x2560xf32>
    %c24_28 = arith.constant 24 : index
    %c0_29 = arith.constant 0 : index
    %26 = vector.load %arg5[%c24_28, %c0_29] : memref<81x2560xf32, #tpu.memory_space<vmem>>, vector<3x2560xf32>
    tpu.vector_store %arg5[%c24_28, %c0_29], %25 {strides = array<i32>} : memref<81x2560xf32, #tpu.memory_space<vmem>>, vector<3x2560xf32>,
    %c0_30 = arith.constant 0 : index
    %c0_31 = arith.constant 0 : index
    %c256 = arith.constant 256 : index
    %27 = vector.load %arg1[%c0_30, %c0_31, %c256] : memref<1x3x3200xf32, #tpu.memory_space<vmem>>, vector<1x3x2560xf32>
    %28 = vector.shape_cast %27 : vector<1x3x2560xf32> to vector<3x2560xf32>
    %c27 = arith.constant 27 : index
    %c0_32 = arith.constant 0 : index
    %29 = vector.load %arg5[%c27, %c0_32] : memref<81x2560xf32, #tpu.memory_space<vmem>>, vector<3x2560xf32>
    tpu.vector_store %arg5[%c27, %c0_32], %28 {strides = array<i32>} : memref<81x2560xf32, #tpu.memory_space<vmem>>, vector<3x2560xf32>,
    %c0_33 = arith.constant 0 : index
    %c0_34 = arith.constant 0 : index
    %c257 = arith.constant 257 : index
    %30 = vector.load %arg1[%c0_33, %c0_34, %c257] : memref<1x3x3200xf32, #tpu.memory_space<vmem>>, vector<1x3x2560xf32>
    %31 = vector.shape_cast %30 : vector<1x3x2560xf32> to vector<3x2560xf32>
    %c30 = arith.constant 30 : index
    %c0_35 = arith.constant 0 : index
    %32 = vector.load %arg5[%c30, %c0_35] : memref<81x2560xf32, #tpu.memory_space<vmem>>, vector<3x2560xf32>
    tpu.vector_store %arg5[%c30, %c0_35], %31 {strides = array<i32>} : memref<81x2560xf32, #tpu.memory_space<vmem>>, vector<3x2560xf32>,
    %c0_36 = arith.constant 0 : index
    %c0_37 = arith.constant 0 : index
    %c258 = arith.constant 258 : index
    %33 = vector.load %arg1[%c0_36, %c0_37, %c258] : memref<1x3x3200xf32, #tpu.memory_space<vmem>>, vector<1x3x2560xf32>
    %34 = vector.shape_cast %33 : vector<1x3x2560xf32> to vector<3x2560xf32>
    %c33 = arith.constant 33 : index
    %c0_38 = arith.constant 0 : index
    %35 = vector.load %arg5[%c33, %c0_38] : memref<81x2560xf32, #tpu.memory_space<vmem>>, vector<3x2560xf32>
    tpu.vector_store %arg5[%c33, %c0_38], %34 {strides = array<i32>} : memref<81x2560xf32, #tpu.memory_space<vmem>>, vector<3x2560xf32>,
    %c0_39 = arith.constant 0 : index
    %c0_40 = arith.constant 0 : index
    %c268 = arith.constant 268 : index
    %36 = vector.load %arg1[%c0_39, %c0_40, %c268] : memref<1x3x3200xf32, #tpu.memory_space<vmem>>, vector<1x3x2560xf32>
    %37 = vector.shape_cast %36 : vector<1x3x2560xf32> to vector<3x2560xf32>
    %c36 = arith.constant 36 : index
    %c0_41 = arith.constant 0 : index
    %38 = vector.load %arg5[%c36, %c0_41] : memref<81x2560xf32, #tpu.memory_space<vmem>>, vector<3x2560xf32>
    tpu.vector_store %arg5[%c36, %c0_41], %37 {strides = array<i32>} : memref<81x2560xf32, #tpu.memory_space<vmem>>, vector<3x2560xf32>,
    %c0_42 = arith.constant 0 : index
    %c0_43 = arith.constant 0 : index
    %c269 = arith.constant 269 : index
    %39 = vector.load %arg1[%c0_42, %c0_43, %c269] : memref<1x3x3200xf32, #tpu.memory_space<vmem>>, vector<1x3x2560xf32>
    %40 = vector.shape_cast %39 : vector<1x3x2560xf32> to vector<3x2560xf32>
    %c39 = arith.constant 39 : index
    %c0_44 = arith.constant 0 : index
    %41 = vector.load %arg5[%c39, %c0_44] : memref<81x2560xf32, #tpu.memory_space<vmem>>, vector<3x2560xf32>
    tpu.vector_store %arg5[%c39, %c0_44], %40 {strides = array<i32>} : memref<81x2560xf32, #tpu.memory_space<vmem>>, vector<3x2560xf32>,
    %c0_45 = arith.constant 0 : index
    %c0_46 = arith.constant 0 : index
    %c270 = arith.constant 270 : index
    %42 = vector.load %arg1[%c0_45, %c0_46, %c270] : memref<1x3x3200xf32, #tpu.memory_space<vmem>>, vector<1x3x2560xf32>
    %43 = vector.shape_cast %42 : vector<1x3x2560xf32> to vector<3x2560xf32>
    %c42 = arith.constant 42 : index
    %c0_47 = arith.constant 0 : index
    %44 = vector.load %arg5[%c42, %c0_47] : memref<81x2560xf32, #tpu.memory_space<vmem>>, vector<3x2560xf32>
    tpu.vector_store %arg5[%c42, %c0_47], %43 {strides = array<i32>} : memref<81x2560xf32, #tpu.memory_space<vmem>>, vector<3x2560xf32>,
    %c0_48 = arith.constant 0 : index
    %c0_49 = arith.constant 0 : index
    %c280 = arith.constant 280 : index
    %45 = vector.load %arg1[%c0_48, %c0_49, %c280] : memref<1x3x3200xf32, #tpu.memory_space<vmem>>, vector<1x3x2560xf32>
    %46 = vector.shape_cast %45 : vector<1x3x2560xf32> to vector<3x2560xf32>
    %c45 = arith.constant 45 : index
    %c0_50 = arith.constant 0 : index
    %47 = vector.load %arg5[%c45, %c0_50] : memref<81x2560xf32, #tpu.memory_space<vmem>>, vector<3x2560xf32>
    tpu.vector_store %arg5[%c45, %c0_50], %46 {strides = array<i32>} : memref<81x2560xf32, #tpu.memory_space<vmem>>, vector<3x2560xf32>,
    %c0_51 = arith.constant 0 : index
    %c0_52 = arith.constant 0 : index
    %c281 = arith.constant 281 : index
    %48 = vector.load %arg1[%c0_51, %c0_52, %c281] : memref<1x3x3200xf32, #tpu.memory_space<vmem>>, vector<1x3x2560xf32>
    %49 = vector.shape_cast %48 : vector<1x3x2560xf32> to vector<3x2560xf32>
    %c48 = arith.constant 48 : index
    %c0_53 = arith.constant 0 : index
    %50 = vector.load %arg5[%c48, %c0_53] : memref<81x2560xf32, #tpu.memory_space<vmem>>, vector<3x2560xf32>
    tpu.vector_store %arg5[%c48, %c0_53], %49 {strides = array<i32>} : memref<81x2560xf32, #tpu.memory_space<vmem>>, vector<3x2560xf32>,
    %c0_54 = arith.constant 0 : index
    %c0_55 = arith.constant 0 : index
    %c282 = arith.constant 282 : index
    %51 = vector.load %arg1[%c0_54, %c0_55, %c282] : memref<1x3x3200xf32, #tpu.memory_space<vmem>>, vector<1x3x2560xf32>
    %52 = vector.shape_cast %51 : vector<1x3x2560xf32> to vector<3x2560xf32>
    %c51 = arith.constant 51 : index
    %c0_56 = arith.constant 0 : index
    %53 = vector.load %arg5[%c51, %c0_56] : memref<81x2560xf32, #tpu.memory_space<vmem>>, vector<3x2560xf32>
    tpu.vector_store %arg5[%c51, %c0_56], %52 {strides = array<i32>} : memref<81x2560xf32, #tpu.memory_space<vmem>>, vector<3x2560xf32>,
    %c0_57 = arith.constant 0 : index
    %c0_58 = arith.constant 0 : index
    %c512 = arith.constant 512 : index
    %54 = vector.load %arg1[%c0_57, %c0_58, %c512] : memref<1x3x3200xf32, #tpu.memory_space<vmem>>, vector<1x3x2560xf32>
    %55 = vector.shape_cast %54 : vector<1x3x2560xf32> to vector<3x2560xf32>
    %c54 = arith.constant 54 : index
    %c0_59 = arith.constant 0 : index
    %56 = vector.load %arg5[%c54, %c0_59] : memref<81x2560xf32, #tpu.memory_space<vmem>>, vector<3x2560xf32>
    tpu.vector_store %arg5[%c54, %c0_59], %55 {strides = array<i32>} : memref<81x2560xf32, #tpu.memory_space<vmem>>, vector<3x2560xf32>,
    %c0_60 = arith.constant 0 : index
    %c0_61 = arith.constant 0 : index
    %c513 = arith.constant 513 : index
    %57 = vector.load %arg1[%c0_60, %c0_61, %c513] : memref<1x3x3200xf32, #tpu.memory_space<vmem>>, vector<1x3x2560xf32>
    %58 = vector.shape_cast %57 : vector<1x3x2560xf32> to vector<3x2560xf32>
    %c57 = arith.constant 57 : index
    %c0_62 = arith.constant 0 : index
    %59 = vector.load %arg5[%c57, %c0_62] : memref<81x2560xf32, #tpu.memory_space<vmem>>, vector<3x2560xf32>
    tpu.vector_store %arg5[%c57, %c0_62], %58 {strides = array<i32>} : memref<81x2560xf32, #tpu.memory_space<vmem>>, vector<3x2560xf32>,
    %c0_63 = arith.constant 0 : index
    %c0_64 = arith.constant 0 : index
    %c514 = arith.constant 514 : index
    %60 = vector.load %arg1[%c0_63, %c0_64, %c514] : memref<1x3x3200xf32, #tpu.memory_space<vmem>>, vector<1x3x2560xf32>
    %61 = vector.shape_cast %60 : vector<1x3x2560xf32> to vector<3x2560xf32>
    %c60 = arith.constant 60 : index
    %c0_65 = arith.constant 0 : index
    %62 = vector.load %arg5[%c60, %c0_65] : memref<81x2560xf32, #tpu.memory_space<vmem>>, vector<3x2560xf32>
    tpu.vector_store %arg5[%c60, %c0_65], %61 {strides = array<i32>} : memref<81x2560xf32, #tpu.memory_space<vmem>>, vector<3x2560xf32>,
    %c0_66 = arith.constant 0 : index
    %c0_67 = arith.constant 0 : index
    %c524 = arith.constant 524 : index
    %63 = vector.load %arg1[%c0_66, %c0_67, %c524] : memref<1x3x3200xf32, #tpu.memory_space<vmem>>, vector<1x3x2560xf32>
    %64 = vector.shape_cast %63 : vector<1x3x2560xf32> to vector<3x2560xf32>
    %c63 = arith.constant 63 : index
    %c0_68 = arith.constant 0 : index
    %65 = vector.load %arg5[%c63, %c0_68] : memref<81x2560xf32, #tpu.memory_space<vmem>>, vector<3x2560xf32>
    tpu.vector_store %arg5[%c63, %c0_68], %64 {strides = array<i32>} : memref<81x2560xf32, #tpu.memory_space<vmem>>, vector<3x2560xf32>,
    %c0_69 = arith.constant 0 : index
    %c0_70 = arith.constant 0 : index
    %c525 = arith.constant 525 : index
    %66 = vector.load %arg1[%c0_69, %c0_70, %c525] : memref<1x3x3200xf32, #tpu.memory_space<vmem>>, vector<1x3x2560xf32>
    %67 = vector.shape_cast %66 : vector<1x3x2560xf32> to vector<3x2560xf32>
    %c66 = arith.constant 66 : index
    %c0_71 = arith.constant 0 : index
    %68 = vector.load %arg5[%c66, %c0_71] : memref<81x2560xf32, #tpu.memory_space<vmem>>, vector<3x2560xf32>
    tpu.vector_store %arg5[%c66, %c0_71], %67 {strides = array<i32>} : memref<81x2560xf32, #tpu.memory_space<vmem>>, vector<3x2560xf32>,
    %c0_72 = arith.constant 0 : index
    %c0_73 = arith.constant 0 : index
    %c526 = arith.constant 526 : index
    %69 = vector.load %arg1[%c0_72, %c0_73, %c526] : memref<1x3x3200xf32, #tpu.memory_space<vmem>>, vector<1x3x2560xf32>
    %70 = vector.shape_cast %69 : vector<1x3x2560xf32> to vector<3x2560xf32>
    %c69 = arith.constant 69 : index
    %c0_74 = arith.constant 0 : index
    %71 = vector.load %arg5[%c69, %c0_74] : memref<81x2560xf32, #tpu.memory_space<vmem>>, vector<3x2560xf32>
    tpu.vector_store %arg5[%c69, %c0_74], %70 {strides = array<i32>} : memref<81x2560xf32, #tpu.memory_space<vmem>>, vector<3x2560xf32>,
    %c0_75 = arith.constant 0 : index
    %c0_76 = arith.constant 0 : index
    %c536 = arith.constant 536 : index
    %72 = vector.load %arg1[%c0_75, %c0_76, %c536] : memref<1x3x3200xf32, #tpu.memory_space<vmem>>, vector<1x3x2560xf32>
    %73 = vector.shape_cast %72 : vector<1x3x2560xf32> to vector<3x2560xf32>
    %c72 = arith.constant 72 : index
    %c0_77 = arith.constant 0 : index
    %74 = vector.load %arg5[%c72, %c0_77] : memref<81x2560xf32, #tpu.memory_space<vmem>>, vector<3x2560xf32>
    tpu.vector_store %arg5[%c72, %c0_77], %73 {strides = array<i32>} : memref<81x2560xf32, #tpu.memory_space<vmem>>, vector<3x2560xf32>,
    %c0_78 = arith.constant 0 : index
    %c0_79 = arith.constant 0 : index
    %c537 = arith.constant 537 : index
    %75 = vector.load %arg1[%c0_78, %c0_79, %c537] : memref<1x3x3200xf32, #tpu.memory_space<vmem>>, vector<1x3x2560xf32>
    %76 = vector.shape_cast %75 : vector<1x3x2560xf32> to vector<3x2560xf32>
    %c75 = arith.constant 75 : index
    %c0_80 = arith.constant 0 : index
    %77 = vector.load %arg5[%c75, %c0_80] : memref<81x2560xf32, #tpu.memory_space<vmem>>, vector<3x2560xf32>
    tpu.vector_store %arg5[%c75, %c0_80], %76 {strides = array<i32>} : memref<81x2560xf32, #tpu.memory_space<vmem>>, vector<3x2560xf32>,
    %c0_81 = arith.constant 0 : index
    %c0_82 = arith.constant 0 : index
    %c538 = arith.constant 538 : index
    %78 = vector.load %arg1[%c0_81, %c0_82, %c538] : memref<1x3x3200xf32, #tpu.memory_space<vmem>>, vector<1x3x2560xf32>
    %79 = vector.shape_cast %78 : vector<1x3x2560xf32> to vector<3x2560xf32>
    %c78 = arith.constant 78 : index
    %c0_83 = arith.constant 0 : index
    %80 = vector.load %arg5[%c78, %c0_83] : memref<81x2560xf32, #tpu.memory_space<vmem>>, vector<3x2560xf32>
    tpu.vector_store %arg5[%c78, %c0_83], %79 {strides = array<i32>} : memref<81x2560xf32, #tpu.memory_space<vmem>>, vector<3x2560xf32>,
    %c0_84 = arith.constant 0 : index
    %c0_85 = arith.constant 0 : index
    %81 = vector.load %arg2[%c0_84, %c0_85] : memref<16x81xf32, #tpu.memory_space<vmem>>, vector<16x81xf32>
    %c0_86 = arith.constant 0 : index
    %c0_87 = arith.constant 0 : index
    %82 = vector.load %arg5[%c0_86, %c0_87] : memref<81x2560xf32, #tpu.memory_space<vmem>>, vector<81x2560xf32>
    %cst = arith.constant dense<0.000000e+00> : vector<16x2560xf32>
    %83 = tpu.matmul %81, %82, %cst {dimension_numbers = #tpu.dot_dimension_numbers<[1], [0], [0], [1], [0, 0, 1, 1], [], []>} : vector<16x81xf32>, vector<81x2560xf32>, vector<16x2560xf32> -> vector<16x2560xf32>
    %84 = vector.extract_strided_slice %83 {offsets = [0, 0], sizes = [16, 256], strides = [1, 1]} : vector<16x2560xf32> to vector<16x256xf32>
    %85 = vector.extract_strided_slice %83 {offsets = [0, 256], sizes = [16, 256], strides = [1, 1]} : vector<16x2560xf32> to vector<16x256xf32>
    %86 = arith.minimumf %84, %85 : vector<16x256xf32>
    %87 = vector.extract_strided_slice %83 {offsets = [0, 512], sizes = [16, 256], strides = [1, 1]} : vector<16x2560xf32> to vector<16x256xf32>
    %88 = arith.minimumf %86, %87 : vector<16x256xf32>
    %89 = vector.extract_strided_slice %83 {offsets = [0, 768], sizes = [16, 256], strides = [1, 1]} : vector<16x2560xf32> to vector<16x256xf32>
    %90 = arith.minimumf %88, %89 : vector<16x256xf32>
    %91 = vector.extract_strided_slice %83 {offsets = [0, 1024], sizes = [16, 256], strides = [1, 1]} : vector<16x2560xf32> to vector<16x256xf32>
    %92 = arith.minimumf %90, %91 : vector<16x256xf32>
    %93 = vector.extract_strided_slice %83 {offsets = [0, 1280], sizes = [16, 256], strides = [1, 1]} : vector<16x2560xf32> to vector<16x256xf32>
    %94 = arith.minimumf %92, %93 : vector<16x256xf32>
    %95 = vector.extract_strided_slice %83 {offsets = [0, 1536], sizes = [16, 256], strides = [1, 1]} : vector<16x2560xf32> to vector<16x256xf32>
    %96 = arith.minimumf %94, %95 : vector<16x256xf32>
    %97 = vector.extract_strided_slice %83 {offsets = [0, 1792], sizes = [16, 256], strides = [1, 1]} : vector<16x2560xf32> to vector<16x256xf32>
    %98 = arith.minimumf %96, %97 : vector<16x256xf32>
    %99 = vector.extract_strided_slice %83 {offsets = [0, 2048], sizes = [16, 256], strides = [1, 1]} : vector<16x2560xf32> to vector<16x256xf32>
    %100 = arith.minimumf %98, %99 : vector<16x256xf32>
    %101 = vector.extract_strided_slice %83 {offsets = [0, 2304], sizes = [16, 256], strides = [1, 1]} : vector<16x2560xf32> to vector<16x256xf32>
    %102 = arith.minimumf %100, %101 : vector<16x256xf32>
    %c0_88 = arith.constant 0 : index
    %c0_89 = arith.constant 0 : index
    %103 = vector.load %arg3[%c0_88, %c0_89] : memref<16x1xf32, #tpu.memory_space<vmem>>, vector<16x1xf32>
    %104 = vector.broadcast %103 : vector<16x1xf32> to vector<16x256xf32>
    %105 = arith.addf %102, %104 : vector<16x256xf32>
    %cst_90 = arith.constant dense<0xFF800000> : vector<256xf32>
    %106 = vector.multi_reduction <maximumf>, %105, %cst_90 [0] : vector<16x256xf32> to vector<256xf32>
    %107 = vector.shape_cast %106 : vector<256xf32> to vector<1x256xf32>
    %108 = vector.broadcast %107 : vector<1x256xf32> to vector<16x256xf32>
    %109 = arith.subf %105, %108 : vector<16x256xf32>
    %110 = math.exp %109 : vector<16x256xf32>
    %cst_91 = arith.constant dense<0.000000e+00> : vector<256xf32>
    %111 = vector.multi_reduction <add>, %110, %cst_91 [0] : vector<16x256xf32> to vector<256xf32>
    %112 = vector.shape_cast %111 : vector<256xf32> to vector<1x256xf32>
    %113 = vector.broadcast %112 : vector<1x256xf32> to vector<16x256xf32>
    %114 = arith.divf %110, %113 : vector<16x256xf32>
    %c0_92 = arith.constant 0 : index
    %c0_93 = arith.constant 0 : index
    %c0_94 = arith.constant 0 : index
    %115 = vector.load %arg4[%c0_92, %c0_93, %c0_94] : memref<1x16x256xf32, #tpu.memory_space<vmem>>, vector<1x16x256xf32>
    %116 = vector.shape_cast %115 : vector<1x16x256xf32> to vector<16x256xf32>
    %117 = vector.shape_cast %114 : vector<16x256xf32> to vector<1x16x256xf32>
    tpu.vector_store %arg4[%c0_92, %c0_93, %c0_94], %117 {strides = array<i32>} : memref<1x16x256xf32, #tpu.memory_space<vmem>>, vector<1x16x256xf32>,
    return
  }
  func.func @transform_0(%arg0: i32) -> (i32, i32, i32) {
    %c0_i32 = arith.constant 0 : i32
    %c0_i32_0 = arith.constant 0 : i32
    %c0_i32_1 = arith.constant 0 : i32
    return %arg0, %c0_i32, %c0_i32_0 : i32, i32, i32
  }
  func.func @transform_1(%arg0: i32) -> (i32, i32) {
    %c0_i32 = arith.constant 0 : i32
    %c0_i32_0 = arith.constant 0 : i32
    %c0_i32_1 = arith.constant 0 : i32
    return %c0_i32, %c0_i32_0 : i32, i32
  }
  func.func @transform_2(%arg0: i32) -> (i32, i32) {
    %c0_i32 = arith.constant 0 : i32
    %c0_i32_0 = arith.constant 0 : i32
    %c0_i32_1 = arith.constant 0 : i32
    return %c0_i32, %c0_i32_0 : i32, i32
  }
  func.func @transform_3(%arg0: i32) -> (i32, i32, i32) {
    %c0_i32 = arith.constant 0 : i32
    %c0_i32_0 = arith.constant 0 : i32
    %c0_i32_1 = arith.constant 0 : i32
    return %arg0, %c0_i32, %c0_i32_0 : i32, i32, i32
  }
}

</mosaic_0001>

<bundles_post_ra>
// kernel: conv3d_min_softmax.1
= control target key start
LH: loop header
LB: loop body
LE: loop exit
PB: predicated region body
PF: predicated region fallthrough
CT: control target
= control target key end

     0   :  { %s5909_s12 = smov 0   ;;  %s8636_s0 = inlined_call_operand.vmem [shape: f32[2,3,3200], index: 0, kind: input, shape index: {}]   ;;  %s8637_s1 = inlined_call_operand.vmem [shape: f32[16,81], index: 1, kind: input, shape index: {}]   ;;  %s8638_s2 = inlined_call_operand.vmem [shape: f32[16,1], index: 2, kind: input, shape index: {}]   ;;  %s8639_s3 = inlined_call_operand.vmem [shape: f32[2,16,256], index: 3, kind: output, shape index: {}]  }
   0x1 LB: > { %s5768_s13 = sadd.s32 4294967295, %s5878_s12   ;;  %p5772_p0 = scmp.ge.s32.totalorder %s5878_s12, 1  ;;  %s5878_s12 = sphi %s5909_s12, %s13_s12  }
   0x2   : > { %p137_p1 = scmp.lt.s32.totalorder %s5878_s12, 3 }
   0x4   : > { %p138_p2 = pnand %p5772_p0, %p137_p1 }
   0x6   : > { %141 = sbr.rel (%p138_p2) target bundleno = 1836 (0x72c), region = 32 }
   0xb   : > { %p161_p3 = scmp.lt.s32.totalorder %s5768_s13, 1  ;;  %s5880_s18 = smov 127   ;;  %vm384_vm0 = vcmask 1039360   ;;  %vm565_vm1 = vcmask 1031168   ;;  %vm766_vm2 = vcmask 949248   ;;  %vm927_vm3 = vcmask 941056  }
   0xc   : > { %s5881_s19 = smov 126   ;;  %s5882_s20 = smov 116   ;;  %vm1108_vm4 = vcmask 932864   ;;  %vm1309_vm5 = vcmask 850944   ;;  %vm1490_vm6 = vcmask 842752   ;;  %vm1650_vm7 = vcmask 834560  }
   0xd   : > { %s8719_s13 = smov (!%p161_p3, %s5768_s13), 1  ;;  %s5883_s21 = smov 115   ;;  %vm5064_vm8 = vcmask 1040384   ;;  %vm5057_vm9 = vcmask 662528  }
   0xe   : > { %s5839_s14 = smul.u32 100, %s8719_s13  ;;  %s5884_s22 = smov 114  }
   0xf   : > { %s5885_s23 = smov 104   ;;  %s5886_s24 = smov 103  }
  0x10   : > { %s5923_s17 = scalar_lea.vmem %s8636_s0, %s5839_s14  ;;  %s5887_s25 = smov 102  }
  0x11   : > { %v174_v0 = vld [vmem:[%s5923_s17 + $0x18] sm:$0x77]  ;;  %v173_v1 = vld [vmem:[%s5923_s17 + $0x10] sm:$0x77]  ;;  %v172_v2 = vld [vmem:[%s5923_s17 + $0x8] sm:$0x77] }
  0x12   : > { %197 = vst [vmem:[#allocation1 + $0x30] ss:$2 sm:$0xff] %v174_v0  ;;  %v171_v3 = vld [vmem:[%s5923_s17] sm:$0x77]  ;;  %v178_v4 = vld [vmem:[%s5923_s17 + $0x38] sm:$0x77] }
  0x13   : > { %195 = vst [vmem:[#allocation1 + $0x20] ss:$2 sm:$0xff] %v173_v1  ;;  %v177_v5 = vld [vmem:[%s5923_s17 + $0x30] sm:$0x77]  ;;  %v176_v10 = vld [vmem:[%s5923_s17 + $0x28] sm:$0x77] }
  0x14   : > { %193 = vst [vmem:[#allocation1 + $0x10] ss:$2 sm:$0xff] %v172_v2  ;;  %v267_v13 = vld [vmem:[%s5923_s17 + $0x18] sm:$0x77]  ;;  %v266_v16 = vld [vmem:[%s5923_s17 + $0x10] sm:$0x77] }
  0x15   : > { %191 = vst [vmem:[#allocation1] ss:$2 sm:$0xff] %v171_v3  ;;  %v180_v19 = vld [vmem:[%s5923_s17 + $0x48] sm:$0x77]  ;;  %v175_v26 = vld [vmem:[%s5923_s17 + $0x20] sm:$0x77] }
  0x16   : > { %v265_v31 = vld [vmem:[%s5923_s17 + $0x8] sm:$0x77]  ;;  %v179_v36 = vld [vmem:[%s5923_s17 + $0x40] sm:$0x77]  ;;  %v271_v39 = vld [vmem:[%s5923_s17 + $0x38] sm:$0x77] }
  0x17   : > { %v270_v40 = vld [vmem:[%s5923_s17 + $0x30] sm:$0x77]  ;;  %v269_v41 = vld [vmem:[%s5923_s17 + $0x28] sm:$0x77]  ;;  %v264_v45 = vld [vmem:[%s5923_s17] sm:$0x77] }
  0x18   : > { %v274_v49 = vld [vmem:[%s5923_s17 + $0x50] sm:$0x7]  ;;  %v268_v54 = vld [vmem:[%s5923_s17 + $0x20] sm:$0x77]  ;;  %v273_v61 = vld [vmem:[%s5923_s17 + $0x48] sm:$0x77] }
  0x19   : > { %v204_v6 = vld.sshfl [vmem:[#allocation1 + $0x30] sm:$0xff pattern:$0x75316420]  ;;  %v205_v7 = vld.sshfl [vmem:[#allocation1 + $0x38] sm:$0xff pattern:$0x75316420] }
  0x1a   : > { %209 = vst [vmem:[#allocation1 + $0x30] ss:$2 sm:$0xff] %v178_v4  ;;  %v202_v8 = vld.sshfl [vmem:[#allocation1 + $0x20] sm:$0xff pattern:$0x75316420]  ;;  %s5838_s9 = sshll.u32 %s8719_s13, 5 }
  0x1b   : > { %250 = vst [vmem:[#allocation2 + $0x440] sm:$0x7] %v204_v6  ;;  %v203_v9 = vld.sshfl [vmem:[#allocation1 + $0x28] sm:$0xff pattern:$0x75316420]  ;;  %s170_s14 = scalar_lea.vmem %s8639_s3, %s5838_s9 }
  0x1c   : > { %251 = vst [vmem:[#allocation2 + $0x378] sm:$0x7] %v205_v7  ;;  %v200_v11 = vld.sshfl [vmem:[#allocation1 + $0x10] sm:$0xff pattern:$0x75316420] }
  0x1d   : > { %208 = vst [vmem:[#allocation1 + $0x20] ss:$2 sm:$0xff] %v177_v5  ;;  %v201_v12 = vld.sshfl [vmem:[#allocation1 + $0x18] sm:$0xff pattern:$0x75316420] }
  0x1e   : > { %248 = vst [vmem:[#allocation2 + $0x450] sm:$0x7] %v202_v8  ;;  %v198_v27 = vld.sshfl [vmem:[#allocation1] sm:$0xff pattern:$0x75316420] }
  0x1f   : > { %249 = vst [vmem:[#allocation2 + $0x328] sm:$0x7] %v203_v9  ;;  %v199_v28 = vld.sshfl [vmem:[#allocation1 + $0x8] sm:$0xff pattern:$0x75316420] }
  0x20   : > { %207 = vst [vmem:[#allocation1 + $0x10] ss:$2 sm:$0xff] %v176_v10  ;;  %v272_v62 = vld [vmem:[%s5923_s17 + $0x40] sm:$0x77]  ;;  %v447_v3 = vld [vmem:[%s5923_s17 + $0x10] sm:$0x77] }
  0x21   : > { %v216_v14 = vld.sshfl [vmem:[#allocation1 + $0x30] sm:$0xff pattern:$0x75316420]  ;;  %v217_v15 = vld.sshfl [vmem:[#allocation1 + $0x38] sm:$0xff pattern:$0x75316420] }
  0x22   : > { %292 = vst [vmem:[#allocation1 + $0x30] ss:$2 sm:$0xff] %v267_v13  ;;  %v445_v6 = vld [vmem:[%s5923_s17] sm:$0x77] }
  0x23   : > { %258 = vst [vmem:[#allocation2 + $0x6d0] sm:$0x7] %v216_v14 }
  0x24   : > { %259 = vst [vmem:[#allocation2 + $0x320] sm:$0x7] %v217_v15  ;;  %v214_v17 = vld.sshfl [vmem:[#allocation1 + $0x20] sm:$0xff pattern:$0x75316420] }
  0x25   : > { %v215_v18 = vld.sshfl [vmem:[#allocation1 + $0x28] sm:$0xff pattern:$0x75316420]  ;;  %256 = vst [vmem:[#allocation2 + $0x548] sm:$0x7] %v214_v17 }
  0x26   : > { %290 = vst [vmem:[#allocation1 + $0x20] ss:$2 sm:$0xff] %v266_v16 }
  0x27   : > { %257 = vst [vmem:[#allocation2 + $0x500] sm:$0x7] %v215_v18  ;;  %v212_v20 = vld.sshfl [vmem:[#allocation1 + $0x10] sm:$0xff pattern:$0x75316420] }
  0x28   : > { %v213_v21 = vld.sshfl [vmem:[#allocation1 + $0x18] sm:$0xff pattern:$0x75316420]  ;;  %246 = vst [vmem:[#allocation2 + $0x4d8] sm:$0x7] %v200_v11 }
  0x29   : > { %v300_v22 = vld.sshfl [vmem:[#allocation1 + $0x38] sm:$0xff pattern:$0x75316420]  ;;  %v299_v23 = vld.sshfl [vmem:[#allocation1 + $0x30] sm:$0xff pattern:$0x75316420] }
  0x2a   : > { %v328_v24 = vrot.slane %v300_v22, 5  ;;  %v327_v25 = vrot.slane %v299_v23, 5  ;;  %219 = vst [vmem:[#allocation1 + $0x10] ss:$2 sm:$0xff] %v180_v19  ;;  %v448_v19 = vld [vmem:[%s5923_s17 + $0x18] sm:$0x77] }
  0x2b   : > { %247 = vst [vmem:[#allocation2 + $0x18] sm:$0x7] %v201_v12  ;;  %v446_v12 = vld [vmem:[%s5923_s17 + $0x8] sm:$0x77] }
  0x2c   : > { %356 = vrot.lane.b32.xlu1 %v328_v24, %s5880_s18  ;;  %354 = vrot.lane.b32.xlu0 %v327_v25, %s5880_s18  ;;  %254 = vst [vmem:[#allocation2 + $0x490] sm:$0x7] %v212_v20  ;;  %v449_v20 = vld [vmem:[%s5923_s17 + $0x20] sm:$0x77] }
  0x2d   : > { %v297_v29 = vld.sshfl [vmem:[#allocation1 + $0x20] sm:$0xff pattern:$0x75316420]  ;;  %255 = vst [vmem:[#allocation2 + $0x318] sm:$0x7] %v213_v21 }
  0x2e   : > { %v325_v30 = vrot.slane %v297_v29, 5  ;;  %206 = vst [vmem:[#allocation1] ss:$2 sm:$0xff] %v175_v26  ;;  %v298_v32 = vld.sshfl [vmem:[#allocation1 + $0x28] sm:$0xff pattern:$0x75316420] }
  0x2f   : > { %244 = vst [vmem:[#allocation2 + $0x2b0] sm:$0x7] %v198_v27  ;;  %v326_v35 = vrot.slane %v298_v32, 5 }
  0x30   : > { %350 = vrot.lane.b32.xlu2 %v325_v30, %s5880_s18  ;;  %245 = vst [vmem:[#allocation2 + $0x3b0] sm:$0x7] %v199_v28  ;;  %v450_v28 = vld [vmem:[%s5923_s17 + $0x28] sm:$0x77] }
  0x31   : > { %v222_v33 = vld.sshfl [vmem:[#allocation1 + $0x10] sm:$0xff pattern:$0x75316420]  ;;  %v223_v34 = vld.sshfl [vmem:[#allocation1 + $0x18] sm:$0xff pattern:$0x75316420] }
  0x32   : > { %288 = vst [vmem:[#allocation1 + $0x10] ss:$2 sm:$0xff] %v265_v31 }
  0x33   : > { %262 = vst [vmem:[#allocation2 + $0x598] sm:$0x7] %v222_v33 }
  0x34   : > { %263 = vst [vmem:[#allocation2 + $0x60] sm:$0x7] %v223_v34  ;;  %v451_v34 = vld [vmem:[%s5923_s17 + $0x30] sm:$0x77] }
  0x35   : > { %v210_v37 = vld.sshfl [vmem:[#allocation1] sm:$0xff pattern:$0x75316420]  ;;  %v211_v38 = vld.sshfl [vmem:[#allocation1 + $0x8] sm:$0xff pattern:$0x75316420] }
  0x36   : > { %218 = vst [vmem:[#allocation1] ss:$2 sm:$0xff] %v179_v36 }
  0x37   : > { %252 = vst [vmem:[#allocation2 + $0x108] sm:$0x7] %v210_v37 }
  0x38   : > { %352 = vrot.lane.b32.xlu2 %v326_v35, %s5880_s18  ;;  %253 = vst [vmem:[#allocation2 + $0x510] sm:$0x7] %v211_v38  ;;  %v452_v35 = vld [vmem:[%s5923_s17 + $0x38] sm:$0x77] }
  0x39   : > { %v295_v42 = vld.sshfl [vmem:[#allocation1 + $0x10] sm:$0xff pattern:$0x75316420]  ;;  %304 = vst [vmem:[#allocation1 + $0x30] ss:$2 sm:$0xff] %v271_v39 }
  0x3a   : > { %v323_v43 = vrot.slane %v295_v42, 5  ;;  %v296_v44 = vld.sshfl [vmem:[#allocation1 + $0x18] sm:$0xff pattern:$0x75316420]  ;;  %303 = vst [vmem:[#allocation1 + $0x20] ss:$2 sm:$0xff] %v270_v40 }
  0x3b   : > { %302 = vst [vmem:[#allocation1 + $0x10] ss:$2 sm:$0xff] %v269_v41  ;;  %v324_v48 = vrot.slane %v296_v44, 5  ;;  %v453_v40 = vld [vmem:[%s5923_s17 + $0x40] sm:$0x77] }
  0x3c   : > { %346 = vrot.lane.b32.xlu1 %v323_v43, %s5880_s18 }
  0x3d   : > { %v220_v46 = vld.sshfl [vmem:[#allocation1] sm:$0xff pattern:$0x75316420]  ;;  %v221_v47 = vld.sshfl [vmem:[#allocation1 + $0x8] sm:$0xff pattern:$0x75316420] }
  0x3e   : > { %286 = vst [vmem:[#allocation1] ss:$2 sm:$0xff] %v264_v45 }
  0x3f   : > { %260 = vst [vmem:[#allocation2 + $0x2c0] sm:$0x7] %v220_v46 }
  0x40   : > { %261 = vst [vmem:[#allocation2 + $0x588] sm:$0x7] %v221_v47  ;;  %v311_v50 = vld.sshfl [vmem:[#allocation1 + $0x30] sm:$0xff pattern:$0x75316420] }
  0x41   : > { %v335_v51 = vrot.slane %v311_v50, 5  ;;  %v310_v52 = vld.sshfl [vmem:[#allocation1 + $0x28] sm:$0xff pattern:$0x75316420] }
  0x42   : > { %v309_v53 = vld.sshfl [vmem:[#allocation1 + $0x20] sm:$0xff pattern:$0x75316420]  ;;  %v307_v58 = vld.sshfl [vmem:[#allocation1 + $0x10] sm:$0xff pattern:$0x75316420] }
  0x43   : > { %370 = vrot.lane.b32.xlu2 %v335_v51, %s5880_s18  ;;  %315 = vst [vmem:[#allocation1 + $0x20] ss:$2 sm:$0xff] %v274_v49  ;;  %v334_v59 = vrot.slane %v310_v52, 5  ;;  %v308_v60 = vld.sshfl [vmem:[#allocation1 + $0x18] sm:$0xff pattern:$0x75316420] }
  0x44   : > { %348 = vrot.lane.b32.xlu1 %v324_v48, %s5880_s18  ;;  %314 = vst [vmem:[#allocation1 + $0x10] ss:$2 sm:$0xff] %v273_v61  ;;  %v331_v4 = vrot.slane %v307_v58, 5  ;;  %v333_v7 = vrot.slane %v309_v53, 5  ;;  %v332_v8 = vrot.slane %v308_v60, 5 }
  0x45   : > { %v293_v55 = vld.sshfl [vmem:[#allocation1] sm:$0xff pattern:$0x75316420]  ;;  %v294_v56 = vld.sshfl [vmem:[#allocation1 + $0x8] sm:$0xff pattern:$0x75316420] }
  0x46   : > { %v321_v57 = vrot.slane %v293_v55, 5  ;;  %301 = vst [vmem:[#allocation1] ss:$2 sm:$0xff] %v268_v54  ;;  %v322_v63 = vrot.slane %v294_v56, 5  ;;  %v454_v48 = vld [vmem:[%s5923_s17 + $0x48] sm:$0x77] }
  0x47   : > { %v312_v15 = vld.sshfl [vmem:[#allocation1 + $0x38] sm:$0xff pattern:$0x75316420]  ;;  %v455_v49 = vld [vmem:[%s5923_s17 + $0x50] sm:$0x7] }
  0x48   : > { %342 = vrot.lane.b32.xlu0 %v321_v57, %s5880_s18  ;;  %v336_v16 = vrot.slane %v312_v15, 5  ;;  %473 = vst [vmem:[#allocation1 + $0x30] ss:$2 sm:$0xff] %v448_v19  ;;  %v647_v58 = vld [vmem:[%s5923_s17 + $0x8] sm:$0x77] }
  0x4a   : > { %v320_v5 = vld.sshfl [vmem:[#allocation1 + $0x20] sm:$0xff pattern:$0x75316420] }
  0x4b   : > { %471 = vst [vmem:[#allocation1 + $0x20] ss:$2 sm:$0xff] %v447_v3  ;;  %v318_v10 = vld.sshfl [vmem:[#allocation1 + $0x10] sm:$0xff pattern:$0x75316420]  ;;  %v341_v17 = vrot.slane %v320_v5, 5 }
  0x4c   : > { %368 = vrot.lane.b32.xlu1 %v334_v59, %s5880_s18  ;;  %v319_v14 = vld.sshfl [vmem:[#allocation1 + $0x18] sm:$0xff pattern:$0x75316420]  ;;  %v339_v31 = vrot.slane %v318_v10, 5  ;;  %v646_v59 = vld [vmem:[%s5923_s17] sm:$0x77] }
  0x4d   : > { %v305_v0 = vld.sshfl [vmem:[#allocation1] sm:$0xff pattern:$0x75316420]  ;;  %v306_v1 = vld.sshfl [vmem:[#allocation1 + $0x8] sm:$0xff pattern:$0x75316420] }
  0x4e   : > { %v329_v2 = vrot.slane %v305_v0, 5  ;;  %313 = vst [vmem:[#allocation1] ss:$2 sm:$0xff] %v272_v62  ;;  %v340_v21 = vrot.slane %v319_v14, 5  ;;  %v330_v23 = vrot.slane %v306_v1, 5 }
  0x4f   : > { %469 = vst [vmem:[#allocation1 + $0x10] ss:$2 sm:$0xff] %v446_v12  ;;  %v480_v33 = vld.sshfl [vmem:[#allocation1 + $0x30] sm:$0xff pattern:$0x75316420] }
  0x50   : > { %344 = vrot.lane.b32.xlu0 %v322_v63, %s5880_s18  ;;  %358 = vrot.lane.b32.xlu2 %v329_v2, %s5880_s18  ;;  %v481_v37 = vld.sshfl [vmem:[#allocation1 + $0x38] sm:$0xff pattern:$0x75316420]  ;;  %v508_v53 = vrot.slane %v480_v33, 2  ;;  %v648_v3 = vld [vmem:[%s5923_s17 + $0x10] sm:$0x77] }
  0x51   : > { %485 = vst [vmem:[#allocation1 + $0x30] ss:$2 sm:$0xff] %v452_v35  ;;  %v509_v42 = vrot.slane %v481_v37, 2  ;;  %v650_v12 = vld [vmem:[%s5923_s17 + $0x20] sm:$0x77] }
  0x52   : > { %v478_v25 = vld.sshfl [vmem:[#allocation1 + $0x20] sm:$0xff pattern:$0x75316420]  ;;  %v479_v30 = vld.sshfl [vmem:[#allocation1 + $0x28] sm:$0xff pattern:$0x75316420] }
  0x53   : > { %v506_v29 = vrot.slane %v478_v25, 2  ;;  %v507_v32 = vrot.slane %v479_v30, 2  ;;  %484 = vst [vmem:[#allocation1 + $0x20] ss:$2 sm:$0xff] %v451_v34 }
  0x54   : > { %362 = vrot.lane.b32.xlu1 %v331_v4, %s5880_s18 }
  0x55   : > { %v316_v9 = vld.sshfl [vmem:[#allocation1] sm:$0xff pattern:$0x75316420]  ;;  %v317_v11 = vld.sshfl [vmem:[#allocation1 + $0x8] sm:$0xff pattern:$0x75316420] }
  0x56   : > { %467 = vst [vmem:[#allocation1] ss:$2 sm:$0xff] %v445_v6  ;;  %v337_v13 = vrot.slane %v316_v9, 5  ;;  %v338_v24 = vrot.slane %v317_v11, 5  ;;  %v649_v11 = vld [vmem:[%s5923_s17 + $0x18] sm:$0x77] }
  0x57   : > { %v476_v26 = vld.sshfl [vmem:[#allocation1 + $0x10] sm:$0xff pattern:$0x75316420]  ;;  %v477_v27 = vld.sshfl [vmem:[#allocation1 + $0x18] sm:$0xff pattern:$0x75316420] }
  0x58   : > { %366 = vrot.lane.b32.xlu0 %v333_v7, %s5880_s18  ;;  %364 = vrot.lane.b32.xlu2 %v332_v8, %s5880_s18  ;;  %483 = vst [vmem:[#allocation1 + $0x10] ss:$2 sm:$0xff] %v450_v28  ;;  %v504_v39 = vrot.slane %v476_v26, 2  ;;  %v505_v45 = vrot.slane %v477_v27, 2 }
  0x59   : > { %v492_v62 = vld.sshfl [vmem:[#allocation1 + $0x30] sm:$0xff pattern:$0x75316420]  ;;  %v493_v9 = vld.sshfl [vmem:[#allocation1 + $0x38] sm:$0xff pattern:$0x75316420] }
  0x5a   : > { %v490_v51 = vld.sshfl [vmem:[#allocation1 + $0x20] sm:$0xff pattern:$0x75316420]  ;;  %v491_v52 = vld.sshfl [vmem:[#allocation1 + $0x28] sm:$0xff pattern:$0x75316420] }
  0x5b   : > { %496 = vst [vmem:[#allocation1 + $0x20] ss:$2 sm:$0xff] %v455_v49  ;;  %v515_v60 = vrot.slane %v491_v52, 2  ;;  %v516_v1 = vrot.slane %v492_v62, 2  ;;  %v514_v7 = vrot.slane %v490_v51, 2  ;;  %v517_v15 = vrot.slane %v493_v9, 2 }
  0x5c   : > { %374 = vrot.lane.b32.xlu1 %v337_v13, %s5880_s18  ;;  %674 = vst [vmem:[#allocation1 + $0x30] ss:$2 sm:$0xff] %v649_v11  ;;  %v655_v52 = vld [vmem:[%s5923_s17 + $0x48] sm:$0x77]  ;;  %v827_v9 = vld [vmem:[%s5923_s17] sm:$0x77] }
  0x5d   : > { %v475_v18 = vld.sshfl [vmem:[#allocation1 + $0x8] sm:$0xff pattern:$0x75316420]  ;;  %v474_v22 = vld.sshfl [vmem:[#allocation1] sm:$0xff pattern:$0x75316420] }
  0x5e   : > { %482 = vst [vmem:[#allocation1] ss:$2 sm:$0xff] %v449_v20  ;;  %v503_v36 = vrot.slane %v475_v18, 2  ;;  %v502_v38 = vrot.slane %v474_v22, 2 }
  0x5f   : > { %v488_v44 = vld.sshfl [vmem:[#allocation1 + $0x10] sm:$0xff pattern:$0x75316420]  ;;  %v489_v47 = vld.sshfl [vmem:[#allocation1 + $0x18] sm:$0xff pattern:$0x75316420] }
  0x60   : > { %372 = vrot.lane.b32.xlu0 %v336_v16, %s5880_s18  ;;  %382 = vrot.lane.b32.xlu2 %v341_v17, %s5880_s18  ;;  %v512_v50 = vrot.slane %v488_v44, 2  ;;  %495 = vst [vmem:[#allocation1 + $0x10] ss:$2 sm:$0xff] %v454_v48  ;;  %v513_v54 = vrot.slane %v489_v47, 2 }
  0x62   : > { %v501_v2 = vld.sshfl [vmem:[#allocation1 + $0x20] sm:$0xff pattern:$0x75316420] }
  0x63   : > { %672 = vst [vmem:[#allocation1 + $0x20] ss:$2 sm:$0xff] %v648_v3  ;;  %v522_v16 = vrot.slane %v501_v2, 2  ;;  %v681_v30 = vld.sshfl [vmem:[#allocation1 + $0x30] sm:$0xff pattern:$0x75316420] }
  0x64   : > { %380 = vrot.lane.b32.xlu1 %v340_v21, %s5880_s18  ;;  %v682_v34 = vld.sshfl [vmem:[#allocation1 + $0x38] sm:$0xff pattern:$0x75316420] }
  0x65   : > { %v486_v41 = vld.sshfl [vmem:[#allocation1] sm:$0xff pattern:$0x75316420]  ;;  %v487_v43 = vld.sshfl [vmem:[#allocation1 + $0x8] sm:$0xff pattern:$0x75316420] }
  0x66   : > { %494 = vst [vmem:[#allocation1] ss:$2 sm:$0xff] %v453_v40  ;;  %v510_v46 = vrot.slane %v486_v41, 2  ;;  %v511_v0 = vrot.slane %v487_v43, 2  ;;  %v710_v41 = vrot.slane %v682_v34, 7 }
  0x67   : > { %v5987_v56 = vld.sshfl [vmem:[#allocation1 + $0x10] sm:$0xff pattern:$0x75316420]  ;;  %v500_v57 = vld.sshfl [vmem:[#allocation1 + $0x18] sm:$0xff pattern:$0x75316420] }
  0x68   : > { %360 = vrot.lane.b32.xlu0 %v330_v23, %s5880_s18  ;;  %376 = vrot.lane.b32.xlu2 %v338_v24, %s5880_s18  ;;  %670 = vst [vmem:[#allocation1 + $0x10] ss:$2 sm:$0xff] %v647_v58  ;;  %v521_v13 = vrot.slane %v500_v57, 2  ;;  %v651_v24 = vld [vmem:[%s5923_s17 + $0x28] sm:$0x77]  ;;  %v520_v26 = vrot.slane %v5987_v56, 2 }
  0x69   : > { %v654_v43 = vld [vmem:[%s5923_s17 + $0x40] sm:$0x77] }
  0x6a   : > { %v679_v28 = vld.sshfl [vmem:[#allocation1 + $0x20] sm:$0xff pattern:$0x75316420] }
  0x6b   : > { %v707_v33 = vrot.slane %v679_v28, 7 }
  0x6c   : > { %531 = vrot.lane.b32.xlu1 %v506_v29, %s5881_s19  ;;  %v680_v29 = vld.sshfl [vmem:[#allocation1 + $0x28] sm:$0xff pattern:$0x75316420] }
  0x6d   : > { %v498_v55 = vld.sshfl [vmem:[#allocation1 + $0x8] sm:$0xff pattern:$0x75316420]  ;;  %v497_v61 = vld.sshfl [vmem:[#allocation1] sm:$0xff pattern:$0x75316420] }
  0x6e   : > { %668 = vst [vmem:[#allocation1] ss:$2 sm:$0xff] %v646_v59  ;;  %v518_v4 = vrot.slane %v497_v61, 2  ;;  %v519_v8 = vrot.slane %v498_v55, 2  ;;  %v709_v59 = vrot.slane %v681_v30, 7 }
  0x6f   : > { %v677_v19 = vld.sshfl [vmem:[#allocation1 + $0x10] sm:$0xff pattern:$0x75316420]  ;;  %v678_v25 = vld.sshfl [vmem:[#allocation1 + $0x18] sm:$0xff pattern:$0x75316420] }
  0x70   : > { %378 = vrot.lane.b32.xlu0 %v339_v31, %s5880_s18  ;;  %533 = vrot.lane.b32.xlu2 %v507_v32, %s5881_s19  ;;  %684 = vst [vmem:[#allocation1 + $0x10] ss:$2 sm:$0xff] %v651_v24  ;;  %v705_v27 = vrot.slane %v677_v19, 7  ;;  %v652_v31 = vld [vmem:[%s5923_s17 + $0x30] sm:$0x77] }
  0x71   : > { %v653_v32 = vld [vmem:[%s5923_s17 + $0x38] sm:$0x77]  ;;  %685 = vst [vmem:[#allocation1 + $0x20] ss:$2 sm:$0xff] %v652_v31 }
  0x72   : > { %686 = vst [vmem:[#allocation1 + $0x30] ss:$2 sm:$0xff] %v653_v32  ;;  %v830_v31 = vld [vmem:[%s5923_s17 + $0x18] sm:$0x77] }
  0x74   : > { %525 = vrot.lane.b32.xlu1 %v503_v36, %s5881_s19 }
  0x75   : > { %v675_v10 = vld.sshfl [vmem:[#allocation1] sm:$0xff pattern:$0x75316420]  ;;  %v676_v14 = vld.sshfl [vmem:[#allocation1 + $0x8] sm:$0xff pattern:$0x75316420] }
  0x76   : > { %683 = vst [vmem:[#allocation1] ss:$2 sm:$0xff] %v650_v12  ;;  %v704_v20 = vrot.slane %v676_v14, 7  ;;  %v703_v37 = vrot.slane %v675_v10, 7 }
  0x77   : > { %v689_v47 = vld.sshfl [vmem:[#allocation1 + $0x10] sm:$0xff pattern:$0x75316420]  ;;  %v690_v51 = vld.sshfl [vmem:[#allocation1 + $0x18] sm:$0xff pattern:$0x75316420] }
  0x78   : > { %523 = vrot.lane.b32.xlu0 %v502_v38, %s5881_s19  ;;  %527 = vrot.lane.b32.xlu2 %v504_v39, %s5881_s19  ;;  %v708_v38 = vrot.slane %v680_v29, 7  ;;  %v691_v55 = vld.sshfl [vmem:[#allocation1 + $0x20] sm:$0xff pattern:$0x75316420]  ;;  %696 = vst [vmem:[#allocation1 + $0x10] ss:$2 sm:$0xff] %v655_v52 }
  0x79   : > { %v692_v56 = vld.sshfl [vmem:[#allocation1 + $0x28] sm:$0xff pattern:$0x75316420]  ;;  %v694_v28 = vld.sshfl [vmem:[#allocation1 + $0x38] sm:$0xff pattern:$0x75316420] }
  0x7c   : > { %537 = vrot.lane.b32.xlu1 %v509_v42, %s5881_s19 }
  0x7d   : > { %v687_v40 = vld.sshfl [vmem:[#allocation1] sm:$0xff pattern:$0x75316420]  ;;  %v688_v42 = vld.sshfl [vmem:[#allocation1 + $0x8] sm:$0xff pattern:$0x75316420] }
  0x7e   : > { %695 = vst [vmem:[#allocation1] ss:$2 sm:$0xff] %v654_v43 }
  0x80   : > { %529 = vrot.lane.b32.xlu0 %v505_v45, %s5881_s19  ;;  %539 = vrot.lane.b32.xlu2 %v510_v46, %s5881_s19  ;;  %v706_v45 = vrot.slane %v678_v25, 7  ;;  %v711_v46 = vrot.slane %v687_v40, 7 }
  0x84   : > { %543 = vrot.lane.b32.xlu1 %v512_v50, %s5881_s19 }
  0x85   : > { %v698_v11 = vld.sshfl [vmem:[#allocation1] sm:$0xff pattern:$0x75316420] }
  0x88   : > { %535 = vrot.lane.b32.xlu0 %v508_v53, %s5881_s19  ;;  %545 = vrot.lane.b32.xlu2 %v513_v54, %s5881_s19  ;;  %v713_v53 = vrot.slane %v689_v47, 7  ;;  %v656_v54 = vld [vmem:[%s5923_s17 + $0x50] sm:$0x7] }
  0x89   : > { %697 = vst [vmem:[#allocation1 + $0x20] ss:$2 sm:$0xff] %v656_v54  ;;  %v833_v54 = vld [vmem:[%s5923_s17 + $0x30] sm:$0x77] }
  0x8a   : > { %v5993_v63 = vpop.permute.xlu2 %350 }
  0x8c   : > { %549 = vrot.lane.b32.xlu1 %v515_v60, %s5881_s19  ;;  %v714_v60 = vrot.slane %v690_v51, 7 }
  0x90   : > { %541 = vrot.lane.b32.xlu0 %v511_v0, %s5881_s19  ;;  %551 = vrot.lane.b32.xlu2 %v516_v1, %s5881_s19  ;;  %v693_v0 = vld.sshfl [vmem:[#allocation1 + $0x30] sm:$0xff pattern:$0x75316420] }
  0x91   : > { %v6043_v1 = vld.sshfl [vmem:[#allocation1 + $0x10] sm:$0xff pattern:$0x75316420]  ;;  %v717_v10 = vrot.slane %v693_v0, 7  ;;  %856 = vst [vmem:[#allocation1 + $0x31] ss:$2 sm:$0xff] %v830_v31 }
  0x92   : > { %v353_v5 = vpop.permute.xlu2 %352  ;;  %v988_v31 = vld [vmem:[%s5923_s17] sm:$0x77] }
  0x93   : > { %v389_v6 = vsel %vm384_vm0, %v5993_v63, %v353_v5 }
  0x94   : > { %555 = vrot.lane.b32.xlu1 %v518_v4, %s5881_s19  ;;  %429 = vst [vmem:[#allocation2 + $0x450] sm:$0x38] %v389_v6  ;;  %v701_v4 = vld.sshfl [vmem:[#allocation1 + $0x18] sm:$0xff pattern:$0x75316420] }
  0x98   : > { %547 = vrot.lane.b32.xlu0 %v514_v7, %s5881_s19  ;;  %557 = vrot.lane.b32.xlu2 %v519_v8, %s5881_s19  ;;  %v712_v8 = vrot.slane %v688_v42, 7 }
  0x9c   : > { %561 = vrot.lane.b32.xlu1 %v521_v13, %s5881_s19  ;;  %v699_v13 = vld.sshfl [vmem:[#allocation1 + $0x8] sm:$0xff pattern:$0x75316420] }
  0x9d   : > { %v6011_v23 = vpop.permute.xlu2 %370  ;;  %850 = vst [vmem:[#allocation1 + $0x1] ss:$2 sm:$0xff] %v827_v9  ;;  %v720_v24 = vrot.slane %v699_v13, 7  ;;  %v837_v13 = vld [vmem:[%s5923_s17 + $0x50] sm:$0x7] }
  0x9e   : > { %v357_v17 = vpop.permute.xlu1 %356  ;;  %v355_v18 = vpop.permute.xlu0 %354 }
  0x9f   : > { %v390_v21 = vsel %vm384_vm0, %v353_v5, %v355_v18  ;;  %v391_v22 = vsel %vm384_vm0, %v355_v18, %v357_v17  ;;  %v828_v5 = vld [vmem:[%s5923_s17 + $0x8] sm:$0x77] }
  0xa0   : > { %553 = vrot.lane.b32.xlu0 %v517_v15, %s5881_s19  ;;  %563 = vrot.lane.b32.xlu2 %v522_v16, %s5881_s19  ;;  %430 = vst [vmem:[#allocation2 + $0x328] sm:$0x38] %v390_v21  ;;  %v719_v15 = vrot.slane %v698_v11, 7  ;;  %v702_v16 = vld.sshfl [vmem:[#allocation1 + $0x20] sm:$0xff pattern:$0x75316420] }
  0xa1   : > { %431 = vst [vmem:[#allocation2 + $0x440] sm:$0x38] %v391_v22  ;;  %v715_v22 = vrot.slane %v691_v55, 7 }
  0xa2   : > { %852 = vst [vmem:[#allocation1 + $0x11] ss:$2 sm:$0xff] %v828_v5 }
  0xa4   : > { %726 = vrot.lane.b32.xlu1 %v704_v20, %s5882_s20  ;;  %v858_v40 = vld.sshfl [vmem:[#allocation1 + $0x8] sm:$0xff pattern:$0x75316420] }
  0xa8   : > { %559 = vrot.lane.b32.xlu0 %v520_v26, %s5881_s19  ;;  %728 = vrot.lane.b32.xlu2 %v705_v27, %s5882_s20  ;;  %v722_v27 = vrot.slane %v701_v4, 7 }
  0xa9   : > { %v859_v47 = vld.sshfl [vmem:[#allocation1 + $0x10] sm:$0xff pattern:$0x75316420] }
  0xaa   : > { %v6020_v35 = vpop.permute.xlu2 %358 }
  0xab   : > { %v392_v36 = vsel %vm384_vm0, %v357_v17, %v6020_v35  ;;  %v829_v17 = vld [vmem:[%s5923_s17 + $0x10] sm:$0x77] }
  0xac   : > { %732 = vrot.lane.b32.xlu1 %v707_v33, %s5882_s20  ;;  %432 = vst [vmem:[#allocation2 + $0x378] sm:$0x38] %v392_v36  ;;  %v718_v33 = vrot.slane %v694_v28, 7  ;;  %v831_v36 = vld [vmem:[%s5923_s17 + $0x20] sm:$0x77] }
  0xad   : > { %854 = vst [vmem:[#allocation1 + $0x21] ss:$2 sm:$0xff] %v829_v17 }
  0xae   : > { %v347_v39 = vpop.permute.xlu1 %346 }
  0xb0   : > { %724 = vrot.lane.b32.xlu0 %v703_v37, %s5882_s20  ;;  %734 = vrot.lane.b32.xlu2 %v708_v38, %s5882_s20  ;;  %v723_v37 = vrot.slane %v702_v16, 7  ;;  %v857_v38 = vld.sshfl [vmem:[#allocation1] sm:$0xff pattern:$0x75316420] }
  0xb1   : > { %865 = vst [vmem:[#allocation1 + $0x1] ss:$2 sm:$0xff] %v831_v36 }
  0xb2   : > { %v365_v44 = vpop.permute.xlu2 %364 }
  0xb4   : > { %738 = vrot.lane.b32.xlu1 %v710_v41, %s5882_s20 }
  0xb6   : > { %v349_v48 = vpop.permute.xlu1 %348 }
  0xb7   : > { %v387_v49 = vsel %vm384_vm0, %v347_v39, %v349_v48  ;;  %v388_v50 = vsel %vm384_vm0, %v349_v48, %v5993_v63  ;;  %v716_v63 = vrot.slane %v692_v56, 7 }
  0xb8   : > { %427 = vst [vmem:[#allocation2 + $0x4d8] sm:$0x38] %v387_v49  ;;  %730 = vrot.lane.b32.xlu0 %v706_v45, %s5882_s20  ;;  %740 = vrot.lane.b32.xlu2 %v711_v46, %s5882_s20  ;;  %v832_v45 = vld [vmem:[%s5923_s17 + $0x28] sm:$0x77]  ;;  %v721_v46 = vrot.slane %v6043_v1, 7 }
  0xb9   : > { %428 = vst [vmem:[#allocation2 + $0x18] sm:$0x38] %v388_v50  ;;  %v860_v49 = vld.sshfl [vmem:[#allocation1 + $0x18] sm:$0xff pattern:$0x75316420] }
  0xba   : > { %v343_v57 = vpop.permute.xlu0 %342  ;;  %v6036_v58 = vpop.permute.xlu2 %382  ;;  %866 = vst [vmem:[#allocation1 + $0x11] ss:$2 sm:$0xff] %v832_v45  ;;  %v835_v1 = vld [vmem:[%s5923_s17 + $0x40] sm:$0x77] }
  0xbb   : > { %v870_v4 = vld.sshfl [vmem:[#allocation1 + $0x8] sm:$0xff pattern:$0x75316420] }
  0xbc   : > { %744 = vrot.lane.b32.xlu1 %v713_v53, %s5882_s20  ;;  %v862_v53 = vld.sshfl [vmem:[#allocation1 + $0x28] sm:$0xff pattern:$0x75316420] }
  0xbe   : > { %v369_v61 = vpop.permute.xlu1 %368 }
  0xbf   : > { %v398_v62 = vsel %vm384_vm0, %v369_v61, %v6011_v23 }
  0xc0   : > { %438 = vst [vmem:[#allocation2 + $0x500] sm:$0x38] %v398_v62  ;;  %736 = vrot.lane.b32.xlu0 %v709_v59, %s5882_s20  ;;  %746 = vrot.lane.b32.xlu2 %v714_v60, %s5882_s20  ;;  %v864_v60 = vld.sshfl [vmem:[#allocation1 + $0x38] sm:$0xff pattern:$0x75316420] }
  0xc2   : > { %v345_v2 = vpop.permute.xlu0 %344  ;;  %v6045_v3 = vpop.permute.xlu2 %376 }
  0xc3   : > { %v385_v6 = vsel %vm384_vm0, %v343_v57, %v345_v2  ;;  %v386_v7 = vsel %vm384_vm0, %v345_v2, %v347_v39  ;;  %v834_v57 = vld [vmem:[%s5923_s17 + $0x38] sm:$0x77]  ;;  %v869_v2 = vld.sshfl [vmem:[#allocation1] sm:$0xff pattern:$0x75316420] }
  0xc4   : > { %750 = vrot.lane.b32.xlu1 %v716_v63, %s5882_s20  ;;  %425 = vst [vmem:[#allocation2 + $0x2b0] sm:$0x38] %v385_v6  ;;  %v872_v6 = vld.sshfl [vmem:[#allocation1 + $0x18] sm:$0xff pattern:$0x75316420] }
  0xc5   : > { %426 = vst [vmem:[#allocation2 + $0x3b0] sm:$0x38] %v386_v7  ;;  %v871_v7 = vld.sshfl [vmem:[#allocation1 + $0x10] sm:$0xff pattern:$0x75316420] }
  0xc6   : > { %v363_v12 = vpop.permute.xlu1 %362  ;;  %877 = vst [vmem:[#allocation1 + $0x1] ss:$2 sm:$0xff] %v835_v1 }
  0xc7   : > { %v395_v14 = vsel %vm384_vm0, %v363_v12, %v365_v44 }
  0xc8   : > { %435 = vst [vmem:[#allocation2 + $0x490] sm:$0x38] %v395_v14  ;;  %742 = vrot.lane.b32.xlu0 %v712_v8, %s5882_s20  ;;  %752 = vrot.lane.b32.xlu2 %v717_v10, %s5882_s20  ;;  %v836_v8 = vld [vmem:[%s5923_s17 + $0x48] sm:$0x77] }
  0xc9   : > { %878 = vst [vmem:[#allocation1 + $0x11] ss:$2 sm:$0xff] %v836_v8 }
  0xca   : > { %v367_v18 = vpop.permute.xlu0 %366  ;;  %v6056_v19 = vpop.permute.xlu2 %533 }
  0xcb   : > { %v396_v20 = vsel %vm384_vm0, %v365_v44, %v367_v18  ;;  %v397_v21 = vsel %vm384_vm0, %v367_v18, %v369_v61 }
  0xcc   : > { %756 = vrot.lane.b32.xlu1 %v719_v15, %s5882_s20  ;;  %436 = vst [vmem:[#allocation2 + $0x318] sm:$0x38] %v396_v20 }
  0xcd   : > { %437 = vst [vmem:[#allocation2 + $0x548] sm:$0x38] %v397_v21 }
  0xce   : > { %v375_v25 = vpop.permute.xlu1 %374 }
  0xcf   : > { %v401_v26 = vsel %vm384_vm0, %v375_v25, %v6045_v3 }
  0xd0   : > { %441 = vst [vmem:[#allocation2 + $0x2c0] sm:$0x38] %v401_v26  ;;  %748 = vrot.lane.b32.xlu0 %v715_v22, %s5882_s20  ;;  %758 = vrot.lane.b32.xlu2 %v720_v24, %s5882_s20  ;;  %v6122_v18 = vld.sshfl [vmem:[#allocation1 + $0x10] sm:$0xff pattern:$0x75316420] }
  0xd1   : > { %v883_v20 = vld.sshfl [vmem:[#allocation1 + $0x18] sm:$0xff pattern:$0x75316420]  ;;  %v989_v24 = vld [vmem:[%s5923_s17 + $0x8] sm:$0x77] }
  0xd2   : > { %v373_v29 = vpop.permute.xlu0 %372  ;;  %v6065_v30 = vpop.permute.xlu2 %527  ;;  %1012 = vst [vmem:[#allocation1 + $0x10] ss:$2 sm:$0xff] %v989_v24 }
  0xd3   : > { %v399_v32 = vsel %vm384_vm0, %v6011_v23, %v373_v29  ;;  %v400_v34 = vsel %vm384_vm0, %v373_v29, %v375_v25 }
  0xd4   : > { %762 = vrot.lane.b32.xlu1 %v722_v27, %s5882_s20  ;;  %439 = vst [vmem:[#allocation2 + $0x6d0] sm:$0x38] %v399_v32  ;;  %v881_v32 = vld.sshfl [vmem:[#allocation1 + $0x8] sm:$0xff pattern:$0x75316420] }
  0xd5   : > { %440 = vst [vmem:[#allocation2 + $0x320] sm:$0x38] %v400_v34 }
  0xd6   : > { %v381_v39 = vpop.permute.xlu1 %380 }
  0xd7   : > { %v404_v41 = vsel %vm384_vm0, %v381_v39, %v6036_v58  ;;  %v863_v58 = vld.sshfl [vmem:[#allocation1 + $0x30] sm:$0xff pattern:$0x75316420] }
  0xd8   : > { %444 = vst [vmem:[#allocation2 + $0x60] sm:$0x38] %v404_v41  ;;  %754 = vrot.lane.b32.xlu0 %v718_v33, %s5882_s20  ;;  %764 = vrot.lane.b32.xlu2 %v723_v37, %s5882_s20 }
  0xd9   : > { %868 = vst [vmem:[#allocation1 + $0x31] ss:$2 sm:$0xff] %v834_v57 }
  0xda   : > { %v361_v23 = vpop.permute.xlu0 %360  ;;  %v6077_v42 = vpop.permute.xlu2 %539 }
  0xdb   : > { %v393_v43 = vsel %vm384_vm0, %v6020_v35, %v361_v23  ;;  %v394_v44 = vsel %vm384_vm0, %v361_v23, %v363_v12  ;;  %v861_v35 = vld.sshfl [vmem:[#allocation1 + $0x20] sm:$0xff pattern:$0x75316420]  ;;  %v991_v23 = vld [vmem:[%s5923_s17 + $0x18] sm:$0x77] }
  0xdc   : > { %887 = vrot.lane.b32.xlu1 %v858_v40, %s5883_s21  ;;  %433 = vst [vmem:[#allocation2 + $0x108] sm:$0x38] %v393_v43 }
  0xdd   : > { %434 = vst [vmem:[#allocation2 + $0x510] sm:$0x38] %v394_v44 }
  0xde   : > { %v532_v48 = vpop.permute.xlu1 %531  ;;  %867 = vst [vmem:[#allocation1 + $0x21] ss:$2 sm:$0xff] %v833_v54 }
  0xdf   : > { %v570_v50 = vsel %vm565_vm1, %v532_v48, %v6056_v19 }
  0xe0   : > { %610 = vst [vmem:[#allocation2 + $0x450] sm:$0xc0] %v570_v50  ;;  %760 = vrot.lane.b32.xlu0 %v721_v46, %s5882_s20  ;;  %889 = vrot.lane.b32.xlu2 %v859_v47, %s5883_s21  ;;  %v875_v27 = vld.sshfl [vmem:[#allocation1 + $0x30] sm:$0xff pattern:$0x75316420] }
  0xe1   : > { %630 = vst [vmem:[#allocation2 + $0x118] sm:$0x1] %v570_v50  ;;  %v876_v41 = vld.sshfl [vmem:[#allocation1 + $0x38] sm:$0xff pattern:$0x75316420] }
  0xe2   : > { %v379_v51 = vpop.permute.xlu0 %378  ;;  %v6089_v52 = vpop.permute.xlu2 %545  ;;  %1016 = vst [vmem:[#allocation1 + $0x30] ss:$2 sm:$0xff] %v991_v23 }
  0xe3   : > { %v402_v55 = vsel %vm384_vm0, %v6045_v3, %v379_v51  ;;  %v403_v56 = vsel %vm384_vm0, %v379_v51, %v381_v39 }
  0xe4   : > { %893 = vrot.lane.b32.xlu1 %v861_v35, %s5883_s21  ;;  %442 = vst [vmem:[#allocation2 + $0x588] sm:$0x38] %v402_v55  ;;  %v1019_v35 = vld.sshfl [vmem:[#allocation1 + $0x10] sm:$0xff pattern:$0x75316420] }
  0xe5   : > { %443 = vst [vmem:[#allocation2 + $0x598] sm:$0x38] %v403_v56  ;;  %v873_v9 = vld.sshfl [vmem:[#allocation1 + $0x20] sm:$0xff pattern:$0x75316420] }
  0xe6   : > { %v526_v59 = vpop.permute.xlu1 %525  ;;  %v874_v12 = vld.sshfl [vmem:[#allocation1 + $0x28] sm:$0xff pattern:$0x75316420] }
  0xe7   : > { %v567_v61 = vsel %vm565_vm1, %v526_v59, %v6065_v30  ;;  %879 = vst [vmem:[#allocation1 + $0x21] ss:$2 sm:$0xff] %v837_v13 }
  0xe8   : > { %607 = vst [vmem:[#allocation2 + $0x3b0] sm:$0xc0] %v567_v61  ;;  %885 = vrot.lane.b32.xlu0 %v857_v38, %s5883_s21  ;;  %895 = vrot.lane.b32.xlu2 %v862_v53, %s5883_s21  ;;  %v1020_v53 = vld.sshfl [vmem:[#allocation1 + $0x18] sm:$0xff pattern:$0x75316420] }
  0xe9   : > { %627 = vst [vmem:[#allocation2 + $0x6d8] sm:$0x1] %v567_v61 }
  0xea   : > { %v524_v62 = vpop.permute.xlu0 %523  ;;  %v6101_v63 = vpop.permute.xlu2 %551 }
  0xeb   : > { %v566_v0 = vsel %vm565_vm1, %v524_v62, %v526_v59 }
  0xec   : > { %899 = vrot.lane.b32.xlu1 %v864_v60, %s5883_s21  ;;  %606 = vst [vmem:[#allocation2 + $0x2b0] sm:$0xc0] %v566_v0 }
  0xed   : > { %626 = vst [vmem:[#allocation2 + $0x3c8] sm:$0x1] %v566_v0  ;;  %v995_v0 = vld [vmem:[%s5923_s17 + $0x38] sm:$0x77] }
  0xee   : > { %v538_v3 = vpop.permute.xlu1 %537  ;;  %v884_v36 = vld.sshfl [vmem:[#allocation1 + $0x20] sm:$0xff pattern:$0x75316420] }
  0xef   : > { %v573_v5 = vsel %vm565_vm1, %v538_v3, %v6077_v42 }
  0xf0   : > { %613 = vst [vmem:[#allocation2 + $0x378] sm:$0xc0] %v573_v5  ;;  %891 = vrot.lane.b32.xlu0 %v860_v49, %s5883_s21  ;;  %901 = vrot.lane.b32.xlu2 %v869_v2, %s5883_s21  ;;  %v1023_v2 = vld.sshfl [vmem:[#allocation1 + $0x30] sm:$0xff pattern:$0x75316420] }
  0xf1   : > { %633 = vst [vmem:[#allocation2 + $0x260] sm:$0x1] %v573_v5  ;;  %v1024_v5 = vld.sshfl [vmem:[#allocation1 + $0x38] sm:$0xff pattern:$0x75316420] }
  0xf2   : > { %v530_v10 = vpop.permute.xlu0 %529  ;;  %v6111_v11 = vpop.permute.xlu2 %557  ;;  %1028 = vst [vmem:[#allocation1 + $0x30] ss:$2 sm:$0xff] %v995_v0  ;;  %v1052_v13 = vrot.slane %v1024_v5, 1  ;;  %v1192_v5 = vld [vmem:[%s5923_s17 + $0x18] sm:$0x77] }
  0xf3   : > { %v568_v14 = vsel %vm565_vm1, %v6065_v30, %v530_v10  ;;  %v569_v15 = vsel %vm565_vm1, %v530_v10, %v532_v48  ;;  %v880_v30 = vld.sshfl [vmem:[#allocation1] sm:$0xff pattern:$0x75316420] }
  0xf4   : > { %905 = vrot.lane.b32.xlu1 %v871_v7, %s5883_s21  ;;  %608 = vst [vmem:[#allocation2 + $0x4d8] sm:$0xc0] %v568_v14 }
  0xf5   : > { %609 = vst [vmem:[#allocation2 + $0x18] sm:$0xc0] %v569_v15 }
  0xf6   : > { %v544_v16 = vpop.permute.xlu1 %543  ;;  %628 = vst [vmem:[#allocation2 + $0x670] sm:$0x1] %v568_v14 }
  0xf7   : > { %v576_v17 = vsel %vm565_vm1, %v544_v16, %v6089_v52  ;;  %629 = vst [vmem:[#allocation2 + $0x348] sm:$0x1] %v569_v15 }
  0xf8   : > { %897 = vrot.lane.b32.xlu0 %v863_v58, %s5883_s21  ;;  %907 = vrot.lane.b32.xlu2 %v872_v6, %s5883_s21  ;;  %616 = vst [vmem:[#allocation2 + $0x490] sm:$0xc0] %v576_v17  ;;  %v1047_v58 = vrot.slane %v1019_v35, 1 }
  0xf9   : > { %636 = vst [vmem:[#allocation2 + $0x538] sm:$0x1] %v576_v17 }
  0xfa   : > { %v536_v21 = vpop.permute.xlu0 %535  ;;  %v564_v22 = vpop.permute.xlu2 %563  ;;  %1010 = vst [vmem:[#allocation1] ss:$2 sm:$0xff] %v988_v31 }
  0xfb   : > { %v571_v25 = vsel %vm565_vm1, %v6056_v19, %v536_v21  ;;  %v572_v26 = vsel %vm565_vm1, %v536_v21, %v538_v3  ;;  %v990_v19 = vld [vmem:[%s5923_s17 + $0x10] sm:$0x77] }
  0xfc   : > { %911 = vrot.lane.b32.xlu1 %v874_v12, %s5883_s21  ;;  %611 = vst [vmem:[#allocation2 + $0x328] sm:$0xc0] %v571_v25 }
  0xfd   : > { %631 = vst [vmem:[#allocation2 + $0xa0] sm:$0x1] %v571_v25 }
  0xfe   : > { %v550_v28 = vpop.permute.xlu1 %549  ;;  %612 = vst [vmem:[#allocation2 + $0x440] sm:$0xc0] %v572_v26 }
  0xff   : > { %v579_v29 = vsel %vm565_vm1, %v550_v28, %v6101_v63  ;;  %632 = vst [vmem:[#allocation2 + $0x1a0] sm:$0x1] %v572_v26 }
 0x100   : > { %903 = vrot.lane.b32.xlu0 %v870_v4, %s5883_s21  ;;  %913 = vrot.lane.b32.xlu2 %v875_v27, %s5883_s21  ;;  %619 = vst [vmem:[#allocation2 + $0x500] sm:$0xc0] %v579_v29 }
 0x101   : > { %639 = vst [vmem:[#allocation2 + $0x4a0] sm:$0x1] %v579_v29  ;;  %v6147_v43 = vld.sshfl [vmem:[#allocation1] sm:$0xff pattern:$0x75316420] }
 0x102   : > { %v542_v33 = vpop.permute.xlu0 %541  ;;  %v6135_v34 = vpop.permute.xlu2 %728  ;;  %1014 = vst [vmem:[#allocation1 + $0x20] ss:$2 sm:$0xff] %v990_v19  ;;  %v1018_v46 = vld.sshfl [vmem:[#allocation1 + $0x8] sm:$0xff pattern:$0x75316420]  ;;  %v1045_v8 = vrot.slane %v6147_v43, 1 }
 0x103   : > { %v574_v37 = vsel %vm565_vm1, %v6077_v42, %v542_v33  ;;  %v575_v38 = vsel %vm565_vm1, %v542_v33, %v544_v16  ;;  %v992_v42 = vld [vmem:[%s5923_s17 + $0x20] sm:$0x77]  ;;  %v1046_v51 = vrot.slane %v1018_v46, 1  ;;  %v998_v29 = vld [vmem:[%s5923_s17 + $0x50] sm:$0x7] }
 0x104   : > { %917 = vrot.lane.b32.xlu1 %v880_v30, %s5883_s21  ;;  %614 = vst [vmem:[#allocation2 + $0x108] sm:$0xc0] %v574_v37  ;;  %v1189_v46 = vld [vmem:[%s5923_s17] sm:$0x77] }
 0x105   : > { %634 = vst [vmem:[#allocation2 + $0xe0] sm:$0x1] %v574_v37  ;;  %v1051_v37 = vrot.slane %v1023_v2, 1 }
 0x106   : > { %v556_v39 = vpop.permute.xlu1 %555  ;;  %615 = vst [vmem:[#allocation2 + $0x510] sm:$0xc0] %v575_v38 }
 0x107   : > { %v582_v40 = vsel %vm565_vm1, %v556_v39, %v6111_v11  ;;  %635 = vst [vmem:[#allocation2 + $0x3a0] sm:$0x1] %v575_v38 }
 0x108   : > { %909 = vrot.lane.b32.xlu0 %v873_v9, %s5883_s21  ;;  %919 = vrot.lane.b32.xlu2 %v881_v32, %s5883_s21  ;;  %622 = vst [vmem:[#allocation2 + $0x2c0] sm:$0xc0] %v582_v40 }
 0x109   : > { %642 = vst [vmem:[#allocation2 + $0x680] sm:$0x1] %v582_v40  ;;  %v1021_v59 = vld.sshfl [vmem:[#allocation1 + $0x20] sm:$0xff pattern:$0x75316420] }
 0x10a   : > { %v548_v44 = vpop.permute.xlu0 %547  ;;  %v6149_v45 = vpop.permute.xlu2 %734  ;;  %1025 = vst [vmem:[#allocation1] ss:$2 sm:$0xff] %v992_v42  ;;  %v1049_v62 = vrot.slane %v1021_v59, 1  ;;  %v1022_v1 = vld.sshfl [vmem:[#allocation1 + $0x28] sm:$0xff pattern:$0x75316420] }
 0x10b   : > { %v577_v47 = vsel %vm565_vm1, %v6089_v52, %v548_v44  ;;  %v578_v48 = vsel %vm565_vm1, %v548_v44, %v550_v28  ;;  %v993_v52 = vld [vmem:[%s5923_s17 + $0x28] sm:$0x77]  ;;  %v1050_v9 = vrot.slane %v1022_v1, 1 }
 0x10c   : > { %923 = vrot.lane.b32.xlu1 %v883_v20, %s5883_s21  ;;  %617 = vst [vmem:[#allocation2 + $0x318] sm:$0xc0] %v577_v47  ;;  %v1048_v20 = vrot.slane %v1020_v53, 1  ;;  %v997_v28 = vld [vmem:[%s5923_s17 + $0x48] sm:$0x77] }
 0x10d   : > { %637 = vst [vmem:[#allocation2 + $0x3c0] sm:$0x1] %v577_v47  ;;  %v1190_v44 = vld [vmem:[%s5923_s17 + $0x8] sm:$0x77] }
 0x10e   : > { %v562_v49 = vpop.permute.xlu1 %561  ;;  %618 = vst [vmem:[#allocation2 + $0x548] sm:$0xc0] %v578_v48 }
 0x10f   : > { %v585_v50 = vsel %vm565_vm1, %v562_v49, %v564_v22  ;;  %638 = vst [vmem:[#allocation2 + $0x5f8] sm:$0x1] %v578_v48 }
 0x110   : > { %915 = vrot.lane.b32.xlu0 %v876_v41, %s5883_s21  ;;  %925 = vrot.lane.b32.xlu2 %v884_v36, %s5883_s21  ;;  %625 = vst [vmem:[#allocation2 + $0x60] sm:$0xc0] %v585_v50  ;;  %v1035_v41 = vld.sshfl [vmem:[#allocation1 + $0x30] sm:$0xff pattern:$0x75316420] }
 0x111   : > { %645 = vst [vmem:[#allocation2 + $0x6a0] sm:$0x1] %v585_v50  ;;  %v1029_v14 = vld.sshfl [vmem:[#allocation1] sm:$0xff pattern:$0x75316420] }
 0x112   : > { %v554_v54 = vpop.permute.xlu0 %553  ;;  %v6159_v55 = vpop.permute.xlu2 %740  ;;  %1026 = vst [vmem:[#allocation1 + $0x10] ss:$2 sm:$0xff] %v993_v52  ;;  %v1030_v17 = vld.sshfl [vmem:[#allocation1 + $0x8] sm:$0xff pattern:$0x75316420]  ;;  %v1053_v21 = vrot.slane %v1029_v14, 1 }
 0x113   : > { %v580_v56 = vsel %vm565_vm1, %v6101_v63, %v554_v54  ;;  %v581_v57 = vsel %vm565_vm1, %v554_v54, %v556_v39  ;;  %v994_v63 = vld [vmem:[%s5923_s17 + $0x30] sm:$0x77]  ;;  %v1059_v52 = vrot.slane %v1035_v41, 1 }
 0x114   : > { %1068 = vrot.lane.b32.xlu1 %v1046_v51, %s5884_s22  ;;  %620 = vst [vmem:[#allocation2 + $0x6d0] sm:$0xc0] %v580_v56  ;;  %v1054_v51 = vrot.slane %v1030_v17, 1 }
 0x115   : > { %640 = vst [vmem:[#allocation2 + $0x4e8] sm:$0x1] %v580_v56 }
 0x116   : > { %v727_v60 = vpop.permute.xlu1 %726  ;;  %621 = vst [vmem:[#allocation2 + $0x320] sm:$0xc0] %v581_v57 }
 0x117   : > { %v768_v61 = vsel %vm766_vm2, %v727_v60, %v6135_v34  ;;  %641 = vst [vmem:[#allocation2 + $0x3d8] sm:$0x1] %v581_v57  ;;  %v1191_v57 = vld [vmem:[%s5923_s17 + $0x10] sm:$0x77] }
 0x118   : > { %921 = vrot.lane.b32.xlu0 %v6122_v18, %s5883_s21  ;;  %1070 = vrot.lane.b32.xlu2 %v1047_v58, %s5884_s22  ;;  %808 = vst [vmem:[#allocation2 + $0x6d8] sm:$0xe] %v768_v61 }
 0x119   : > { %1027 = vst [vmem:[#allocation1 + $0x20] ss:$2 sm:$0xff] %v994_v63  ;;  %v1031_v22 = vld.sshfl [vmem:[#allocation1 + $0x10] sm:$0xff pattern:$0x75316420] }
 0x11a   : > { %v560_v3 = vpop.permute.xlu0 %559  ;;  %v6172_v4 = vpop.permute.xlu2 %746  ;;  %v1032_v26 = vld.sshfl [vmem:[#allocation1 + $0x18] sm:$0xff pattern:$0x75316420]  ;;  %v1055_v27 = vrot.slane %v1031_v22, 1 }
 0x11b   : > { %v583_v6 = vsel %vm565_vm1, %v6111_v11, %v560_v3  ;;  %v584_v7 = vsel %vm565_vm1, %v560_v3, %v562_v49  ;;  %v996_v11 = vld [vmem:[%s5923_s17 + $0x40] sm:$0x77]  ;;  %1038 = vst [vmem:[#allocation1 + $0x10] ss:$2 sm:$0xff] %v997_v28  ;;  %v1056_v38 = vrot.slane %v1032_v26, 1 }
 0x11c   : > { %1074 = vrot.lane.b32.xlu1 %v1049_v62, %s5884_s22  ;;  %623 = vst [vmem:[#allocation2 + $0x588] sm:$0xc0] %v583_v6  ;;  %v1036_v3 = vld.sshfl [vmem:[#allocation1 + $0x38] sm:$0xff pattern:$0x75316420] }
 0x11d   : > { %643 = vst [vmem:[#allocation2 + $0x3d0] sm:$0x1] %v583_v6  ;;  %v1193_v6 = vld [vmem:[%s5923_s17 + $0x20] sm:$0x77] }
 0x11e   : > { %v733_v10 = vpop.permute.xlu1 %732  ;;  %624 = vst [vmem:[#allocation2 + $0x598] sm:$0xc0] %v584_v7 }
 0x11f   : > { %v771_v12 = vsel %vm766_vm2, %v733_v10, %v6149_v45  ;;  %644 = vst [vmem:[#allocation2 + $0x80] sm:$0x1] %v584_v7 }
 0x120   : > { %1066 = vrot.lane.b32.xlu0 %v1045_v8, %s5884_s22  ;;  %1076 = vrot.lane.b32.xlu2 %v1050_v9, %s5884_s22  ;;  %811 = vst [vmem:[#allocation2 + $0x118] sm:$0xe] %v771_v12  ;;  %v1033_v19 = vld.sshfl [vmem:[#allocation1 + $0x20] sm:$0xff pattern:$0x75316420] }
 0x121   : > { %1037 = vst [vmem:[#allocation1] ss:$2 sm:$0xff] %v996_v11  ;;  %v1034_v32 = vld.sshfl [vmem:[#allocation1 + $0x28] sm:$0xff pattern:$0x75316420]  ;;  %v1057_v62 = vrot.slane %v1033_v19, 1 }
 0x122   : > { %v725_v15 = vpop.permute.xlu0 %724  ;;  %v6184_v16 = vpop.permute.xlu2 %752  ;;  %1039 = vst [vmem:[#allocation1 + $0x20] ss:$2 sm:$0xff] %v998_v29  ;;  %v1058_v23 = vrot.slane %v1034_v32, 1  ;;  %v6204_v42 = vld.sshfl [vmem:[#allocation1 + $0x10] sm:$0xff pattern:$0x75316420] }
 0x123   : > { %v767_v18 = vsel %vm766_vm2, %v725_v15, %v727_v60  ;;  %v1043_v43 = vld.sshfl [vmem:[#allocation1 + $0x18] sm:$0xff pattern:$0x75316420]  ;;  %1217 = vst [vmem:[#allocation1 + $0x30] ss:$2 sm:$0xff] %v1192_v5  ;;  %v1063_v26 = vrot.slane %v6204_v42, 1 }
 0x124   : > { %1080 = vrot.lane.b32.xlu1 %v1052_v13, %s5884_s22  ;;  %807 = vst [vmem:[#allocation2 + $0x3c8] sm:$0xe] %v767_v18  ;;  %v1064_v2 = vrot.slane %v1043_v43, 1  ;;  %v1060_v13 = vrot.slane %v1036_v3, 1  ;;  %v1194_v18 = vld [vmem:[%s5923_s17 + $0x28] sm:$0x77] }
 0x125   : > { %1213 = vst [vmem:[#allocation1 + $0x10] ss:$2 sm:$0xff] %v1190_v44  ;;  %v1195_v32 = vld [vmem:[%s5923_s17 + $0x30] sm:$0x77] }
 0x126   : > { %v739_v24 = vpop.permute.xlu1 %738 }
 0x127   : > { %v774_v25 = vsel %vm766_vm2, %v739_v24, %v6159_v55 }
 0x128   : > { %814 = vst [vmem:[#allocation2 + $0x260] sm:$0xe] %v774_v25  ;;  %1072 = vrot.lane.b32.xlu0 %v1048_v20, %s5884_s22  ;;  %1082 = vrot.lane.b32.xlu2 %v1053_v21, %s5884_s22  ;;  %v1040_v49 = vld.sshfl [vmem:[#allocation1] sm:$0xff pattern:$0x75316420] }
 0x129   : > { %v1061_v56 = vrot.slane %v1040_v49, 1 }
 0x12a   : > { %v731_v30 = vpop.permute.xlu0 %730  ;;  %v6194_v31 = vpop.permute.xlu2 %758 }
 0x12b   : > { %v769_v33 = vsel %vm766_vm2, %v6135_v34, %v731_v30  ;;  %v770_v36 = vsel %vm766_vm2, %v731_v30, %v733_v10  ;;  %v1041_v34 = vld.sshfl [vmem:[#allocation1 + $0x8] sm:$0xff pattern:$0x75316420] }
 0x12c   : > { %1086 = vrot.lane.b32.xlu1 %v1055_v27, %s5884_s22  ;;  %809 = vst [vmem:[#allocation2 + $0x670] sm:$0xe] %v769_v33  ;;  %v1062_v63 = vrot.slane %v1041_v34, 1  ;;  %v1221_v22 = vld.sshfl [vmem:[#allocation1 + $0x18] sm:$0xff pattern:$0x75316420] }
 0x12d   : > { %810 = vst [vmem:[#allocation2 + $0x348] sm:$0xe] %v770_v36  ;;  %v1196_v33 = vld [vmem:[%s5923_s17 + $0x38] sm:$0x77] }
 0x12e   : > { %v745_v39 = vpop.permute.xlu1 %744  ;;  %1211 = vst [vmem:[#allocation1] ss:$2 sm:$0xff] %v1189_v46 }
 0x12f   : > { %v777_v40 = vsel %vm766_vm2, %v745_v39, %v6172_v4 }
 0x130   : > { %817 = vst [vmem:[#allocation2 + $0x538] sm:$0xe] %v777_v40  ;;  %1078 = vrot.lane.b32.xlu0 %v1051_v37, %s5884_s22  ;;  %1088 = vrot.lane.b32.xlu2 %v1056_v38, %s5884_s22  ;;  %v1224_v38 = vld.sshfl [vmem:[#allocation1 + $0x30] sm:$0xff pattern:$0x75316420] }
 0x132   : > { %v737_v47 = vpop.permute.xlu0 %736  ;;  %v765_v48 = vpop.permute.xlu2 %764 }
 0x133   : > { %v772_v50 = vsel %vm766_vm2, %v6149_v45, %v737_v47  ;;  %v773_v35 = vsel %vm766_vm2, %v737_v47, %v739_v24  ;;  %v1044_v45 = vld.sshfl [vmem:[#allocation1 + $0x20] sm:$0xff pattern:$0x75316420] }
 0x134   : > { %1092 = vrot.lane.b32.xlu1 %v1058_v23, %s5884_s22  ;;  %812 = vst [vmem:[#allocation2 + $0xa0] sm:$0xe] %v772_v50  ;;  %v1065_v11 = vrot.slane %v1044_v45, 1  ;;  %v1197_v47 = vld [vmem:[%s5923_s17 + $0x40] sm:$0x77] }
 0x135   : > { %813 = vst [vmem:[#allocation2 + $0x1a0] sm:$0xe] %v773_v35  ;;  %v1219_v9 = vld.sshfl [vmem:[#allocation1 + $0x8] sm:$0xff pattern:$0x75316420]  ;;  %v1249_v35 = vrot.slane %v1221_v22, 6 }
 0x136   : > { %v751_v53 = vpop.permute.xlu1 %750  ;;  %1215 = vst [vmem:[#allocation1 + $0x20] ss:$2 sm:$0xff] %v1191_v57  ;;  %v1247_v17 = vrot.slane %v1219_v9, 6  ;;  %v1198_v45 = vld [vmem:[%s5923_s17 + $0x48] sm:$0x77] }
 0x137   : > { %v780_v54 = vsel %vm766_vm2, %v751_v53, %v6184_v16  ;;  %v1199_v57 = vld [vmem:[%s5923_s17 + $0x50] sm:$0x7] }
 0x138   : > { %820 = vst [vmem:[#allocation2 + $0x4a0] sm:$0xe] %v780_v54  ;;  %1084 = vrot.lane.b32.xlu0 %v1054_v51, %s5884_s22  ;;  %1094 = vrot.lane.b32.xlu2 %v1059_v52, %s5884_s22 }
 0x13a   : > { %v743_v58 = vpop.permute.xlu0 %742  ;;  %v6217_v59 = vpop.permute.xlu2 %889 }
 0x13b   : > { %v775_v60 = vsel %vm766_vm2, %v6159_v55, %v743_v58  ;;  %v776_v61 = vsel %vm766_vm2, %v743_v58, %v745_v39  ;;  %v6227_v55 = vld.sshfl [vmem:[#allocation1] sm:$0xff pattern:$0x75316420]  ;;  %v1225_v39 = vld.sshfl [vmem:[#allocation1 + $0x38] sm:$0xff pattern:$0x75316420] }
 0x13c   : > { %1098 = vrot.lane.b32.xlu1 %v1061_v56, %s5884_s22  ;;  %815 = vst [vmem:[#allocation2 + $0xe0] sm:$0xe] %v775_v60  ;;  %v1246_v23 = vrot.slane %v6227_v55, 6  ;;  %v1253_v44 = vrot.slane %v1225_v39, 6 }
 0x13d   : > { %816 = vst [vmem:[#allocation2 + $0x3a0] sm:$0xe] %v776_v61  ;;  %v1222_v28 = vld.sshfl [vmem:[#allocation1 + $0x20] sm:$0xff pattern:$0x75316420] }
 0x13e   : > { %v757_v0 = vpop.permute.xlu1 %756  ;;  %1226 = vst [vmem:[#allocation1] ss:$2 sm:$0xff] %v1193_v6  ;;  %v1250_v19 = vrot.slane %v1222_v28, 6 }
 0x13f   : > { %v783_v1 = vsel %vm766_vm2, %v757_v0, %v6194_v31  ;;  %1229 = vst [vmem:[#allocation1 + $0x30] ss:$2 sm:$0xff] %v1196_v33 }
 0x140   : > { %823 = vst [vmem:[#allocation2 + $0x680] sm:$0xe] %v783_v1  ;;  %1090 = vrot.lane.b32.xlu0 %v1057_v62, %s5884_s22  ;;  %1100 = vrot.lane.b32.xlu2 %v1062_v63, %s5884_s22 }
 0x142   : > { %v749_v7 = vpop.permute.xlu0 %748  ;;  %v6231_v8 = vpop.permute.xlu2 %895 }
 0x143   : > { %v778_v10 = vsel %vm766_vm2, %v6172_v4, %v749_v7  ;;  %v779_v12 = vsel %vm766_vm2, %v749_v7, %v751_v53  ;;  %v1220_v4 = vld.sshfl [vmem:[#allocation1 + $0x10] sm:$0xff pattern:$0x75316420]  ;;  %v1371_v7 = vld [vmem:[%s5923_s17 + $0x8] sm:$0x77] }
 0x144   : > { %1104 = vrot.lane.b32.xlu1 %v1064_v2, %s5884_s22  ;;  %818 = vst [vmem:[#allocation2 + $0x3c0] sm:$0xe] %v778_v10  ;;  %v1248_v27 = vrot.slane %v1220_v4, 6  ;;  %v1252_v2 = vrot.slane %v1224_v38, 6 }
 0x145   : > { %819 = vst [vmem:[#allocation2 + $0x5f8] sm:$0xe] %v779_v12  ;;  %v1231_v46 = vld.sshfl [vmem:[#allocation1 + $0x8] sm:$0xff pattern:$0x75316420] }
 0x146   : > { %v763_v14 = vpop.permute.xlu1 %762  ;;  %1227 = vst [vmem:[#allocation1 + $0x10] ss:$2 sm:$0xff] %v1194_v18  ;;  %v1237_v38 = vld.sshfl [vmem:[#allocation1 + $0x38] sm:$0xff pattern:$0x75316420] }
 0x147   : > { %v786_v15 = vsel %vm766_vm2, %v763_v14, %v765_v48 }
 0x148   : > { %826 = vst [vmem:[#allocation2 + $0x6a0] sm:$0xe] %v786_v15  ;;  %1096 = vrot.lane.b32.xlu0 %v1060_v13, %s5884_s22  ;;  %1106 = vrot.lane.b32.xlu2 %v1065_v11, %s5884_s22  ;;  %v1255_v15 = vrot.slane %v1231_v46, 6 }
 0x14a   : > { %v755_v20 = vpop.permute.xlu0 %754  ;;  %v6241_v21 = vpop.permute.xlu2 %901 }
 0x14b   : > { %v781_v24 = vsel %vm766_vm2, %v6184_v16, %v755_v20  ;;  %v782_v25 = vsel %vm766_vm2, %v755_v20, %v757_v0  ;;  %v1223_v16 = vld.sshfl [vmem:[#allocation1 + $0x28] sm:$0xff pattern:$0x75316420] }
 0x14c   : > { %1269 = vrot.lane.b32.xlu1 %v1247_v17, %s5885_s23  ;;  %821 = vst [vmem:[#allocation2 + $0x4e8] sm:$0xe] %v781_v24  ;;  %v1251_v34 = vrot.slane %v1223_v16, 6  ;;  %v1370_v17 = vld [vmem:[%s5923_s17] sm:$0x77] }
 0x14d   : > { %822 = vst [vmem:[#allocation2 + $0x3d8] sm:$0xe] %v782_v25  ;;  %v1232_v52 = vld.sshfl [vmem:[#allocation1 + $0x10] sm:$0xff pattern:$0x75316420] }
 0x14e   : > { %v888_v29 = vpop.permute.xlu1 %887  ;;  %1228 = vst [vmem:[#allocation1 + $0x20] ss:$2 sm:$0xff] %v1195_v32  ;;  %v1256_v56 = vrot.slane %v1232_v52, 6  ;;  %v1233_v58 = vld.sshfl [vmem:[#allocation1 + $0x18] sm:$0xff pattern:$0x75316420] }
 0x14f   : > { %v929_v30 = vsel %vm927_vm3, %v888_v29, %v6217_v59  ;;  %1239 = vst [vmem:[#allocation1 + $0x10] ss:$2 sm:$0xff] %v1198_v45  ;;  %v1257_v3 = vrot.slane %v1233_v58, 6 }
 0x150   : > { %969 = vst [vmem:[#allocation2 + $0x6d8] sm:$0x70] %v929_v30  ;;  %1102 = vrot.lane.b32.xlu0 %v1063_v26, %s5884_s22  ;;  %1271 = vrot.lane.b32.xlu2 %v1248_v27, %s5885_s23  ;;  %v1372_v26 = vld [vmem:[%s5923_s17 + $0x10] sm:$0x77] }
 0x152   : > { %v761_v36 = vpop.permute.xlu0 %760  ;;  %v6254_v37 = vpop.permute.xlu2 %907 }
 0x153   : > { %v784_v40 = vsel %vm766_vm2, %v6194_v31, %v761_v36  ;;  %v785_v41 = vsel %vm766_vm2, %v761_v36, %v763_v14  ;;  %v1230_v31 = vld.sshfl [vmem:[#allocation1] sm:$0xff pattern:$0x75316420] }
 0x154   : > { %1275 = vrot.lane.b32.xlu1 %v1250_v19, %s5885_s23  ;;  %824 = vst [vmem:[#allocation2 + $0x3d0] sm:$0xe] %v784_v40  ;;  %v1254_v51 = vrot.slane %v1230_v31, 6 }
 0x155   : > { %825 = vst [vmem:[#allocation2 + $0x80] sm:$0xe] %v785_v41  ;;  %v1234_v60 = vld.sshfl [vmem:[#allocation1 + $0x20] sm:$0xff pattern:$0x75316420] }
 0x156   : > { %v894_v42 = vpop.permute.xlu1 %893  ;;  %1238 = vst [vmem:[#allocation1] ss:$2 sm:$0xff] %v1197_v47  ;;  %v1235_v63 = vld.sshfl [vmem:[#allocation1 + $0x28] sm:$0xff pattern:$0x75316420]  ;;  %v1258_v16 = vrot.slane %v1234_v60, 6 }
 0x157   : > { %v932_v43 = vsel %vm927_vm3, %v894_v42, %v6231_v8  ;;  %1240 = vst [vmem:[#allocation1 + $0x20] ss:$2 sm:$0xff] %v1199_v57  ;;  %v1259_v6 = vrot.slane %v1235_v63, 6  ;;  %v6287_v9 = vld.sshfl [vmem:[#allocation1 + $0x10] sm:$0xff pattern:$0x75316420] }
 0x158   : > { %972 = vst [vmem:[#allocation2 + $0x118] sm:$0x70] %v932_v43  ;;  %1267 = vrot.lane.b32.xlu0 %v1246_v23, %s5885_s23  ;;  %1277 = vrot.lane.b32.xlu2 %v1251_v34, %s5885_s23  ;;  %v1244_v10 = vld.sshfl [vmem:[#allocation1 + $0x18] sm:$0xff pattern:$0x75316420] }
 0x159   : > { %1394 = vst [vmem:[#allocation1 + $0x10] ss:$2 sm:$0xff] %v1371_v7  ;;  %v1265_v36 = vrot.slane %v1244_v10, 6  ;;  %v1374_v34 = vld [vmem:[%s5923_s17 + $0x20] sm:$0x77] }
 0x15a   : > { %v886_v48 = vpop.permute.xlu0 %885  ;;  %v6266_v49 = vpop.permute.xlu2 %913  ;;  %v1376_v63 = vld [vmem:[%s5923_s17 + $0x30] sm:$0x77] }
 0x15b   : > { %v928_v50 = vsel %vm927_vm3, %v886_v48, %v888_v29 }
 0x15c   : > { %1281 = vrot.lane.b32.xlu1 %v1253_v44, %s5885_s23  ;;  %968 = vst [vmem:[#allocation2 + $0x3c8] sm:$0x70] %v928_v50  ;;  %v1261_v44 = vrot.slane %v1237_v38, 6 }
 0x15d   : > { %v1241_v4 = vld.sshfl [vmem:[#allocation1] sm:$0xff pattern:$0x75316420]  ;;  %v1242_v22 = vld.sshfl [vmem:[#allocation1 + $0x8] sm:$0xff pattern:$0x75316420] }
 0x15e   : > { %v900_v53 = vpop.permute.xlu1 %899  ;;  %1392 = vst [vmem:[#allocation1] ss:$2 sm:$0xff] %v1370_v17  ;;  %v1245_v25 = vld.sshfl [vmem:[#allocation1 + $0x20] sm:$0xff pattern:$0x75316420]  ;;  %v1263_v19 = vrot.slane %v1242_v22, 6 }
 0x15f   : > { %v935_v54 = vsel %vm927_vm3, %v900_v53, %v6241_v21  ;;  %1396 = vst [vmem:[#allocation1 + $0x20] ss:$2 sm:$0xff] %v1372_v26  ;;  %v1266_v31 = vrot.slane %v1245_v25, 6  ;;  %v1379_v26 = vld [vmem:[%s5923_s17 + $0x48] sm:$0x77] }
 0x160   : > { %975 = vst [vmem:[#allocation2 + $0x260] sm:$0x70] %v935_v54  ;;  %1273 = vrot.lane.b32.xlu0 %v1249_v35, %s5885_s23  ;;  %1283 = vrot.lane.b32.xlu2 %v1254_v51, %s5885_s23  ;;  %v6322_v50 = vld.sshfl [vmem:[#allocation1 + $0x18] sm:$0xff pattern:$0x75316420] }
 0x161   : > { %v1375_v35 = vld [vmem:[%s5923_s17 + $0x28] sm:$0x77] }
 0x162   : > { %v892_v61 = vpop.permute.xlu0 %891  ;;  %v6276_v62 = vpop.permute.xlu2 %919 }
 0x163   : > { %v930_v0 = vsel %vm927_vm3, %v6217_v59, %v892_v61  ;;  %v931_v1 = vsel %vm927_vm3, %v892_v61, %v894_v42  ;;  %v1236_v59 = vld.sshfl [vmem:[#allocation1 + $0x30] sm:$0xff pattern:$0x75316420] }
 0x164   : > { %1287 = vrot.lane.b32.xlu1 %v1256_v56, %s5885_s23  ;;  %970 = vst [vmem:[#allocation2 + $0x670] sm:$0x70] %v930_v0  ;;  %v1260_v18 = vrot.slane %v1236_v59, 6  ;;  %v1264_v56 = vrot.slane %v6287_v9, 6 }
 0x165   : > { %971 = vst [vmem:[#allocation2 + $0x348] sm:$0x70] %v931_v1  ;;  %v6310_v39 = vld.sshfl [vmem:[#allocation1] sm:$0xff pattern:$0x75316420] }
 0x166   : > { %v906_v55 = vpop.permute.xlu1 %905  ;;  %v1400_v23 = vld.sshfl [vmem:[#allocation1 + $0x8] sm:$0xff pattern:$0x75316420]  ;;  %v1403_v57 = vld.sshfl [vmem:[#allocation1 + $0x20] sm:$0xff pattern:$0x75316420] }
 0x167   : > { %v938_v5 = vsel %vm927_vm3, %v906_v55, %v6254_v37  ;;  %1407 = vst [vmem:[#allocation1] ss:$2 sm:$0xff] %v1374_v34  ;;  %v1428_v48 = vrot.slane %v1400_v23, 3  ;;  %v1431_v61 = vrot.slane %v1403_v57, 3  ;;  %v1427_v59 = vrot.slane %v6310_v39, 3 }
 0x168   : > { %978 = vst [vmem:[#allocation2 + $0x538] sm:$0x70] %v938_v5  ;;  %1279 = vrot.lane.b32.xlu0 %v1252_v2, %s5885_s23  ;;  %1289 = vrot.lane.b32.xlu2 %v1257_v3, %s5885_s23 }
 0x16a   : > { %v898_v12 = vpop.permute.xlu0 %897  ;;  %v926_v13 = vpop.permute.xlu2 %925 }
 0x16b   : > { %v933_v11 = vsel %vm927_vm3, %v6231_v8, %v898_v12  ;;  %v934_v14 = vsel %vm927_vm3, %v898_v12, %v900_v53  ;;  %v1262_v8 = vrot.slane %v1241_v4, 6 }
 0x16c   : > { %1293 = vrot.lane.b32.xlu1 %v1259_v6, %s5885_s23  ;;  %973 = vst [vmem:[#allocation2 + $0xa0] sm:$0x70] %v933_v11 }
 0x16d   : > { %974 = vst [vmem:[#allocation2 + $0x1a0] sm:$0x70] %v934_v14 }
 0x16e   : > { %v912_v20 = vpop.permute.xlu1 %911 }
 0x16f   : > { %v941_v24 = vsel %vm927_vm3, %v912_v20, %v6266_v49 }
 0x170   : > { %981 = vst [vmem:[#allocation2 + $0x4a0] sm:$0x70] %v941_v24  ;;  %1285 = vrot.lane.b32.xlu0 %v1255_v15, %s5885_s23  ;;  %1295 = vrot.lane.b32.xlu2 %v1260_v18, %s5885_s23  ;;  %v1412_v15 = vld.sshfl [vmem:[#allocation1 + $0x8] sm:$0xff pattern:$0x75316420]  ;;  %v1430_v18 = vrot.slane %v6322_v50, 3 }
 0x172   : > { %v904_v27 = vpop.permute.xlu0 %903  ;;  %v6299_v28 = vpop.permute.xlu2 %1070 }
 0x173   : > { %v936_v29 = vsel %vm927_vm3, %v6241_v21, %v904_v27  ;;  %v937_v30 = vsel %vm927_vm3, %v904_v27, %v906_v55  ;;  %v1373_v21 = vld [vmem:[%s5923_s17 + $0x18] sm:$0x77]  ;;  %v1380_v27 = vld [vmem:[%s5923_s17 + $0x50] sm:$0x7] }
 0x174   : > { %1299 = vrot.lane.b32.xlu1 %v1262_v8, %s5885_s23  ;;  %976 = vst [vmem:[#allocation2 + $0xe0] sm:$0x70] %v936_v29  ;;  %v1377_v55 = vld [vmem:[%s5923_s17 + $0x38] sm:$0x77] }
 0x175   : > { %977 = vst [vmem:[#allocation2 + $0x3a0] sm:$0x70] %v937_v30 }
 0x176   : > { %v918_v32 = vpop.permute.xlu1 %917  ;;  %1398 = vst [vmem:[#allocation1 + $0x30] ss:$2 sm:$0xff] %v1373_v21 }
 0x177   : > { %v944_v33 = vsel %vm927_vm3, %v918_v32, %v6276_v62 }
 0x178   : > { %984 = vst [vmem:[#allocation2 + $0x680] sm:$0x70] %v944_v33  ;;  %1291 = vrot.lane.b32.xlu0 %v1258_v16, %s5885_s23  ;;  %1301 = vrot.lane.b32.xlu2 %v1263_v19, %s5885_s23 }
 0x17a   : > { %v910_v40 = vpop.permute.xlu0 %909  ;;  %v6312_v41 = vpop.permute.xlu2 %1076 }
 0x17b   : > { %v939_v42 = vsel %vm927_vm3, %v6254_v37, %v910_v40  ;;  %v940_v43 = vsel %vm927_vm3, %v910_v40, %v912_v20  ;;  %v1401_v37 = vld.sshfl [vmem:[#allocation1 + $0x10] sm:$0xff pattern:$0x75316420] }
 0x17c   : > { %1305 = vrot.lane.b32.xlu1 %v1265_v36, %s5885_s23  ;;  %979 = vst [vmem:[#allocation2 + $0x3c0] sm:$0x70] %v939_v42  ;;  %v1429_v45 = vrot.slane %v1401_v37, 3 }
 0x17d   : > { %980 = vst [vmem:[#allocation2 + $0x5f8] sm:$0x70] %v940_v43  ;;  %v1405_v0 = vld.sshfl [vmem:[#allocation1 + $0x30] sm:$0xff pattern:$0x75316420] }
 0x17e   : > { %v924_v46 = vpop.permute.xlu1 %923  ;;  %1408 = vst [vmem:[#allocation1 + $0x10] ss:$2 sm:$0xff] %v1375_v35  ;;  %v1406_v1 = vld.sshfl [vmem:[#allocation1 + $0x38] sm:$0xff pattern:$0x75316420]  ;;  %v1433_v36 = vrot.slane %v1405_v0, 3 }
 0x17f   : > { %v947_v47 = vsel %vm927_vm3, %v924_v46, %v926_v13  ;;  %1410 = vst [vmem:[#allocation1 + $0x30] ss:$2 sm:$0xff] %v1377_v55  ;;  %v1434_v12 = vrot.slane %v1406_v1, 3  ;;  %v1411_v13 = vld.sshfl [vmem:[#allocation1] sm:$0xff pattern:$0x75316420] }
 0x180   : > { %987 = vst [vmem:[#allocation2 + $0x6a0] sm:$0x70] %v947_v47  ;;  %1297 = vrot.lane.b32.xlu0 %v1261_v44, %s5885_s23  ;;  %1307 = vrot.lane.b32.xlu2 %v1266_v31, %s5885_s23  ;;  %v1435_v4 = vrot.slane %v1411_v13, 3  ;;  %v1552_v44 = vld [vmem:[%s5923_s17 + $0x8] sm:$0x77]  ;;  %v1436_v47 = vrot.slane %v1412_v15, 3 }
 0x182   : > { %v916_v51 = vpop.permute.xlu0 %915  ;;  %v6325_v52 = vpop.permute.xlu2 %1082 }
 0x183   : > { %v942_v53 = vsel %vm927_vm3, %v6266_v49, %v916_v51  ;;  %v943_v54 = vsel %vm927_vm3, %v916_v51, %v918_v32  ;;  %v1404_v49 = vld.sshfl [vmem:[#allocation1 + $0x28] sm:$0xff pattern:$0x75316420] }
 0x184   : > { %1450 = vrot.lane.b32.xlu1 %v1428_v48, %s5886_s24  ;;  %982 = vst [vmem:[#allocation2 + $0x4e8] sm:$0x70] %v942_v53  ;;  %v1432_v7 = vrot.slane %v1404_v49, 3  ;;  %v1551_v53 = vld [vmem:[%s5923_s17] sm:$0x77] }
 0x185   : > { %983 = vst [vmem:[#allocation2 + $0x3d8] sm:$0x70] %v943_v54  ;;  %v1413_v20 = vld.sshfl [vmem:[#allocation1 + $0x10] sm:$0xff pattern:$0x75316420] }
 0x186   : > { %v1069_v58 = vpop.permute.xlu1 %1068  ;;  %1409 = vst [vmem:[#allocation1 + $0x20] ss:$2 sm:$0xff] %v1376_v63  ;;  %v1414_v8 = vld.sshfl [vmem:[#allocation1 + $0x18] sm:$0xff pattern:$0x75316420]  ;;  %v1437_v25 = vrot.slane %v1413_v20, 3 }
 0x187   : > { %v1110_v60 = vsel %vm1108_vm4, %v1069_v58, %v6299_v28  ;;  %1420 = vst [vmem:[#allocation1 + $0x10] ss:$2 sm:$0xff] %v1379_v26  ;;  %v1438_v38 = vrot.slane %v1414_v8, 3  ;;  %v1418_v63 = vld.sshfl [vmem:[#allocation1 + $0x38] sm:$0xff pattern:$0x75316420] }
 0x188   : > { %1150 = vst [vmem:[#allocation2 + $0x6d8] sm:$0x80] %v1110_v60  ;;  %1303 = vrot.lane.b32.xlu0 %v1264_v56, %s5885_s23  ;;  %1452 = vrot.lane.b32.xlu2 %v1429_v45, %s5886_s24  ;;  %v1557_v26 = vld [vmem:[%s5923_s17 + $0x30] sm:$0x77] }
 0x189   : > { %1170 = vst [vmem:[#allocation2 + $0x5c0] sm:$0x3] %v1110_v60 }
 0x18a   : > { %v922_v2 = vpop.permute.xlu0 %921  ;;  %v6337_v3 = vpop.permute.xlu2 %1088 }
 0x18b   : > { %v945_v5 = vsel %vm927_vm3, %v6276_v62, %v922_v2  ;;  %v946_v6 = vsel %vm927_vm3, %v922_v2, %v924_v46  ;;  %v1378_v62 = vld [vmem:[%s5923_s17 + $0x40] sm:$0x77] }
 0x18c   : > { %1456 = vrot.lane.b32.xlu1 %v1431_v61, %s5886_s24  ;;  %985 = vst [vmem:[#allocation2 + $0x3d0] sm:$0x70] %v945_v5  ;;  %v1555_v2 = vld [vmem:[%s5923_s17 + $0x20] sm:$0x77] }
 0x18d   : > { %986 = vst [vmem:[#allocation2 + $0x80] sm:$0x70] %v946_v6  ;;  %v6363_v16 = vld.sshfl [vmem:[#allocation1 + $0x20] sm:$0xff pattern:$0x75316420] }
 0x18e   : > { %v1075_v9 = vpop.permute.xlu1 %1074  ;;  %1419 = vst [vmem:[#allocation1] ss:$2 sm:$0xff] %v1378_v62  ;;  %v1416_v19 = vld.sshfl [vmem:[#allocation1 + $0x28] sm:$0xff pattern:$0x75316420] }
 0x18f   : > { %v1113_v10 = vsel %vm1108_vm4, %v1075_v9, %v6312_v41  ;;  %1421 = vst [vmem:[#allocation1 + $0x20] ss:$2 sm:$0xff] %v1380_v27  ;;  %v1440_v40 = vrot.slane %v1416_v19, 3  ;;  %v6373_v23 = vld.sshfl [vmem:[#allocation1 + $0x10] sm:$0xff pattern:$0x75316420] }
 0x190   : > { %1153 = vst [vmem:[#allocation2 + $0x118] sm:$0x80] %v1113_v10  ;;  %1448 = vrot.lane.b32.xlu0 %v1427_v59, %s5886_s24  ;;  %1458 = vrot.lane.b32.xlu2 %v1432_v7, %s5886_s24  ;;  %v1425_v43 = vld.sshfl [vmem:[#allocation1 + $0x18] sm:$0xff pattern:$0x75316420] }
 0x191   : > { %1173 = vst [vmem:[#allocation2 + $0x610] sm:$0x3] %v1113_v10  ;;  %v1446_v1 = vrot.slane %v1425_v43, 3  ;;  %v1442_v10 = vrot.slane %v1418_v63, 3  ;;  %v1561_v43 = vld [vmem:[%s5923_s17 + $0x50] sm:$0x7] }
 0x192   : > { %v1067_v11 = vpop.permute.xlu0 %1066  ;;  %v6350_v14 = vpop.permute.xlu2 %1094  ;;  %1575 = vst [vmem:[#allocation1 + $0x10] ss:$2 sm:$0xff] %v1552_v44 }
 0x193   : > { %v1109_v17 = vsel %vm1108_vm4, %v1067_v11, %v1069_v58  ;;  %v1439_v58 = vrot.slane %v6363_v16, 3  ;;  %v1554_v11 = vld [vmem:[%s5923_s17 + $0x18] sm:$0x77] }
 0x194   : > { %1462 = vrot.lane.b32.xlu1 %v1434_v12, %s5886_s24  ;;  %1149 = vst [vmem:[#allocation2 + $0x3c8] sm:$0x80] %v1109_v17 }
 0x195   : > { %1169 = vst [vmem:[#allocation2 + $0x90] sm:$0x3] %v1109_v17  ;;  %v1422_v37 = vld.sshfl [vmem:[#allocation1] sm:$0xff pattern:$0x75316420] }
 0x196   : > { %v1081_v22 = vpop.permute.xlu1 %1080  ;;  %v1443_v51 = vrot.slane %v1422_v37, 3  ;;  %v1426_v0 = vld.sshfl [vmem:[#allocation1 + $0x20] sm:$0xff pattern:$0x75316420] }
 0x197   : > { %v1116_v24 = vsel %vm1108_vm4, %v1081_v22, %v6325_v52  ;;  %v1447_v12 = vrot.slane %v1426_v0, 3 }
 0x198   : > { %1156 = vst [vmem:[#allocation2 + $0x260] sm:$0x80] %v1116_v24  ;;  %1454 = vrot.lane.b32.xlu0 %v1430_v18, %s5886_s24  ;;  %1464 = vrot.lane.b32.xlu2 %v1435_v4, %s5886_s24  ;;  %v1445_v4 = vrot.slane %v6373_v23, 3  ;;  %v1560_v23 = vld [vmem:[%s5923_s17 + $0x48] sm:$0x77] }
 0x199   : > { %1176 = vst [vmem:[#allocation2 + $0x3f0] sm:$0x3] %v1116_v24  ;;  %v1582_v20 = vld.sshfl [vmem:[#allocation1 + $0x10] sm:$0xff pattern:$0x75316420] }
 0x19a   : > { %v1073_v29 = vpop.permute.xlu0 %1072  ;;  %v6361_v30 = vpop.permute.xlu2 %1100  ;;  %v1583_v24 = vld.sshfl [vmem:[#allocation1 + $0x18] sm:$0xff pattern:$0x75316420] }
 0x19b   : > { %v1111_v32 = vsel %vm1108_vm4, %v6299_v28, %v1073_v29  ;;  %v1112_v33 = vsel %vm1108_vm4, %v1073_v29, %v1075_v9  ;;  %v1417_v28 = vld.sshfl [vmem:[#allocation1 + $0x30] sm:$0xff pattern:$0x75316420] }
 0x19c   : > { %1468 = vrot.lane.b32.xlu1 %v1437_v25, %s5886_s24  ;;  %1151 = vst [vmem:[#allocation2 + $0x670] sm:$0x80] %v1111_v32  ;;  %v1441_v48 = vrot.slane %v1417_v28, 3  ;;  %v1556_v25 = vld [vmem:[%s5923_s17 + $0x28] sm:$0x77] }
 0x19d   : > { %1171 = vst [vmem:[#allocation2 + $0x5d0] sm:$0x3] %v1111_v32 }
 0x19e   : > { %v1087_v21 = vpop.permute.xlu1 %1086  ;;  %1152 = vst [vmem:[#allocation2 + $0x348] sm:$0x80] %v1112_v33 }
 0x19f   : > { %v1119_v39 = vsel %vm1108_vm4, %v1087_v21, %v6337_v3  ;;  %1172 = vst [vmem:[#allocation2 + $0x4f0] sm:$0x3] %v1112_v33 }
 0x1a0   : > { %1460 = vrot.lane.b32.xlu0 %v1433_v36, %s5886_s24  ;;  %1470 = vrot.lane.b32.xlu2 %v1438_v38, %s5886_s24  ;;  %1159 = vst [vmem:[#allocation2 + $0x538] sm:$0x80] %v1119_v39 }
 0x1a1   : > { %1179 = vst [vmem:[#allocation2 + $0x368] sm:$0x3] %v1119_v39 }
 0x1a2   : > { %v1079_v34 = vpop.permute.xlu0 %1078  ;;  %v1107_v42 = vpop.permute.xlu2 %1106  ;;  %1579 = vst [vmem:[#allocation1 + $0x30] ss:$2 sm:$0xff] %v1554_v11 }
 0x1a3   : > { %v1114_v31 = vsel %vm1108_vm4, %v6312_v41, %v1079_v34  ;;  %v1115_v46 = vsel %vm1108_vm4, %v1079_v34, %v1081_v22  ;;  %v1423_v41 = vld.sshfl [vmem:[#allocation1 + $0x8] sm:$0xff pattern:$0x75316420]  ;;  %1589 = vst [vmem:[#allocation1 + $0x10] ss:$2 sm:$0xff] %v1556_v25 }
 0x1a4   : > { %1474 = vrot.lane.b32.xlu1 %v1440_v40, %s5886_s24  ;;  %1154 = vst [vmem:[#allocation2 + $0xa0] sm:$0x80] %v1114_v31  ;;  %v1444_v60 = vrot.slane %v1423_v41, 3  ;;  %v1559_v40 = vld [vmem:[%s5923_s17 + $0x40] sm:$0x77] }
 0x1a5   : > { %1174 = vst [vmem:[#allocation2 + $0x220] sm:$0x3] %v1114_v31 }
 0x1a6   : > { %v1093_v50 = vpop.permute.xlu1 %1092  ;;  %1155 = vst [vmem:[#allocation2 + $0x1a0] sm:$0x80] %v1115_v46 }
 0x1a7   : > { %v1122_v35 = vsel %vm1108_vm4, %v1093_v50, %v6350_v14  ;;  %1175 = vst [vmem:[#allocation2 + $0x58] sm:$0x3] %v1115_v46 }
 0x1a8   : > { %1466 = vrot.lane.b32.xlu0 %v1436_v47, %s5886_s24  ;;  %1476 = vrot.lane.b32.xlu2 %v1441_v48, %s5886_s24  ;;  %1162 = vst [vmem:[#allocation2 + $0x4a0] sm:$0x80] %v1122_v35 }
 0x1a9   : > { %1182 = vst [vmem:[#allocation2 + $0x410] sm:$0x3] %v1122_v35  ;;  %v1586_v39 = vld.sshfl [vmem:[#allocation1 + $0x30] sm:$0xff pattern:$0x75316420] }
 0x1aa   : > { %v1085_v54 = vpop.permute.xlu0 %1084  ;;  %v6385_v56 = vpop.permute.xlu2 %1271  ;;  %1573 = vst [vmem:[#allocation1] ss:$2 sm:$0xff] %v1551_v53  ;;  %v1587_v28 = vld.sshfl [vmem:[#allocation1 + $0x38] sm:$0xff pattern:$0x75316420] }
 0x1ab   : > { %v1117_v45 = vsel %vm1108_vm4, %v6325_v52, %v1085_v54  ;;  %v1118_v57 = vsel %vm1108_vm4, %v1085_v54, %v1087_v21  ;;  %v1553_v52 = vld [vmem:[%s5923_s17 + $0x10] sm:$0x77]  ;;  %v1595_v34 = vld.sshfl [vmem:[#allocation1 + $0x18] sm:$0xff pattern:$0x75316420] }
 0x1ac   : > { %1480 = vrot.lane.b32.xlu1 %v1443_v51, %s5886_s24  ;;  %1157 = vst [vmem:[#allocation2 + $0xe0] sm:$0x80] %v1117_v45  ;;  %v1714_v35 = vld [vmem:[%s5923_s17 + $0x20] sm:$0x77] }
 0x1ad   : > { %1177 = vst [vmem:[#allocation2 + $0x5e8] sm:$0x3] %v1117_v45  ;;  %v1711_v45 = vld [vmem:[%s5923_s17 + $0x8] sm:$0x77] }
 0x1ae   : > { %v1099_v49 = vpop.permute.xlu1 %1098  ;;  %1158 = vst [vmem:[#allocation2 + $0x3a0] sm:$0x80] %v1118_v57 }
 0x1af   : > { %v1125_v61 = vsel %vm1108_vm4, %v1099_v49, %v6361_v30  ;;  %1178 = vst [vmem:[#allocation2 + $0xb0] sm:$0x3] %v1118_v57 }
 0x1b0   : > { %1472 = vrot.lane.b32.xlu0 %v1439_v58, %s5886_s24  ;;  %1482 = vrot.lane.b32.xlu2 %v1444_v60, %s5886_s24  ;;  %1165 = vst [vmem:[#allocation2 + $0x680] sm:$0x80] %v1125_v61 }
 0x1b1   : > { %1185 = vst [vmem:[#allocation2 + $0x358] sm:$0x3] %v1125_v61  ;;  %v6398_v55 = vld.sshfl [vmem:[#allocation1] sm:$0xff pattern:$0x75316420] }
 0x1b2   : > { %v1091_v5 = vpop.permute.xlu0 %1090  ;;  %v6400_v6 = vpop.permute.xlu2 %1277  ;;  %v1581_v59 = vld.sshfl [vmem:[#allocation1 + $0x8] sm:$0xff pattern:$0x75316420]  ;;  %1577 = vst [vmem:[#allocation1 + $0x20] ss:$2 sm:$0xff] %v1553_v52 }
 0x1b3   : > { %v1120_v7 = vsel %vm1108_vm4, %v6337_v3, %v1091_v5  ;;  %v1121_v9 = vsel %vm1108_vm4, %v1091_v5, %v1093_v50  ;;  %1588 = vst [vmem:[#allocation1] ss:$2 sm:$0xff] %v1555_v2  ;;  %v1712_v61 = vld [vmem:[%s5923_s17 + $0x10] sm:$0x77] }
 0x1b4   : > { %1486 = vrot.lane.b32.xlu1 %v1446_v1, %s5886_s24  ;;  %1160 = vst [vmem:[#allocation2 + $0x3c0] sm:$0x80] %v1120_v7 }
 0x1b5   : > { %1180 = vst [vmem:[#allocation2 + $0x4b0] sm:$0x3] %v1120_v7 }
 0x1b6   : > { %v1105_v62 = vpop.permute.xlu1 %1104  ;;  %1161 = vst [vmem:[#allocation2 + $0x5f8] sm:$0x80] %v1121_v9 }
 0x1b7   : > { %v1128_v13 = vsel %vm1108_vm4, %v1105_v62, %v1107_v42  ;;  %1181 = vst [vmem:[#allocation2 + $0x2d8] sm:$0x3] %v1121_v9  ;;  %v1594_v42 = vld.sshfl [vmem:[#allocation1 + $0x10] sm:$0xff pattern:$0x75316420] }
 0x1b8   : > { %1478 = vrot.lane.b32.xlu0 %v1442_v10, %s5886_s24  ;;  %1488 = vrot.lane.b32.xlu2 %v1447_v12, %s5886_s24  ;;  %1168 = vst [vmem:[#allocation2 + $0x6a0] sm:$0x80] %v1128_v13  ;;  %v1715_v9 = vld [vmem:[%s5923_s17 + $0x28] sm:$0x77] }
 0x1b9   : > { %1188 = vst [vmem:[#allocation2 + $0x640] sm:$0x3] %v1128_v13  ;;  %v1585_v16 = vld.sshfl [vmem:[#allocation1 + $0x28] sm:$0xff pattern:$0x75316420] }
 0x1ba   : > { %v1097_v3 = vpop.permute.xlu0 %1096  ;;  %v6410_v15 = vpop.permute.xlu2 %1283  ;;  %v1592_v38 = vld.sshfl [vmem:[#allocation1] sm:$0xff pattern:$0x75316420]  ;;  %v6431_v21 = vld.sshfl [vmem:[#allocation1 + $0x8] sm:$0xff pattern:$0x75316420] }
 0x1bb   : > { %v1123_v17 = vsel %vm1108_vm4, %v6350_v14, %v1097_v3  ;;  %v1124_v18 = vsel %vm1108_vm4, %v1097_v3, %v1099_v49  ;;  %v1584_v14 = vld.sshfl [vmem:[#allocation1 + $0x20] sm:$0xff pattern:$0x75316420]  ;;  %1600 = vst [vmem:[#allocation1] ss:$2 sm:$0xff] %v1559_v40 }
 0x1bc   : > { %1610 = vrot.lane.b32.xlu1 %v1581_v59, %s5887_s25  ;;  %1163 = vst [vmem:[#allocation2 + $0x4e8] sm:$0x80] %v1123_v17  ;;  %v1717_v3 = vld [vmem:[%s5923_s17 + $0x38] sm:$0x77] }
 0x1bd   : > { %1183 = vst [vmem:[#allocation2 + $0x408] sm:$0x3] %v1123_v17 }
 0x1be   : > { %v1270_v22 = vpop.permute.xlu1 %1269  ;;  %1164 = vst [vmem:[#allocation2 + $0x3d8] sm:$0x80] %v1124_v18 }
 0x1bf   : > { %v1311_v8 = vsel %vm1309_vm5, %v1270_v22, %v6385_v56  ;;  %1184 = vst [vmem:[#allocation2 + $0x4e0] sm:$0x3] %v1124_v18 }
 0x1c0   : > { %1484 = vrot.lane.b32.xlu0 %v1445_v4, %s5886_s24  ;;  %1612 = vrot.lane.b32.xlu2 %v1582_v20, %s5887_s25  ;;  %1351 = vst [vmem:[#allocation2 + $0x5c0] sm:$0x1c] %v1311_v8 }
 0x1c1   : > { %1590 = vst [vmem:[#allocation1 + $0x20] ss:$2 sm:$0xff] %v1557_v26  ;;  %v1718_v26 = vld [vmem:[%s5923_s17 + $0x40] sm:$0x77] }
 0x1c2   : > { %v1103_v27 = vpop.permute.xlu0 %1102  ;;  %v6423_v29 = vpop.permute.xlu2 %1289  ;;  %1601 = vst [vmem:[#allocation1 + $0x10] ss:$2 sm:$0xff] %v1560_v23  ;;  %v1604_v60 = vld.sshfl [vmem:[#allocation1 + $0x8] sm:$0xff pattern:$0x75316420] }
 0x1c3   : > { %v1126_v19 = vsel %vm1108_vm4, %v6361_v30, %v1103_v27  ;;  %v1127_v32 = vsel %vm1108_vm4, %v1103_v27, %v1105_v62  ;;  %v1558_v30 = vld [vmem:[%s5923_s17 + $0x38] sm:$0x77]  ;;  %v1603_v49 = vld.sshfl [vmem:[#allocation1] sm:$0xff pattern:$0x75316420] }
 0x1c4   : > { %1616 = vrot.lane.b32.xlu1 %v1584_v14, %s5887_s25  ;;  %1166 = vst [vmem:[#allocation2 + $0x3d0] sm:$0x80] %v1126_v19  ;;  %v1716_v62 = vld [vmem:[%s5923_s17 + $0x30] sm:$0x77] }
 0x1c5   : > { %1186 = vst [vmem:[#allocation2 + $0x68] sm:$0x3] %v1126_v19  ;;  %v1720_v19 = vld [vmem:[%s5923_s17 + $0x50] sm:$0x77] }
 0x1c6   : > { %v1276_v33 = vpop.permute.xlu1 %1275  ;;  %1167 = vst [vmem:[#allocation2 + $0x80] sm:$0x80] %v1127_v32 }
 0x1c7   : > { %v1314_v36 = vsel %vm1309_vm5, %v1276_v33, %v6400_v6  ;;  %1187 = vst [vmem:[#allocation2 + $0x188] sm:$0x3] %v1127_v32  ;;  %v1719_v32 = vld [vmem:[%s5923_s17 + $0x48] sm:$0x77] }
 0x1c8   : > { %1608 = vrot.lane.b32.xlu0 %v6398_v55, %s5887_s25  ;;  %1618 = vrot.lane.b32.xlu2 %v1585_v16, %s5887_s25  ;;  %1354 = vst [vmem:[#allocation2 + $0x610] sm:$0x1c] %v1314_v36  ;;  %v6442_v46 = vld.sshfl [vmem:[#allocation1 + $0x20] sm:$0xff pattern:$0x75316420] }
 0x1c9   : > { %1591 = vst [vmem:[#allocation1 + $0x30] ss:$2 sm:$0xff] %v1558_v30  ;;  %v1597_v48 = vld.sshfl [vmem:[#allocation1 + $0x28] sm:$0xff pattern:$0x75316420] }
 0x1ca   : > { %v1268_v44 = vpop.permute.xlu0 %1267  ;;  %v6440_v31 = vpop.permute.xlu2 %1295  ;;  %1602 = vst [vmem:[#allocation1 + $0x20] ss:$2 sm:$0xff] %v1561_v43  ;;  %v6461_v63 = vld.sshfl [vmem:[#allocation1 + $0x10] sm:$0xff pattern:$0x75316420] }
 0x1cb   : > { %v1310_v47 = vsel %vm1309_vm5, %v1268_v44, %v1270_v22  ;;  %v6463_v1 = vld.sshfl [vmem:[#allocation1 + $0x18] sm:$0xff pattern:$0x75316420]  ;;  %1731 = vst [vmem:[#allocation1] ss:$2 sm:$0xff] %v1711_v45 }
 0x1cc   : > { %1622 = vrot.lane.b32.xlu1 %v1587_v28, %s5887_s25  ;;  %1350 = vst [vmem:[#allocation2 + $0x90] sm:$0x1c] %v1310_v47 }
 0x1cd   : > { %1733 = vst [vmem:[#allocation1 + $0x10] ss:$2 sm:$0xff] %v1712_v61  ;;  %v1830_v61 = vld [vmem:[%s5923_s17 + $0x38] sm:$0x77] }
 0x1ce   : > { %v1282_v37 = vpop.permute.xlu1 %1281 }
 0x1cf   : > { %v1317_v50 = vsel %vm1309_vm5, %v1282_v37, %v6410_v15 }
 0x1d0   : > { %1357 = vst [vmem:[#allocation2 + $0x3f0] sm:$0x1c] %v1317_v50  ;;  %1614 = vrot.lane.b32.xlu0 %v1583_v24, %s5887_s25  ;;  %1624 = vrot.lane.b32.xlu2 %v1592_v38, %s5887_s25  ;;  %v1598_v51 = vld.sshfl [vmem:[#allocation1 + $0x30] sm:$0xff pattern:$0x75316420] }
 0x1d1   : > { %v6451_v53 = vld.sshfl [vmem:[#allocation1 + $0x38] sm:$0xff pattern:$0x75316420]  ;;  %v6468_v2 = vld.sshfl [vmem:[#allocation1 + $0x20] sm:$0xff pattern:$0x75316420] }
 0x1d2   : > { %v1274_v41 = vpop.permute.xlu0 %1273  ;;  %v6453_v54 = vpop.permute.xlu2 %1301  ;;  %1737 = vst [vmem:[#allocation1 + $0x30] ss:$2 sm:$0xff] %v1714_v35  ;;  %v6477_v12 = vld.sshfl [vmem:[#allocation1] sm:$0xff pattern:$0x75316420] }
 0x1d3   : > { %v1312_v57 = vsel %vm1309_vm5, %v6385_v56, %v1274_v41  ;;  %v1313_v58 = vsel %vm1309_vm5, %v1274_v41, %v1276_v33  ;;  %v1713_v56 = vld [vmem:[%s5923_s17 + $0x18] sm:$0x77]  ;;  %v6482_v11 = vld.sshfl [vmem:[#allocation1 + $0x8] sm:$0xff pattern:$0x75316420] }
 0x1d4   : > { %1628 = vrot.lane.b32.xlu1 %v1594_v42, %s5887_s25  ;;  %1352 = vst [vmem:[#allocation2 + $0x5d0] sm:$0x1c] %v1312_v57  ;;  %v6485_v17 = vld.sshfl [vmem:[#allocation1 + $0x10] sm:$0xff pattern:$0x75316420] }
 0x1d5   : > { %1353 = vst [vmem:[#allocation2 + $0x4f0] sm:$0x1c] %v1313_v58  ;;  %v1827_v42 = vld [vmem:[%s5923_s17 + $0x20] sm:$0x77] }
 0x1d6   : > { %v1288_v0 = vpop.permute.xlu1 %1287  ;;  %1735 = vst [vmem:[#allocation1 + $0x20] ss:$2 sm:$0xff] %v1713_v56 }
 0x1d7   : > { %v1320_v52 = vsel %vm1309_vm5, %v1288_v0, %v6423_v29  ;;  %1746 = vst [vmem:[#allocation1] ss:$2 sm:$0xff] %v1715_v9  ;;  %v1828_v9 = vld [vmem:[%s5923_s17 + $0x28] sm:$0x77] }
 0x1d8   : > { %1360 = vst [vmem:[#allocation2 + $0x368] sm:$0x1c] %v1320_v52  ;;  %1620 = vrot.lane.b32.xlu0 %v1586_v39, %s5887_s25  ;;  %1630 = vrot.lane.b32.xlu2 %v1595_v34, %s5887_s25 }
 0x1d9   : > { %v6492_v18 = vld.sshfl [vmem:[#allocation1 + $0x30] sm:$0xff pattern:$0x75316420]  ;;  %v6498_v24 = vld.sshfl [vmem:[#allocation1 + $0x38] sm:$0xff pattern:$0x75316420] }
 0x1da   : > { %v1280_v55 = vpop.permute.xlu0 %1279  ;;  %v1308_v5 = vpop.permute.xlu2 %1307  ;;  %1749 = vst [vmem:[#allocation1 + $0x30] ss:$2 sm:$0xff] %v1718_v26 }
 0x1db   : > { %v1315_v59 = vsel %vm1309_vm5, %v6400_v6, %v1280_v55  ;;  %v1316_v7 = vsel %vm1309_vm5, %v1280_v55, %v1282_v37  ;;  %v6490_v6 = vld.sshfl [vmem:[#allocation1 + $0x18] sm:$0xff pattern:$0x75316420] }
 0x1dc   : > { %1634 = vrot.lane.b32.xlu1 %v1597_v48, %s5887_s25  ;;  %1355 = vst [vmem:[#allocation2 + $0x220] sm:$0x1c] %v1315_v59 }
 0x1dd   : > { %1356 = vst [vmem:[#allocation2 + $0x58] sm:$0x1c] %v1316_v7  ;;  %v6494_v4 = vld.sshfl [vmem:[#allocation1 + $0x20] sm:$0xff pattern:$0x75316420] }
 0x1de   : > { %v1294_v10 = vpop.permute.xlu1 %1293  ;;  %v6496_v20 = vld.sshfl [vmem:[#allocation1 + $0x28] sm:$0xff pattern:$0x75316420]  ;;  %1747 = vst [vmem:[#allocation1 + $0x10] ss:$2 sm:$0xff] %v1716_v62 }
 0x1df   : > { %v1323_v13 = vsel %vm1309_vm5, %v1294_v10, %v6440_v31  ;;  %1748 = vst [vmem:[#allocation1 + $0x20] ss:$2 sm:$0xff] %v1717_v3  ;;  %v6516_v33 = vld.sshfl [vmem:[#allocation1 + $0x8] sm:$0xff pattern:$0x75316420] }
 0x1e0   : > { %1363 = vst [vmem:[#allocation2 + $0x410] sm:$0x1c] %v1323_v13  ;;  %1626 = vrot.lane.b32.xlu0 %v6431_v21, %s5887_s25  ;;  %1636 = vrot.lane.b32.xlu2 %v1598_v51, %s5887_s25  ;;  %v1826_v21 = vld [vmem:[%s5923_s17 + $0x18] sm:$0x77]  ;;  %v1824_v51 = vld [vmem:[%s5923_s17 + $0x8] sm:$0x77] }
 0x1e1   : > { %v6535_v44 = vld.sshfl [vmem:[#allocation1 + $0x30] sm:$0xff pattern:$0x75316420]  ;;  %v6538_v47 = vld.sshfl [vmem:[#allocation1 + $0x38] sm:$0xff pattern:$0x75316420] }
 0x1e2   : > { %v1286_v22 = vpop.permute.xlu0 %1285  ;;  %v6500_v8 = vpop.permute.xlu2 %1452  ;;  %1852 = vst [vmem:[#allocation1 + $0x30] ss:$2 sm:$0xff] %v1827_v42 }
 0x1e3   : > { %v1318_v25 = vsel %vm1309_vm5, %v6410_v15, %v1286_v22  ;;  %v1319_v14 = vsel %vm1309_vm5, %v1286_v22, %v1288_v0  ;;  %v6514_v15 = vld.sshfl [vmem:[#allocation1] sm:$0xff pattern:$0x75316420] }
 0x1e4   : > { %1640 = vrot.lane.b32.xlu1 %v1603_v49, %s5887_s25  ;;  %1358 = vst [vmem:[#allocation2 + $0x5e8] sm:$0x1c] %v1318_v25  ;;  %v1829_v49 = vld [vmem:[%s5923_s17 + $0x30] sm:$0x77] }
 0x1e5   : > { %1359 = vst [vmem:[#allocation2 + $0xb0] sm:$0x1c] %v1319_v14  ;;  %v6518_v36 = vld.sshfl [vmem:[#allocation1 + $0x10] sm:$0xff pattern:$0x75316420] }
 0x1e6   : > { %v1300_v27 = vpop.permute.xlu1 %1299  ;;  %v6520_v38 = vld.sshfl [vmem:[#allocation1 + $0x18] sm:$0xff pattern:$0x75316420]  ;;  %v6525_v40 = vld.sshfl [vmem:[#allocation1 + $0x20] sm:$0xff pattern:$0x75316420] }
 0x1e7   : > { %v1326_v16 = vsel %vm1309_vm5, %v1300_v27, %v6453_v54  ;;  %1759 = vst [vmem:[#allocation1 + $0x10] ss:$2 sm:$0xff] %v1720_v19  ;;  %v6532_v34 = vld.sshfl [vmem:[#allocation1 + $0x28] sm:$0xff pattern:$0x75316420] }
 0x1e8   : > { %1366 = vst [vmem:[#allocation2 + $0x358] sm:$0x1c] %v1326_v16  ;;  %1632 = vrot.lane.b32.xlu0 %v6442_v46, %s5887_s25  ;;  %1642 = vrot.lane.b32.xlu2 %v1604_v60, %s5887_s25 }
 0x1e9   : > { %1758 = vst [vmem:[#allocation1] ss:$2 sm:$0xff] %v1719_v32  ;;  %v1859_v7 = vld.sshfl [vmem:[#allocation1 + $0x30] sm:$0xff pattern:$0x75316420] }
 0x1ea   : > { %v1292_v39 = vpop.permute.xlu0 %1291  ;;  %v6523_v30 = vpop.permute.xlu2 %1458  ;;  %1850 = vst [vmem:[#allocation1 + $0x20] ss:$2 sm:$0xff] %v1826_v21 }
 0x1eb   : > { %v1321_v28 = vsel %vm1309_vm5, %v6423_v29, %v1292_v39  ;;  %v1322_v23 = vsel %vm1309_vm5, %v1292_v39, %v1294_v10  ;;  %v1825_v29 = vld [vmem:[%s5923_s17 + $0x10] sm:$0x77]  ;;  %v1831_v10 = vld [vmem:[%s5923_s17 + $0x40] sm:$0x77] }
 0x1ec   : > { %1646 = vrot.lane.b32.xlu1 %v6463_v1, %s5887_s25  ;;  %1361 = vst [vmem:[#allocation2 + $0x4b0] sm:$0x1c] %v1321_v28  ;;  %v1832_v28 = vld [vmem:[%s5923_s17 + $0x48] sm:$0x77] }
 0x1ed   : > { %1362 = vst [vmem:[#allocation2 + $0x2d8] sm:$0x1c] %v1322_v23 }
 0x1ee   : > { %v1306_v43 = vpop.permute.xlu1 %1305  ;;  %v6545_v48 = vld.sshfl [vmem:[#allocation1 + $0x10] sm:$0xff pattern:$0x75316420]  ;;  %v6547_v37 = vld.sshfl [vmem:[#allocation1 + $0x18] sm:$0xff pattern:$0x75316420] }
 0x1ef   : > { %v1329_v46 = vsel %vm1309_vm5, %v1306_v43, %v1308_v5  ;;  %1848 = vst [vmem:[#allocation1 + $0x10] ss:$2 sm:$0xff] %v1825_v29 }
 0x1f0   : > { %1369 = vst [vmem:[#allocation2 + $0x640] sm:$0x1c] %v1329_v46  ;;  %1638 = vrot.lane.b32.xlu0 %v6451_v53, %s5887_s25  ;;  %1648 = vrot.lane.b32.xlu2 %v6468_v2, %s5887_s25  ;;  %v6555_v45 = vld.sshfl [vmem:[#allocation1] sm:$0xff pattern:$0x75316420] }
 0x1f1   : > { %v6557_v57 = vld.sshfl [vmem:[#allocation1 + $0x8] sm:$0xff pattern:$0x75316420]  ;;  %v1857_v55 = vld.sshfl [vmem:[#allocation1 + $0x20] sm:$0xff pattern:$0x75316420] }
 0x1f2   : > { %v1298_v50 = vpop.permute.xlu0 %1297  ;;  %v6549_v35 = vpop.permute.xlu2 %1464  ;;  %1846 = vst [vmem:[#allocation1] ss:$2 sm:$0xff] %v1824_v51  ;;  %v1885_v32 = vrot.slane %v1857_v55, 2  ;;  %v1833_v51 = vld [vmem:[%s5923_s17 + $0x50] sm:$0x77] }
 0x1f3   : > { %v1324_v41 = vsel %vm1309_vm5, %v6440_v31, %v1298_v50  ;;  %v1325_v53 = vsel %vm1309_vm5, %v1298_v50, %v1300_v27  ;;  %v1858_v31 = vld.sshfl [vmem:[#allocation1 + $0x28] sm:$0xff pattern:$0x75316420] }
 0x1f4   : > { %1364 = vst [vmem:[#allocation2 + $0x408] sm:$0x1c] %v1324_v41  ;;  %v1886_v14 = vrot.slane %v1858_v31, 2  ;;  %v1834_v41 = vld [vmem:[%s5923_s17 + $0x58] sm:$0x7] }
 0x1f5   : > { %1365 = vst [vmem:[#allocation2 + $0x4e0] sm:$0x1c] %v1325_v53 }
 0x1f6   : > { %v1451_v58 = vpop.permute.xlu1 %1450  ;;  %v1855_v0 = vld.sshfl [vmem:[#allocation1 + $0x10] sm:$0xff pattern:$0x75316420]  ;;  %v1856_v1 = vld.sshfl [vmem:[#allocation1 + $0x18] sm:$0xff pattern:$0x75316420] }
 0x1f7   : > { %v1492_v60 = vsel %vm1490_vm6, %v1451_v58, %v6500_v8  ;;  %v1883_v56 = vrot.slane %v1855_v0, 2  ;;  %1862 = vst [vmem:[#allocation1 + $0x10] ss:$2 sm:$0xff] %v1829_v49  ;;  %v1884_v19 = vrot.slane %v1856_v1, 2 }
 0x1f8   : > { %1532 = vst [vmem:[#allocation2 + $0x5c0] sm:$0xe0] %v1492_v60  ;;  %1644 = vrot.lane.b32.xlu0 %v6461_v63, %s5887_s25  ;;  %v1860_v63 = vld.sshfl [vmem:[#allocation1 + $0x38] sm:$0xff pattern:$0x75316420] }
 0x1f9   : > { %1863 = vst [vmem:[#allocation1 + $0x20] ss:$2 sm:$0xff] %v1830_v61  ;;  %1906 = vrot.lane.b32.xlu2 %v1883_v56, %s5880_s18  ;;  %v1853_v62 = vld.sshfl [vmem:[#allocation1] sm:$0xff pattern:$0x75316420]  ;;  %v1887_v61 = vrot.slane %v1859_v7, 2 }
 0x1fa   : > { %v1304_v52 = vpop.permute.xlu0 %1303  ;;  %v6565_v2 = vpop.permute.xlu2 %1470  ;;  %v1881_v3 = vrot.slane %v1853_v62, 2  ;;  %v1854_v22 = vld.sshfl [vmem:[#allocation1 + $0x8] sm:$0xff pattern:$0x75316420]  ;;  %1864 = vst [vmem:[#allocation1 + $0x30] ss:$2 sm:$0xff] %v1831_v10 }
 0x1fb   : > { %v1327_v5 = vsel %vm1309_vm5, %v6453_v54, %v1304_v52  ;;  %v1328_v59 = vsel %vm1309_vm5, %v1304_v52, %v1306_v43  ;;  %v1882_v54 = vrot.slane %v1854_v22, 2  ;;  %1861 = vst [vmem:[#allocation1] ss:$2 sm:$0xff] %v1828_v9  ;;  %v1888_v0 = vrot.slane %v1860_v63, 2  ;;  %v2025_v10 = vld [vmem:[%s5923_s17 + $0x10] sm:$0x77] }
 0x1fc   : > { %1367 = vst [vmem:[#allocation2 + $0x68] sm:$0x1c] %v1327_v5 }
 0x1fd   : > { %1368 = vst [vmem:[#allocation2 + $0x188] sm:$0x1c] %v1328_v59  ;;  %1904 = vrot.lane.b32.xlu1 %v1882_v54, %s5880_s18 }
 0x1fe   : > { %v1457_v13 = vpop.permute.xlu1 %1456  ;;  %v1868_v42 = vld.sshfl [vmem:[#allocation1 + $0x18] sm:$0xff pattern:$0x75316420]  ;;  %v1867_v43 = vld.sshfl [vmem:[#allocation1 + $0x10] sm:$0xff pattern:$0x75316420] }
 0x1ff   : > { %v1495_v25 = vsel %vm1490_vm6, %v1457_v13, %v6523_v30  ;;  %1874 = vst [vmem:[#allocation1 + $0x10] ss:$2 sm:$0xff] %v1833_v51  ;;  %v1892_v56 = vrot.slane %v1868_v42, 2  ;;  %v2027_v51 = vld [vmem:[%s5923_s17 + $0x20] sm:$0x77] }
 0x200   : > { %1535 = vst [vmem:[#allocation2 + $0x610] sm:$0xe0] %v1495_v25  ;;  %1902 = vrot.lane.b32.xlu0 %v1881_v3, %s5880_s18  ;;  %v1869_v50 = vld.sshfl [vmem:[#allocation1 + $0x20] sm:$0xff pattern:$0x75316420] }
 0x201   : > { %1912 = vrot.lane.b32.xlu2 %v1886_v14, %s5880_s18  ;;  %v1870_v60 = vld.sshfl [vmem:[#allocation1 + $0x28] sm:$0xff pattern:$0x75316420]  ;;  %v1871_v62 = vld.sshfl [vmem:[#allocation1 + $0x30] sm:$0xff pattern:$0x75316420] }
 0x202   : > { %v1449_v26 = vpop.permute.xlu0 %1448  ;;  %v6577_v27 = vpop.permute.xlu2 %1476  ;;  %v1865_v23 = vld.sshfl [vmem:[#allocation1] sm:$0xff pattern:$0x75316420]  ;;  %v1866_v29 = vld.sshfl [vmem:[#allocation1 + $0x8] sm:$0xff pattern:$0x75316420] }
 0x203   : > { %v1491_v16 = vsel %vm1490_vm6, %v1449_v26, %v1451_v58  ;;  %v1889_v46 = vrot.slane %v1865_v23, 2  ;;  %1873 = vst [vmem:[#allocation1] ss:$2 sm:$0xff] %v1832_v28  ;;  %v1890_v63 = vrot.slane %v1866_v29, 2  ;;  %v2024_v25 = vld [vmem:[%s5923_s17 + $0x8] sm:$0x77] }
 0x204   : > { %1531 = vst [vmem:[#allocation2 + $0x90] sm:$0xe0] %v1491_v16  ;;  %v1895_v26 = vrot.slane %v1871_v62, 2  ;;  %v2026_v16 = vld [vmem:[%s5923_s17 + $0x18] sm:$0x77]  ;;  %v1893_v28 = vrot.slane %v1869_v50, 2 }
 0x205   : > { %1910 = vrot.lane.b32.xlu1 %v1885_v32, %s5880_s18  ;;  %1875 = vst [vmem:[#allocation1 + $0x20] ss:$2 sm:$0xff] %v1834_v41  ;;  %v1894_v23 = vrot.slane %v1870_v60, 2 }
 0x206   : > { %v1463_v21 = vpop.permute.xlu1 %1462  ;;  %v6598_v5 = vld.sshfl [vmem:[#allocation1 + $0x10] sm:$0xff pattern:$0x75316420]  ;;  %v6603_v9 = vld.sshfl [vmem:[#allocation1 + $0x18] sm:$0xff pattern:$0x75316420] }
 0x207   : > { %v1498_v39 = vsel %vm1490_vm6, %v1463_v21, %v6549_v35  ;;  %2048 = vst [vmem:[#allocation1 + $0x10] ss:$2 sm:$0xff] %v2025_v10  ;;  %v1899_v62 = vrot.slane %v6598_v5, 2 }
 0x208   : > { %1538 = vst [vmem:[#allocation2 + $0x3f0] sm:$0xe0] %v1498_v39  ;;  %1908 = vrot.lane.b32.xlu0 %v1884_v19, %s5880_s18 }
 0x209   : > { %1918 = vrot.lane.b32.xlu2 %v1889_v46, %s5880_s18  ;;  %v1872_v46 = vld.sshfl [vmem:[#allocation1 + $0x38] sm:$0xff pattern:$0x75316420] }
 0x20a   : > { %v1455_v53 = vpop.permute.xlu0 %1454  ;;  %v6588_v58 = vpop.permute.xlu2 %1482  ;;  %v1877_v22 = vld.sshfl [vmem:[#allocation1 + $0x8] sm:$0xff pattern:$0x75316420]  ;;  %2052 = vst [vmem:[#allocation1 + $0x30] ss:$2 sm:$0xff] %v2027_v51 }
 0x20b   : > { %v1493_v49 = vsel %vm1490_vm6, %v6500_v8, %v1455_v53  ;;  %v1494_v31 = vsel %vm1490_vm6, %v1455_v53, %v1457_v13  ;;  %v1891_v13 = vrot.slane %v1867_v43, 2  ;;  %v1898_v29 = vrot.slane %v1877_v22, 2 }
 0x20c   : > { %1533 = vst [vmem:[#allocation2 + $0x5d0] sm:$0xe0] %v1493_v49  ;;  %v1880_v14 = vld.sshfl [vmem:[#allocation1 + $0x20] sm:$0xff pattern:$0x75316420] }
 0x20d   : > { %1534 = vst [vmem:[#allocation2 + $0x4f0] sm:$0xe0] %v1494_v31  ;;  %1916 = vrot.lane.b32.xlu1 %v1888_v0, %s5880_s18  ;;  %v2028_v49 = vld [vmem:[%s5923_s17 + $0x28] sm:$0x77] }
 0x20e   : > { %v1469_v1 = vpop.permute.xlu1 %1468  ;;  %2050 = vst [vmem:[#allocation1 + $0x20] ss:$2 sm:$0xff] %v2026_v16 }
 0x20f   : > { %v1501_v52 = vsel %vm1490_vm6, %v1469_v1, %v6565_v2 }
 0x210   : > { %1541 = vst [vmem:[#allocation2 + $0x368] sm:$0xe0] %v1501_v52  ;;  %1914 = vrot.lane.b32.xlu0 %v1887_v61, %s5880_s18  ;;  %v1896_v61 = vrot.slane %v1872_v46, 2  ;;  %v2032_v46 = vld [vmem:[%s5923_s17 + $0x48] sm:$0x77] }
 0x211   : > { %1924 = vrot.lane.b32.xlu2 %v1892_v56, %s5880_s18  ;;  %v1901_v56 = vrot.slane %v1880_v14, 2  ;;  %v2059_v14 = vld.sshfl [vmem:[#allocation1 + $0x30] sm:$0xff pattern:$0x75316420] }
 0x212   : > { %v1461_v8 = vpop.permute.xlu0 %1460  ;;  %v1489_v55 = vpop.permute.xlu2 %1488 }
 0x213   : > { %v1496_v59 = vsel %vm1490_vm6, %v6523_v30, %v1461_v8  ;;  %v1497_v7 = vsel %vm1490_vm6, %v1461_v8, %v1463_v21  ;;  %v1876_v30 = vld.sshfl [vmem:[#allocation1] sm:$0xff pattern:$0x75316420]  ;;  %v2055_v8 = vld.sshfl [vmem:[#allocation1 + $0x10] sm:$0xff pattern:$0x75316420] }
 0x214   : > { %1536 = vst [vmem:[#allocation2 + $0x220] sm:$0xe0] %v1496_v59  ;;  %v1897_v0 = vrot.slane %v1876_v30, 2  ;;  %v2029_v59 = vld [vmem:[%s5923_s17 + $0x30] sm:$0x77] }
 0x215   : > { %1537 = vst [vmem:[#allocation2 + $0x58] sm:$0xe0] %v1497_v7  ;;  %1922 = vrot.lane.b32.xlu1 %v1891_v13, %s5880_s18  ;;  %v1900_v13 = vrot.slane %v6603_v9, 2  ;;  %v2031_v30 = vld [vmem:[%s5923_s17 + $0x40] sm:$0x77] }
 0x216   : > { %v1475_v3 = vpop.permute.xlu1 %1474  ;;  %2046 = vst [vmem:[#allocation1] ss:$2 sm:$0xff] %v2024_v25  ;;  %v2058_v25 = vld.sshfl [vmem:[#allocation1 + $0x28] sm:$0xff pattern:$0x75316420] }
 0x217   : > { %v1504_v54 = vsel %vm1490_vm6, %v1475_v3, %v6577_v27  ;;  %v2057_v5 = vld.sshfl [vmem:[#allocation1 + $0x20] sm:$0xff pattern:$0x75316420]  ;;  %v2060_v9 = vld.sshfl [vmem:[#allocation1 + $0x38] sm:$0xff pattern:$0x75316420] }
 0x218   : > { %1544 = vst [vmem:[#allocation2 + $0x410] sm:$0xe0] %v1504_v54  ;;  %1920 = vrot.lane.b32.xlu0 %v1890_v63, %s5880_s18  ;;  %v2030_v54 = vld [vmem:[%s5923_s17 + $0x38] sm:$0x77] }
 0x219   : > { %1930 = vrot.lane.b32.xlu2 %v1895_v26, %s5880_s18  ;;  %2063 = vst [vmem:[#allocation1 + $0x20] ss:$2 sm:$0xff] %v2030_v54 }
 0x21a   : > { %v1467_v19 = vpop.permute.xlu0 %1466  ;;  %v6613_v32 = vpop.permute.xlu2 %1612  ;;  %2064 = vst [vmem:[#allocation1 + $0x30] ss:$2 sm:$0xff] %v2031_v30  ;;  %v2205_v30 = vld [vmem:[%s5923_s17 + $0x10] sm:$0x77] }
 0x21b   : > { %v1499_v21 = vsel %vm1490_vm6, %v6549_v35, %v1467_v19  ;;  %v1500_v39 = vsel %vm1490_vm6, %v1467_v19, %v1469_v1 }
 0x21c   : > { %1539 = vst [vmem:[#allocation2 + $0x5e8] sm:$0xe0] %v1499_v21 }
 0x21d   : > { %1540 = vst [vmem:[#allocation2 + $0xb0] sm:$0xe0] %v1500_v39  ;;  %1928 = vrot.lane.b32.xlu1 %v1894_v23, %s5880_s18  ;;  %v2053_v35 = vld.sshfl [vmem:[#allocation1] sm:$0xff pattern:$0x75316420] }
 0x21e   : > { %v1481_v42 = vpop.permute.xlu1 %1480  ;;  %v2054_v53 = vld.sshfl [vmem:[#allocation1 + $0x8] sm:$0xff pattern:$0x75316420]  ;;  %v2081_v39 = vrot.slane %v2053_v35, 7 }
 0x21f   : > { %v1507_v43 = vsel %vm1490_vm6, %v1481_v42, %v6588_v58  ;;  %2061 = vst [vmem:[#allocation1] ss:$2 sm:$0xff] %v2028_v49  ;;  %v2085_v49 = vrot.slane %v2057_v5, 7 }
 0x220   : > { %1547 = vst [vmem:[#allocation2 + $0x358] sm:$0xe0] %v1507_v43  ;;  %1926 = vrot.lane.b32.xlu0 %v1893_v28, %s5880_s18  ;;  %v2082_v28 = vrot.slane %v2054_v53, 7  ;;  %v2086_v43 = vrot.slane %v2058_v25, 7 }
 0x221   : > { %1936 = vrot.lane.b32.xlu2 %v1898_v29, %s5880_s18 }
 0x222   : > { %v1473_v50 = vpop.permute.xlu0 %1472  ;;  %v6624_v41 = vpop.permute.xlu2 %1618 }
 0x223   : > { %v1502_v60 = vsel %vm1490_vm6, %v6565_v2, %v1473_v50  ;;  %v1503_v31 = vsel %vm1490_vm6, %v1473_v50, %v1475_v3  ;;  %v2056_v2 = vld.sshfl [vmem:[#allocation1 + $0x18] sm:$0xff pattern:$0x75316420] }
 0x224   : > { %1542 = vst [vmem:[#allocation2 + $0x4b0] sm:$0xe0] %v1502_v60  ;;  %v2084_v53 = vrot.slane %v2056_v2, 7  ;;  %v2069_v2 = vld.sshfl [vmem:[#allocation1 + $0x20] sm:$0xff pattern:$0x75316420] }
 0x225   : > { %1543 = vst [vmem:[#allocation2 + $0x2d8] sm:$0xe0] %v1503_v31  ;;  %1934 = vrot.lane.b32.xlu1 %v1897_v0, %s5880_s18 }
 0x226   : > { %v1487_v1 = vpop.permute.xlu1 %1486  ;;  %2062 = vst [vmem:[#allocation1 + $0x10] ss:$2 sm:$0xff] %v2029_v59  ;;  %v2065_v51 = vld.sshfl [vmem:[#allocation1] sm:$0xff pattern:$0x75316420] }
 0x227   : > { %v1510_v52 = vsel %vm1490_vm6, %v1487_v1, %v1489_v55  ;;  %v2066_v35 = vld.sshfl [vmem:[#allocation1 + $0x8] sm:$0xff pattern:$0x75316420] }
 0x228   : > { %1550 = vst [vmem:[#allocation2 + $0x640] sm:$0xe0] %v1510_v52  ;;  %1932 = vrot.lane.b32.xlu0 %v1896_v61, %s5880_s18  ;;  %v2033_v52 = vld [vmem:[%s5923_s17 + $0x50] sm:$0x77] }
 0x229   : > { %1942 = vrot.lane.b32.xlu2 %v1901_v56, %s5880_s18  ;;  %2073 = vst [vmem:[#allocation1] ss:$2 sm:$0xff] %v2032_v46  ;;  %v2034_v56 = vld [vmem:[%s5923_s17 + $0x58] sm:$0x7] }
 0x22a   : > { %v1479_v7 = vpop.permute.xlu0 %1478  ;;  %v6635_v10 = vpop.permute.xlu2 %1624 }
 0x22b   : > { %v1505_v63 = vsel %vm1490_vm6, %v6577_v27, %v1479_v7  ;;  %v1506_v55 = vsel %vm1490_vm6, %v1479_v7, %v1481_v42  ;;  %v2083_v27 = vrot.slane %v2055_v8, 7  ;;  %v2070_v7 = vld.sshfl [vmem:[#allocation1 + $0x28] sm:$0xff pattern:$0x75316420] }
 0x22c   : > { %1545 = vst [vmem:[#allocation2 + $0x408] sm:$0xe0] %v1505_v63 }
 0x22d   : > { %1546 = vst [vmem:[#allocation2 + $0x4e0] sm:$0xe0] %v1506_v55  ;;  %1940 = vrot.lane.b32.xlu1 %v1900_v13, %s5880_s18  ;;  %v2068_v61 = vld.sshfl [vmem:[#allocation1 + $0x18] sm:$0xff pattern:$0x75316420]  ;;  %v2088_v13 = vrot.slane %v2060_v9, 7 }
 0x22e   : > { %v1611_v3 = vpop.permute.xlu1 %1610  ;;  %v2067_v0 = vld.sshfl [vmem:[#allocation1 + $0x10] sm:$0xff pattern:$0x75316420]  ;;  %2075 = vst [vmem:[#allocation1 + $0x20] ss:$2 sm:$0xff] %v2034_v56  ;;  %v2092_v25 = vrot.slane %v2068_v61, 7 }
 0x22f   : > { %v1652_v22 = vsel %vm1650_vm7, %v1611_v3, %v6613_v32  ;;  %2074 = vst [vmem:[#allocation1 + $0x10] ss:$2 sm:$0xff] %v2033_v52  ;;  %v2204_v9 = vld [vmem:[%s5923_s17 + $0x8] sm:$0x77] }
 0x230   : > { %1692 = vst [vmem:[#allocation2 + $0x5d8] sm:$0x7] %v1652_v22  ;;  %1938 = vrot.lane.b32.xlu0 %v1899_v62, %s5880_s18  ;;  %v2087_v62 = vrot.slane %v2059_v14, 7 }
 0x231   : > { %2106 = vrot.lane.b32.xlu2 %v2083_v27, %s5881_s19 }
 0x232   : > { %v1485_v26 = vpop.permute.xlu0 %1484  ;;  %v6649_v16 = vpop.permute.xlu2 %1630 }
 0x233   : > { %v1508_v19 = vsel %vm1490_vm6, %v6588_v58, %v1485_v26  ;;  %v1509_v21 = vsel %vm1490_vm6, %v1485_v26, %v1487_v1  ;;  %v2089_v1 = vrot.slane %v2065_v51, 7  ;;  %v2071_v26 = vld.sshfl [vmem:[#allocation1 + $0x30] sm:$0xff pattern:$0x75316420]  ;;  %v2206_v51 = vld [vmem:[%s5923_s17 + $0x18] sm:$0x77] }
 0x234   : > { %1548 = vst [vmem:[#allocation2 + $0x68] sm:$0xe0] %v1508_v19  ;;  %v2090_v19 = vrot.slane %v2066_v35, 7 }
 0x235   : > { %1549 = vst [vmem:[#allocation2 + $0x188] sm:$0xe0] %v1509_v21  ;;  %2104 = vrot.lane.b32.xlu1 %v2082_v28, %s5881_s19  ;;  %v2091_v28 = vrot.slane %v2067_v0, 7  ;;  %v2072_v0 = vld.sshfl [vmem:[#allocation1 + $0x38] sm:$0xff pattern:$0x75316420] }
 0x236   : > { %v1617_v23 = vpop.permute.xlu1 %1616  ;;  %v6682_v54 = vld.sshfl [vmem:[#allocation1 + $0x18] sm:$0xff pattern:$0x75316420] }
 0x237   : > { %v1655_v42 = vsel %vm1650_vm7, %v1617_v23, %v6624_v41 }
 0x238   : > { %1695 = vst [vmem:[#allocation2 + $0x6b0] sm:$0x7] %v1655_v42  ;;  %2102 = vrot.lane.b32.xlu0 %v2081_v39, %s5881_s19  ;;  %v2077_v39 = vld.sshfl [vmem:[#allocation1 + $0x8] sm:$0xff pattern:$0x75316420] }
 0x239   : > { %2112 = vrot.lane.b32.xlu2 %v2086_v43, %s5881_s19  ;;  %v2076_v42 = vld.sshfl [vmem:[#allocation1] sm:$0xff pattern:$0x75316420] }
 0x23a   : > { %v1609_v58 = vpop.permute.xlu0 %1608  ;;  %v6660_v29 = vpop.permute.xlu2 %1636  ;;  %2227 = vst [vmem:[#allocation1 + $0x1] ss:$2 sm:$0xff] %v2204_v9  ;;  %v2100_v9 = vrot.slane %v6682_v54, 7  ;;  %v2211_v54 = vld [vmem:[%s5923_s17 + $0x40] sm:$0x77] }
 0x23b   : > { %v1651_v50 = vsel %vm1650_vm7, %v1609_v58, %v1611_v3  ;;  %v2080_v58 = vld.sshfl [vmem:[#allocation1 + $0x20] sm:$0xff pattern:$0x75316420] }
 0x23c   : > { %1691 = vst [vmem:[#allocation2 + $0x528] sm:$0x7] %v1651_v50 }
 0x23d   : > { %2110 = vrot.lane.b32.xlu1 %v2085_v49, %s5881_s19  ;;  %2231 = vst [vmem:[#allocation1 + $0x21] ss:$2 sm:$0xff] %v2206_v51  ;;  %v2094_v49 = vrot.slane %v2070_v7, 7  ;;  %v2097_v7 = vrot.slane %v2076_v42, 7  ;;  %v2210_v42 = vld [vmem:[%s5923_s17 + $0x38] sm:$0x77] }
 0x23e   : > { %v1623_v60 = vpop.permute.xlu1 %1622 }
 0x23f   : > { %v1658_v31 = vsel %vm1650_vm7, %v1623_v60, %v6635_v10 }
 0x240   : > { %1698 = vst [vmem:[#allocation2 + $0x98] sm:$0x7] %v1658_v31  ;;  %2108 = vrot.lane.b32.xlu0 %v2084_v53, %s5881_s19  ;;  %v2093_v53 = vrot.slane %v2069_v2, 7  ;;  %v2096_v2 = vrot.slane %v2072_v0, 7  ;;  %v2213_v0 = vld [vmem:[%s5923_s17 + $0x50] sm:$0x77] }
 0x241   : > { %2118 = vrot.lane.b32.xlu2 %v2089_v1, %s5881_s19 }
 0x242   : > { %v1615_v8 = vpop.permute.xlu0 %1614  ;;  %v6670_v59 = vpop.permute.xlu2 %1642 }
 0x243   : > { %v1653_v63 = vsel %vm1650_vm7, %v6613_v32, %v1615_v8  ;;  %v1654_v55 = vsel %vm1650_vm7, %v1615_v8, %v1617_v23  ;;  %v6680_v32 = vld.sshfl [vmem:[#allocation1 + $0x10] sm:$0xff pattern:$0x75316420]  ;;  %v2207_v8 = vld [vmem:[%s5923_s17 + $0x20] sm:$0x77] }
 0x244   : > { %1693 = vst [vmem:[#allocation2 + $0x650] sm:$0x7] %v1653_v63 }
 0x245   : > { %1694 = vst [vmem:[#allocation2 + $0x340] sm:$0x7] %v1654_v55  ;;  %2116 = vrot.lane.b32.xlu1 %v2088_v13, %s5881_s19  ;;  %v2208_v55 = vld [vmem:[%s5923_s17 + $0x28] sm:$0x77] }
 0x246   : > { %v1629_v3 = vpop.permute.xlu1 %1628  ;;  %2229 = vst [vmem:[#allocation1 + $0x11] ss:$2 sm:$0xff] %v2205_v30 }
 0x247   : > { %v1661_v22 = vsel %vm1650_vm7, %v1629_v3, %v6649_v16  ;;  %2233 = vst [vmem:[#allocation1 + $0x31] ss:$2 sm:$0xff] %v2207_v8 }
 0x248   : > { %1701 = vst [vmem:[#allocation2 + $0xc8] sm:$0x7] %v1661_v22  ;;  %2114 = vrot.lane.b32.xlu0 %v2087_v62, %s5881_s19  ;;  %v2101_v22 = vrot.slane %v2080_v58, 7 }
 0x249   : > { %2124 = vrot.lane.b32.xlu2 %v2092_v25, %s5881_s19 }
 0x24a   : > { %v1621_v27 = vpop.permute.xlu0 %1620  ;;  %v1649_v21 = vpop.permute.xlu2 %1648 }
 0x24b   : > { %v1656_v5 = vsel %vm1650_vm7, %v6624_v41, %v1621_v27  ;;  %v1657_v14 = vsel %vm1650_vm7, %v1621_v27, %v1623_v60  ;;  %v2095_v41 = vrot.slane %v2071_v26, 7 }
 0x24c   : > { %1696 = vst [vmem:[#allocation2 + $0x2b8] sm:$0x7] %v1656_v5  ;;  %v2209_v5 = vld [vmem:[%s5923_s17 + $0x30] sm:$0x77] }
 0x24d   : > { %1697 = vst [vmem:[#allocation2 + $0x5b0] sm:$0x7] %v1657_v14  ;;  %2122 = vrot.lane.b32.xlu1 %v2091_v28, %s5881_s19  ;;  %v2099_v14 = vrot.slane %v6680_v32, 7  ;;  %v2236_v26 = vld.sshfl [vmem:[#allocation1 + $0x10] sm:$0xff pattern:$0x75316420] }
 0x24e   : > { %v1635_v23 = vpop.permute.xlu1 %1634  ;;  %v2239_v28 = vld.sshfl [vmem:[#allocation1 + $0x28] sm:$0xff pattern:$0x75316420] }
 0x24f   : > { %v1664_v43 = vsel %vm1650_vm7, %v1635_v23, %v6660_v29 }
 0x250   : > { %1704 = vst [vmem:[#allocation2 + $0x580] sm:$0x7] %v1664_v43  ;;  %2120 = vrot.lane.b32.xlu0 %v2090_v19, %s5881_s19  ;;  %v2237_v19 = vld.sshfl [vmem:[#allocation1 + $0x18] sm:$0xff pattern:$0x75316420] }
 0x251   : > { %2130 = vrot.lane.b32.xlu2 %v2095_v41, %s5881_s19  ;;  %2243 = vst [vmem:[#allocation1 + $0x11] ss:$2 sm:$0xff] %v2209_v5  ;;  %v2240_v43 = vld.sshfl [vmem:[#allocation1 + $0x30] sm:$0xff pattern:$0x75316420] }
 0x252   : > { %v1627_v46 = vpop.permute.xlu0 %1626 }
 0x253   : > { %v1659_v35 = vsel %vm1650_vm7, %v6635_v10, %v1627_v46  ;;  %v1660_v50 = vsel %vm1650_vm7, %v1627_v46, %v1629_v3  ;;  %v6699_v31 = vpop.permute.xlu2 %1906  ;;  %v2098_v10 = vrot.slane %v2077_v39, 7  ;;  %v2234_v3 = vld.sshfl [vmem:[#allocation1] sm:$0xff pattern:$0x75316420] }
 0x254   : > { %1699 = vst [vmem:[#allocation2 + $0x120] sm:$0x7] %v1659_v35  ;;  %v2241_v46 = vld.sshfl [vmem:[#allocation1 + $0x38] sm:$0xff pattern:$0x75316420] }
 0x255   : > { %1700 = vst [vmem:[#allocation2 + $0x1f8] sm:$0x7] %v1660_v50  ;;  %2128 = vrot.lane.b32.xlu1 %v2094_v49, %s5881_s19  ;;  %v2212_v50 = vld [vmem:[%s5923_s17 + $0x48] sm:$0x77] }
 0x256   : > { %v1641_v60 = vpop.permute.xlu1 %1640  ;;  %2245 = vst [vmem:[#allocation1 + $0x31] ss:$2 sm:$0xff] %v2211_v54  ;;  %v2366_v54 = vld [vmem:[%s5923_s17 + $0x18] sm:$0x77] }
 0x257   : > { %v1667_v61 = vsel %vm1650_vm7, %v1641_v60, %v6670_v59 }
 0x258   : > { %1707 = vst [vmem:[#allocation2 + $0x208] sm:$0x7] %v1667_v61  ;;  %2126 = vrot.lane.b32.xlu0 %v2093_v53, %s5881_s19  ;;  %v2249_v61 = vld.sshfl [vmem:[#allocation1 + $0x18] sm:$0xff pattern:$0x75316420] }
 0x259   : > { %2136 = vrot.lane.b32.xlu2 %v2098_v10, %s5881_s19  ;;  %v2248_v10 = vld.sshfl [vmem:[#allocation1 + $0x10] sm:$0xff pattern:$0x75316420] }
 0x25a   : > { %v1633_v1 = vpop.permute.xlu0 %1632  ;;  %2255 = vst [vmem:[#allocation1 + $0x11] ss:$2 sm:$0xff] %v2213_v0 }
 0x25b   : > { %v1662_v52 = vsel %vm1650_vm7, %v6649_v16, %v1633_v1  ;;  %v1663_v56 = vsel %vm1650_vm7, %v1633_v1, %v1635_v23  ;;  %v6711_v62 = vpop.permute.xlu2 %1912  ;;  %v2235_v16 = vld.sshfl [vmem:[#allocation1 + $0x8] sm:$0xff pattern:$0x75316420]  ;;  %v2238_v23 = vld.sshfl [vmem:[#allocation1 + $0x20] sm:$0xff pattern:$0x75316420] }
 0x25c   : > { %1702 = vst [vmem:[#allocation2 + $0x1d8] sm:$0x7] %v1662_v52 }
 0x25d   : > { %1703 = vst [vmem:[#allocation2 + $0x360] sm:$0x7] %v1663_v56  ;;  %2134 = vrot.lane.b32.xlu1 %v2097_v7, %s5881_s19 }
 0x25e   : > { %v1647_v63 = vpop.permute.xlu1 %1646  ;;  %2242 = vst [vmem:[#allocation1 + $0x1] ss:$2 sm:$0xff] %v2208_v55 }
 0x25f   : > { %v1670_v13 = vsel %vm1650_vm7, %v1647_v63, %v1649_v21  ;;  %2244 = vst [vmem:[#allocation1 + $0x21] ss:$2 sm:$0xff] %v2210_v42 }
 0x260   : > { %1710 = vst [vmem:[#allocation2 + $0x330] sm:$0x7] %v1670_v13  ;;  %2132 = vrot.lane.b32.xlu0 %v2096_v2, %s5881_s19 }
 0x261   : > { %2142 = vrot.lane.b32.xlu2 %v2101_v22, %s5881_s19  ;;  %v6768_v5 = vld.sshfl [vmem:[#allocation1 + $0x18] sm:$0xff pattern:$0x75316420] }
 0x262   : > { %v1639_v25 = vpop.permute.xlu0 %1638 }
 0x263   : > { %v1665_v27 = vsel %vm1650_vm7, %v6660_v29, %v1639_v25  ;;  %v1666_v30 = vsel %vm1650_vm7, %v1639_v25, %v1641_v60  ;;  %v6723_v21 = vpop.permute.xlu2 %1918 }
 0x264   : > { %1705 = vst [vmem:[#allocation2 + $0x5b8] sm:$0x7] %v1665_v27  ;;  %v6764_v27 = vld.sshfl [vmem:[#allocation1 + $0x10] sm:$0xff pattern:$0x75316420] }
 0x265   : > { %1706 = vst [vmem:[#allocation2 + $0x628] sm:$0x7] %v1666_v30  ;;  %2140 = vrot.lane.b32.xlu1 %v2100_v9, %s5881_s19  ;;  %v2246_v58 = vld.sshfl [vmem:[#allocation1] sm:$0xff pattern:$0x75316420] }
 0x266   : > { %v2247_v35 = vld.sshfl [vmem:[#allocation1 + $0x8] sm:$0xff pattern:$0x75316420]  ;;  %v2250_v55 = vld.sshfl [vmem:[#allocation1 + $0x20] sm:$0xff pattern:$0x75316420] }
 0x267   : > { %2254 = vst [vmem:[#allocation1 + $0x1] ss:$2 sm:$0xff] %v2212_v50 }
 0x268   : > { %2138 = vrot.lane.b32.xlu0 %v2099_v14, %s5881_s19  ;;  %v2365_v14 = vld [vmem:[%s5923_s17 + $0x10] sm:$0x77] }
 0x269   : > { %2266 = vrot.lane.b32.xlu2 %v2236_v26, %s5882_s20  ;;  %v2364_v26 = vld [vmem:[%s5923_s17 + $0x8] sm:$0x77]  ;;  %2388 = vst [vmem:[#allocation1 + $0x10] ss:$2 sm:$0xff] %v2365_v14 }
 0x26a   : > { %v1645_v29 = vpop.permute.xlu0 %1644 }
 0x26b   : > { %v1668_v39 = vsel %vm1650_vm7, %v6670_v59, %v1645_v29  ;;  %v1669_v32 = vsel %vm1650_vm7, %v1645_v29, %v1647_v63  ;;  %v6733_v41 = vpop.permute.xlu2 %1924  ;;  %v2214_v63 = vld [vmem:[%s5923_s17 + $0x58] sm:$0x7] }
 0x26c   : > { %1708 = vst [vmem:[#allocation2 + $0x150] sm:$0x7] %v1668_v39 }
 0x26d   : > { %1709 = vst [vmem:[#allocation2 + $0x338] sm:$0x7] %v1669_v32  ;;  %2264 = vrot.lane.b32.xlu1 %v2235_v16, %s5882_s20 }
 0x26e   : > { %v2258_v9 = vld.sshfl [vmem:[#allocation1 + $0x8] sm:$0xff pattern:$0x75316420]  ;;  %v2257_v29 = vld.sshfl [vmem:[#allocation1] sm:$0xff pattern:$0x75316420] }
 0x26f   : > { %v1905_v51 = vpop.permute.xlu1 %1904  ;;  %2386 = vst [vmem:[#allocation1] ss:$2 sm:$0xff] %v2364_v26 }
 0x270   : > { %2262 = vrot.lane.b32.xlu0 %v2234_v3, %s5882_s20  ;;  %v1945_v49 = vsel %vm384_vm0, %v1905_v51, %v6699_v31 }
 0x271   : > { %2272 = vrot.lane.b32.xlu2 %v2239_v28, %s5882_s20  ;;  %1985 = vst [vmem:[#allocation2 + $0x5d8] sm:$0xc0] %v1945_v49 }
 0x272   : > { %v1903_v59 = vpop.permute.xlu0 %1902  ;;  %2005 = vst [vmem:[#allocation2 + $0x420] sm:$0x1] %v1945_v49 }
 0x273   : > { %v1944_v53 = vsel %vm384_vm0, %v1903_v59, %v1905_v51  ;;  %v6742_v60 = vpop.permute.xlu2 %1930 }
 0x274   : > { %1984 = vst [vmem:[#allocation2 + $0x528] sm:$0xc0] %v1944_v53 }
 0x275   : > { %2004 = vst [vmem:[#allocation2 + $0x168] sm:$0x1] %v1944_v53  ;;  %2270 = vrot.lane.b32.xlu1 %v2238_v23, %s5882_s20  ;;  %v2367_v53 = vld [vmem:[%s5923_s17 + $0x20] sm:$0x77] }
 0x276   : > { %v2393_v49 = vld.sshfl [vmem:[#allocation1] sm:$0xff pattern:$0x75316420] }
 0x277   : > { %v1911_v56 = vpop.permute.xlu1 %1910 }
 0x278   : > { %2268 = vrot.lane.b32.xlu0 %v2237_v19, %s5882_s20  ;;  %v1948_v2 = vsel %vm384_vm0, %v1911_v56, %v6711_v62 }
 0x279   : > { %2278 = vrot.lane.b32.xlu2 %v2246_v58, %s5882_s20  ;;  %1988 = vst [vmem:[#allocation2 + $0x6b0] sm:$0xc0] %v1948_v2 }
 0x27a   : > { %v1909_v1 = vpop.permute.xlu0 %1908  ;;  %2008 = vst [vmem:[#allocation2 + $0x3b8] sm:$0x1] %v1948_v2 }
 0x27b   : > { %v1946_v52 = vsel %vm384_vm0, %v6699_v31, %v1909_v1  ;;  %v1947_v8 = vsel %vm384_vm0, %v1909_v1, %v1911_v56  ;;  %v6753_v7 = vpop.permute.xlu2 %1936  ;;  %v2251_v31 = vld.sshfl [vmem:[#allocation1 + $0x28] sm:$0xff pattern:$0x75316420] }
 0x27c   : > { %1986 = vst [vmem:[#allocation2 + $0x650] sm:$0xc0] %v1946_v52 }
 0x27d   : > { %2006 = vst [vmem:[#allocation2 + $0x268] sm:$0x1] %v1946_v52  ;;  %2276 = vrot.lane.b32.xlu1 %v2241_v46, %s5882_s20 }
 0x27e   : > { %1987 = vst [vmem:[#allocation2 + $0x340] sm:$0xc0] %v1947_v8 }
 0x27f   : > { %2007 = vst [vmem:[#allocation2 + $0xb8] sm:$0x1] %v1947_v8  ;;  %v1917_v16 = vpop.permute.xlu1 %1916  ;;  %v2395_v8 = vld.sshfl [vmem:[#allocation1 + $0x10] sm:$0xff pattern:$0x75316420] }
 0x280   : > { %2274 = vrot.lane.b32.xlu0 %v2240_v43, %s5882_s20  ;;  %2256 = vst [vmem:[#allocation1 + $0x21] ss:$2 sm:$0xff] %v2214_v63  ;;  %v1951_v25 = vsel %vm384_vm0, %v1917_v16, %v6723_v21  ;;  %v2369_v63 = vld [vmem:[%s5923_s17 + $0x30] sm:$0x77] }
 0x281   : > { %2284 = vrot.lane.b32.xlu2 %v2249_v61, %s5882_s20  ;;  %1991 = vst [vmem:[#allocation2 + $0x98] sm:$0xc0] %v1951_v25 }
 0x282   : > { %v1915_v13 = vpop.permute.xlu0 %1914  ;;  %2011 = vst [vmem:[#allocation2 + $0x2d0] sm:$0x1] %v1951_v25  ;;  %v2421_v25 = vrot.slane %v2393_v49, 1 }
 0x283   : > { %v1949_v3 = vsel %vm384_vm0, %v6711_v62, %v1915_v13  ;;  %v1950_v22 = vsel %vm384_vm0, %v1915_v13, %v1917_v16  ;;  %v6766_v30 = vpop.permute.xlu2 %1942  ;;  %v2252_v62 = vld.sshfl [vmem:[#allocation1 + $0x30] sm:$0xff pattern:$0x75316420] }
 0x284   : > { %1989 = vst [vmem:[#allocation2 + $0x2b8] sm:$0xc0] %v1949_v3 }
 0x285   : > { %2009 = vst [vmem:[#allocation2 + $0x448] sm:$0x1] %v1949_v3  ;;  %2282 = vrot.lane.b32.xlu1 %v2248_v10, %s5882_s20  ;;  %v2394_v10 = vld.sshfl [vmem:[#allocation1 + $0x8] sm:$0xff pattern:$0x75316420] }
 0x286   : > { %1990 = vst [vmem:[#allocation2 + $0x5b0] sm:$0xc0] %v1950_v22 }
 0x287   : > { %2010 = vst [vmem:[#allocation2] sm:$0x1] %v1950_v22  ;;  %v1923_v32 = vpop.permute.xlu1 %1922 }
 0x288   : > { %2280 = vrot.lane.b32.xlu0 %v2247_v35, %s5882_s20  ;;  %v1954_v23 = vsel %vm384_vm0, %v1923_v32, %v6733_v41  ;;  %v2253_v35 = vld.sshfl [vmem:[#allocation1 + $0x38] sm:$0xff pattern:$0x75316420] }
 0x289   : > { %2290 = vrot.lane.b32.xlu2 %v2252_v62, %s5882_s20  ;;  %1994 = vst [vmem:[#allocation2 + $0xc8] sm:$0xc0] %v1954_v23 }
 0x28a   : > { %v1921_v19 = vpop.permute.xlu0 %1920  ;;  %2014 = vst [vmem:[#allocation2 + $0x5e0] sm:$0x1] %v1954_v23  ;;  %v2372_v23 = vld [vmem:[%s5923_s17 + $0x48] sm:$0x77] }
 0x28b   : > { %v1952_v39 = vsel %vm384_vm0, %v6723_v21, %v1921_v19  ;;  %v1953_v28 = vsel %vm384_vm0, %v1921_v19, %v1923_v32  ;;  %v6780_v42 = vpop.permute.xlu2 %2106  ;;  %v2261_v21 = vld.sshfl [vmem:[#allocation1 + $0x20] sm:$0xff pattern:$0x75316420]  ;;  %2392 = vst [vmem:[#allocation1 + $0x30] ss:$2 sm:$0xff] %v2367_v53 }
 0x28c   : > { %1992 = vst [vmem:[#allocation2 + $0x120] sm:$0xc0] %v1952_v39  ;;  %v2371_v19 = vld [vmem:[%s5923_s17 + $0x40] sm:$0x77] }
 0x28d   : > { %2012 = vst [vmem:[#allocation2 + $0x10] sm:$0x1] %v1952_v39  ;;  %2288 = vrot.lane.b32.xlu1 %v2251_v31, %s5882_s20 }
 0x28e   : > { %1993 = vst [vmem:[#allocation2 + $0x1f8] sm:$0xc0] %v1953_v28 }
 0x28f   : > { %2013 = vst [vmem:[#allocation2 + $0x520] sm:$0x1] %v1953_v28  ;;  %v1929_v59 = vpop.permute.xlu1 %1928 }
 0x290   : > { %2286 = vrot.lane.b32.xlu0 %v2250_v55, %s5882_s20  ;;  %2390 = vst [vmem:[#allocation1 + $0x20] ss:$2 sm:$0xff] %v2366_v54  ;;  %v1957_v51 = vsel %vm384_vm0, %v1929_v59, %v6742_v60  ;;  %v2396_v55 = vld.sshfl [vmem:[#allocation1 + $0x18] sm:$0xff pattern:$0x75316420]  ;;  %v1766_v54 = vrot.slane %v6485_v17, 5 }
 0x291   : > { %2296 = vrot.lane.b32.xlu2 %v2258_v9, %s5882_s20  ;;  %1997 = vst [vmem:[#allocation2 + $0x580] sm:$0xc0] %v1957_v51 }
 0x292   : > { %v1927_v43 = vpop.permute.xlu0 %1926  ;;  %2017 = vst [vmem:[#allocation2 + $0xc0] sm:$0x1] %v1957_v51  ;;  %v2399_v9 = vld.sshfl [vmem:[#allocation1 + $0x30] sm:$0xff pattern:$0x75316420] }
 0x293   : > { %v1955_v46 = vsel %vm384_vm0, %v6733_v41, %v1927_v43  ;;  %v1956_v58 = vsel %vm384_vm0, %v1927_v43, %v1929_v59  ;;  %v6791_v50 = vpop.permute.xlu2 %2112  ;;  %v2368_v41 = vld [vmem:[%s5923_s17 + $0x28] sm:$0x77]  ;;  %2402 = vst [vmem:[#allocation1 + $0x10] ss:$2 sm:$0xff] %v2369_v63 }
 0x294   : > { %1995 = vst [vmem:[#allocation2 + $0x1d8] sm:$0xc0] %v1955_v46 }
 0x295   : > { %2015 = vst [vmem:[#allocation2 + $0x430] sm:$0x1] %v1955_v46  ;;  %2294 = vrot.lane.b32.xlu1 %v2257_v29, %s5882_s20  ;;  %v2400_v29 = vld.sshfl [vmem:[#allocation1 + $0x38] sm:$0xff pattern:$0x75316420]  ;;  %v2424_v46 = vrot.slane %v2396_v55, 1 }
 0x296   : > { %1996 = vst [vmem:[#allocation2 + $0x360] sm:$0xc0] %v1956_v58 }
 0x297   : > { %2016 = vst [vmem:[#allocation2 + $0x470] sm:$0x1] %v1956_v58  ;;  %v1935_v1 = vpop.permute.xlu1 %1934  ;;  %v2397_v14 = vld.sshfl [vmem:[#allocation1 + $0x20] sm:$0xff pattern:$0x75316420] }
 0x298   : > { %2292 = vrot.lane.b32.xlu0 %v2253_v35, %s5882_s20  ;;  %2401 = vst [vmem:[#allocation1] ss:$2 sm:$0xff] %v2368_v41  ;;  %v1960_v56 = vsel %vm384_vm0, %v1935_v1, %v6753_v7  ;;  %v2425_v59 = vrot.slane %v2397_v14, 1 }
 0x299   : > { %2302 = vrot.lane.b32.xlu2 %v2261_v21, %s5882_s20  ;;  %2000 = vst [vmem:[#allocation2 + $0x208] sm:$0xc0] %v1960_v56 }
 0x29a   : > { %v1933_v61 = vpop.permute.xlu0 %1932  ;;  %2020 = vst [vmem:[#allocation2 + $0x310] sm:$0x1] %v1960_v56  ;;  %v2408_v41 = vld.sshfl [vmem:[#allocation1 + $0x18] sm:$0xff pattern:$0x75316420] }
 0x29b   : > { %v1958_v0 = vsel %vm384_vm0, %v6742_v60, %v1933_v61  ;;  %v1959_v52 = vsel %vm384_vm0, %v1933_v61, %v1935_v1  ;;  %v6803_v2 = vpop.permute.xlu2 %2118  ;;  %v2423_v60 = vrot.slane %v2395_v8, 1  ;;  %2404 = vst [vmem:[#allocation1 + $0x30] ss:$2 sm:$0xff] %v2371_v19  ;;  %v2373_v1 = vld [vmem:[%s5923_s17 + $0x50] sm:$0x77] }
 0x29c   : > { %1998 = vst [vmem:[#allocation2 + $0x5b8] sm:$0xc0] %v1958_v0 }
 0x29d   : > { %2018 = vst [vmem:[#allocation2 + $0x210] sm:$0x1] %v1958_v0  ;;  %2300 = vrot.lane.b32.xlu1 %v6768_v5, %s5882_s20  ;;  %v2398_v5 = vld.sshfl [vmem:[#allocation1 + $0x28] sm:$0xff pattern:$0x75316420] }
 0x29e   : > { %1999 = vst [vmem:[#allocation2 + $0x628] sm:$0xc0] %v1959_v52  ;;  %v2426_v26 = vrot.slane %v2398_v5, 1  ;;  %v2407_v0 = vld.sshfl [vmem:[#allocation1 + $0x10] sm:$0xff pattern:$0x75316420] }
 0x29f   : > { %2019 = vst [vmem:[#allocation2 + $0x250] sm:$0x1] %v1959_v52  ;;  %v1941_v3 = vpop.permute.xlu1 %1940  ;;  %v6822_v32 = vld.sshfl [vmem:[#allocation1 + $0x8] sm:$0xff pattern:$0x75316420]  ;;  %v2428_v52 = vrot.slane %v2400_v29, 1 }
 0x2a0   : > { %2298 = vrot.lane.b32.xlu0 %v6764_v27, %s5882_s20  ;;  %v1963_v22 = vsel %vm384_vm0, %v1941_v3, %v6766_v30  ;;  %v2422_v27 = vrot.slane %v2394_v10, 1  ;;  %v2405_v30 = vld.sshfl [vmem:[#allocation1] sm:$0xff pattern:$0x75316420]  ;;  %1806 = vst [vmem:[#allocation2 + $0x650] sm:$0x38] %v1766_v54 }
 0x2a1   : > { %2446 = vrot.lane.b32.xlu2 %v2423_v60, %s5883_s21  ;;  %2003 = vst [vmem:[#allocation2 + $0x330] sm:$0xc0] %v1963_v22  ;;  %v2429_v51 = vrot.slane %v2405_v30, 1  ;;  %v2427_v10 = vrot.slane %v2399_v9, 1  ;;  %v2432_v60 = vrot.slane %v2408_v41, 1  ;;  %v2430_v5 = vrot.slane %v6822_v32, 1 }
 0x2a2   : > { %v1939_v31 = vpop.permute.xlu0 %1938  ;;  %2023 = vst [vmem:[#allocation2 + $0x1f0] sm:$0x1] %v1963_v22  ;;  %v2411_v14 = vld.sshfl [vmem:[#allocation1 + $0x30] sm:$0xff pattern:$0x75316420]  ;;  %v1767_v9 = vrot.slane %v6490_v6, 5 }
 0x2a3   : > { %v1961_v13 = vsel %vm384_vm0, %v6753_v7, %v1939_v31  ;;  %v1962_v16 = vsel %vm384_vm0, %v1939_v31, %v1941_v3  ;;  %v6816_v62 = vpop.permute.xlu2 %2124  ;;  %v2370_v7 = vld [vmem:[%s5923_s17 + $0x38] sm:$0x77]  ;;  %2413 = vst [vmem:[#allocation1] ss:$2 sm:$0xff] %v2372_v23  ;;  %v2435_v30 = vrot.slane %v2411_v14, 1 }
 0x2a4   : > { %2001 = vst [vmem:[#allocation2 + $0x150] sm:$0xc0] %v1961_v13  ;;  %v2570_v14 = vld [vmem:[%s5923_s17 + $0x38] sm:$0x77] }
 0x2a5   : > { %2021 = vst [vmem:[#allocation2 + $0x2a0] sm:$0x1] %v1961_v13  ;;  %2444 = vrot.lane.b32.xlu1 %v2422_v27, %s5883_s21  ;;  %v2564_v13 = vld [vmem:[%s5923_s17 + $0x8] sm:$0x77] }
 0x2a6   : > { %2002 = vst [vmem:[#allocation2 + $0x338] sm:$0xc0] %v1962_v16 }
 0x2a7   : > { %2022 = vst [vmem:[#allocation2 + $0x48] sm:$0x1] %v1962_v16  ;;  %v2105_v28 = vpop.permute.xlu1 %2104 }
 0x2a8   : > { %2442 = vrot.lane.b32.xlu0 %v2421_v25, %s5883_s21  ;;  %2403 = vst [vmem:[#allocation1 + $0x20] ss:$2 sm:$0xff] %v2370_v7  ;;  %v2145_v43 = vsel %vm565_vm1, %v2105_v28, %v6780_v42  ;;  %v2431_v7 = vrot.slane %v2407_v0, 1 }
 0x2a9   : > { %2452 = vrot.lane.b32.xlu2 %v2426_v26, %s5883_s21  ;;  %2185 = vst [vmem:[#allocation2 + $0x420] sm:$0xe] %v2145_v43  ;;  %v2565_v26 = vld [vmem:[%s5923_s17 + $0x10] sm:$0x77] }
 0x2aa   : > { %v2103_v39 = vpop.permute.xlu0 %2102  ;;  %2414 = vst [vmem:[#allocation1 + $0x10] ss:$2 sm:$0xff] %v2373_v1  ;;  %v2417_v55 = vld.sshfl [vmem:[#allocation1 + $0x8] sm:$0xff pattern:$0x75316420] }
 0x2ab   : > { %v2144_v21 = vsel %vm565_vm1, %v2103_v39, %v2105_v28  ;;  %v6830_v58 = vpop.permute.xlu2 %2130  ;;  %v6846_v31 = vld.sshfl [vmem:[#allocation1] sm:$0xff pattern:$0x75316420]  ;;  %1807 = vst [vmem:[#allocation2 + $0x340] sm:$0x38] %v1767_v9 }
 0x2ac   : > { %2184 = vst [vmem:[#allocation2 + $0x168] sm:$0xe] %v2144_v21  ;;  %v2566_v28 = vld [vmem:[%s5923_s17 + $0x18] sm:$0x77]  ;;  %v2437_v0 = vrot.slane %v6846_v31, 1 }
 0x2ad   : > { %2450 = vrot.lane.b32.xlu1 %v2425_v59, %s5883_s21  ;;  %2586 = vst [vmem:[#allocation1] ss:$2 sm:$0xff] %v2564_v13  ;;  %v2568_v1 = vld [vmem:[%s5923_s17 + $0x28] sm:$0x77] }
 0x2af   : > { %v2111_v53 = vpop.permute.xlu1 %2110  ;;  %v2409_v56 = vld.sshfl [vmem:[#allocation1 + $0x20] sm:$0xff pattern:$0x75316420]  ;;  %v2410_v63 = vld.sshfl [vmem:[#allocation1 + $0x28] sm:$0xff pattern:$0x75316420] }
 0x2b0   : > { %2448 = vrot.lane.b32.xlu0 %v2424_v46, %s5883_s21  ;;  %v2148_v61 = vsel %vm565_vm1, %v2111_v53, %v6791_v50  ;;  %v2433_v43 = vrot.slane %v2409_v56, 1  ;;  %v2434_v46 = vrot.slane %v2410_v63, 1 }
 0x2b1   : > { %2458 = vrot.lane.b32.xlu2 %v2429_v51, %s5883_s21  ;;  %2188 = vst [vmem:[#allocation2 + $0x3b8] sm:$0xe] %v2148_v61  ;;  %v6860_v19 = vld.sshfl [vmem:[#allocation1 + $0x10] sm:$0xff pattern:$0x75316420]  ;;  %v2438_v51 = vrot.slane %v2417_v55, 1 }
 0x2b2   : > { %v2109_v17 = vpop.permute.xlu0 %2108  ;;  %v6863_v29 = vld.sshfl [vmem:[#allocation1 + $0x18] sm:$0xff pattern:$0x75316420]  ;;  %v2569_v55 = vld [vmem:[%s5923_s17 + $0x30] sm:$0x77] }
 0x2b3   : > { %v2146_v35 = vsel %vm565_vm1, %v6780_v42, %v2109_v17  ;;  %v2147_v49 = vsel %vm565_vm1, %v2109_v17, %v2111_v53  ;;  %v6841_v8 = vpop.permute.xlu2 %2136  ;;  %v2374_v42 = vld [vmem:[%s5923_s17 + $0x58] sm:$0x7]  ;;  %2588 = vst [vmem:[#allocation1 + $0x10] ss:$2 sm:$0xff] %v2565_v26  ;;  %v2567_v17 = vld [vmem:[%s5923_s17 + $0x20] sm:$0x77] }
 0x2b4   : > { %2186 = vst [vmem:[#allocation2 + $0x268] sm:$0xe] %v2146_v35  ;;  %v2593_v56 = vld.sshfl [vmem:[#allocation1] sm:$0xff pattern:$0x75316420] }
 0x2b5   : > { %2187 = vst [vmem:[#allocation2 + $0xb8] sm:$0xe] %v2147_v49  ;;  %2456 = vrot.lane.b32.xlu1 %v2428_v52, %s5883_s21  ;;  %v1764_v52 = vrot.slane %v6477_v12, 5  ;;  %v2594_v63 = vld.sshfl [vmem:[#allocation1 + $0x8] sm:$0xff pattern:$0x75316420] }
 0x2b6   : > { %2415 = vst [vmem:[#allocation1 + $0x20] ss:$2 sm:$0xff] %v2374_v42 }
 0x2b7   : > { %v2117_v22 = vpop.permute.xlu1 %2116  ;;  %2601 = vst [vmem:[#allocation1] ss:$2 sm:$0xff] %v2568_v1 }
 0x2b8   : > { %2454 = vrot.lane.b32.xlu0 %v2427_v10, %s5883_s21  ;;  %v2151_v27 = vsel %vm565_vm1, %v2117_v22, %v6803_v2  ;;  %1804 = vst [vmem:[#allocation2 + $0x528] sm:$0x38] %v1764_v52 }
 0x2b9   : > { %2464 = vrot.lane.b32.xlu2 %v2432_v60, %s5883_s21  ;;  %2191 = vst [vmem:[#allocation2 + $0x2d0] sm:$0xe] %v2151_v27  ;;  %v2440_v27 = vrot.slane %v6863_v29, 1 }
 0x2ba   : > { %v2115_v3 = vpop.permute.xlu0 %2114  ;;  %v2595_v13 = vld.sshfl [vmem:[#allocation1 + $0x10] sm:$0xff pattern:$0x75316420]  ;;  %v2596_v12 = vld.sshfl [vmem:[#allocation1 + $0x18] sm:$0xff pattern:$0x75316420] }
 0x2bb   : > { %v2149_v16 = vsel %vm565_vm1, %v6791_v50, %v2115_v3  ;;  %v2150_v25 = vsel %vm565_vm1, %v2115_v3, %v2117_v22  ;;  %v6858_v50 = vpop.permute.xlu2 %2142  ;;  %2602 = vst [vmem:[#allocation1 + $0x10] ss:$2 sm:$0xff] %v2569_v55 }
 0x2bc   : > { %2189 = vst [vmem:[#allocation2 + $0x448] sm:$0xe] %v2149_v16 }
 0x2bd   : > { %2190 = vst [vmem:[#allocation2] sm:$0xe] %v2150_v25  ;;  %2462 = vrot.lane.b32.xlu1 %v2431_v7, %s5883_s21  ;;  %v2420_v32 = vld.sshfl [vmem:[#allocation1 + $0x20] sm:$0xff pattern:$0x75316420]  ;;  %v2439_v25 = vrot.slane %v6860_v19, 1 }
 0x2be   : > { %2590 = vst [vmem:[#allocation1 + $0x20] ss:$2 sm:$0xff] %v2566_v28  ;;  %v2441_v60 = vrot.slane %v2420_v32, 1  ;;  %v2622_v28 = vrot.slane %v2594_v63, 6 }
 0x2bf   : > { %v2123_v23 = vpop.permute.xlu1 %2122 }
 0x2c0   : > { %2460 = vrot.lane.b32.xlu0 %v2430_v5, %s5883_s21  ;;  %v2154_v21 = vsel %vm565_vm1, %v2123_v23, %v6816_v62 }
 0x2c1   : > { %2470 = vrot.lane.b32.xlu2 %v2435_v30, %s5883_s21  ;;  %2194 = vst [vmem:[#allocation2 + $0x5e0] sm:$0xe] %v2154_v21 }
 0x2c2   : > { %v2121_v39 = vpop.permute.xlu0 %2120  ;;  %v2608_v52 = vld.sshfl [vmem:[#allocation1 + $0x18] sm:$0xff pattern:$0x75316420] }
 0x2c3   : > { %v2152_v6 = vsel %vm565_vm1, %v6803_v2, %v2121_v39  ;;  %v2153_v54 = vsel %vm565_vm1, %v2121_v39, %v2123_v23  ;;  %v6873_v59 = vpop.permute.xlu2 %2266  ;;  %v2412_v2 = vld.sshfl [vmem:[#allocation1 + $0x38] sm:$0xff pattern:$0x75316420]  ;;  %v2621_v39 = vrot.slane %v2593_v56, 6  ;;  %v1770_v23 = vrot.slane %v6492_v18, 5 }
 0x2c4   : > { %2192 = vst [vmem:[#allocation2 + $0x10] sm:$0xe] %v2152_v6  ;;  %v2436_v49 = vrot.slane %v2412_v2, 1  ;;  %v2571_v6 = vld [vmem:[%s5923_s17 + $0x40] sm:$0x77] }
 0x2c5   : > { %2193 = vst [vmem:[#allocation2 + $0x520] sm:$0xe] %v2153_v54  ;;  %2468 = vrot.lane.b32.xlu1 %v2434_v46, %s5883_s21  ;;  %v2598_v26 = vld.sshfl [vmem:[#allocation1 + $0x28] sm:$0xff pattern:$0x75316420] }
 0x2c6   : > { %2592 = vst [vmem:[#allocation1 + $0x30] ss:$2 sm:$0xff] %v2567_v17  ;;  %v2597_v9 = vld.sshfl [vmem:[#allocation1 + $0x20] sm:$0xff pattern:$0x75316420]  ;;  %v2626_v46 = vrot.slane %v2598_v26, 6 }
 0x2c7   : > { %v2129_v41 = vpop.permute.xlu1 %2128  ;;  %2603 = vst [vmem:[#allocation1 + $0x20] ss:$2 sm:$0xff] %v2570_v14  ;;  %v2572_v2 = vld [vmem:[%s5923_s17 + $0x48] sm:$0x77] }
 0x2c8   : > { %2466 = vrot.lane.b32.xlu0 %v2433_v43, %s5883_s21  ;;  %v2157_v10 = vsel %vm565_vm1, %v2129_v41, %v6830_v58  ;;  %1810 = vst [vmem:[#allocation2 + $0x5b0] sm:$0x38] %v1770_v23  ;;  %v6921_v17 = vld.sshfl [vmem:[#allocation1 + $0x8] sm:$0xff pattern:$0x75316420]  ;;  %v1773_v23 = vrot.slane %v6516_v33, 5 }
 0x2c9   : > { %2476 = vrot.lane.b32.xlu2 %v2438_v51, %s5883_s21  ;;  %2197 = vst [vmem:[#allocation2 + $0xc0] sm:$0xe] %v2157_v10  ;;  %v2605_v51 = vld.sshfl [vmem:[#allocation1] sm:$0xff pattern:$0x75316420] }
 0x2ca   : > { %v2127_v35 = vpop.permute.xlu0 %2126  ;;  %2613 = vst [vmem:[#allocation1] ss:$2 sm:$0xff] %v2572_v2  ;;  %v2629_v10 = vrot.slane %v2605_v51, 6  ;;  %v2607_v56 = vld.sshfl [vmem:[#allocation1 + $0x10] sm:$0xff pattern:$0x75316420] }
 0x2cb   : > { %v2155_v53 = vsel %vm565_vm1, %v6816_v62, %v2127_v35  ;;  %v2156_v61 = vsel %vm565_vm1, %v2127_v35, %v2129_v41  ;;  %v1765_v62 = vrot.slane %v6482_v11, 5  ;;  %v6888_v42 = vpop.permute.xlu2 %2272  ;;  %v2624_v41 = vrot.slane %v2596_v12, 6  ;;  %1813 = vst [vmem:[#allocation2 + $0x1f8] sm:$0x38] %v1773_v23 }
 0x2cc   : > { %2195 = vst [vmem:[#allocation2 + $0x430] sm:$0xe] %v2155_v53 }
 0x2cd   : > { %2196 = vst [vmem:[#allocation2 + $0x470] sm:$0xe] %v2156_v61  ;;  %2474 = vrot.lane.b32.xlu1 %v2437_v0, %s5883_s21  ;;  %v2599_v54 = vld.sshfl [vmem:[#allocation1 + $0x30] sm:$0xff pattern:$0x75316420] }
 0x2ce   : > { %1805 = vst [vmem:[#allocation2 + $0x5d8] sm:$0x38] %v1765_v62  ;;  %v2600_v43 = vld.sshfl [vmem:[#allocation1 + $0x38] sm:$0xff pattern:$0x75316420]  ;;  %v2627_v55 = vrot.slane %v2599_v54, 6 }
 0x2cf   : > { %v2135_v3 = vpop.permute.xlu1 %2134  ;;  %2604 = vst [vmem:[#allocation1 + $0x30] ss:$2 sm:$0xff] %v2571_v6  ;;  %v2573_v0 = vld [vmem:[%s5923_s17 + $0x50] sm:$0x77]  ;;  %v2628_v12 = vrot.slane %v2600_v43, 6 }
 0x2d0   : > { %2472 = vrot.lane.b32.xlu0 %v2436_v49, %s5883_s21  ;;  %v2160_v22 = vsel %vm565_vm1, %v2135_v3, %v6841_v8  ;;  %v2625_v49 = vrot.slane %v2597_v9, 6  ;;  %2614 = vst [vmem:[#allocation1 + $0x10] ss:$2 sm:$0xff] %v2573_v0  ;;  %v2746_v43 = vld [vmem:[%s5923_s17 + $0x18] sm:$0x77] }
 0x2d1   : > { %2482 = vrot.lane.b32.xlu2 %v2441_v60, %s5883_s21  ;;  %2200 = vst [vmem:[#allocation2 + $0x310] sm:$0xe] %v2160_v22  ;;  %v2745_v22 = vld [vmem:[%s5923_s17 + $0x10] sm:$0x77]  ;;  %v2748_v0 = vld [vmem:[%s5923_s17 + $0x28] sm:$0x77] }
 0x2d2   : > { %v2133_v31 = vpop.permute.xlu0 %2132  ;;  %v2616_v6 = vld.sshfl [vmem:[#allocation1] sm:$0xff pattern:$0x75316420] }
 0x2d3   : > { %v2158_v11 = vsel %vm565_vm1, %v6830_v58, %v2133_v31  ;;  %v2159_v16 = vsel %vm565_vm1, %v2133_v31, %v2135_v3  ;;  %v6901_v5 = vpop.permute.xlu2 %2278  ;;  %v2623_v58 = vrot.slane %v2595_v13, 6  ;;  %v2574_v31 = vld [vmem:[%s5923_s17 + $0x58] sm:$0x7]  ;;  %v1774_v13 = vrot.slane %v6518_v36, 5 }
 0x2d4   : > { %2198 = vst [vmem:[#allocation2 + $0x210] sm:$0xe] %v2158_v11  ;;  %v2609_v11 = vld.sshfl [vmem:[#allocation1 + $0x20] sm:$0xff pattern:$0x75316420] }
 0x2d5   : > { %2199 = vst [vmem:[#allocation2 + $0x250] sm:$0xe] %v2159_v16  ;;  %2480 = vrot.lane.b32.xlu1 %v2440_v27, %s5883_s21  ;;  %v2610_v3 = vld.sshfl [vmem:[#allocation1 + $0x28] sm:$0xff pattern:$0x75316420]  ;;  %v2632_v16 = vrot.slane %v2608_v52, 6 }
 0x2d6   : > { %2615 = vst [vmem:[#allocation1 + $0x20] ss:$2 sm:$0xff] %v2574_v31  ;;  %v2611_v26 = vld.sshfl [vmem:[#allocation1 + $0x30] sm:$0xff pattern:$0x75316420]  ;;  %v2633_v2 = vrot.slane %v2609_v11, 6 }
 0x2d7   : > { %v2141_v30 = vpop.permute.xlu1 %2140  ;;  %1814 = vst [vmem:[#allocation2 + $0xc8] sm:$0x38] %v1774_v13  ;;  %v6946_v27 = vld.sshfl [vmem:[#allocation1 + $0x10] sm:$0xff pattern:$0x75316420]  ;;  %v2635_v54 = vrot.slane %v2611_v26, 6 }
 0x2d8   : > { %2478 = vrot.lane.b32.xlu0 %v2439_v25, %s5883_s21  ;;  %v2163_v32 = vsel %vm565_vm1, %v2141_v30, %v6858_v50  ;;  %v1768_v50 = vrot.slane %v6494_v4, 5  ;;  %v1769_v4 = vrot.slane %v6496_v20, 5  ;;  %v6948_v36 = vld.sshfl [vmem:[#allocation1 + $0x18] sm:$0xff pattern:$0x75316420]  ;;  %v2637_v52 = vrot.slane %v2616_v6, 6 }
 0x2d9   : > { %2646 = vrot.lane.b32.xlu2 %v2623_v58, %s5884_s22  ;;  %2203 = vst [vmem:[#allocation2 + $0x1f0] sm:$0xe] %v2163_v32  ;;  %v1772_v32 = vrot.slane %v6514_v15, 5  ;;  %v2749_v31 = vld [vmem:[%s5923_s17 + $0x30] sm:$0x77] }
 0x2da   : > { %v2139_v7 = vpop.permute.xlu0 %2138  ;;  %1808 = vst [vmem:[#allocation2 + $0x6b0] sm:$0x38] %v1768_v50 }
 0x2db   : > { %v2161_v19 = vsel %vm565_vm1, %v6841_v8, %v2139_v7  ;;  %v2162_v29 = vsel %vm565_vm1, %v2139_v7, %v2141_v30  ;;  %v1771_v8 = vrot.slane %v6498_v24, 5  ;;  %v6915_v21 = vpop.permute.xlu2 %2284  ;;  %1809 = vst [vmem:[#allocation2 + $0x2b8] sm:$0x38] %v1769_v4  ;;  %v2630_v7 = vrot.slane %v6921_v17, 6 }
 0x2dc   : > { %2201 = vst [vmem:[#allocation2 + $0x2a0] sm:$0xe] %v2161_v19  ;;  %v2631_v30 = vrot.slane %v2607_v56, 6  ;;  %v2612_v17 = vld.sshfl [vmem:[#allocation1 + $0x38] sm:$0xff pattern:$0x75316420] }
 0x2dd   : > { %2202 = vst [vmem:[#allocation2 + $0x48] sm:$0xe] %v2162_v29  ;;  %2644 = vrot.lane.b32.xlu1 %v2622_v28, %s5884_s22  ;;  %v1775_v29 = vrot.slane %v6520_v38, 5 }
 0x2de   : > { %1811 = vst [vmem:[#allocation2 + $0x98] sm:$0x38] %v1771_v8  ;;  %v2620_v8 = vld.sshfl [vmem:[#allocation1 + $0x20] sm:$0xff pattern:$0x75316420] }
 0x2df   : > { %v2265_v24 = vpop.permute.xlu1 %2264  ;;  %2768 = vst [vmem:[#allocation1 + $0x10] ss:$2 sm:$0xff] %v2745_v22  ;;  %v1777_v22 = vrot.slane %v6532_v34, 5 }
 0x2e0   : > { %2642 = vrot.lane.b32.xlu0 %v2621_v39, %s5884_s22  ;;  %v2305_v53 = vsel %vm766_vm2, %v2265_v24, %v6873_v59  ;;  %v2744_v39 = vld [vmem:[%s5923_s17 + $0x8] sm:$0x77]  ;;  %1815 = vst [vmem:[#allocation2 + $0x1d8] sm:$0x38] %v1775_v29 }
 0x2e1   : > { %2652 = vrot.lane.b32.xlu2 %v2626_v46, %s5884_s22  ;;  %2345 = vst [vmem:[#allocation2 + $0x420] sm:$0x70] %v2305_v53 }
 0x2e2   : > { %v2263_v18 = vpop.permute.xlu0 %2262  ;;  %1812 = vst [vmem:[#allocation2 + $0x120] sm:$0x38] %v1772_v32 }
 0x2e3   : > { %v2304_v35 = vsel %vm766_vm2, %v2263_v18, %v2265_v24  ;;  %v6928_v61 = vpop.permute.xlu2 %2290  ;;  %2770 = vst [vmem:[#allocation1 + $0x20] ss:$2 sm:$0xff] %v2746_v43  ;;  %v2634_v18 = vrot.slane %v2610_v3, 6  ;;  %v2747_v24 = vld [vmem:[%s5923_s17 + $0x20] sm:$0x77] }
 0x2e4   : > { %2344 = vst [vmem:[#allocation2 + $0x168] sm:$0x70] %v2304_v35 }
 0x2e5   : > { %2650 = vrot.lane.b32.xlu1 %v2625_v49, %s5884_s22  ;;  %2772 = vst [vmem:[#allocation1 + $0x30] ss:$2 sm:$0xff] %v2747_v24 }
 0x2e6   : > { %1817 = vst [vmem:[#allocation2 + $0x580] sm:$0x38] %v1777_v22 }
 0x2e7   : > { %v2271_v20 = vpop.permute.xlu1 %2270 }
 0x2e8   : > { %2648 = vrot.lane.b32.xlu0 %v2624_v41, %s5884_s22  ;;  %v2308_v60 = vsel %vm766_vm2, %v2271_v20, %v6888_v42 }
 0x2e9   : > { %2658 = vrot.lane.b32.xlu2 %v2629_v10, %s5884_s22  ;;  %2348 = vst [vmem:[#allocation2 + $0x3b8] sm:$0x70] %v2308_v60  ;;  %v2636_v10 = vrot.slane %v2612_v17, 6  ;;  %v2775_v60 = vld.sshfl [vmem:[#allocation1 + $0x10] sm:$0xff pattern:$0x75316420] }
 0x2ea   : > { %v2269_v1 = vpop.permute.xlu0 %2268 }
 0x2eb   : > { %v2306_v62 = vsel %vm766_vm2, %v6873_v59, %v2269_v1  ;;  %v2307_v63 = vsel %vm766_vm2, %v2269_v1, %v2271_v20  ;;  %v6941_v59 = vpop.permute.xlu2 %2296  ;;  %v1778_v1 = vrot.slane %v6535_v44, 5  ;;  %v1779_v20 = vrot.slane %v6538_v47, 5 }
 0x2ec   : > { %2346 = vst [vmem:[#allocation2 + $0x268] sm:$0x70] %v2306_v62  ;;  %v1776_v47 = vrot.slane %v6525_v40, 5  ;;  %v2803_v40 = vrot.slane %v2775_v60, 3 }
 0x2ed   : > { %2347 = vst [vmem:[#allocation2 + $0xb8] sm:$0x70] %v2307_v63  ;;  %2656 = vrot.lane.b32.xlu1 %v2628_v12, %s5884_s22  ;;  %v2641_v63 = vrot.slane %v2620_v8, 6  ;;  %v2779_v29 = vld.sshfl [vmem:[#allocation1 + $0x30] sm:$0xff pattern:$0x75316420] }
 0x2ee   : > { %1818 = vst [vmem:[#allocation2 + $0x5b8] sm:$0x38] %v1778_v1  ;;  %v2780_v32 = vld.sshfl [vmem:[#allocation1 + $0x38] sm:$0xff pattern:$0x75316420]  ;;  %v1782_v8 = vrot.slane %v6545_v48, 5 }
 0x2ef   : > { %v2277_v14 = vpop.permute.xlu1 %2276  ;;  %1819 = vst [vmem:[#allocation2 + $0x628] sm:$0x38] %v1779_v20 }
 0x2f0   : > { %2654 = vrot.lane.b32.xlu0 %v2627_v55, %s5884_s22  ;;  %v2311_v19 = vsel %vm766_vm2, %v2277_v14, %v6901_v5  ;;  %v6990_v55 = vld.sshfl [vmem:[#allocation1 + $0x18] sm:$0xff pattern:$0x75316420]  ;;  %1816 = vst [vmem:[#allocation2 + $0x360] sm:$0x38] %v1776_v47 }
 0x2f1   : > { %2664 = vrot.lane.b32.xlu2 %v2632_v16, %s5884_s22  ;;  %2351 = vst [vmem:[#allocation2 + $0x2d0] sm:$0x70] %v2311_v19  ;;  %v2639_v16 = vrot.slane %v6946_v27, 6  ;;  %v2777_v27 = vld.sshfl [vmem:[#allocation1 + $0x20] sm:$0xff pattern:$0x75316420] }
 0x2f2   : > { %v2275_v25 = vpop.permute.xlu0 %2274  ;;  %2782 = vst [vmem:[#allocation1 + $0x10] ss:$2 sm:$0xff] %v2749_v31 }
 0x2f3   : > { %v2309_v58 = vsel %vm766_vm2, %v6888_v42, %v2275_v25  ;;  %v2310_v9 = vsel %vm766_vm2, %v2275_v25, %v2277_v14  ;;  %v2617_v42 = vld.sshfl [vmem:[#allocation1 + $0x8] sm:$0xff pattern:$0x75316420]  ;;  %v6960_v28 = vpop.permute.xlu2 %2302  ;;  %v2750_v14 = vld [vmem:[%s5923_s17 + $0x38] sm:$0x77] }
 0x2f4   : > { %2349 = vst [vmem:[#allocation2 + $0x448] sm:$0x70] %v2309_v58  ;;  %v2778_v58 = vld.sshfl [vmem:[#allocation1 + $0x28] sm:$0xff pattern:$0x75316420] }
 0x2f5   : > { %2350 = vst [vmem:[#allocation2] sm:$0x70] %v2310_v9  ;;  %2662 = vrot.lane.b32.xlu1 %v2631_v30, %s5884_s22  ;;  %v2751_v30 = vld [vmem:[%s5923_s17 + $0x40] sm:$0x77] }
 0x2f6   : > { %2766 = vst [vmem:[#allocation1] ss:$2 sm:$0xff] %v2744_v39 }
 0x2f7   : > { %v2283_v46 = vpop.permute.xlu1 %2282  ;;  %2783 = vst [vmem:[#allocation1 + $0x20] ss:$2 sm:$0xff] %v2750_v14 }
 0x2f8   : > { %2660 = vrot.lane.b32.xlu0 %v2630_v7, %s5884_s22  ;;  %v2314_v50 = vsel %vm766_vm2, %v2283_v46, %v6915_v21  ;;  %2784 = vst [vmem:[#allocation1 + $0x30] ss:$2 sm:$0xff] %v2751_v30 }
 0x2f9   : > { %2670 = vrot.lane.b32.xlu2 %v2635_v54, %s5884_s22  ;;  %2354 = vst [vmem:[#allocation2 + $0x5e0] sm:$0x70] %v2314_v50  ;;  %v2752_v54 = vld [vmem:[%s5923_s17 + $0x48] sm:$0x77] }
 0x2fa   : > { %v2281_v38 = vpop.permute.xlu0 %2280  ;;  %1822 = vst [vmem:[#allocation2 + $0x338] sm:$0x38] %v1782_v8 }
 0x2fb   : > { %v2312_v15 = vsel %vm766_vm2, %v6901_v5, %v2281_v38  ;;  %v2313_v33 = vsel %vm766_vm2, %v2281_v38, %v2283_v46  ;;  %v6972_v51 = vpop.permute.xlu2 %2446  ;;  %v2638_v5 = vrot.slane %v2617_v42, 6  ;;  %v2804_v46 = vrot.slane %v6990_v55, 3 }
 0x2fc   : > { %2352 = vst [vmem:[#allocation2 + $0x10] sm:$0x70] %v2312_v15 }
 0x2fd   : > { %2353 = vst [vmem:[#allocation2 + $0x520] sm:$0x70] %v2313_v33  ;;  %2668 = vrot.lane.b32.xlu1 %v2634_v18, %s5884_s22  ;;  %v2773_v56 = vld.sshfl [vmem:[#allocation1] sm:$0xff pattern:$0x75316420]  ;;  %v2805_v33 = vrot.slane %v2777_v27, 3 }
 0x2fe   : > { %v2801_v19 = vrot.slane %v2773_v56, 3  ;;  %v2787_v18 = vld.sshfl [vmem:[#allocation1 + $0x10] sm:$0xff pattern:$0x75316420] }
 0x2ff   : > { %v2289_v41 = vpop.permute.xlu1 %2288  ;;  %v2789_v1 = vld.sshfl [vmem:[#allocation1 + $0x20] sm:$0xff pattern:$0x75316420]  ;;  %v2791_v31 = vld.sshfl [vmem:[#allocation1 + $0x30] sm:$0xff pattern:$0x75316420] }
 0x300   : > { %2666 = vrot.lane.b32.xlu0 %v2633_v2, %s5884_s22  ;;  %v2317_v49 = vsel %vm766_vm2, %v2289_v41, %v6928_v61  ;;  %v2788_v2 = vld.sshfl [vmem:[#allocation1 + $0x18] sm:$0xff pattern:$0x75316420]  ;;  %v2815_v47 = vrot.slane %v2791_v31, 3  ;;  %v2932_v31 = vld [vmem:[%s5923_s17 + $0x48] sm:$0x77] }
 0x301   : > { %2676 = vrot.lane.b32.xlu2 %v2638_v5, %s5884_s22  ;;  %2357 = vst [vmem:[#allocation2 + $0xc0] sm:$0x70] %v2317_v49  ;;  %v2753_v5 = vld [vmem:[%s5923_s17 + $0x50] sm:$0x77]  ;;  %v2808_v49 = vrot.slane %v2780_v32, 3 }
 0x302   : > { %v2287_v35 = vpop.permute.xlu0 %2286  ;;  %2794 = vst [vmem:[#allocation1 + $0x10] ss:$2 sm:$0xff] %v2753_v5  ;;  %v2928_v5 = vld [vmem:[%s5923_s17 + $0x28] sm:$0x77] }
 0x303   : > { %v2315_v53 = vsel %vm766_vm2, %v6915_v21, %v2287_v35  ;;  %v2316_v4 = vsel %vm766_vm2, %v2287_v35, %v2289_v41  ;;  %v6985_v62 = vpop.permute.xlu2 %2452  ;;  %v2774_v21 = vld.sshfl [vmem:[#allocation1 + $0x8] sm:$0xff pattern:$0x75316420] }
 0x304   : > { %2355 = vst [vmem:[#allocation2 + $0x430] sm:$0x70] %v2315_v53  ;;  %v2802_v39 = vrot.slane %v2774_v21, 3 }
 0x305   : > { %2356 = vst [vmem:[#allocation2 + $0x470] sm:$0x70] %v2316_v4  ;;  %2674 = vrot.lane.b32.xlu1 %v2637_v52, %s5884_s22  ;;  %v2807_v4 = vrot.slane %v2779_v29, 3  ;;  %v2790_v52 = vld.sshfl [vmem:[#allocation1 + $0x28] sm:$0xff pattern:$0x75316420] }
 0x306   : > { %2781 = vst [vmem:[#allocation1] ss:$2 sm:$0xff] %v2748_v0  ;;  %v2754_v0 = vld [vmem:[%s5923_s17 + $0x58] sm:$0x7] }
 0x307   : > { %v2295_v12 = vpop.permute.xlu1 %2294  ;;  %2795 = vst [vmem:[#allocation1 + $0x20] ss:$2 sm:$0xff] %v2754_v0 }
 0x308   : > { %2672 = vrot.lane.b32.xlu0 %v2636_v10, %s5884_s22  ;;  %v2320_v3 = vsel %vm766_vm2, %v2295_v12, %v6941_v59 }
 0x309   : > { %2682 = vrot.lane.b32.xlu2 %v2641_v63, %s5884_s22  ;;  %2360 = vst [vmem:[#allocation2 + $0x310] sm:$0x70] %v2320_v3  ;;  %v2924_v3 = vld [vmem:[%s5923_s17 + $0x8] sm:$0x77] }
 0x30a   : > { %v2293_v44 = vpop.permute.xlu0 %2292 }
 0x30b   : > { %v2318_v13 = vsel %vm766_vm2, %v6928_v61, %v2293_v44  ;;  %v2319_v11 = vsel %vm766_vm2, %v2293_v44, %v2295_v12  ;;  %v2640_v61 = vrot.slane %v6948_v36, 6  ;;  %v7003_v25 = vpop.permute.xlu2 %2458  ;;  %v2811_v44 = vrot.slane %v2787_v18, 3  ;;  %v7050_v12 = vld.sshfl [vmem:[#allocation1 + $0x10] sm:$0xff pattern:$0x75316420] }
 0x30c   : > { %2358 = vst [vmem:[#allocation2 + $0x210] sm:$0x70] %v2318_v13 }
 0x30d   : > { %2359 = vst [vmem:[#allocation2 + $0x250] sm:$0x70] %v2319_v11  ;;  %2680 = vrot.lane.b32.xlu1 %v2640_v61, %s5884_s22  ;;  %v2785_v6 = vld.sshfl [vmem:[#allocation1] sm:$0xff pattern:$0x75316420] }
 0x30e   : > { %v2786_v23 = vld.sshfl [vmem:[#allocation1 + $0x8] sm:$0xff pattern:$0x75316420]  ;;  %v2809_v48 = vrot.slane %v2785_v6, 3 }
 0x30f   : > { %v2301_v36 = vpop.permute.xlu1 %2300  ;;  %2793 = vst [vmem:[#allocation1] ss:$2 sm:$0xff] %v2752_v54  ;;  %v2810_v55 = vrot.slane %v2786_v23, 3  ;;  %v2800_v30 = vld.sshfl [vmem:[#allocation1 + $0x20] sm:$0xff pattern:$0x75316420] }
 0x310   : > { %2678 = vrot.lane.b32.xlu0 %v2639_v16, %s5884_s22  ;;  %v2323_v9 = vsel %vm766_vm2, %v2301_v36, %v6960_v28  ;;  %v7056_v16 = vld.sshfl [vmem:[#allocation1 + $0x18] sm:$0xff pattern:$0x75316420]  ;;  %v2927_v54 = vld [vmem:[%s5923_s17 + $0x20] sm:$0x77] }
 0x311   : > { %2826 = vrot.lane.b32.xlu2 %v2803_v40, %s5885_s23  ;;  %2363 = vst [vmem:[#allocation2 + $0x1f0] sm:$0x70] %v2323_v9  ;;  %v2792_v9 = vld.sshfl [vmem:[#allocation1 + $0x38] sm:$0xff pattern:$0x75316420] }
 0x312   : > { %v2299_v7 = vpop.permute.xlu0 %2298  ;;  %v2816_v6 = vrot.slane %v2792_v9, 3  ;;  %2952 = vst [vmem:[#allocation1 + $0x30] ss:$2 sm:$0xff] %v2927_v54  ;;  %v3083_v9 = vld [vmem:[%s5923_s17 + $0x8] sm:$0x77] }
 0x313   : > { %v2321_v34 = vsel %vm766_vm2, %v6941_v59, %v2299_v7  ;;  %v2322_v26 = vsel %vm766_vm2, %v2299_v7, %v2301_v36  ;;  %v7015_v42 = vpop.permute.xlu2 %2464  ;;  %v2806_v59 = vrot.slane %v2778_v58, 3  ;;  %v2813_v7 = vrot.slane %v2789_v1, 3 }
 0x314   : > { %2361 = vst [vmem:[#allocation2 + $0x2a0] sm:$0x70] %v2321_v34  ;;  %v2814_v34 = vrot.slane %v2790_v52, 3  ;;  %v2931_v52 = vld [vmem:[%s5923_s17 + $0x40] sm:$0x77] }
 0x315   : > { %2362 = vst [vmem:[#allocation2 + $0x48] sm:$0x70] %v2322_v26  ;;  %2824 = vrot.lane.b32.xlu1 %v2802_v39, %s5885_s23  ;;  %v2926_v26 = vld [vmem:[%s5923_s17 + $0x18] sm:$0x77] }
 0x316   : > { %v2797_v11 = vld.sshfl [vmem:[#allocation1 + $0x8] sm:$0xff pattern:$0x75316420]  ;;  %v2796_v61 = vld.sshfl [vmem:[#allocation1] sm:$0xff pattern:$0x75316420] }
 0x317   : > { %v2445_v43 = vpop.permute.xlu1 %2444  ;;  %2946 = vst [vmem:[#allocation1] ss:$2 sm:$0xff] %v2924_v3 }
 0x318   : > { %2822 = vrot.lane.b32.xlu0 %v2801_v19, %s5885_s23  ;;  %v2485_v15 = vsel %vm927_vm3, %v2445_v43, %v6972_v51  ;;  %2950 = vst [vmem:[#allocation1 + $0x20] ss:$2 sm:$0xff] %v2926_v26 }
 0x319   : > { %2832 = vrot.lane.b32.xlu2 %v2806_v59, %s5885_s23  ;;  %2525 = vst [vmem:[#allocation2 + $0x420] sm:$0x80] %v2485_v15 }
 0x31a   : > { %v2443_v28 = vpop.permute.xlu0 %2442  ;;  %2545 = vst [vmem:[#allocation2 + $0x370] sm:$0x3] %v2485_v15 }
 0x31b   : > { %v2484_v38 = vsel %vm927_vm3, %v2443_v28, %v2445_v43  ;;  %v7026_v50 = vpop.permute.xlu2 %2470  ;;  %v2817_v28 = vrot.slane %v2796_v61, 3 }
 0x31c   : > { %2524 = vst [vmem:[#allocation2 + $0x168] sm:$0x80] %v2484_v38 }
 0x31d   : > { %2544 = vst [vmem:[#allocation2 + $0x5c8] sm:$0x3] %v2484_v38  ;;  %2830 = vrot.lane.b32.xlu1 %v2805_v33, %s5885_s23  ;;  %v2819_v33 = vrot.slane %v7050_v12, 3 }
 0x31e   : > { %v2953_v18 = vld.sshfl [vmem:[#allocation1] sm:$0xff pattern:$0x75316420] }
 0x31f   : > { %v2451_v35 = vpop.permute.xlu1 %2450  ;;  %v2958_v1 = vld.sshfl [vmem:[#allocation1 + $0x28] sm:$0xff pattern:$0x75316420] }
 0x320   : > { %2828 = vrot.lane.b32.xlu0 %v2804_v46, %s5885_s23  ;;  %v2488_v41 = vsel %vm927_vm3, %v2451_v35, %v6985_v62 }
 0x321   : > { %2838 = vrot.lane.b32.xlu2 %v2809_v48, %s5885_s23  ;;  %2528 = vst [vmem:[#allocation2 + $0x3b8] sm:$0x80] %v2488_v41  ;;  %v2820_v48 = vrot.slane %v7056_v16, 3 }
 0x322   : > { %v2449_v17 = vpop.permute.xlu0 %2448  ;;  %2548 = vst [vmem:[#allocation2 + $0x590] sm:$0x3] %v2488_v41 }
 0x323   : > { %v2486_v24 = vsel %vm927_vm3, %v6972_v51, %v2449_v17  ;;  %v2487_v53 = vsel %vm927_vm3, %v2449_v17, %v2451_v35  ;;  %v7037_v10 = vpop.permute.xlu2 %2476  ;;  %v2812_v51 = vrot.slane %v2788_v2, 3  ;;  %v2929_v17 = vld [vmem:[%s5923_s17 + $0x30] sm:$0x77] }
 0x324   : > { %2526 = vst [vmem:[#allocation2 + $0x268] sm:$0x80] %v2486_v24 }
 0x325   : > { %2546 = vst [vmem:[#allocation2 + $0x30] sm:$0x3] %v2486_v24  ;;  %2836 = vrot.lane.b32.xlu1 %v2808_v49, %s5885_s23  ;;  %v2954_v24 = vld.sshfl [vmem:[#allocation1 + $0x8] sm:$0xff pattern:$0x75316420] }
 0x326   : > { %2527 = vst [vmem:[#allocation2 + $0xb8] sm:$0x80] %v2487_v53 }
 0x327   : > { %2547 = vst [vmem:[#allocation2 + $0x2f0] sm:$0x3] %v2487_v53  ;;  %v2457_v20 = vpop.permute.xlu1 %2456 }
 0x328   : > { %2834 = vrot.lane.b32.xlu0 %v2807_v4, %s5885_s23  ;;  %v2491_v60 = vsel %vm927_vm3, %v2457_v20, %v7003_v25  ;;  %2961 = vst [vmem:[#allocation1] ss:$2 sm:$0xff] %v2928_v5 }
 0x329   : > { %2844 = vrot.lane.b32.xlu2 %v2812_v51, %s5885_s23  ;;  %2531 = vst [vmem:[#allocation2 + $0x2d0] sm:$0x80] %v2491_v60 }
 0x32a   : > { %v2455_v56 = vpop.permute.xlu0 %2454  ;;  %2551 = vst [vmem:[#allocation2 + $0x688] sm:$0x3] %v2491_v60  ;;  %v2960_v60 = vld.sshfl [vmem:[#allocation1 + $0x38] sm:$0xff pattern:$0x75316420] }
 0x32b   : > { %v2489_v21 = vsel %vm927_vm3, %v6985_v62, %v2455_v56  ;;  %v2490_v63 = vsel %vm927_vm3, %v2455_v56, %v2457_v20  ;;  %v7048_v13 = vpop.permute.xlu2 %2482  ;;  %v2925_v62 = vld [vmem:[%s5923_s17 + $0x10] sm:$0x77] }
 0x32c   : > { %2529 = vst [vmem:[#allocation2 + $0x448] sm:$0x80] %v2489_v21  ;;  %v2959_v20 = vld.sshfl [vmem:[#allocation1 + $0x30] sm:$0xff pattern:$0x75316420] }
 0x32d   : > { %2549 = vst [vmem:[#allocation2 + $0x3e0] sm:$0x3] %v2489_v21  ;;  %2842 = vrot.lane.b32.xlu1 %v2811_v44, %s5885_s23  ;;  %v2957_v21 = vld.sshfl [vmem:[#allocation1 + $0x20] sm:$0xff pattern:$0x75316420] }
 0x32e   : > { %2530 = vst [vmem:[#allocation2] sm:$0x80] %v2490_v63 }
 0x32f   : > { %2550 = vst [vmem:[#allocation2 + $0x160] sm:$0x3] %v2490_v63  ;;  %v2463_v58 = vpop.permute.xlu1 %2462  ;;  %v2965_v12 = vld.sshfl [vmem:[#allocation1] sm:$0xff pattern:$0x75316420] }
 0x330   : > { %2840 = vrot.lane.b32.xlu0 %v2810_v55, %s5885_s23  ;;  %2948 = vst [vmem:[#allocation1 + $0x10] ss:$2 sm:$0xff] %v2925_v62  ;;  %v2494_v14 = vsel %vm927_vm3, %v2463_v58, %v7015_v42  ;;  %v1780_v62 = vrot.slane %v6555_v45, 5 }
 0x331   : > { %2850 = vrot.lane.b32.xlu2 %v2815_v47, %s5885_s23  ;;  %2534 = vst [vmem:[#allocation2 + $0x5e0] sm:$0x80] %v2494_v14 }
 0x332   : > { %v2461_v22 = vpop.permute.xlu0 %2460  ;;  %2554 = vst [vmem:[#allocation2 + $0x2c8] sm:$0x3] %v2494_v14  ;;  %v2934_v14 = vld [vmem:[%s5923_s17 + $0x58] sm:$0x7] }
 0x333   : > { %v2492_v40 = vsel %vm927_vm3, %v7003_v25, %v2461_v22  ;;  %v2493_v27 = vsel %vm927_vm3, %v2461_v22, %v2463_v58  ;;  %v7064_v36 = vpop.permute.xlu2 %2646  ;;  %v2818_v25 = vrot.slane %v2797_v11, 3  ;;  %2964 = vst [vmem:[#allocation1 + $0x30] ss:$2 sm:$0xff] %v2931_v52  ;;  %v2966_v11 = vld.sshfl [vmem:[#allocation1 + $0x8] sm:$0xff pattern:$0x75316420] }
 0x334   : > { %2532 = vst [vmem:[#allocation2 + $0x10] sm:$0x80] %v2492_v40  ;;  %v2933_v58 = vld [vmem:[%s5923_s17 + $0x50] sm:$0x77] }
 0x335   : > { %2552 = vst [vmem:[#allocation2 + $0x350] sm:$0x3] %v2492_v40  ;;  %2848 = vrot.lane.b32.xlu1 %v2814_v34, %s5885_s23 }
 0x336   : > { %2533 = vst [vmem:[#allocation2 + $0x520] sm:$0x80] %v2493_v27 }
 0x337   : > { %2553 = vst [vmem:[#allocation2 + $0x618] sm:$0x3] %v2493_v27  ;;  %v2469_v29 = vpop.permute.xlu1 %2468  ;;  %v2956_v53 = vld.sshfl [vmem:[#allocation1 + $0x18] sm:$0xff pattern:$0x75316420] }
 0x338   : > { %2846 = vrot.lane.b32.xlu0 %v2813_v7, %s5885_s23  ;;  %v2497_v59 = vsel %vm927_vm3, %v2469_v29, %v7026_v50  ;;  %2973 = vst [vmem:[#allocation1] ss:$2 sm:$0xff] %v2932_v31  ;;  %v1781_v7 = vrot.slane %v6557_v57, 5 }
 0x339   : > { %2856 = vrot.lane.b32.xlu2 %v2818_v25, %s5885_s23  ;;  %2537 = vst [vmem:[#allocation2 + $0xc0] sm:$0x80] %v2497_v59 }
 0x33a   : > { %v2467_v19 = vpop.permute.xlu0 %2466  ;;  %2557 = vst [vmem:[#allocation2 + $0x2a8] sm:$0x3] %v2497_v59 }
 0x33b   : > { %v2495_v39 = vsel %vm927_vm3, %v7015_v42, %v2467_v19  ;;  %v2496_v32 = vsel %vm927_vm3, %v2467_v19, %v2469_v29  ;;  %v7075_v23 = vpop.permute.xlu2 %2652  ;;  %v2821_v42 = vrot.slane %v2800_v30, 3  ;;  %1820 = vst [vmem:[#allocation2 + $0x208] sm:$0x38] %v1780_v62 }
 0x33c   : > { %2535 = vst [vmem:[#allocation2 + $0x430] sm:$0x80] %v2495_v39 }
 0x33d   : > { %2555 = vst [vmem:[#allocation2 + $0x200] sm:$0x3] %v2495_v39  ;;  %2854 = vrot.lane.b32.xlu1 %v2817_v28, %s5885_s23 }
 0x33e   : > { %2536 = vst [vmem:[#allocation2 + $0x470] sm:$0x80] %v2496_v32 }
 0x33f   : > { %2556 = vst [vmem:[#allocation2 + $0xd0] sm:$0x3] %v2496_v32  ;;  %v2475_v38 = vpop.permute.xlu1 %2474  ;;  %v2977_v25 = vld.sshfl [vmem:[#allocation1 + $0x8] sm:$0xff pattern:$0x75316420] }
 0x340   : > { %2852 = vrot.lane.b32.xlu0 %v2816_v6, %s5885_s23  ;;  %v2500_v46 = vsel %vm927_vm3, %v2475_v38, %v7037_v10  ;;  %v2976_v26 = vld.sshfl [vmem:[#allocation1] sm:$0xff pattern:$0x75316420]  ;;  %1821 = vst [vmem:[#allocation2 + $0x150] sm:$0x38] %v1781_v7 }
 0x341   : > { %2862 = vrot.lane.b32.xlu2 %v2821_v42, %s5885_s23  ;;  %2540 = vst [vmem:[#allocation2 + $0x310] sm:$0x80] %v2500_v46  ;;  %v3084_v32 = vld [vmem:[%s5923_s17 + $0x10] sm:$0x77] }
 0x342   : > { %v2473_v8 = vpop.permute.xlu0 %2472  ;;  %2560 = vst [vmem:[#allocation2 + $0x198] sm:$0x3] %v2500_v46 }
 0x343   : > { %v2498_v43 = vsel %vm927_vm3, %v7026_v50, %v2473_v8  ;;  %v2499_v15 = vsel %vm927_vm3, %v2473_v8, %v2475_v38  ;;  %v7088_v2 = vpop.permute.xlu2 %2658  ;;  %v2955_v50 = vld.sshfl [vmem:[#allocation1 + $0x10] sm:$0xff pattern:$0x75316420]  ;;  %3105 = vst [vmem:[#allocation1] ss:$2 sm:$0xff] %v3083_v9 }
 0x344   : > { %2538 = vst [vmem:[#allocation2 + $0x210] sm:$0x80] %v2498_v43  ;;  %v3085_v8 = vld [vmem:[%s5923_s17 + $0x18] sm:$0x77] }
 0x345   : > { %2558 = vst [vmem:[#allocation2 + $0x418] sm:$0x3] %v2498_v43  ;;  %2860 = vrot.lane.b32.xlu1 %v2820_v48, %s5885_s23 }
 0x346   : > { %2539 = vst [vmem:[#allocation2 + $0x250] sm:$0x80] %v2499_v15 }
 0x347   : > { %2559 = vst [vmem:[#allocation2 + $0x308] sm:$0x3] %v2499_v15  ;;  %v2481_v4 = vpop.permute.xlu1 %2480 }
 0x348   : > { %2858 = vrot.lane.b32.xlu0 %v2819_v33, %s5885_s23  ;;  %2962 = vst [vmem:[#allocation1 + $0x10] ss:$2 sm:$0xff] %v2929_v17  ;;  %v2503_v0 = vsel %vm927_vm3, %v2481_v4, %v7048_v13  ;;  %v1783_v13 = vrot.slane %v6547_v37, 5  ;;  %v3088_v33 = vld [vmem:[%s5923_s17 + $0x30] sm:$0x77] }
 0x349   : > { %2985 = vrot.lane.b32.xlu2 %v2955_v50, %s5886_s24  ;;  %2543 = vst [vmem:[#allocation2 + $0x1f0] sm:$0x80] %v2503_v0  ;;  %v2972_v17 = vld.sshfl [vmem:[#allocation1 + $0x38] sm:$0xff pattern:$0x75316420] }
 0x34a   : > { %v2479_v35 = vpop.permute.xlu0 %2478  ;;  %2563 = vst [vmem:[#allocation2 + $0x290] sm:$0x3] %v2503_v0  ;;  %v3113_v0 = vld.sshfl [vmem:[#allocation1 + $0x8] sm:$0xff pattern:$0x75316420] }
 0x34b   : > { %v2501_v41 = vsel %vm927_vm3, %v7037_v10, %v2479_v35  ;;  %v2502_v49 = vsel %vm927_vm3, %v2479_v35, %v2481_v4  ;;  %v7100_v51 = vpop.permute.xlu2 %2664  ;;  %v2930_v10 = vld [vmem:[%s5923_s17 + $0x38] sm:$0x77]  ;;  %1823 = vst [vmem:[#allocation2 + $0x330] sm:$0x38] %v1783_v13  ;;  %v3091_v13 = vld [vmem:[%s5923_s17 + $0x48] sm:$0x77] }
 0x34c   : > { %2541 = vst [vmem:[#allocation2 + $0x2a0] sm:$0x80] %v2501_v41  ;;  %v3112_v4 = vld.sshfl [vmem:[#allocation1] sm:$0xff pattern:$0x75316420]  ;;  %v3141_v7 = vrot.slane %v3113_v0, 5 }
 0x34d   : > { %2561 = vst [vmem:[#allocation2 + $0x138] sm:$0x3] %v2501_v41  ;;  %2983 = vrot.lane.b32.xlu1 %v2954_v24, %s5886_s24  ;;  %v3271_v0 = vld [vmem:[%s5923_s17 + $0x50] sm:$0x77] }
 0x34e   : > { %2542 = vst [vmem:[#allocation2 + $0x48] sm:$0x80] %v2502_v49 }
 0x34f   : > { %2562 = vst [vmem:[#allocation2 + $0xa8] sm:$0x3] %v2502_v49  ;;  %v2645_v63 = vpop.permute.xlu1 %2644  ;;  %v2968_v61 = vld.sshfl [vmem:[#allocation1 + $0x18] sm:$0xff pattern:$0x75316420] }
 0x350   : > { %2981 = vrot.lane.b32.xlu0 %v2953_v18, %s5886_s24  ;;  %2963 = vst [vmem:[#allocation1 + $0x20] ss:$2 sm:$0xff] %v2930_v10  ;;  %v2685_v44 = vsel %vm1108_vm4, %v2645_v63, %v7064_v36  ;;  %v2967_v40 = vld.sshfl [vmem:[#allocation1 + $0x10] sm:$0xff pattern:$0x75316420] }
 0x351   : > { %2991 = vrot.lane.b32.xlu2 %v2958_v1, %s5886_s24  ;;  %2725 = vst [vmem:[#allocation2 + $0x370] sm:$0x1c] %v2685_v44  ;;  %v3087_v49 = vld [vmem:[%s5923_s17 + $0x28] sm:$0x77]  ;;  %v3092_v10 = vld [vmem:[%s5923_s17 + $0x50] sm:$0x77] }
 0x352   : > { %v2643_v56 = vpop.permute.xlu0 %2642  ;;  %2974 = vst [vmem:[#allocation1 + $0x10] ss:$2 sm:$0xff] %v2933_v58 }
 0x353   : > { %v2684_v55 = vsel %vm1108_vm4, %v2643_v56, %v2645_v63  ;;  %v7113_v47 = vpop.permute.xlu2 %2670  ;;  %3120 = vst [vmem:[#allocation1] ss:$2 sm:$0xff] %v3087_v49  ;;  %v3089_v56 = vld [vmem:[%s5923_s17 + $0x38] sm:$0x77]  ;;  %v3270_v49 = vld [vmem:[%s5923_s17 + $0x48] sm:$0x77] }
 0x354   : > { %2724 = vst [vmem:[#allocation2 + $0x5c8] sm:$0x1c] %v2684_v55 }
 0x355   : > { %2989 = vrot.lane.b32.xlu1 %v2957_v21, %s5886_s24 }
 0x357   : > { %v2651_v16 = vpop.permute.xlu1 %2650  ;;  %v2969_v27 = vld.sshfl [vmem:[#allocation1 + $0x20] sm:$0xff pattern:$0x75316420] }
 0x358   : > { %2987 = vrot.lane.b32.xlu0 %v2956_v53, %s5886_s24  ;;  %v2688_v22 = vsel %vm1108_vm4, %v2651_v16, %v7075_v23 }
 0x359   : > { %2997 = vrot.lane.b32.xlu2 %v2965_v12, %s5886_s24  ;;  %2728 = vst [vmem:[#allocation2 + $0x590] sm:$0x1c] %v2688_v22  ;;  %v7140_v6 = vld.sshfl [vmem:[#allocation1 + $0x10] sm:$0xff pattern:$0x75316420] }
 0x35a   : > { %v2649_v3 = vpop.permute.xlu0 %2648  ;;  %v7142_v28 = vld.sshfl [vmem:[#allocation1 + $0x18] sm:$0xff pattern:$0x75316420]  ;;  %v7189_v62 = vld.sshfl [vmem:[#allocation1] sm:$0xff pattern:$0x75316420] }
 0x35b   : > { %v2686_v37 = vsel %vm1108_vm4, %v7064_v36, %v2649_v3  ;;  %v2687_v45 = vsel %vm1108_vm4, %v2649_v3, %v2651_v16  ;;  %v7126_v34 = vpop.permute.xlu2 %2676  ;;  %v2970_v36 = vld.sshfl [vmem:[#allocation1 + $0x28] sm:$0xff pattern:$0x75316420]  ;;  %3107 = vst [vmem:[#allocation1 + $0x10] ss:$2 sm:$0xff] %v3084_v32 }
 0x35c   : > { %2726 = vst [vmem:[#allocation2 + $0x30] sm:$0x1c] %v2686_v37  ;;  %v3090_v16 = vld [vmem:[%s5923_s17 + $0x40] sm:$0x77] }
 0x35d   : > { %2727 = vst [vmem:[#allocation2 + $0x2f0] sm:$0x1c] %v2687_v45  ;;  %2995 = vrot.lane.b32.xlu1 %v2960_v60, %s5886_s24 }
 0x35e   : > { %2975 = vst [vmem:[#allocation1 + $0x20] ss:$2 sm:$0xff] %v2934_v14  ;;  %v3263_v14 = vld [vmem:[%s5923_s17 + $0x10] sm:$0x77] }
 0x35f   : > { %v2657_v30 = vpop.permute.xlu1 %2656 }
 0x360   : > { %2993 = vrot.lane.b32.xlu0 %v2959_v20, %s5886_s24  ;;  %v2691_v29 = vsel %vm1108_vm4, %v2657_v30, %v7088_v2 }
 0x361   : > { %3003 = vrot.lane.b32.xlu2 %v2968_v61, %s5886_s24  ;;  %2731 = vst [vmem:[#allocation2 + $0x688] sm:$0x1c] %v2691_v29 }
 0x362   : > { %v2655_v19 = vpop.permute.xlu0 %2654  ;;  %v3114_v50 = vld.sshfl [vmem:[#allocation1 + $0x10] sm:$0xff pattern:$0x75316420]  ;;  %v7156_v18 = vld.sshfl [vmem:[#allocation1 + $0x18] sm:$0xff pattern:$0x75316420] }
 0x363   : > { %v2689_v57 = vsel %vm1108_vm4, %v7075_v23, %v2655_v19  ;;  %v2690_v39 = vsel %vm1108_vm4, %v2655_v19, %v2657_v30  ;;  %v7138_v59 = vpop.permute.xlu2 %2682  ;;  %v2971_v23 = vld.sshfl [vmem:[#allocation1 + $0x30] sm:$0xff pattern:$0x75316420]  ;;  %3121 = vst [vmem:[#allocation1 + $0x10] ss:$2 sm:$0xff] %v3088_v33 }
 0x364   : > { %2729 = vst [vmem:[#allocation2 + $0x3e0] sm:$0x1c] %v2689_v57  ;;  %v3264_v19 = vld [vmem:[%s5923_s17 + $0x18] sm:$0x77]  ;;  %v3265_v33 = vld [vmem:[%s5923_s17 + $0x20] sm:$0x77] }
 0x365   : > { %2730 = vst [vmem:[#allocation2 + $0x160] sm:$0x1c] %v2690_v39  ;;  %3001 = vrot.lane.b32.xlu1 %v2967_v40, %s5886_s24  ;;  %v2980_v54 = vld.sshfl [vmem:[#allocation1 + $0x20] sm:$0xff pattern:$0x75316420] }
 0x366   : > { %3109 = vst [vmem:[#allocation1 + $0x20] ss:$2 sm:$0xff] %v3085_v8 }
 0x367   : > { %v2663_v38 = vpop.permute.xlu1 %2662 }
 0x368   : > { %2999 = vrot.lane.b32.xlu0 %v2966_v11, %s5886_s24  ;;  %v2694_v46 = vsel %vm1108_vm4, %v2663_v38, %v7100_v51  ;;  %v7191_v11 = vld.sshfl [vmem:[#allocation1 + $0x8] sm:$0xff pattern:$0x75316420] }
 0x369   : > { %3009 = vrot.lane.b32.xlu2 %v2971_v23, %s5886_s24  ;;  %2734 = vst [vmem:[#allocation2 + $0x2c8] sm:$0x1c] %v2694_v46  ;;  %v3143_v23 = vrot.slane %v7156_v18, 5  ;;  %v3148_v46 = vrot.slane %v7189_v62, 5 }
 0x36a   : > { %v2661_v42 = vpop.permute.xlu0 %2660  ;;  %v7174_v52 = vld.sshfl [vmem:[#allocation1 + $0x10] sm:$0xff pattern:$0x75316420]  ;;  %3132 = vst [vmem:[#allocation1] ss:$2 sm:$0xff] %v3091_v13 }
 0x36b   : > { %v2692_v43 = vsel %vm1108_vm4, %v7088_v2, %v2661_v42  ;;  %v2693_v15 = vsel %vm1108_vm4, %v2661_v42, %v2663_v38  ;;  %v7154_v48 = vpop.permute.xlu2 %2826  ;;  %v3086_v2 = vld [vmem:[%s5923_s17 + $0x20] sm:$0x77] }
 0x36c   : > { %2732 = vst [vmem:[#allocation2 + $0x350] sm:$0x1c] %v2692_v43  ;;  %v3267_v43 = vld [vmem:[%s5923_s17 + $0x30] sm:$0x77] }
 0x36d   : > { %2733 = vst [vmem:[#allocation2 + $0x618] sm:$0x1c] %v2693_v15  ;;  %3007 = vrot.lane.b32.xlu1 %v2970_v36, %s5886_s24  ;;  %v3117_v20 = vld.sshfl [vmem:[#allocation1 + $0x28] sm:$0xff pattern:$0x75316420] }
 0x36e   : > { %3111 = vst [vmem:[#allocation1 + $0x30] ss:$2 sm:$0xff] %v3086_v2  ;;  %v7178_v63 = vld.sshfl [vmem:[#allocation1 + $0x20] sm:$0xff pattern:$0x75316420]  ;;  %v3145_v39 = vrot.slane %v3117_v20, 5 }
 0x36f   : > { %v2669_v35 = vpop.permute.xlu1 %2668  ;;  %3122 = vst [vmem:[#allocation1 + $0x20] ss:$2 sm:$0xff] %v3089_v56  ;;  %v3144_v42 = vrot.slane %v7178_v63, 5  ;;  %v3266_v15 = vld [vmem:[%s5923_s17 + $0x28] sm:$0x77] }
 0x370   : > { %3005 = vrot.lane.b32.xlu0 %v2969_v27, %s5886_s24  ;;  %v2697_v41 = vsel %vm1108_vm4, %v2669_v35, %v7113_v47  ;;  %v3140_v27 = vrot.slane %v3112_v4, 5 }
 0x371   : > { %3015 = vrot.lane.b32.xlu2 %v2977_v25, %s5886_s24  ;;  %2737 = vst [vmem:[#allocation2 + $0x2a8] sm:$0x1c] %v2697_v41  ;;  %v7219_v57 = vld.sshfl [vmem:[#allocation1 + $0x8] sm:$0xff pattern:$0x75316420] }
 0x372   : > { %v2667_v5 = vpop.permute.xlu0 %2666  ;;  %v7221_v30 = vld.sshfl [vmem:[#allocation1] sm:$0xff pattern:$0x75316420] }
 0x373   : > { %v2695_v24 = vsel %vm1108_vm4, %v7100_v51, %v2667_v5  ;;  %v2696_v53 = vsel %vm1108_vm4, %v2667_v5, %v2669_v35  ;;  %v7168_v1 = vpop.permute.xlu2 %2832  ;;  %v7171_v51 = vld.sshfl [vmem:[#allocation1 + $0x18] sm:$0xff pattern:$0x75316420]  ;;  %3283 = vst [vmem:[#allocation1] ss:$2 sm:$0xff] %v3263_v14 }
 0x374   : > { %2735 = vst [vmem:[#allocation2 + $0x200] sm:$0x1c] %v2695_v24  ;;  %v3151_v63 = vrot.slane %v7171_v51, 5 }
 0x375   : > { %2736 = vst [vmem:[#allocation2 + $0xd0] sm:$0x1c] %v2696_v53  ;;  %3013 = vrot.lane.b32.xlu1 %v2976_v26, %s5886_s24  ;;  %v7195_v3 = vld.sshfl [vmem:[#allocation1 + $0x30] sm:$0xff pattern:$0x75316420] }
 0x376   : > { %3133 = vst [vmem:[#allocation1 + $0x10] ss:$2 sm:$0xff] %v3092_v10  ;;  %v7199_v37 = vld.sshfl [vmem:[#allocation1 + $0x38] sm:$0xff pattern:$0x75316420]  ;;  %v3146_v41 = vrot.slane %v7195_v3, 5 }
 0x377   : > { %v2675_v55 = vpop.permute.xlu1 %2674  ;;  %3123 = vst [vmem:[#allocation1 + $0x30] ss:$2 sm:$0xff] %v3090_v16  ;;  %v7209_v36 = vld.sshfl [vmem:[#allocation1 + $0x20] sm:$0xff pattern:$0x75316420]  ;;  %v3147_v4 = vrot.slane %v7199_v37, 5 }
 0x378   : > { %3011 = vrot.lane.b32.xlu0 %v2972_v17, %s5886_s24  ;;  %v2700_v31 = vsel %vm1108_vm4, %v2675_v55, %v7126_v34  ;;  %v7211_v25 = vld.sshfl [vmem:[#allocation1 + $0x28] sm:$0xff pattern:$0x75316420]  ;;  %v3093_v26 = vld [vmem:[%s5923_s17 + $0x58] sm:$0x7]  ;;  %v3149_v37 = vrot.slane %v7191_v11, 5 }
 0x379   : > { %3021 = vrot.lane.b32.xlu2 %v2980_v54, %s5886_s24  ;;  %2740 = vst [vmem:[#allocation2 + $0x198] sm:$0x1c] %v2700_v31 }
 0x37a   : > { %v2673_v21 = vpop.permute.xlu0 %2672  ;;  %3134 = vst [vmem:[#allocation1 + $0x20] ss:$2 sm:$0xff] %v3093_v26  ;;  %v7247_v18 = vld.sshfl [vmem:[#allocation1 + $0x8] sm:$0xff pattern:$0x75316420] }
 0x37b   : > { %v2698_v60 = vsel %vm1108_vm4, %v7113_v47, %v2673_v21  ;;  %v2699_v44 = vsel %vm1108_vm4, %v2673_v21, %v2675_v55  ;;  %v7187_v12 = vpop.permute.xlu2 %2838  ;;  %v3142_v47 = vrot.slane %v3114_v50, 5  ;;  %v7245_v50 = vld.sshfl [vmem:[#allocation1] sm:$0xff pattern:$0x75316420] }
 0x37c   : > { %2738 = vst [vmem:[#allocation2 + $0x418] sm:$0x1c] %v2698_v60 }
 0x37d   : > { %2739 = vst [vmem:[#allocation2 + $0x308] sm:$0x1c] %v2699_v44  ;;  %3019 = vrot.lane.b32.xlu1 %v7142_v28, %s5886_s24  ;;  %v7216_v9 = vld.sshfl [vmem:[#allocation1 + $0x10] sm:$0xff pattern:$0x75316420] }
 0x37e   : > { %v7224_v29 = vld.sshfl [vmem:[#allocation1 + $0x18] sm:$0xff pattern:$0x75316420]  ;;  %v7233_v54 = vld.sshfl [vmem:[#allocation1 + $0x30] sm:$0xff pattern:$0x75316420] }
 0x37f   : > { %v2681_v61 = vpop.permute.xlu1 %2680  ;;  %3285 = vst [vmem:[#allocation1 + $0x10] ss:$2 sm:$0xff] %v3264_v19  ;;  %v7238_v38 = vld.sshfl [vmem:[#allocation1 + $0x38] sm:$0xff pattern:$0x75316420] }
 0x380   : > { %3017 = vrot.lane.b32.xlu0 %v7140_v6, %s5886_s24  ;;  %v2703_v58 = vsel %vm1108_vm4, %v2681_v61, %v7138_v59  ;;  %3289 = vst [vmem:[#allocation1 + $0x30] ss:$2 sm:$0xff] %v3266_v15 }
 0x381   : > { %3165 = vrot.lane.b32.xlu2 %v3142_v47, %s5887_s25  ;;  %2743 = vst [vmem:[#allocation2 + $0x290] sm:$0x1c] %v2703_v58  ;;  %v7249_v5 = vld.sshfl [vmem:[#allocation1 + $0x20] sm:$0xff pattern:$0x75316420] }
 0x382   : > { %v2679_v45 = vpop.permute.xlu0 %2678  ;;  %3298 = vst [vmem:[#allocation1] ss:$2 sm:$0xff] %v3267_v43  ;;  %v3269_v47 = vld [vmem:[%s5923_s17 + $0x40] sm:$0x77] }
 0x383   : > { %v2701_v22 = vsel %vm1108_vm4, %v7126_v34, %v2679_v45  ;;  %v2702_v40 = vsel %vm1108_vm4, %v2679_v45, %v2681_v61  ;;  %v7214_v34 = vpop.permute.xlu2 %2844  ;;  %3287 = vst [vmem:[#allocation1 + $0x20] ss:$2 sm:$0xff] %v3265_v33  ;;  %v3154_v61 = vrot.slane %v7233_v54, 5  ;;  %v3397_v54 = vld [vmem:[%s5923_s17 + $0x18] sm:$0x77] }
 0x384   : > { %2741 = vst [vmem:[#allocation2 + $0x138] sm:$0x1c] %v2701_v22 }
 0x385   : > { %2742 = vst [vmem:[#allocation2 + $0xa8] sm:$0x1c] %v2702_v40  ;;  %3163 = vrot.lane.b32.xlu1 %v3141_v7, %s5887_s25  ;;  %v3272_v40 = vld [vmem:[%s5923_s17 + $0x58] sm:$0x77]  ;;  %v3396_v7 = vld [vmem:[%s5923_s17 + $0x10] sm:$0x77] }
 0x386   : > { %v7264_v56 = vld.sshfl [vmem:[#allocation1 + $0x10] sm:$0xff pattern:$0x75316420]  ;;  %v7272_v60 = vld.sshfl [vmem:[#allocation1 + $0x18] sm:$0xff pattern:$0x75316420] }
 0x387   : > { %v2825_v59 = vpop.permute.xlu1 %2824  ;;  %v7266_v21 = vld.sshfl [vmem:[#allocation1 + $0x30] sm:$0xff pattern:$0x75316420]  ;;  %v7268_v20 = vld.sshfl [vmem:[#allocation1 + $0x38] sm:$0xff pattern:$0x75316420] }
 0x388   : > { %3161 = vrot.lane.b32.xlu0 %v3140_v27, %s5887_s25  ;;  %v2865_v28 = vsel %vm1309_vm5, %v2825_v59, %v7154_v48  ;;  %3301 = vst [vmem:[#allocation1 + $0x30] ss:$2 sm:$0xff] %v3270_v49  ;;  %v3400_v49 = vld [vmem:[%s5923_s17 + $0x30] sm:$0x77] }
 0x389   : > { %3171 = vrot.lane.b32.xlu2 %v3145_v39, %s5887_s25  ;;  %2905 = vst [vmem:[#allocation2 + $0x370] sm:$0xe0] %v2865_v28  ;;  %v7275_v55 = vld.sshfl [vmem:[#allocation1] sm:$0xff pattern:$0x75316420]  ;;  %v3152_v39 = vrot.slane %v7209_v36, 5 }
 0x38a   : > { %v2823_v32 = vpop.permute.xlu0 %2822  ;;  %v7277_v44 = vld.sshfl [vmem:[#allocation1 + $0x8] sm:$0xff pattern:$0x75316420]  ;;  %v7287_v16 = vld.sshfl [vmem:[#allocation1 + $0x20] sm:$0xff pattern:$0x75316420] }
 0x38b   : > { %v2864_v6 = vsel %vm1309_vm5, %v2823_v32, %v2825_v59  ;;  %v7235_v8 = vpop.permute.xlu2 %2850  ;;  %3310 = vst [vmem:[#allocation1] ss:$2 sm:$0xff] %v3271_v0  ;;  %v7290_v45 = vld.sshfl [vmem:[#allocation1 + $0x28] sm:$0xff pattern:$0x75316420]  ;;  %v3153_v59 = vrot.slane %v7211_v25, 5 }
 0x38c   : > { %2904 = vst [vmem:[#allocation2 + $0x5c8] sm:$0xe0] %v2864_v6  ;;  %v3398_v28 = vld [vmem:[%s5923_s17 + $0x20] sm:$0x77]  ;;  %v3157_v36 = vrot.slane %v7219_v57, 5 }
 0x38d   : > { %3169 = vrot.lane.b32.xlu1 %v3144_v42, %s5887_s25  ;;  %3300 = vst [vmem:[#allocation1 + $0x20] ss:$2 sm:$0xff] %v3269_v47  ;;  %v3158_v47 = vrot.slane %v7216_v9, 5  ;;  %v3403_v9 = vld [vmem:[%s5923_s17 + $0x48] sm:$0x77] }
 0x38f   : > { %v2831_v24 = vpop.permute.xlu1 %2830 }
 0x390   : > { %3167 = vrot.lane.b32.xlu0 %v3143_v23, %s5887_s25  ;;  %v2868_v53 = vsel %vm1309_vm5, %v2831_v24, %v7168_v1 }
 0x391   : > { %3177 = vrot.lane.b32.xlu2 %v3148_v46, %s5887_s25  ;;  %2908 = vst [vmem:[#allocation2 + $0x590] sm:$0xe0] %v2868_v53 }
 0x392   : > { %v2829_v2 = vpop.permute.xlu0 %2828  ;;  %v7310_v32 = vld.sshfl [vmem:[#allocation1] sm:$0xff pattern:$0x75316420] }
 0x393   : > { %v2866_v17 = vsel %vm1309_vm5, %v7154_v48, %v2829_v2  ;;  %v2867_v35 = vsel %vm1309_vm5, %v2829_v2, %v2831_v24  ;;  %v7261_v10 = vpop.permute.xlu2 %2856  ;;  %v3268_v48 = vld [vmem:[%s5923_s17 + $0x38] sm:$0x77]  ;;  %v7336_v24 = vld.sshfl [vmem:[#allocation1 + $0x30] sm:$0xff pattern:$0x75316420] }
 0x394   : > { %2906 = vst [vmem:[#allocation2 + $0x30] sm:$0xe0] %v2866_v17  ;;  %v7318_v23 = vld.sshfl [vmem:[#allocation1 + $0x20] sm:$0xff pattern:$0x75316420]  ;;  %v3155_v17 = vrot.slane %v7238_v38, 5 }
 0x395   : > { %2907 = vst [vmem:[#allocation2 + $0x2f0] sm:$0xe0] %v2867_v35  ;;  %3175 = vrot.lane.b32.xlu1 %v3147_v4, %s5887_s25  ;;  %v7320_v42 = vld.sshfl [vmem:[#allocation1 + $0x28] sm:$0xff pattern:$0x75316420]  ;;  %v3160_v4 = vrot.slane %v7249_v5, 5 }
 0x396   : > { %3299 = vst [vmem:[#allocation1 + $0x10] ss:$2 sm:$0xff] %v3268_v48  ;;  %v7339_v35 = vld.sshfl [vmem:[#allocation1 + $0x38] sm:$0xff pattern:$0x75316420] }
 0x397   : > { %v2837_v62 = vpop.permute.xlu1 %2836  ;;  %3422 = vst [vmem:[#allocation1 + $0x20] ss:$2 sm:$0xff] %v3398_v28  ;;  %v3405_v28 = vld [vmem:[%s5923_s17 + $0x58] sm:$0x77] }
 0x398   : > { %3173 = vrot.lane.b32.xlu0 %v3146_v41, %s5887_s25  ;;  %v2871_v3 = vsel %vm1309_vm5, %v2837_v62, %v7187_v12  ;;  %v3399_v41 = vld [vmem:[%s5923_s17 + $0x28] sm:$0x77] }
 0x399   : > { %3183 = vrot.lane.b32.xlu2 %v3151_v63, %s5887_s25  ;;  %2911 = vst [vmem:[#allocation2 + $0x688] sm:$0xe0] %v2871_v3  ;;  %v3401_v63 = vld [vmem:[%s5923_s17 + $0x38] sm:$0x77]  ;;  %v3402_v3 = vld [vmem:[%s5923_s17 + $0x40] sm:$0x77] }
 0x39a   : > { %v2835_v31 = vpop.permute.xlu0 %2834  ;;  %3424 = vst [vmem:[#allocation1 + $0x30] ss:$2 sm:$0xff] %v3399_v41 }
 0x39b   : > { %v2869_v13 = vsel %vm1309_vm5, %v7168_v1, %v2835_v31  ;;  %v2870_v51 = vsel %vm1309_vm5, %v2835_v31, %v2837_v62  ;;  %v3150_v1 = vrot.slane %v7174_v52, 5  ;;  %v7292_v22 = vpop.permute.xlu2 %2862 }
 0x39c   : > { %2909 = vst [vmem:[#allocation2 + $0x3e0] sm:$0xe0] %v2869_v13 }
 0x39d   : > { %2910 = vst [vmem:[#allocation2 + $0x160] sm:$0xe0] %v2870_v51  ;;  %3181 = vrot.lane.b32.xlu1 %v3150_v1, %s5887_s25  ;;  %v7298_v58 = vld.sshfl [vmem:[#allocation1 + $0x10] sm:$0xff pattern:$0x75316420] }
 0x39e   : > { %v7300_v27 = vld.sshfl [vmem:[#allocation1 + $0x18] sm:$0xff pattern:$0x75316420] }
 0x39f   : > { %v2843_v14 = vpop.permute.xlu1 %2842  ;;  %3311 = vst [vmem:[#allocation1 + $0x10] ss:$2 sm:$0xff] %v3272_v40 }
 0x3a0   : > { %3179 = vrot.lane.b32.xlu0 %v3149_v37, %s5887_s25  ;;  %v2874_v19 = vsel %vm1309_vm5, %v2843_v14, %v7214_v34  ;;  %v3159_v37 = vrot.slane %v7224_v29, 5 }
 0x3a1   : > { %3189 = vrot.lane.b32.xlu2 %v3154_v61, %s5887_s25  ;;  %2914 = vst [vmem:[#allocation2 + $0x2c8] sm:$0xe0] %v2874_v19  ;;  %v3429_v61 = vld.sshfl [vmem:[#allocation1 + $0x20] sm:$0xff pattern:$0x75316420] }
 0x3a2   : > { %v2841_v11 = vpop.permute.xlu0 %2840 }
 0x3a3   : > { %v2872_v52 = vsel %vm1309_vm5, %v7187_v12, %v2841_v11  ;;  %v2873_v26 = vsel %vm1309_vm5, %v2841_v11, %v2843_v14  ;;  %v7313_v12 = vld.sshfl [vmem:[#allocation1 + $0x8] sm:$0xff pattern:$0x75316420]  ;;  %v7315_v6 = vpop.permute.xlu2 %2985  ;;  %v3432_v14 = vld.sshfl [vmem:[#allocation1 + $0x38] sm:$0xff pattern:$0x75316420] }
 0x3a4   : > { %2912 = vst [vmem:[#allocation2 + $0x350] sm:$0xe0] %v2872_v52  ;;  %v3431_v52 = vld.sshfl [vmem:[#allocation1 + $0x30] sm:$0xff pattern:$0x75316420] }
 0x3a5   : > { %2913 = vst [vmem:[#allocation2 + $0x618] sm:$0xe0] %v2873_v26  ;;  %3187 = vrot.lane.b32.xlu1 %v3153_v59, %s5887_s25 }
 0x3a6   : > { %3418 = vst [vmem:[#allocation1] ss:$2 sm:$0xff] %v3396_v7  ;;  %v7326_v43 = vld.sshfl [vmem:[#allocation1 + $0x10] sm:$0xff pattern:$0x75316420] }
 0x3a7   : > { %v7328_v15 = vld.sshfl [vmem:[#allocation1 + $0x18] sm:$0xff pattern:$0x75316420]  ;;  %v2849_v33 = vpop.permute.xlu1 %2848  ;;  %3436 = vst [vmem:[#allocation1 + $0x30] ss:$2 sm:$0xff] %v3403_v9 }
 0x3a8   : > { %3185 = vrot.lane.b32.xlu0 %v3152_v39, %s5887_s25  ;;  %3420 = vst [vmem:[#allocation1 + $0x10] ss:$2 sm:$0xff] %v3397_v54  ;;  %v2877_v2 = vsel %vm1309_vm5, %v2849_v33, %v7235_v8 }
 0x3a9   : > { %3195 = vrot.lane.b32.xlu2 %v3157_v36, %s5887_s25  ;;  %2917 = vst [vmem:[#allocation2 + $0x2a8] sm:$0xe0] %v2877_v2 }
 0x3aa   : > { %v2847_v25 = vpop.permute.xlu0 %2846 }
 0x3ab   : > { %v2875_v46 = vsel %vm1309_vm5, %v7214_v34, %v2847_v25  ;;  %v2876_v57 = vsel %vm1309_vm5, %v2847_v25, %v2849_v33  ;;  %v3156_v34 = vrot.slane %v7221_v30, 5  ;;  %v7342_v53 = vpop.permute.xlu2 %2991 }
 0x3ac   : > { %2915 = vst [vmem:[#allocation2 + $0x200] sm:$0xe0] %v2875_v46 }
 0x3ad   : > { %2916 = vst [vmem:[#allocation2 + $0xd0] sm:$0xe0] %v2876_v57  ;;  %3193 = vrot.lane.b32.xlu1 %v3156_v34, %s5887_s25  ;;  %v3425_v0 = vld.sshfl [vmem:[#allocation1] sm:$0xff pattern:$0x75316420] }
 0x3ae   : > { %v3426_v48 = vld.sshfl [vmem:[#allocation1 + $0x8] sm:$0xff pattern:$0x75316420]  ;;  %v3453_v39 = vrot.slane %v3425_v0, 7  ;;  %v3457_v0 = vrot.slane %v3429_v61, 7 }
 0x3af   : > { %v2855_v31 = vpop.permute.xlu1 %2854  ;;  %v3427_v13 = vld.sshfl [vmem:[#allocation1 + $0x10] sm:$0xff pattern:$0x75316420]  ;;  %3433 = vst [vmem:[#allocation1] ss:$2 sm:$0xff] %v3400_v49  ;;  %v3454_v59 = vrot.slane %v3426_v48, 7 }
 0x3b0   : > { %3191 = vrot.lane.b32.xlu0 %v3155_v17, %s5887_s25  ;;  %v2880_v5 = vsel %vm1309_vm5, %v2855_v31, %v7261_v10  ;;  %v3428_v51 = vld.sshfl [vmem:[#allocation1 + $0x18] sm:$0xff pattern:$0x75316420]  ;;  %v3455_v40 = vrot.slane %v3427_v13, 7  ;;  %v3404_v17 = vld [vmem:[%s5923_s17 + $0x50] sm:$0x77] }
 0x3b1   : > { %3201 = vrot.lane.b32.xlu2 %v3160_v4, %s5887_s25  ;;  %2920 = vst [vmem:[#allocation2 + $0x198] sm:$0xe0] %v2880_v5 }
 0x3b2   : > { %v2853_v38 = vpop.permute.xlu0 %2852  ;;  %3434 = vst [vmem:[#allocation1 + $0x10] ss:$2 sm:$0xff] %v3401_v63 }
 0x3b3   : > { %v2878_v30 = vsel %vm1309_vm5, %v7235_v8, %v2853_v38  ;;  %v2879_v62 = vsel %vm1309_vm5, %v2853_v38, %v2855_v31  ;;  %v3430_v8 = vld.sshfl [vmem:[#allocation1 + $0x28] sm:$0xff pattern:$0x75316420]  ;;  %v7359_v1 = vpop.permute.xlu2 %2997  ;;  %v3456_v38 = vrot.slane %v3428_v51, 7  ;;  %v3578_v51 = vld [vmem:[%s5923_s17 + $0x20] sm:$0x77] }
 0x3b4   : > { %2918 = vst [vmem:[#allocation2 + $0x418] sm:$0xe0] %v2878_v30  ;;  %v3577_v30 = vld [vmem:[%s5923_s17 + $0x18] sm:$0x77] }
 0x3b5   : > { %2919 = vst [vmem:[#allocation2 + $0x308] sm:$0xe0] %v2879_v62  ;;  %3199 = vrot.lane.b32.xlu1 %v3159_v37, %s5887_s25 }
 0x3b6   : > { %3435 = vst [vmem:[#allocation1 + $0x20] ss:$2 sm:$0xff] %v3402_v3  ;;  %v3437_v25 = vld.sshfl [vmem:[#allocation1] sm:$0xff pattern:$0x75316420] }
 0x3b7   : > { %v2861_v7 = vpop.permute.xlu1 %2860  ;;  %v7376_v46 = vld.sshfl [vmem:[#allocation1 + $0x8] sm:$0xff pattern:$0x75316420]  ;;  %v3461_v63 = vrot.slane %v3437_v25, 7 }
 0x3b8   : > { %3197 = vrot.lane.b32.xlu0 %v3158_v47, %s5887_s25  ;;  %v2883_v19 = vsel %vm1309_vm5, %v2861_v7, %v7292_v22  ;;  %v3458_v22 = vrot.slane %v3430_v8, 7  ;;  %3445 = vst [vmem:[#allocation1] ss:$2 sm:$0xff] %v3404_v17  ;;  %v3459_v8 = vrot.slane %v3431_v52, 7 }
 0x3b9   : > { %3478 = vrot.lane.b32.xlu2 %v3455_v40, %s5880_s18  ;;  %2923 = vst [vmem:[#allocation2 + $0x290] sm:$0xe0] %v2883_v19  ;;  %v7373_v54 = vld.sshfl [vmem:[#allocation1 + $0x18] sm:$0xff pattern:$0x75316420]  ;;  %v3460_v40 = vrot.slane %v3432_v14, 7 }
 0x3ba   : > { %v2859_v11 = vpop.permute.xlu0 %2858  ;;  %v7378_v33 = vld.sshfl [vmem:[#allocation1 + $0x10] sm:$0xff pattern:$0x75316420] }
 0x3bb   : > { %v2881_v29 = vsel %vm1309_vm5, %v7261_v10, %v2859_v11  ;;  %v2882_v26 = vsel %vm1309_vm5, %v2859_v11, %v2861_v7  ;;  %v7371_v36 = vpop.permute.xlu2 %3003  ;;  %v3406_v10 = vld [vmem:[%s5923_s17 + $0x60] sm:$0x7]  ;;  %3446 = vst [vmem:[#allocation1 + $0x10] ss:$2 sm:$0xff] %v3405_v28  ;;  %v3576_v7 = vld [vmem:[%s5923_s17 + $0x10] sm:$0x77] }
 0x3bc   : > { %2921 = vst [vmem:[#allocation2 + $0x138] sm:$0xe0] %v2881_v29 }
 0x3bd   : > { %2922 = vst [vmem:[#allocation2 + $0xa8] sm:$0xe0] %v2882_v26  ;;  %v7381_v57 = vld.sshfl [vmem:[#allocation1 + $0x20] sm:$0xff pattern:$0x75316420]  ;;  %3476 = vrot.lane.b32.xlu1 %v3454_v59, %s5880_s18 }
 0x3be   : > { %v7384_v2 = vld.sshfl [vmem:[#allocation1 + $0x28] sm:$0xff pattern:$0x75316420]  ;;  %v3581_v26 = vld [vmem:[%s5923_s17 + $0x38] sm:$0x77] }
 0x3bf   : > { %v2984_v41 = vpop.permute.xlu1 %2983  ;;  %3447 = vst [vmem:[#allocation1 + $0x20] ss:$2 sm:$0xff] %v3406_v10  ;;  %v3449_v11 = vld.sshfl [vmem:[#allocation1 + $0x8] sm:$0xff pattern:$0x75316420]  ;;  %v3462_v10 = vrot.slane %v7376_v46, 7 }
 0x3c0   : > { %3474 = vrot.lane.b32.xlu0 %v3453_v39, %s5880_s18  ;;  %v3024_v49 = vsel %vm1490_vm6, %v2984_v41, %v7315_v6  ;;  %v7414_v52 = vld.sshfl [vmem:[#allocation1] sm:$0xff pattern:$0x75316420] }
 0x3c1   : > { %3484 = vrot.lane.b32.xlu2 %v3458_v22, %s5880_s18  ;;  %3064 = vst [vmem:[#allocation2 + $0x8] sm:$0x7] %v3024_v49  ;;  %v3582_v59 = vld [vmem:[%s5923_s17 + $0x40] sm:$0x77] }
 0x3c2   : > { %v2982_v34 = vpop.permute.xlu0 %2981  ;;  %v7395_v31 = vld.sshfl [vmem:[#allocation1 + $0x10] sm:$0xff pattern:$0x75316420]  ;;  %v7397_v13 = vld.sshfl [vmem:[#allocation1 + $0x18] sm:$0xff pattern:$0x75316420] }
 0x3c3   : > { %v3023_v4 = vsel %vm1490_vm6, %v2982_v34, %v2984_v41  ;;  %v7391_v48 = vpop.permute.xlu2 %3009  ;;  %3601 = vst [vmem:[#allocation1 + $0x11] ss:$2 sm:$0xff] %v3577_v30  ;;  %v3443_v22 = vld.sshfl [vmem:[#allocation1 + $0x30] sm:$0xff pattern:$0x75316420] }
 0x3c4   : > { %3063 = vst [vmem:[#allocation2 + $0x40] sm:$0x7] %v3023_v4  ;;  %v3467_v41 = vrot.slane %v3443_v22, 7 }
 0x3c5   : > { %3482 = vrot.lane.b32.xlu1 %v3457_v0, %s5880_s18  ;;  %3599 = vst [vmem:[#allocation1 + $0x1] ss:$2 sm:$0xff] %v3576_v7 }
 0x3c6   : > { %v7407_v61 = vld.sshfl [vmem:[#allocation1 + $0x20] sm:$0xff pattern:$0x75316420] }
 0x3c7   : > { %v2990_v47 = vpop.permute.xlu1 %2989  ;;  %3603 = vst [vmem:[#allocation1 + $0x21] ss:$2 sm:$0xff] %v3578_v51  ;;  %v3586_v51 = vld [vmem:[%s5923_s17 + $0x60] sm:$0x7]  ;;  %v3473_v22 = vrot.slane %v7407_v61, 7 }
 0x3c8   : > { %3480 = vrot.lane.b32.xlu0 %v3456_v38, %s5880_s18  ;;  %v3027_v37 = vsel %vm1490_vm6, %v2990_v47, %v7342_v53 }
 0x3c9   : > { %3490 = vrot.lane.b32.xlu2 %v3461_v63, %s5880_s18  ;;  %3067 = vst [vmem:[#allocation2 + $0x278] sm:$0x7] %v3027_v37  ;;  %v3470_v37 = vrot.slane %v3449_v11, 7 }
 0x3ca   : > { %v2988_v62 = vpop.permute.xlu0 %2987  ;;  %v7420_v39 = vld.sshfl [vmem:[#allocation1 + $0x10] sm:$0xff pattern:$0x75316420]  ;;  %v7428_v25 = vld.sshfl [vmem:[#allocation1 + $0x18] sm:$0xff pattern:$0x75316420] }
 0x3cb   : > { %v3025_v5 = vsel %vm1490_vm6, %v7315_v6, %v2988_v62  ;;  %v3026_v3 = vsel %vm1490_vm6, %v2988_v62, %v2990_v47  ;;  %v3464_v6 = vrot.slane %v7373_v54, 7  ;;  %v7412_v9 = vpop.permute.xlu2 %3015  ;;  %3615 = vst [vmem:[#allocation1 + $0x11] ss:$2 sm:$0xff] %v3581_v26  ;;  %v3465_v62 = vrot.slane %v7381_v57, 7  ;;  %v3585_v47 = vld [vmem:[%s5923_s17 + $0x58] sm:$0x77] }
 0x3cc   : > { %3065 = vst [vmem:[#allocation2 + $0x288] sm:$0x7] %v3025_v5  ;;  %v7441_v38 = vld.sshfl [vmem:[#allocation1] sm:$0xff pattern:$0x75316420]  ;;  %v3466_v5 = vrot.slane %v7384_v2, 7 }
 0x3cd   : > { %3066 = vst [vmem:[#allocation2 + $0x398] sm:$0x7] %v3026_v3  ;;  %3488 = vrot.lane.b32.xlu1 %v3460_v40, %s5880_s18  ;;  %v7443_v0 = vld.sshfl [vmem:[#allocation1 + $0x8] sm:$0xff pattern:$0x75316420] }
 0x3ce   : > { %v7431_v17 = vld.sshfl [vmem:[#allocation1 + $0x28] sm:$0xff pattern:$0x75316420]  ;;  %v7433_v34 = vld.sshfl [vmem:[#allocation1 + $0x20] sm:$0xff pattern:$0x75316420] }
 0x3cf   : > { %v2996_v19 = vpop.permute.xlu1 %2995  ;;  %3616 = vst [vmem:[#allocation1 + $0x21] ss:$2 sm:$0xff] %v3582_v59  ;;  %v3444_v2 = vld.sshfl [vmem:[#allocation1 + $0x38] sm:$0xff pattern:$0x75316420] }
 0x3d0   : > { %3486 = vrot.lane.b32.xlu0 %v3459_v8, %s5880_s18  ;;  %v3030_v54 = vsel %vm1490_vm6, %v2996_v19, %v7359_v1 }
 0x3d1   : > { %3496 = vrot.lane.b32.xlu2 %v3464_v6, %s5880_s18  ;;  %3070 = vst [vmem:[#allocation2 + $0x38] sm:$0x7] %v3030_v54  ;;  %v3738_v54 = vld [vmem:[%s5923_s17 + $0x20] sm:$0x77] }
 0x3d2   : > { %v2994_v29 = vpop.permute.xlu0 %2993  ;;  %v7454_v3 = vld.sshfl [vmem:[#allocation1 + $0x18] sm:$0xff pattern:$0x75316420]  ;;  %v7456_v8 = vld.sshfl [vmem:[#allocation1 + $0x10] sm:$0xff pattern:$0x75316420] }
 0x3d3   : > { %v3028_v14 = vsel %vm1490_vm6, %v7342_v53, %v2994_v29  ;;  %v3029_v28 = vsel %vm1490_vm6, %v2994_v29, %v2996_v19  ;;  %v3463_v53 = vrot.slane %v7378_v33, 7  ;;  %v7439_v4 = vpop.permute.xlu2 %3021  ;;  %3627 = vst [vmem:[#allocation1 + $0x11] ss:$2 sm:$0xff] %v3585_v47  ;;  %v3469_v19 = vrot.slane %v7414_v52, 7 }
 0x3d4   : > { %3068 = vst [vmem:[#allocation2 + $0x270] sm:$0x7] %v3028_v14  ;;  %v3468_v14 = vrot.slane %v3444_v2, 7  ;;  %v3736_v2 = vld [vmem:[%s5923_s17 + $0x10] sm:$0x77] }
 0x3d5   : > { %3069 = vst [vmem:[#allocation2 + $0x110] sm:$0x7] %v3029_v28  ;;  %3494 = vrot.lane.b32.xlu1 %v3463_v53, %s5880_s18  ;;  %v3579_v28 = vld [vmem:[%s5923_s17 + $0x28] sm:$0x77] }
 0x3d6   : > { %v7459_v40 = vld.sshfl [vmem:[#allocation1 + $0x20] sm:$0xff pattern:$0x75316420]  ;;  %v7461_v57 = vld.sshfl [vmem:[#allocation1 + $0x28] sm:$0xff pattern:$0x75316420] }
 0x3d7   : > { %v3002_v49 = vpop.permute.xlu1 %3001  ;;  %3628 = vst [vmem:[#allocation1 + $0x21] ss:$2 sm:$0xff] %v3586_v51 }
 0x3d8   : > { %3492 = vrot.lane.b32.xlu0 %v3462_v10, %s5880_s18  ;;  %v3033_v30 = vsel %vm1490_vm6, %v3002_v49, %v7371_v36  ;;  %v3737_v10 = vld [vmem:[%s5923_s17 + $0x18] sm:$0x77]  ;;  %3605 = vst [vmem:[#allocation1 + $0x31] ss:$2 sm:$0xff] %v3579_v28 }
 0x3d9   : > { %3502 = vrot.lane.b32.xlu2 %v3467_v41, %s5880_s18  ;;  %3073 = vst [vmem:[#allocation2 + $0x3a8] sm:$0x7] %v3033_v30  ;;  %v3584_v41 = vld [vmem:[%s5923_s17 + $0x50] sm:$0x77] }
 0x3da   : > { %v3000_v46 = vpop.permute.xlu0 %2999 }
 0x3db   : > { %v3031_v33 = vsel %vm1490_vm6, %v7359_v1, %v3000_v46  ;;  %v3032_v63 = vsel %vm1490_vm6, %v3000_v46, %v3002_v49  ;;  %v3580_v1 = vld [vmem:[%s5923_s17 + $0x30] sm:$0x77]  ;;  %v7471_v59 = vpop.permute.xlu2 %3165  ;;  %v7488_v49 = vld.sshfl [vmem:[#allocation1 + $0x18] sm:$0xff pattern:$0x75316420] }
 0x3dc   : > { %3071 = vst [vmem:[#allocation2 + $0x230] sm:$0x7] %v3031_v33  ;;  %v7483_v46 = vld.sshfl [vmem:[#allocation1 + $0x10] sm:$0xff pattern:$0x75316420] }
 0x3dd   : > { %3072 = vst [vmem:[#allocation2 + $0x620] sm:$0x7] %v3032_v63  ;;  %3500 = vrot.lane.b32.xlu1 %v3466_v5, %s5880_s18  ;;  %v3471_v5 = vrot.slane %v7395_v31, 7  ;;  %v3741_v31 = vld [vmem:[%s5923_s17 + $0x38] sm:$0x77] }
 0x3de   : > { %3614 = vst [vmem:[#allocation1 + $0x1] ss:$2 sm:$0xff] %v3580_v1  ;;  %v7486_v52 = vld.sshfl [vmem:[#allocation1 + $0x20] sm:$0xff pattern:$0x75316420]  ;;  %v3472_v1 = vrot.slane %v7397_v13, 7 }
 0x3df   : > { %v3008_v29 = vpop.permute.xlu1 %3007  ;;  %3762 = vst [vmem:[#allocation1 + $0x20] ss:$2 sm:$0xff] %v3738_v54  ;;  %v3612_v28 = vld.sshfl [vmem:[#allocation1 + $0x30] sm:$0xff pattern:$0x75316420] }
 0x3e0   : > { %3498 = vrot.lane.b32.xlu0 %v3465_v62, %s5880_s18  ;;  %v3036_v26 = vsel %vm1490_vm6, %v3008_v29, %v7391_v48  ;;  %3760 = vst [vmem:[#allocation1 + $0x10] ss:$2 sm:$0xff] %v3737_v10  ;;  %v3613_v54 = vld.sshfl [vmem:[#allocation1 + $0x38] sm:$0xff pattern:$0x75316420] }
 0x3e1   : > { %3508 = vrot.lane.b32.xlu2 %v3470_v37, %s5880_s18  ;;  %3076 = vst [vmem:[#allocation2 + $0x78] sm:$0x7] %v3036_v26  ;;  %v3583_v10 = vld [vmem:[%s5923_s17 + $0x48] sm:$0x77] }
 0x3e2   : > { %v3006_v6 = vpop.permute.xlu0 %3005  ;;  %3617 = vst [vmem:[#allocation1 + $0x31] ss:$2 sm:$0xff] %v3583_v10 }
 0x3e3   : > { %v3034_v11 = vsel %vm1490_vm6, %v7371_v36, %v3006_v6  ;;  %v3035_v7 = vsel %vm1490_vm6, %v3006_v6, %v3008_v29 }
 0x3e4   : > { %3074 = vst [vmem:[#allocation2 + $0x400] sm:$0x7] %v3034_v11 }
 0x3e5   : > { %3075 = vst [vmem:[#allocation2 + $0x1a8] sm:$0x7] %v3035_v7  ;;  %v7475_v36 = vld.sshfl [vmem:[#allocation1] sm:$0xff pattern:$0x75316420]  ;;  %3506 = vrot.lane.b32.xlu1 %v3469_v19, %s5880_s18 }
 0x3e6   : > { %v7478_v53 = vld.sshfl [vmem:[#allocation1 + $0x8] sm:$0xff pattern:$0x75316420]  ;;  %v3742_v7 = vld [vmem:[%s5923_s17 + $0x40] sm:$0x77] }
 0x3e7   : > { %3626 = vst [vmem:[#allocation1 + $0x1] ss:$2 sm:$0xff] %v3584_v41  ;;  %v3014_v30 = vpop.permute.xlu1 %3013  ;;  %v7510_v29 = vld.sshfl [vmem:[#allocation1 + $0x10] sm:$0xff pattern:$0x75316420] }
 0x3e8   : > { %3504 = vrot.lane.b32.xlu0 %v3468_v14, %s5880_s18  ;;  %v3039_v62 = vsel %vm1490_vm6, %v3014_v30, %v7412_v9  ;;  %v7512_v13 = vld.sshfl [vmem:[#allocation1 + $0x28] sm:$0xff pattern:$0x75316420]  ;;  %v7520_v19 = vld.sshfl [vmem:[#allocation1 + $0x18] sm:$0xff pattern:$0x75316420] }
 0x3e9   : > { %3514 = vrot.lane.b32.xlu2 %v3473_v22, %s5880_s18  ;;  %3079 = vst [vmem:[#allocation2 + $0x468] sm:$0x7] %v3039_v62 }
 0x3ea   : > { %v3012_v33 = vpop.permute.xlu0 %3011  ;;  %3774 = vst [vmem:[#allocation1 + $0x10] ss:$2 sm:$0xff] %v3741_v31 }
 0x3eb   : > { %v3037_v63 = vsel %vm1490_vm6, %v7391_v48, %v3012_v33  ;;  %v3038_v61 = vsel %vm1490_vm6, %v3012_v33, %v3014_v30  ;;  %v7498_v48 = vpop.permute.xlu2 %3171 }
 0x3ec   : > { %3077 = vst [vmem:[#allocation2 + $0x130] sm:$0x7] %v3037_v63  ;;  %v3740_v63 = vld [vmem:[%s5923_s17 + $0x30] sm:$0x77] }
 0x3ed   : > { %3078 = vst [vmem:[#allocation2 + $0x100] sm:$0x7] %v3038_v61  ;;  %3512 = vrot.lane.b32.xlu1 %v3472_v1, %s5880_s18  ;;  %v3746_v61 = vld [vmem:[%s5923_s17 + $0x60] sm:$0x7]  ;;  %v3745_v1 = vld [vmem:[%s5923_s17 + $0x58] sm:$0x77] }
 0x3ee   : > { %v7501_v47 = vld.sshfl [vmem:[#allocation1 + $0x8] sm:$0xff pattern:$0x75316420]  ;;  %v7503_v51 = vld.sshfl [vmem:[#allocation1] sm:$0xff pattern:$0x75316420] }
 0x3ef   : > { %v3020_v11 = vpop.permute.xlu1 %3019  ;;  %3758 = vst [vmem:[#allocation1] ss:$2 sm:$0xff] %v3736_v2 }
 0x3f0   : > { %3510 = vrot.lane.b32.xlu0 %v3471_v5, %s5880_s18  ;;  %v3042_v14 = vsel %vm1490_vm6, %v3020_v11, %v7439_v4 }
 0x3f1   : > { %3638 = vrot.lane.b32.xlu2 %v7420_v39, %s5881_s19  ;;  %3082 = vst [vmem:[#allocation2 + $0x6c0] sm:$0x7] %v3042_v14  ;;  %v7555_v31 = vld.sshfl [vmem:[#allocation1 + $0x18] sm:$0xff pattern:$0x75316420] }
 0x3f2   : > { %v3018_v37 = vpop.permute.xlu0 %3017 }
 0x3f3   : > { %v3040_v6 = vsel %vm1490_vm6, %v7412_v9, %v3018_v37  ;;  %v3041_v26 = vsel %vm1490_vm6, %v3018_v37, %v3020_v11  ;;  %v7522_v9 = vld.sshfl [vmem:[#allocation1 + $0x20] sm:$0xff pattern:$0x75316420]  ;;  %v7527_v4 = vpop.permute.xlu2 %3177 }
 0x3f4   : > { %3080 = vst [vmem:[#allocation2 + $0x248] sm:$0x7] %v3040_v6  ;;  %v7557_v6 = vld.sshfl [vmem:[#allocation1 + $0x10] sm:$0xff pattern:$0x75316420] }
 0x3f5   : > { %3081 = vst [vmem:[#allocation2 + $0x4a8] sm:$0x7] %v3041_v26  ;;  %3636 = vrot.lane.b32.xlu1 %v7443_v0, %s5881_s19  ;;  %v3744_v26 = vld [vmem:[%s5923_s17 + $0x50] sm:$0x77] }
 0x3f6   : > { %3775 = vst [vmem:[#allocation1 + $0x20] ss:$2 sm:$0xff] %v3742_v7  ;;  %v7531_v22 = vld.sshfl [vmem:[#allocation1] sm:$0xff pattern:$0x75316420] }
 0x3f7   : > { %v7533_v41 = vld.sshfl [vmem:[#allocation1 + $0x8] sm:$0xff pattern:$0x75316420]  ;;  %v3164_v33 = vpop.permute.xlu1 %3163  ;;  %3786 = vst [vmem:[#allocation1 + $0x10] ss:$2 sm:$0xff] %v3745_v1 }
 0x3f8   : > { %3634 = vrot.lane.b32.xlu0 %v7441_v38, %s5881_s19  ;;  %v3204_v38 = vsel %vm1650_vm7, %v3164_v33, %v7471_v59  ;;  %3773 = vst [vmem:[#allocation1] ss:$2 sm:$0xff] %v3740_v63 }
 0x3f9   : > { %3644 = vrot.lane.b32.xlu2 %v7431_v17, %s5881_s19  ;;  %3244 = vst [vmem:[#allocation2 + $0x8] sm:$0x38] %v3204_v38 }
 0x3fa   : > { %v3162_v39 = vpop.permute.xlu0 %3161 }
 0x3fb   : > { %v3203_v30 = vsel %vm1650_vm7, %v3162_v39, %v3164_v33  ;;  %v7551_v17 = vpop.permute.xlu2 %3183 }
 0x3fc   : > { %3243 = vst [vmem:[#allocation2 + $0x40] sm:$0x38] %v3203_v30  ;;  %v3624_v30 = vld.sshfl [vmem:[#allocation1 + $0x30] sm:$0xff pattern:$0x75316420] }
 0x3fd   : > { %v7541_v0 = vld.sshfl [vmem:[#allocation1 + $0x20] sm:$0xff pattern:$0x75316420]  ;;  %3642 = vrot.lane.b32.xlu1 %v7433_v34, %s5881_s19  ;;  %v7548_v62 = vld.sshfl [vmem:[#allocation1 + $0x28] sm:$0xff pattern:$0x75316420] }
 0x3fe   : > { %3787 = vst [vmem:[#allocation1 + $0x20] ss:$2 sm:$0xff] %v3746_v61  ;;  %v3936_v61 = vld [vmem:[%s5923_s17 + $0x10] sm:$0x77] }
 0x3ff   : > { %v3170_v2 = vpop.permute.xlu1 %3169  ;;  %v7564_v11 = vld.sshfl [vmem:[#allocation1] sm:$0xff pattern:$0x75316420]  ;;  %v7566_v7 = vld.sshfl [vmem:[#allocation1 + $0x8] sm:$0xff pattern:$0x75316420] }
 0x400   : > { %3640 = vrot.lane.b32.xlu0 %v7428_v25, %s5881_s19  ;;  %v3207_v34 = vsel %vm1650_vm7, %v3170_v2, %v7498_v48  ;;  %3785 = vst [vmem:[#allocation1] ss:$2 sm:$0xff] %v3744_v26 }
 0x401   : > { %3650 = vrot.lane.b32.xlu2 %v7475_v36, %s5881_s19  ;;  %3247 = vst [vmem:[#allocation2 + $0x278] sm:$0x38] %v3207_v34 }
 0x402   : > { %v3168_v5 = vpop.permute.xlu0 %3167 }
 0x403   : > { %v3205_v37 = vsel %vm1650_vm7, %v7471_v59, %v3168_v5  ;;  %v3206_v25 = vsel %vm1650_vm7, %v3168_v5, %v3170_v2  ;;  %v3938_v59 = vld [vmem:[%s5923_s17 + $0x20] sm:$0x77] }
 0x404   : > { %3245 = vst [vmem:[#allocation2 + $0x288] sm:$0x38] %v3205_v37  ;;  %v3937_v37 = vld [vmem:[%s5923_s17 + $0x18] sm:$0x77] }
 0x405   : > { %3246 = vst [vmem:[#allocation2 + $0x398] sm:$0x38] %v3206_v25  ;;  %3648 = vrot.lane.b32.xlu1 %v3613_v54, %s5881_s19  ;;  %v7572_v14 = vld.sshfl [vmem:[#allocation1 + $0x20] sm:$0xff pattern:$0x75316420] }
 0x406   : > { %8640 = vst [vmem:[#allocation3_spill] sm:$0xff] %v7572_v14  ;;  %v3942_v54 = vld [vmem:[%s5923_s17 + $0x40] sm:$0x77] }
 0x407   : > { %3962 = vst [vmem:[#allocation1 + $0x20] ss:$2 sm:$0xff] %v3938_v59  ;;  %v3176_v39 = vpop.permute.xlu1 %3175  ;;  %v7582_v38 = vld.sshfl [vmem:[#allocation1 + $0x8] sm:$0xff pattern:$0x75316420] }
 0x408   : > { %3646 = vrot.lane.b32.xlu0 %v3612_v28, %s5881_s19  ;;  %v3210_v63 = vsel %vm1650_vm7, %v3176_v39, %v7527_v4  ;;  %v3190_v28 = vpop.permute.xlu2 %3189  ;;  %v7604_v59 = vld.sshfl [vmem:[#allocation1 + $0x18] sm:$0xff pattern:$0x75316420] }
 0x409   : > { %3656 = vrot.lane.b32.xlu2 %v7454_v3, %s5881_s19  ;;  %3250 = vst [vmem:[#allocation2 + $0x38] sm:$0x38] %v3210_v63 }
 0x40a   : > { %v3174_v10 = vpop.permute.xlu0 %3173  ;;  %8641 = vst [vmem:[#allocation4_spill] sm:$0xff] %v7604_v59  ;;  %v3797_v59 = vrot.slane %v7522_v9, 1 }
 0x40b   : > { %v3208_v36 = vsel %vm1650_vm7, %v7498_v48, %v3174_v10  ;;  %v3209_v33 = vsel %vm1650_vm7, %v3174_v10, %v3176_v39  ;;  %v7586_v48 = vld.sshfl [vmem:[#allocation1] sm:$0xff pattern:$0x75316420] }
 0x40c   : > { %3248 = vst [vmem:[#allocation2 + $0x270] sm:$0x38] %v3208_v36  ;;  %v3946_v10 = vld [vmem:[%s5923_s17 + $0x60] sm:$0x7] }
 0x40d   : > { %3249 = vst [vmem:[#allocation2 + $0x110] sm:$0x38] %v3209_v33  ;;  %3654 = vrot.lane.b32.xlu1 %v7456_v8, %s5881_s19 }
 0x40e   : > { %v7591_v5 = vld.sshfl [vmem:[#allocation1 + $0x20] sm:$0xff pattern:$0x75316420]  ;;  %v7593_v1 = vld.sshfl [vmem:[#allocation1 + $0x28] sm:$0xff pattern:$0x75316420] }
 0x40f   : > { %3975 = vst [vmem:[#allocation1 + $0x20] ss:$2 sm:$0xff] %v3942_v54  ;;  %v3182_v25 = vpop.permute.xlu1 %3181  ;;  %v3625_v54 = vld.sshfl [vmem:[#allocation1 + $0x38] sm:$0xff pattern:$0x75316420] }
 0x410   : > { %3652 = vrot.lane.b32.xlu0 %v7478_v53, %s5881_s19  ;;  %3958 = vst [vmem:[#allocation1] ss:$2 sm:$0xff] %v3936_v61  ;;  %v7598_v53 = vld.sshfl [vmem:[#allocation1 + $0x10] sm:$0xff pattern:$0x75316420]  ;;  %v3213_v8 = vsel %vm1650_vm7, %v3182_v25, %v7551_v17  ;;  %v3196_v26 = vpop.permute.xlu2 %3195 }
 0x411   : > { %3662 = vrot.lane.b32.xlu2 %v3624_v30, %s5881_s19  ;;  %3253 = vst [vmem:[#allocation2 + $0x3a8] sm:$0x38] %v3213_v8  ;;  %v3940_v30 = vld [vmem:[%s5923_s17 + $0x30] sm:$0x77] }
 0x412   : > { %v3180_v3 = vpop.permute.xlu0 %3179  ;;  %3960 = vst [vmem:[#allocation1 + $0x10] ss:$2 sm:$0xff] %v3937_v37  ;;  %v3739_v37 = vld [vmem:[%s5923_s17 + $0x28] sm:$0x77] }
 0x413   : > { %v3211_v2 = vsel %vm1650_vm7, %v7527_v4, %v3180_v3  ;;  %v3212_v34 = vsel %vm1650_vm7, %v3180_v3, %v3182_v25  ;;  %3764 = vst [vmem:[#allocation1 + $0x30] ss:$2 sm:$0xff] %v3739_v37 }
 0x414   : > { %3251 = vst [vmem:[#allocation2 + $0x230] sm:$0x38] %v3211_v2  ;;  %v3941_v2 = vld [vmem:[%s5923_s17 + $0x38] sm:$0x77] }
 0x415   : > { %3252 = vst [vmem:[#allocation2 + $0x620] sm:$0x38] %v3212_v34  ;;  %3660 = vrot.lane.b32.xlu1 %v7461_v57, %s5881_s19 }
 0x416   : > { %v7611_v4 = vld.sshfl [vmem:[#allocation1 + $0x20] sm:$0xff pattern:$0x75316420]  ;;  %v7613_v36 = vld.sshfl [vmem:[#allocation1 + $0x28] sm:$0xff pattern:$0x75316420] }
 0x417   : > { %8642 = vst [vmem:[#allocation5_spill] sm:$0xff] %v7613_v36  ;;  %v3188_v63 = vpop.permute.xlu1 %3187  ;;  %v7622_v61 = vld.sshfl [vmem:[#allocation1] sm:$0xff pattern:$0x75316420] }
 0x418   : > { %3658 = vrot.lane.b32.xlu0 %v7459_v40, %s5881_s19  ;;  %3987 = vst [vmem:[#allocation1 + $0x20] ss:$2 sm:$0xff] %v3946_v10  ;;  %v3216_v57 = vsel %vm1650_vm7, %v3188_v63, %v3190_v28  ;;  %v7624_v3 = vld.sshfl [vmem:[#allocation1 + $0x8] sm:$0xff pattern:$0x75316420]  ;;  %v3202_v34 = vpop.permute.xlu2 %3201 }
 0x419   : > { %3668 = vrot.lane.b32.xlu2 %v7501_v47, %s5881_s19  ;;  %3256 = vst [vmem:[#allocation2 + $0x78] sm:$0x38] %v3216_v57  ;;  %v7630_v25 = vld.sshfl [vmem:[#allocation1 + $0x10] sm:$0xff pattern:$0x75316420] }
 0x41a   : > { %v3186_v39 = vpop.permute.xlu0 %3185  ;;  %3973 = vst [vmem:[#allocation1] ss:$2 sm:$0xff] %v3940_v30  ;;  %v7636_v8 = vld.sshfl [vmem:[#allocation1 + $0x18] sm:$0xff pattern:$0x75316420]  ;;  %v3795_v30 = vrot.slane %v7510_v29, 1 }
 0x41b   : > { %v3214_v33 = vsel %vm1650_vm7, %v7551_v17, %v3186_v39  ;;  %v3215_v40 = vsel %vm1650_vm7, %v3186_v39, %v3188_v63  ;;  %v4118_v17 = vld [vmem:[%s5923_s17 + $0x20] sm:$0x77]  ;;  %3974 = vst [vmem:[#allocation1 + $0x10] ss:$2 sm:$0xff] %v3941_v2  ;;  %v3945_v29 = vld [vmem:[%s5923_s17 + $0x58] sm:$0x77] }
 0x41c   : > { %3254 = vst [vmem:[#allocation2 + $0x400] sm:$0x38] %v3214_v33 }
 0x41d   : > { %3255 = vst [vmem:[#allocation2 + $0x1a8] sm:$0x38] %v3215_v40  ;;  %3666 = vrot.lane.b32.xlu1 %v7503_v51, %s5881_s19  ;;  %v4122_v51 = vld [vmem:[%s5923_s17 + $0x40] sm:$0x77] }
 0x41f   : > { %v7634_v47 = vld.sshfl [vmem:[#allocation1 + $0x20] sm:$0xff pattern:$0x75316420]  ;;  %v3194_v33 = vpop.permute.xlu1 %3193 }
 0x420   : > { %3664 = vrot.lane.b32.xlu0 %v3625_v54, %s5881_s19  ;;  %8643 = vst [vmem:[#allocation6_spill] sm:$0xff] %v7634_v47  ;;  %v3219_v54 = vsel %vm1650_vm7, %v3194_v33, %v3196_v26  ;;  %v3479_v2 = vpop.permute.xlu2 %3478  ;;  %v4117_v47 = vld [vmem:[%s5923_s17 + $0x18] sm:$0x77] }
 0x421   : > { %4142 = vst [vmem:[#allocation1 + $0x20] ss:$2 sm:$0xff] %v4118_v17  ;;  %3674 = vrot.lane.b32.xlu2 %v7486_v52, %s5881_s19  ;;  %v7648_v40 = vld.sshfl [vmem:[#allocation1] sm:$0xff pattern:$0x75316420] }
 0x422   : > { %v3192_v10 = vpop.permute.xlu0 %3191  ;;  %3259 = vst [vmem:[#allocation2 + $0x468] sm:$0x38] %v3219_v54  ;;  %v7656_v17 = vld.sshfl [vmem:[#allocation1 + $0x8] sm:$0xff pattern:$0x75316420]  ;;  %v3794_v54 = vrot.slane %v7533_v41, 1 }
 0x423   : > { %v3217_v39 = vsel %vm1650_vm7, %v3190_v28, %v3192_v10  ;;  %v3218_v63 = vsel %vm1650_vm7, %v3192_v10, %v3194_v33  ;;  %v3944_v28 = vld [vmem:[%s5923_s17 + $0x50] sm:$0x77]  ;;  %8644 = vst [vmem:[#allocation7_spill] sm:$0xff] %v7656_v17  ;;  %v3793_v33 = vrot.slane %v7531_v22, 1 }
 0x424   : > { %3257 = vst [vmem:[#allocation2 + $0x130] sm:$0x38] %v3217_v39 }
 0x425   : > { %3258 = vst [vmem:[#allocation2 + $0x100] sm:$0x38] %v3218_v63  ;;  %3672 = vrot.lane.b32.xlu1 %v7488_v49, %s5881_s19  ;;  %v7664_v63 = vld.sshfl [vmem:[#allocation1 + $0x10] sm:$0xff pattern:$0x75316420] }
 0x426   : > { %3985 = vst [vmem:[#allocation1] ss:$2 sm:$0xff] %v3944_v28  ;;  %v3771_v28 = vld.sshfl [vmem:[#allocation1 + $0x30] sm:$0xff pattern:$0x75316420] }
 0x427   : > { %v3200_v10 = vpop.permute.xlu1 %3199  ;;  %8645 = vst [vmem:[#allocation8_spill] sm:$0xff] %v7664_v63  ;;  %v4456_v63 = vld [vmem:[%s5923_s17 + $0x18] sm:$0x77] }
 0x428   : > { %3670 = vrot.lane.b32.xlu0 %v7483_v46, %s5881_s19  ;;  %v7652_v57 = vld.sshfl [vmem:[#allocation1 + $0x20] sm:$0xff pattern:$0x75316420]  ;;  %v7654_v37 = vld.sshfl [vmem:[#allocation1 + $0x28] sm:$0xff pattern:$0x75316420]  ;;  %v3222_v49 = vsel %vm1650_vm7, %v3200_v10, %v3202_v34 }
 0x429   : > { %4155 = vst [vmem:[#allocation1 + $0x20] ss:$2 sm:$0xff] %v4122_v51  ;;  %3818 = vrot.lane.b32.xlu2 %v3795_v30, %s5882_s20  ;;  %v7667_v51 = vld.sshfl [vmem:[#allocation1 + $0x18] sm:$0xff pattern:$0x75316420]  ;;  %v3798_v34 = vrot.slane %v7512_v13, 1 }
 0x42a   : > { %v3198_v52 = vpop.permute.xlu0 %3197  ;;  %8646 = vst [vmem:[#allocation9_spill] sm:$0xff] %v7667_v51  ;;  %v3743_v30 = vld [vmem:[%s5923_s17 + $0x48] sm:$0x77] }
 0x42b   : > { %v3220_v46 = vsel %vm1650_vm7, %v3196_v26, %v3198_v52  ;;  %v3221_v39 = vsel %vm1650_vm7, %v3198_v52, %v3200_v10  ;;  %3262 = vst [vmem:[#allocation2 + $0x6c0] sm:$0x38] %v3222_v49  ;;  %v4126_v26 = vld [vmem:[%s5923_s17 + $0x60] sm:$0x7] }
 0x42c   : > { %3260 = vst [vmem:[#allocation2 + $0x248] sm:$0x38] %v3220_v46  ;;  %v3772_v52 = vld.sshfl [vmem:[#allocation1 + $0x38] sm:$0xff pattern:$0x75316420] }
 0x42d   : > { %3261 = vst [vmem:[#allocation2 + $0x4a8] sm:$0x38] %v3221_v39  ;;  %3816 = vrot.lane.b32.xlu1 %v3794_v54, %s5882_s20  ;;  %v3796_v39 = vrot.slane %v7520_v19, 1  ;;  %v7685_v54 = vld.sshfl [vmem:[#allocation1 + $0x8] sm:$0xff pattern:$0x75316420] }
 0x42e   : > { %3986 = vst [vmem:[#allocation1 + $0x10] ss:$2 sm:$0xff] %v3945_v29  ;;  %v4116_v29 = vld [vmem:[%s5923_s17 + $0x10] sm:$0x77]  ;;  %v4298_v19 = vld [vmem:[%s5923_s17 + $0x20] sm:$0x77] }
 0x42f   : > { %3776 = vst [vmem:[#allocation1 + $0x30] ss:$2 sm:$0xff] %v3743_v30  ;;  %v3477_v10 = vpop.permute.xlu1 %3476  ;;  %v3485_v30 = vpop.permute.xlu2 %3484 }
 0x430   : > { %3814 = vrot.lane.b32.xlu0 %v3793_v33, %s5882_s20  ;;  %v7674_v22 = vld.sshfl [vmem:[#allocation1 + $0x20] sm:$0xff pattern:$0x75316420]  ;;  %v7676_v46 = vld.sshfl [vmem:[#allocation1 + $0x28] sm:$0xff pattern:$0x75316420]  ;;  %v3517_v13 = vsel %vm384_vm0, %v3477_v10, %v3479_v2 }
 0x431   : > { %8647 = vst [vmem:[#allocation10_spill] sm:$0xff] %v7674_v22  ;;  %3824 = vrot.lane.b32.xlu2 %v3798_v34, %s5882_s20  ;;  %v7683_v33 = vld.sshfl [vmem:[#allocation1] sm:$0xff pattern:$0x75316420]  ;;  %v3318_v34 = vrot.slane %v7264_v56, 2  ;;  %v3800_v56 = vrot.slane %v3772_v52, 1 }
 0x432   : > { %v3475_v41 = vpop.permute.xlu0 %3474  ;;  %8648 = vst [vmem:[#allocation11_spill] sm:$0xff] %v7676_v46  ;;  %v4460_v22 = vld [vmem:[%s5923_s17 + $0x38] sm:$0x77] }
 0x433   : > { %4167 = vst [vmem:[#allocation1 + $0x20] ss:$2 sm:$0xff] %v4126_v26  ;;  %v3516_v49 = vsel %vm384_vm0, %v3475_v41, %v3477_v10  ;;  %v3801_v26 = vrot.slane %v7564_v11, 1 }
 0x434   : > { %8649 = vst [vmem:[#allocation12_spill] sm:$0xff] %v7683_v33  ;;  %v4304_v33 = vld [vmem:[%s5923_s17 + $0x50] sm:$0x77] }
 0x435   : > { %8650 = vst [vmem:[#allocation13_spill] sm:$0xff] %v7685_v54  ;;  %v7689_v14 = vld.sshfl [vmem:[#allocation1 + $0x10] sm:$0xff pattern:$0x75316420]  ;;  %3822 = vrot.lane.b32.xlu1 %v3797_v59, %s5882_s20 }
 0x436   : > { %3556 = vst [vmem:[#allocation2 + $0x1b8] sm:$0xe] %v3516_v49  ;;  %v7694_v41 = vld.sshfl [vmem:[#allocation1 + $0x18] sm:$0xff pattern:$0x75316420] }
 0x437   : > { %3557 = vst [vmem:[#allocation2 + $0x460] sm:$0xe] %v3517_v13  ;;  %v3483_v13 = vpop.permute.xlu1 %3482  ;;  %v4120_v59 = vld [vmem:[%s5923_s17 + $0x30] sm:$0x77]  ;;  %v3491_v54 = vpop.permute.xlu2 %3490 }
 0x438   : > { %8651 = vst [vmem:[#allocation14_spill] sm:$0xff] %v7689_v14  ;;  %3820 = vrot.lane.b32.xlu0 %v3796_v39, %s5882_s20  ;;  %v3520_v39 = vsel %vm384_vm0, %v3483_v13, %v3485_v30 }
 0x439   : > { %4138 = vst [vmem:[#allocation1] ss:$2 sm:$0xff] %v4116_v29  ;;  %v3799_v29 = vrot.slane %v3771_v28, 1  ;;  %3830 = vrot.lane.b32.xlu2 %v3801_v26, %s5882_s20 }
 0x43a   : > { %8652 = vst [vmem:[#allocation15_spill] sm:$0xff] %v7694_v41  ;;  %v3481_v10 = vpop.permute.xlu0 %3480  ;;  %v7698_v9 = vld.sshfl [vmem:[#allocation1 + $0x20] sm:$0xff pattern:$0x75316420] }
 0x43b   : > { %4140 = vst [vmem:[#allocation1 + $0x10] ss:$2 sm:$0xff] %v4117_v47  ;;  %v3518_v49 = vsel %vm384_vm0, %v3479_v2, %v3481_v10  ;;  %v3519_v11 = vsel %vm384_vm0, %v3481_v10, %v3483_v13  ;;  %v3804_v2 = vrot.slane %v7555_v31, 1  ;;  %v7718_v13 = vld.sshfl [vmem:[#allocation1 + $0x38] sm:$0xff pattern:$0x75316420] }
 0x43c   : > { %8653 = vst [vmem:[#allocation16_spill] sm:$0xff] %v7698_v9 }
 0x43d   : > { %3378 = vst [vmem:[#allocation2 + $0x128] sm:$0x1] %v3318_v34  ;;  %3828 = vrot.lane.b32.xlu1 %v3800_v56, %s5882_s20 }
 0x43e   : > { %4322 = vst [vmem:[#allocation1 + $0x20] ss:$2 sm:$0xff] %v4298_v19  ;;  %v4302_v19 = vld [vmem:[%s5923_s17 + $0x40] sm:$0x77] }
 0x43f   : > { %3558 = vst [vmem:[#allocation2 + $0x128] sm:$0xe] %v3518_v49  ;;  %v3489_v49 = vpop.permute.xlu1 %3488 }
 0x440   : > { %3559 = vst [vmem:[#allocation2 + $0x668] sm:$0xe] %v3519_v11  ;;  %v7705_v47 = vld.sshfl [vmem:[#allocation1] sm:$0xff pattern:$0x75316420]  ;;  %3826 = vrot.lane.b32.xlu0 %v3799_v29, %s5882_s20  ;;  %v3523_v11 = vsel %vm384_vm0, %v3489_v49, %v3491_v54  ;;  %v3803_v29 = vrot.slane %v7557_v6, 1 }
 0x441   : > { %3560 = vst [vmem:[#allocation2 + $0x698] sm:$0xe] %v3520_v39  ;;  %v7707_v14 = vld.sshfl [vmem:[#allocation1 + $0x8] sm:$0xff pattern:$0x75316420]  ;;  %v3802_v39 = vrot.slane %v7566_v7, 1  ;;  %3836 = vrot.lane.b32.xlu2 %v3804_v2, %s5882_s20 }
 0x442   : > { %4153 = vst [vmem:[#allocation1] ss:$2 sm:$0xff] %v4120_v59  ;;  %v3487_v28 = vpop.permute.xlu0 %3486  ;;  %v4306_v59 = vld [vmem:[%s5923_s17 + $0x60] sm:$0x7]  ;;  %v4124_v2 = vld [vmem:[%s5923_s17 + $0x50] sm:$0x77] }
 0x443   : > { %3358 = vst [vmem:[#allocation2 + $0x288] sm:$0xc0] %v3318_v34  ;;  %v3521_v10 = vsel %vm384_vm0, %v3485_v30, %v3487_v28  ;;  %v3522_v31 = vsel %vm384_vm0, %v3487_v28, %v3489_v49  ;;  %v3939_v34 = vld [vmem:[%s5923_s17 + $0x28] sm:$0x77] }
 0x444   : > { %3561 = vst [vmem:[#allocation2 + $0x630] sm:$0xe] %v3521_v10  ;;  %v3783_v30 = vld.sshfl [vmem:[#allocation1 + $0x30] sm:$0xff pattern:$0x75316420] }
 0x445   : > { %v7713_v26 = vld.sshfl [vmem:[#allocation1 + $0x20] sm:$0xff pattern:$0x75316420]  ;;  %v7715_v52 = vld.sshfl [vmem:[#allocation1 + $0x28] sm:$0xff pattern:$0x75316420]  ;;  %3834 = vrot.lane.b32.xlu1 %v3803_v29, %s5882_s20 }
 0x446   : > { %4335 = vst [vmem:[#allocation1 + $0x20] ss:$2 sm:$0xff] %v4302_v19  ;;  %v3807_v56 = vrot.slane %v3783_v30, 1  ;;  %v3497_v19 = vpop.permute.xlu2 %3496  ;;  %v4121_v30 = vld [vmem:[%s5923_s17 + $0x38] sm:$0x77] }
 0x447   : > { %3562 = vst [vmem:[#allocation2 + $0x4f8] sm:$0xe] %v3522_v31  ;;  %v3495_v49 = vpop.permute.xlu1 %3494  ;;  %v7744_v41 = vld.sshfl [vmem:[#allocation1 + $0x10] sm:$0xff pattern:$0x75316420] }
 0x448   : > { %3563 = vst [vmem:[#allocation2 + $0x530] sm:$0xe] %v3523_v11  ;;  %3832 = vrot.lane.b32.xlu0 %v3802_v39, %s5882_s20  ;;  %v3526_v39 = vsel %vm384_vm0, %v3495_v49, %v3497_v19 }
 0x449   : > { %3964 = vst [vmem:[#allocation1 + $0x30] ss:$2 sm:$0xff] %v3939_v34  ;;  %v7735_v31 = vld.sshfl [vmem:[#allocation1] sm:$0xff pattern:$0x75316420]  ;;  %v3805_v34 = vrot.slane %v7541_v0, 1  ;;  %3842 = vrot.lane.b32.xlu2 %v3807_v56, %s5882_s20 }
 0x44a   : > { %v3493_v28 = vpop.permute.xlu0 %3492  ;;  %v7741_v29 = vld.sshfl [vmem:[#allocation1 + $0x8] sm:$0xff pattern:$0x75316420]  ;;  %3566 = vst [vmem:[#allocation2 + $0x1c8] sm:$0xe] %v3526_v39  ;;  %v3810_v56 = vrot.slane %v7582_v38, 1 }
 0x44b   : > { %v3524_v6 = vsel %vm384_vm0, %v3491_v54, %v3493_v28  ;;  %v3525_v11 = vsel %vm384_vm0, %v3493_v28, %v3495_v49  ;;  %8655 = vst [vmem:[#allocation18_spill] sm:$0xff] %v7741_v29  ;;  %v7746_v54 = vld.sshfl [vmem:[#allocation1 + $0x18] sm:$0xff pattern:$0x75316420]  ;;  %v4457_v0 = vld [vmem:[%s5923_s17 + $0x20] sm:$0x77] }
 0x44c   : > { %3564 = vst [vmem:[#allocation2 + $0x600] sm:$0xe] %v3524_v6  ;;  %v3943_v6 = vld [vmem:[%s5923_s17 + $0x48] sm:$0x77]  ;;  %v3319_v49 = vrot.slane %v7272_v60, 2 }
 0x44d   : > { %v7729_v7 = vld.sshfl [vmem:[#allocation1 + $0x20] sm:$0xff pattern:$0x75316420]  ;;  %v7731_v10 = vld.sshfl [vmem:[#allocation1 + $0x28] sm:$0xff pattern:$0x75316420] }
 0x44e   : > { %8654 = vst [vmem:[#allocation17_spill] sm:$0xff] %v7731_v10  ;;  %v3503_v39 = vpop.permute.xlu2 %3502 }
 0x44f   : > { %4347 = vst [vmem:[#allocation1 + $0x20] ss:$2 sm:$0xff] %v4306_v59  ;;  %v3806_v59 = vrot.slane %v7548_v62, 1 }
 0x450   : > { %3565 = vst [vmem:[#allocation2 + $0x380] sm:$0xe] %v3525_v11  ;;  %v7750_v28 = vld.sshfl [vmem:[#allocation1 + $0x30] sm:$0xff pattern:$0x75316420]  ;;  %3838 = vrot.lane.b32.xlu0 %v3805_v34, %s5882_s20  ;;  %v3501_v34 = vpop.permute.xlu1 %3500 }
 0x451   : > { %v7752_v9 = vld.sshfl [vmem:[#allocation1 + $0x38] sm:$0xff pattern:$0x75316420]  ;;  %4165 = vst [vmem:[#allocation1] ss:$2 sm:$0xff] %v4124_v2  ;;  %3840 = vrot.lane.b32.xlu1 %v3806_v59, %s5882_s20  ;;  %v3529_v60 = vsel %vm384_vm0, %v3501_v34, %v3503_v39  ;;  %3848 = vrot.lane.b32.xlu2 %v3810_v56, %s5882_s20  ;;  %v3809_v59 = vrot.slane %v7586_v48, 1 }
 0x452   : > { %3976 = vst [vmem:[#allocation1 + $0x30] ss:$2 sm:$0xff] %v3943_v6  ;;  %v3499_v11 = vpop.permute.xlu0 %3498  ;;  %v3808_v6 = vrot.slane %v7718_v13, 1 }
 0x453   : > { %4154 = vst [vmem:[#allocation1 + $0x10] ss:$2 sm:$0xff] %v4121_v30  ;;  %v3527_v2 = vsel %vm384_vm0, %v3497_v19, %v3499_v11  ;;  %v3528_v38 = vsel %vm384_vm0, %v3499_v11, %v3501_v34  ;;  %v4119_v30 = vld [vmem:[%s5923_s17 + $0x28] sm:$0x77]  ;;  %v4461_v19 = vld [vmem:[%s5923_s17 + $0x40] sm:$0x77] }
 0x454   : > { %3379 = vst [vmem:[#allocation2 + $0x668] sm:$0x1] %v3319_v49  ;;  %v4296_v11 = vld [vmem:[%s5923_s17 + $0x10] sm:$0x77] }
 0x455   : > { %3567 = vst [vmem:[#allocation2 + $0x1e8] sm:$0xe] %v3527_v2 }
 0x456   : > { %v7759_v62 = vld.sshfl [vmem:[#allocation1 + $0x20] sm:$0xff pattern:$0x75316420]  ;;  %3568 = vst [vmem:[#allocation2 + $0x20] sm:$0xe] %v3528_v38  ;;  %v7787_v46 = vpop.permute.xlu2 %3508 }
 0x457   : > { %8656 = vst [vmem:[#allocation19_spill] sm:$0xff] %v7759_v62 }
 0x458   : > { %4481 = vst [vmem:[#allocation1 + $0x20] ss:$2 sm:$0xff] %v4457_v0  ;;  %3844 = vrot.lane.b32.xlu0 %v3808_v6, %s5882_s20  ;;  %v7775_v2 = vld.sshfl [vmem:[#allocation1] sm:$0xff pattern:$0x75316420] }
 0x459   : > { %3569 = vst [vmem:[#allocation2 + $0x28] sm:$0xe] %v3529_v60  ;;  %v7768_v62 = vld.sshfl [vmem:[#allocation1 + $0x30] sm:$0xff pattern:$0x75316420]  ;;  %3846 = vrot.lane.b32.xlu1 %v3809_v59, %s5882_s20  ;;  %v3507_v60 = vpop.permute.xlu1 %3506 }
 0x45a   : > { %8657 = vst [vmem:[#allocation20_spill] sm:$0xff] %v7768_v62  ;;  %v7770_v0 = vld.sshfl [vmem:[#allocation1 + $0x38] sm:$0xff pattern:$0x75316420]  ;;  %v3505_v34 = vpop.permute.xlu0 %3504  ;;  %v4465_v59 = vld [vmem:[%s5923_s17 + $0x60] sm:$0x7]  ;;  %v3532_v10 = vsel %vm384_vm0, %v3507_v60, %v7787_v46 }
 0x45b   : > { %8658 = vst [vmem:[#allocation21_spill] sm:$0xff] %v7770_v0  ;;  %v7777_v13 = vld.sshfl [vmem:[#allocation1 + $0x8] sm:$0xff pattern:$0x75316420]  ;;  %v3530_v38 = vsel %vm384_vm0, %v3503_v39, %v3505_v34  ;;  %v3531_v6 = vsel %vm384_vm0, %v3505_v34, %v3507_v60  ;;  %v4125_v39 = vld [vmem:[%s5923_s17 + $0x58] sm:$0x77] }
 0x45c   : > { %4144 = vst [vmem:[#allocation1 + $0x30] ss:$2 sm:$0xff] %v4119_v30  ;;  %v3811_v30 = vrot.slane %v7598_v53, 1  ;;  %v7799_v34 = vld.sshfl [vmem:[#allocation1 + $0x10] sm:$0xff pattern:$0x75316420] }
 0x45d   : > { %8659 = vst [vmem:[#allocation22_spill] sm:$0xff] %v7775_v2  ;;  %v7802_v53 = vld.sshfl [vmem:[#allocation1 + $0x18] sm:$0xff pattern:$0x75316420] }
 0x45e   : > { %8660 = vst [vmem:[#allocation23_spill] sm:$0xff] %v7777_v13  ;;  %v4123_v13 = vld [vmem:[%s5923_s17 + $0x48] sm:$0x77] }
 0x45f   : > { %v7780_v56 = vld.sshfl [vmem:[#allocation1 + $0x20] sm:$0xff pattern:$0x75316420]  ;;  %v7782_v48 = vld.sshfl [vmem:[#allocation1 + $0x28] sm:$0xff pattern:$0x75316420] }
 0x460   : > { %4494 = vst [vmem:[#allocation1 + $0x20] ss:$2 sm:$0xff] %v4461_v19  ;;  %3850 = vrot.lane.b32.xlu0 %v3811_v30, %s5882_s20 }
 0x461   : > { %4318 = vst [vmem:[#allocation1] ss:$2 sm:$0xff] %v4296_v11  ;;  %v4300_v11 = vld [vmem:[%s5923_s17 + $0x30] sm:$0x77] }
 0x462   : > { %3570 = vst [vmem:[#allocation2 + $0x388] sm:$0xe] %v3530_v38 }
 0x463   : > { %3571 = vst [vmem:[#allocation2 + $0x170] sm:$0xe] %v3531_v6  ;;  %v7793_v19 = vld.sshfl [vmem:[#allocation1 + $0x30] sm:$0xff pattern:$0x75316420] }
 0x464   : > { %v7795_v2 = vld.sshfl [vmem:[#allocation1 + $0x38] sm:$0xff pattern:$0x75316420]  ;;  %8661 = vst [vmem:[#allocation24_spill] sm:$0xff] %v7799_v34  ;;  %v4462_v34 = vld [vmem:[%s5923_s17 + $0x48] sm:$0x77] }
 0x465   : > { %4156 = vst [vmem:[#allocation1 + $0x30] ss:$2 sm:$0xff] %v4123_v13  ;;  %v4299_v13 = vld [vmem:[%s5923_s17 + $0x28] sm:$0x77] }
 0x466   : > { %3572 = vst [vmem:[#allocation2 + $0x1b0] sm:$0xe] %v3532_v10  ;;  %v3316_v10 = vrot.slane %v7245_v50, 2  ;;  %v4303_v50 = vld [vmem:[%s5923_s17 + $0x48] sm:$0x77] }
 0x467   : > { %8662 = vst [vmem:[#allocation25_spill] sm:$0xff] %v7802_v53  ;;  %v7804_v38 = vld.sshfl [vmem:[#allocation1 + $0x20] sm:$0xff pattern:$0x75316420] }
 0x468   : > { %v7806_v60 = vld.sshfl [vmem:[#allocation1 + $0x28] sm:$0xff pattern:$0x75316420]  ;;  %v7808_v6 = vld.sshfl [vmem:[#allocation1] sm:$0xff pattern:$0x75316420] }
 0x469   : > { %8663 = vst [vmem:[#allocation26_spill] sm:$0xff] %v7806_v60  ;;  %v7810_v36 = vld.sshfl [vmem:[#allocation1 + $0x8] sm:$0xff pattern:$0x75316420] }
 0x46a   : > { %4506 = vst [vmem:[#allocation1 + $0x20] ss:$2 sm:$0xff] %v4465_v59  ;;  %v4297_v59 = vld [vmem:[%s5923_s17 + $0x18] sm:$0x77] }
 0x46b   : > { %4166 = vst [vmem:[#allocation1 + $0x10] ss:$2 sm:$0xff] %v4125_v39 }
 0x46c   : > { %4333 = vst [vmem:[#allocation1] ss:$2 sm:$0xff] %v4300_v11  ;;  %v7814_v30 = vld.sshfl [vmem:[#allocation1 + $0x30] sm:$0xff pattern:$0x75316420]  ;;  %v3317_v11 = vrot.slane %v7247_v18, 2 }
 0x46d   : > { %3359 = vst [vmem:[#allocation2 + $0x398] sm:$0xc0] %v3319_v49  ;;  %v7816_v0 = vld.sshfl [vmem:[#allocation1 + $0x38] sm:$0xff pattern:$0x75316420] }
 0x46e   : > { %8664 = vst [vmem:[#allocation27_spill] sm:$0xff] %v7814_v30  ;;  %v3515_v30 = vpop.permute.xlu2 %3514 }
 0x46f   : > { %8665 = vst [vmem:[#allocation28_spill] sm:$0xff] %v7816_v0 }
 0x470   : > { %4324 = vst [vmem:[#allocation1 + $0x30] ss:$2 sm:$0xff] %v4299_v13 }
 0x471   : > { %3376 = vst [vmem:[#allocation2 + $0x1b8] sm:$0x1] %v3316_v10 }
 0x472   : > { %3356 = vst [vmem:[#allocation2 + $0x40] sm:$0xc0] %v3316_v10  ;;  %v7820_v60 = vld.sshfl [vmem:[#allocation1 + $0x10] sm:$0xff pattern:$0x75316420]  ;;  %v3322_v10 = vrot.slane %v7266_v21, 2 }
 0x473   : > { %8666 = vst [vmem:[#allocation29_spill] sm:$0xff] %v7820_v60  ;;  %v7822_v39 = vld.sshfl [vmem:[#allocation1 + $0x18] sm:$0xff pattern:$0x75316420]  ;;  %v4455_v60 = vld [vmem:[%s5923_s17 + $0x10] sm:$0x77] }
 0x474   : > { %8667 = vst [vmem:[#allocation30_spill] sm:$0xff] %v7822_v39  ;;  %v7824_v62 = vld.sshfl [vmem:[#allocation1] sm:$0xff pattern:$0x75316420]  ;;  %v4458_v39 = vld [vmem:[%s5923_s17 + $0x28] sm:$0x77] }
 0x475   : > { %v7826_v49 = vld.sshfl [vmem:[#allocation1 + $0x8] sm:$0xff pattern:$0x75316420]  ;;  %4320 = vst [vmem:[#allocation1 + $0x10] ss:$2 sm:$0xff] %v4297_v59  ;;  %v3323_v21 = vrot.slane %v7268_v20, 2 }
 0x476   : > { %8668 = vst [vmem:[#allocation31_spill] sm:$0xff] %v7826_v49  ;;  %v4301_v59 = vld [vmem:[%s5923_s17 + $0x38] sm:$0x77] }
 0x477   : > { %4345 = vst [vmem:[#allocation1] ss:$2 sm:$0xff] %v4304_v33  ;;  %v7830_v13 = vld.sshfl [vmem:[#allocation1 + $0x30] sm:$0xff pattern:$0x75316420] }
 0x478   : > { %v7832_v0 = vld.sshfl [vmem:[#allocation1 + $0x38] sm:$0xff pattern:$0x75316420]  ;;  %3377 = vst [vmem:[#allocation2 + $0x460] sm:$0x1] %v3317_v11 }
 0x479   : > { %4336 = vst [vmem:[#allocation1 + $0x30] ss:$2 sm:$0xff] %v4303_v50  ;;  %v4305_v20 = vld [vmem:[%s5923_s17 + $0x58] sm:$0x77] }
 0x47a   : > { %3357 = vst [vmem:[#allocation2 + $0x8] sm:$0xc0] %v3317_v11 }
 0x47b   : > { %3382 = vst [vmem:[#allocation2 + $0x4f8] sm:$0x1] %v3322_v10 }
 0x47c   : > { %v7842_v18 = vld.sshfl [vmem:[#allocation1 + $0x10] sm:$0xff pattern:$0x75316420]  ;;  %v7844_v29 = vld.sshfl [vmem:[#allocation1 + $0x18] sm:$0xff pattern:$0x75316420] }
 0x47d   : > { %3362 = vst [vmem:[#allocation2 + $0x110] sm:$0xc0] %v3322_v10  ;;  %v7858_v10 = vpop.permute.xlu2 %3638 }
 0x47e   : > { %v7837_v17 = vld.sshfl [vmem:[#allocation1] sm:$0xff pattern:$0x75316420]  ;;  %v7839_v33 = vld.sshfl [vmem:[#allocation1 + $0x8] sm:$0xff pattern:$0x75316420] }
 0x47f   : > { %8669 = vst [vmem:[#allocation32_spill] sm:$0xff] %v7837_v17  ;;  %v4459_v17 = vld [vmem:[%s5923_s17 + $0x30] sm:$0x77] }
 0x480   : > { %8670 = vst [vmem:[#allocation33_spill] sm:$0xff] %v7839_v33  ;;  %v7847_v50 = vld.sshfl [vmem:[#allocation1 + $0x30] sm:$0xff pattern:$0x75316420] }
 0x481   : > { %4477 = vst [vmem:[#allocation1] ss:$2 sm:$0xff] %v4455_v60  ;;  %v7849_v11 = vld.sshfl [vmem:[#allocation1 + $0x38] sm:$0xff pattern:$0x75316420]  ;;  %v3320_v60 = vrot.slane %v7287_v16, 2 }
 0x482   : > { %8671 = vst [vmem:[#allocation34_spill] sm:$0xff] %v7847_v50  ;;  %v4463_v16 = vld [vmem:[%s5923_s17 + $0x50] sm:$0x77] }
 0x483   : > { %8672 = vst [vmem:[#allocation35_spill] sm:$0xff] %v7849_v11 }
 0x484   : > { %4483 = vst [vmem:[#allocation1 + $0x30] ss:$2 sm:$0xff] %v4458_v39 }
 0x485   : > { %4334 = vst [vmem:[#allocation1 + $0x10] ss:$2 sm:$0xff] %v4301_v59  ;;  %v7876_v51 = vpop.permute.xlu2 %3644 }
 0x486   : > { %3383 = vst [vmem:[#allocation2 + $0x530] sm:$0x1] %v3323_v21 }
 0x487   : > { %3363 = vst [vmem:[#allocation2 + $0x38] sm:$0xc0] %v3323_v21 }
 0x488   : > { %v7853_v33 = vld.sshfl [vmem:[#allocation1] sm:$0xff pattern:$0x75316420]  ;;  %v7855_v49 = vld.sshfl [vmem:[#allocation1 + $0x8] sm:$0xff pattern:$0x75316420] }
 0x489   : > { %4492 = vst [vmem:[#allocation1] ss:$2 sm:$0xff] %v4459_v17  ;;  %v3321_v17 = vrot.slane %v7290_v45, 2  ;;  %v4637_v45 = vld [vmem:[%s5923_s17 + $0x20] sm:$0x77] }
 0x48a   : > { %3380 = vst [vmem:[#allocation2 + $0x698] sm:$0x1] %v3320_v60 }
 0x48b   : > { %v7861_v11 = vld.sshfl [vmem:[#allocation1 + $0x30] sm:$0xff pattern:$0x75316420]  ;;  %v7863_v39 = vld.sshfl [vmem:[#allocation1 + $0x38] sm:$0xff pattern:$0x75316420] }
 0x48c   : > { %4495 = vst [vmem:[#allocation1 + $0x30] ss:$2 sm:$0xff] %v4462_v34  ;;  %v7865_v59 = vld.sshfl [vmem:[#allocation1 + $0x10] sm:$0xff pattern:$0x75316420]  ;;  %v3326_v34 = vrot.slane %v7298_v58, 2 }
 0x48d   : > { %8673 = vst [vmem:[#allocation36_spill] sm:$0xff] %v7865_v59  ;;  %v7867_v21 = vld.sshfl [vmem:[#allocation1 + $0x18] sm:$0xff pattern:$0x75316420] }
 0x48e   : > { %8674 = vst [vmem:[#allocation37_spill] sm:$0xff] %v7867_v21 }
 0x48f   : > { %4346 = vst [vmem:[#allocation1 + $0x10] ss:$2 sm:$0xff] %v4305_v20  ;;  %v3511_v20 = vpop.permute.xlu0 %3510 }
 0x490   : > { %3360 = vst [vmem:[#allocation2 + $0x278] sm:$0xc0] %v3320_v60  ;;  %v7871_v50 = vld.sshfl [vmem:[#allocation1] sm:$0xff pattern:$0x75316420] }
 0x491   : > { %v7873_v53 = vld.sshfl [vmem:[#allocation1 + $0x8] sm:$0xff pattern:$0x75316420]  ;;  %3381 = vst [vmem:[#allocation2 + $0x630] sm:$0x1] %v3321_v17 }
 0x492   : > { %8675 = vst [vmem:[#allocation38_spill] sm:$0xff] %v7873_v53  ;;  %v7883_v60 = vld.sshfl [vmem:[#allocation1 + $0x20] sm:$0xff pattern:$0x75316420]  ;;  %v3513_v53 = vpop.permute.xlu1 %3512 }
 0x493   : > { %4504 = vst [vmem:[#allocation1] ss:$2 sm:$0xff] %v4463_v16  ;;  %v3533_v16 = vsel %vm384_vm0, %v7787_v46, %v3511_v20  ;;  %v3535_v58 = vsel %vm384_vm0, %v3513_v53, %v3515_v30 }
 0x494   : > { %3361 = vst [vmem:[#allocation2 + $0x270] sm:$0xc0] %v3321_v17  ;;  %v3534_v17 = vsel %vm384_vm0, %v3511_v20, %v3513_v53  ;;  %v3324_v20 = vrot.slane %v7275_v55, 2 }
 0x495   : > { %8678 = vst [vmem:[#allocation41_spill] sm:$0xff] %v7883_v60 }
 0x496   : > { %v7879_v59 = vld.sshfl [vmem:[#allocation1 + $0x10] sm:$0xff pattern:$0x75316420]  ;;  %v7881_v21 = vld.sshfl [vmem:[#allocation1 + $0x18] sm:$0xff pattern:$0x75316420] }
 0x497   : > { %8676 = vst [vmem:[#allocation39_spill] sm:$0xff] %v7879_v59 }
 0x498   : > { %8677 = vst [vmem:[#allocation40_spill] sm:$0xff] %v7881_v21  ;;  %v7896_v21 = vpop.permute.xlu2 %3650 }
 0x499   : > { %4479 = vst [vmem:[#allocation1 + $0x10] ss:$2 sm:$0xff] %v4456_v63  ;;  %v3327_v63 = vrot.slane %v7300_v27, 2 }
 0x49a   : > { %3386 = vst [vmem:[#allocation2 + $0x1c8] sm:$0x1] %v3326_v34  ;;  %v3637_v30 = vpop.permute.xlu1 %3636 }
 0x49b   : > { %4661 = vst [vmem:[#allocation1 + $0x20] ss:$2 sm:$0xff] %v4637_v45  ;;  %v3635_v45 = vpop.permute.xlu0 %3634  ;;  %v3677_v27 = vsel %vm565_vm1, %v3637_v30, %v7858_v10 }
 0x49c   : > { %3573 = vst [vmem:[#allocation2 + $0x438] sm:$0xe] %v3533_v16  ;;  %v3676_v16 = vsel %vm565_vm1, %v3635_v45, %v3637_v30  ;;  %v4636_v30 = vld [vmem:[%s5923_s17 + $0x18] sm:$0x77] }
 0x49d   : > { %3574 = vst [vmem:[#allocation2 + $0x70] sm:$0xe] %v3534_v17  ;;  %v4464_v17 = vld [vmem:[%s5923_s17 + $0x58] sm:$0x77] }
 0x49e   : > { %3575 = vst [vmem:[#allocation2 + $0xe8] sm:$0xe] %v3535_v58 }
 0x49f   : > { %3366 = vst [vmem:[#allocation2 + $0x3a8] sm:$0xc0] %v3326_v34 }
 0x4a0   : > { %v7892_v60 = vld.sshfl [vmem:[#allocation1 + $0x10] sm:$0xff pattern:$0x75316420]  ;;  %v7894_v59 = vld.sshfl [vmem:[#allocation1 + $0x18] sm:$0xff pattern:$0x75316420]  ;;  %v7909_v58 = vpop.permute.xlu2 %3656 }
 0x4a1   : > { %4493 = vst [vmem:[#allocation1 + $0x10] ss:$2 sm:$0xff] %v4460_v22  ;;  %v3325_v22 = vrot.slane %v7277_v44, 2 }
 0x4a2   : > { %v4668_v46 = vld.sshfl [vmem:[#allocation1 + $0x20] sm:$0xff pattern:$0x75316420]  ;;  %3387 = vst [vmem:[#allocation2 + $0x1e8] sm:$0x1] %v3327_v63  ;;  %v3643_v45 = vpop.permute.xlu1 %3642 }
 0x4a3   : > { %v4696_v53 = vrot.slane %v4668_v46, 2  ;;  %3367 = vst [vmem:[#allocation2 + $0x400] sm:$0xc0] %v3327_v63  ;;  %v3641_v63 = vpop.permute.xlu0 %3640  ;;  %v3680_v44 = vsel %vm565_vm1, %v3643_v45, %v7876_v51 }
 0x4a4   : > { %3384 = vst [vmem:[#allocation2 + $0x600] sm:$0x1] %v3324_v20  ;;  %v3678_v46 = vsel %vm565_vm1, %v7858_v10, %v3641_v63  ;;  %v4516_v10 = vrot.slane %v7780_v56, 5 }
 0x4a5   : > { %4721 = vrot.lane.b32.xlu0 %v4696_v53, %s5887_s25  ;;  %3716 = vst [vmem:[#allocation2 + $0x1b8] sm:$0x70] %v3676_v16  ;;  %v3679_v53 = vsel %vm565_vm1, %v3641_v63, %v3643_v45 }
 0x4a6   : > { %3717 = vst [vmem:[#allocation2 + $0x460] sm:$0x70] %v3677_v27 }
 0x4a7   : > { %3364 = vst [vmem:[#allocation2 + $0x230] sm:$0xc0] %v3324_v20  ;;  %v3330_v20 = vrot.slane %v7336_v24, 2 }
 0x4a8   : > { %v7905_v34 = vld.sshfl [vmem:[#allocation1 + $0x10] sm:$0xff pattern:$0x75316420]  ;;  %v7907_v55 = vld.sshfl [vmem:[#allocation1 + $0x18] sm:$0xff pattern:$0x75316420] }
 0x4a9   : > { %4505 = vst [vmem:[#allocation1 + $0x10] ss:$2 sm:$0xff] %v4464_v17  ;;  %v3331_v17 = vrot.slane %v7339_v35, 2  ;;  %v7934_v35 = vld.sshfl [vmem:[#allocation1 + $0x8] sm:$0xff pattern:$0x75316420] }
 0x4aa   : > { %3385 = vst [vmem:[#allocation2 + $0x380] sm:$0x1] %v3325_v22 }
 0x4ab   : > { %3365 = vst [vmem:[#allocation2 + $0x620] sm:$0xc0] %v3325_v22  ;;  %v3647_v22 = vpop.permute.xlu0 %3646 }
 0x4ac   : > { %3718 = vst [vmem:[#allocation2 + $0x128] sm:$0x70] %v3678_v46  ;;  %v3681_v63 = vsel %vm565_vm1, %v7876_v51, %v3647_v22  ;;  %v3663_v46 = vpop.permute.xlu2 %3662 }
 0x4ad   : > { %4361 = vrot.lane.b32.xlu0 %v7713_v26, %s5885_s23  ;;  %3719 = vst [vmem:[#allocation2 + $0x668] sm:$0x70] %v3679_v53  ;;  %v3649_v26 = vpop.permute.xlu1 %3648  ;;  %v7931_v53 = vld.sshfl [vmem:[#allocation1] sm:$0xff pattern:$0x75316420] }
 0x4ae   : > { %3720 = vst [vmem:[#allocation2 + $0x698] sm:$0x70] %v3680_v44  ;;  %v3682_v24 = vsel %vm565_vm1, %v3647_v22, %v3649_v26  ;;  %v3683_v45 = vsel %vm565_vm1, %v3649_v26, %v7896_v21  ;;  %v3328_v22 = vrot.slane %v7318_v23, 2 }
 0x4af   : > { %3390 = vst [vmem:[#allocation2 + $0x388] sm:$0x1] %v3330_v20 }
 0x4b0   : > { %v7920_v16 = vld.sshfl [vmem:[#allocation1 + $0x10] sm:$0xff pattern:$0x75316420]  ;;  %v7922_v27 = vld.sshfl [vmem:[#allocation1 + $0x18] sm:$0xff pattern:$0x75316420] }
 0x4b1   : > { %4659 = vst [vmem:[#allocation1 + $0x10] ss:$2 sm:$0xff] %v4636_v30 }
 0x4b2   : > { %3370 = vst [vmem:[#allocation2 + $0x130] sm:$0xc0] %v3330_v20  ;;  %v4635_v20 = vld [vmem:[%s5923_s17 + $0x10] sm:$0x77] }
 0x4b3   : > { %3391 = vst [vmem:[#allocation2 + $0x170] sm:$0x1] %v3331_v17  ;;  %v3653_v26 = vpop.permute.xlu0 %3652 }
 0x4b4   : > { %3721 = vst [vmem:[#allocation2 + $0x630] sm:$0x70] %v3681_v63  ;;  %v3997_v63 = vrot.slane %v7591_v5, 6  ;;  %v3669_v23 = vpop.permute.xlu2 %3668 }
 0x4b5   : > { %4541 = vrot.lane.b32.xlu0 %v4516_v10, %s5886_s24  ;;  %3722 = vst [vmem:[#allocation2 + $0x4f8] sm:$0x70] %v3682_v24  ;;  %v3684_v10 = vsel %vm565_vm1, %v7896_v21, %v3653_v26  ;;  %v3655_v24 = vpop.permute.xlu1 %3654  ;;  %v3334_v21 = vrot.slane %v7326_v43, 2  ;;  %v3335_v43 = vrot.slane %v7328_v15, 2 }
 0x4b6   : > { %3723 = vst [vmem:[#allocation2 + $0x530] sm:$0x70] %v3683_v45  ;;  %v3685_v45 = vsel %vm565_vm1, %v3653_v26, %v3655_v24  ;;  %v3686_v5 = vsel %vm565_vm1, %v3655_v24, %v7909_v58  ;;  %v7970_v26 = vld.sshfl [vmem:[#allocation1 + $0x38] sm:$0xff pattern:$0x75316420]  ;;  %v3996_v24 = vrot.slane %v7636_v8, 6 }
 0x4b7   : > { %4657 = vst [vmem:[#allocation1] ss:$2 sm:$0xff] %v4635_v20 }
 0x4b8   : > { %v4667_v56 = vld.sshfl [vmem:[#allocation1 + $0x18] sm:$0xff pattern:$0x75316420]  ;;  %v4666_v51 = vld.sshfl [vmem:[#allocation1 + $0x10] sm:$0xff pattern:$0x75316420] }
 0x4b9   : > { %v4695_v44 = vrot.slane %v4667_v56, 2  ;;  %v4694_v30 = vrot.slane %v4666_v51, 2  ;;  %3371 = vst [vmem:[#allocation2 + $0x100] sm:$0xc0] %v3331_v17  ;;  %v3329_v56 = vrot.slane %v7320_v42, 2  ;;  %v4177_v17 = vrot.slane %v7652_v57, 3 }
 0x4ba   : > { %3388 = vst [vmem:[#allocation2 + $0x20] sm:$0x1] %v3328_v22 }
 0x4bb   : > { %4719 = vrot.lane.b32.xlu2 %v4695_v44, %s5887_s25  ;;  %4717 = vrot.lane.b32.xlu1 %v4694_v30, %s5887_s25  ;;  %3724 = vst [vmem:[#allocation2 + $0x600] sm:$0x70] %v3684_v10  ;;  %v3659_v51 = vpop.permute.xlu0 %3658  ;;  %v3333_v10 = vrot.slane %v7313_v12, 2 }
 0x4bc   : > { %3725 = vst [vmem:[#allocation2 + $0x380] sm:$0x70] %v3685_v45  ;;  %v3687_v44 = vsel %vm565_vm1, %v7909_v58, %v3659_v51  ;;  %v3332_v58 = vrot.slane %v7310_v32, 2  ;;  %v3675_v20 = vpop.permute.xlu2 %3674  ;;  %v4638_v45 = vld [vmem:[%s5923_s17 + $0x28] sm:$0x77] }
 0x4bd   : > { %4022 = vrot.lane.b32.xlu0 %v3997_v63, %s5883_s21  ;;  %3726 = vst [vmem:[#allocation2 + $0x1c8] sm:$0x70] %v3686_v5  ;;  %v3661_v30 = vpop.permute.xlu1 %3660  ;;  %v4513_v5 = vrot.slane %v7855_v49, 5  ;;  %v4175_v49 = vrot.slane %v7744_v41, 3 }
 0x4be   : > { %3368 = vst [vmem:[#allocation2 + $0x1a8] sm:$0xc0] %v3328_v22  ;;  %v3688_v42 = vsel %vm565_vm1, %v3659_v51, %v3661_v30  ;;  %v3689_v57 = vsel %vm565_vm1, %v3661_v30, %v3663_v46  ;;  %v4665_v51 = vld.sshfl [vmem:[#allocation1 + $0x8] sm:$0xff pattern:$0x75316420] }
 0x4bf   : > { %3389 = vst [vmem:[#allocation2 + $0x28] sm:$0x1] %v3329_v56  ;;  %v4639_v30 = vld [vmem:[%s5923_s17 + $0x30] sm:$0x77] }
 0x4c0   : > { %3369 = vst [vmem:[#allocation2 + $0x78] sm:$0xc0] %v3329_v56 }
 0x4c1   : > { %3394 = vst [vmem:[#allocation2 + $0x70] sm:$0x1] %v3334_v21 }
 0x4c2   : > { %3727 = vst [vmem:[#allocation2 + $0x1e8] sm:$0x70] %v3687_v44  ;;  %v4664_v44 = vld.sshfl [vmem:[#allocation1] sm:$0xff pattern:$0x75316420] }
 0x4c3   : > { %4359 = vrot.lane.b32.xlu2 %v7844_v29, %s5885_s23  ;;  %4357 = vrot.lane.b32.xlu1 %v7842_v18, %s5885_s23  ;;  %3728 = vst [vmem:[#allocation2 + $0x20] sm:$0x70] %v3688_v42  ;;  %v4515_v29 = vrot.slane %v7894_v59, 5  ;;  %v4514_v18 = vrot.slane %v7892_v60, 5  ;;  %v3665_v63 = vpop.permute.xlu0 %3664  ;;  %v4692_v41 = vrot.slane %v4664_v44, 2 }
 0x4c4   : > { %3729 = vst [vmem:[#allocation2 + $0x28] sm:$0x70] %v3689_v57  ;;  %v3690_v15 = vsel %vm565_vm1, %v3663_v46, %v3665_v63  ;;  %v7966_v59 = vld.sshfl [vmem:[#allocation1 + $0x30] sm:$0xff pattern:$0x75316420]  ;;  %v3995_v46 = vrot.slane %v7630_v25, 6 }
 0x4c5   : > { %4202 = vrot.lane.b32.xlu0 %v4177_v17, %s5884_s22  ;;  %3374 = vst [vmem:[#allocation2 + $0x4a8] sm:$0xc0] %v3334_v21  ;;  %v3667_v22 = vpop.permute.xlu1 %3666  ;;  %v4176_v21 = vrot.slane %v7746_v54, 3 }
 0x4c6   : > { %3395 = vst [vmem:[#allocation2 + $0xe8] sm:$0x1] %v3335_v43  ;;  %v3691_v60 = vsel %vm565_vm1, %v3665_v63, %v3667_v22  ;;  %v3692_v32 = vsel %vm565_vm1, %v3667_v22, %v3669_v23 }
 0x4c7   : > { %3375 = vst [vmem:[#allocation2 + $0x6c0] sm:$0xc0] %v3335_v43 }
 0x4c8   : > { %3392 = vst [vmem:[#allocation2 + $0x1b0] sm:$0x1] %v3332_v58 }
 0x4c9   : > { %3372 = vst [vmem:[#allocation2 + $0x468] sm:$0xc0] %v3332_v58 }
 0x4ca   : > { %3730 = vst [vmem:[#allocation2 + $0x388] sm:$0x70] %v3690_v15 }
 0x4cb   : > { %4539 = vrot.lane.b32.xlu2 %v4515_v29, %s5886_s24  ;;  %4537 = vrot.lane.b32.xlu1 %v4514_v18, %s5886_s24  ;;  %3731 = vst [vmem:[#allocation2 + $0x170] sm:$0x70] %v3691_v60  ;;  %v3671_v56 = vpop.permute.xlu0 %3670  ;;  %v4693_v18 = vrot.slane %v4665_v51, 2 }
 0x4cc   : > { %3732 = vst [vmem:[#allocation2 + $0x1b0] sm:$0x70] %v3692_v32  ;;  %v3693_v12 = vsel %vm565_vm1, %v3669_v23, %v3671_v56  ;;  %v4173_v23 = vrot.slane %v7705_v47, 3  ;;  %v4512_v32 = vrot.slane %v7853_v33, 5  ;;  %v3994_v33 = vrot.slane %v7624_v3, 6 }
 0x4cd   : > { %4353 = vrot.lane.b32.xlu0 %v7808_v6, %s5885_s23  ;;  %3393 = vst [vmem:[#allocation2 + $0x438] sm:$0x1] %v3333_v10  ;;  %v3819_v6 = vpop.permute.xlu2 %3818  ;;  %v3673_v17 = vpop.permute.xlu1 %3672 }
 0x4ce   : > { %4663 = vst [vmem:[#allocation1 + $0x30] ss:$2 sm:$0xff] %v4638_v45  ;;  %v3694_v25 = vsel %vm565_vm1, %v3671_v56, %v3673_v17  ;;  %v3695_v8 = vsel %vm565_vm1, %v3673_v17, %v3675_v20  ;;  %v3993_v56 = vrot.slane %v7622_v61, 6 }
 0x4cf   : > { %3373 = vst [vmem:[#allocation2 + $0x248] sm:$0xc0] %v3333_v10 }
 0x4d0   : > { %3733 = vst [vmem:[#allocation2 + $0x438] sm:$0x70] %v3693_v12  ;;  %v4519_v12 = vrot.slane %v7863_v39, 5  ;;  %v4174_v39 = vrot.slane %v7707_v14, 3 }
 0x4d1   : > { %3734 = vst [vmem:[#allocation2 + $0x70] sm:$0x70] %v3694_v25 }
 0x4d2   : > { %3735 = vst [vmem:[#allocation2 + $0xe8] sm:$0x70] %v3695_v8 }
 0x4d3   : > { %4020 = vrot.lane.b32.xlu2 %v3996_v24, %s5883_s21  ;;  %4018 = vrot.lane.b32.xlu1 %v3995_v46, %s5883_s21  ;;  %4672 = vst [vmem:[#allocation1] ss:$2 sm:$0xff] %v4639_v30  ;;  %v3815_v42 = vpop.permute.xlu0 %3814 }
 0x4d5   : > { %4535 = vrot.lane.b32.xlu0 %v4513_v5, %s5886_s24  ;;  %v3817_v57 = vpop.permute.xlu1 %3816  ;;  %v3825_v43 = vpop.permute.xlu2 %3824  ;;  %v4671_v58 = vld.sshfl [vmem:[#allocation1 + $0x38] sm:$0xff pattern:$0x75316420]  ;;  %v4670_v25 = vld.sshfl [vmem:[#allocation1 + $0x30] sm:$0xff pattern:$0x75316420] }
 0x4d6   : > { %v3856_v54 = vsel %vm766_vm2, %v3815_v42, %v3817_v57  ;;  %v3857_v29 = vsel %vm766_vm2, %v3817_v57, %v3819_v6  ;;  %v4699_v47 = vrot.slane %v4671_v58, 2 }
 0x4d7   : > { %3896 = vst [vmem:[#allocation2 + $0x1b8] sm:$0x80] %v3856_v54 }
 0x4d8   : > { %3897 = vst [vmem:[#allocation2 + $0x460] sm:$0x80] %v3857_v29 }
 0x4d9   : > { %3916 = vst [vmem:[#allocation2 + $0x178] sm:$0x3] %v3856_v54 }
 0x4da   : > { %3917 = vst [vmem:[#allocation2 + $0x5a0] sm:$0x3] %v3857_v29  ;;  %v4676_v30 = vld.sshfl [vmem:[#allocation1] sm:$0xff pattern:$0x75316420] }
 0x4db   : > { %4200 = vrot.lane.b32.xlu2 %v4176_v21, %s5884_s22  ;;  %4198 = vrot.lane.b32.xlu1 %v4175_v49, %s5884_s22  ;;  %v3821_v20 = vpop.permute.xlu0 %3820  ;;  %v4698_v21 = vrot.slane %v4670_v25, 2  ;;  %v4000_v49 = vrot.slane %v7752_v9, 6  ;;  %v4180_v9 = vrot.slane %v7795_v2, 3  ;;  %v4518_v2 = vrot.slane %v7861_v11, 5 }
 0x4dc   : > { %v3858_v63 = vsel %vm766_vm2, %v3819_v6, %v3821_v20  ;;  %v3999_v11 = vrot.slane %v7750_v28, 6 }
 0x4dd   : > { %4194 = vrot.lane.b32.xlu0 %v4173_v23, %s5884_s22  ;;  %v3823_v15 = vpop.permute.xlu1 %3822  ;;  %3898 = vst [vmem:[#allocation2 + $0x128] sm:$0x80] %v3858_v63  ;;  %v3831_v10 = vpop.permute.xlu2 %3830 }
 0x4de   : > { %v3859_v22 = vsel %vm766_vm2, %v3821_v20, %v3823_v15  ;;  %v3860_v60 = vsel %vm766_vm2, %v3823_v15, %v3825_v43  ;;  %3918 = vst [vmem:[#allocation2 + $0x558] sm:$0x3] %v3858_v63  ;;  %v4520_v15 = vrot.slane %v7871_v50, 5 }
 0x4df   : > { %3899 = vst [vmem:[#allocation2 + $0x668] sm:$0x80] %v3859_v22 }
 0x4e0   : > { %3900 = vst [vmem:[#allocation2 + $0x698] sm:$0x80] %v3860_v60 }
 0x4e1   : > { %3919 = vst [vmem:[#allocation2 + $0x690] sm:$0x3] %v3859_v22  ;;  %v4669_v22 = vld.sshfl [vmem:[#allocation1 + $0x28] sm:$0xff pattern:$0x75316420] }
 0x4e2   : > { %3920 = vst [vmem:[#allocation2 + $0x560] sm:$0x3] %v3860_v60  ;;  %v4641_v60 = vld [vmem:[%s5923_s17 + $0x40] sm:$0x77] }
 0x4e3   : > { %4715 = vrot.lane.b32.xlu2 %v4693_v18, %s5887_s25  ;;  %4713 = vrot.lane.b32.xlu1 %v4692_v41, %s5887_s25  ;;  %v3827_v24 = vpop.permute.xlu0 %3826  ;;  %4674 = vst [vmem:[#allocation1 + $0x20] ss:$2 sm:$0xff] %v4641_v60  ;;  %v4940_v60 = vld [vmem:[#allocation2 + $0x2f0] sm:$0xff] }
 0x4e4   : > { %v3861_v46 = vsel %vm766_vm2, %v3825_v43, %v3827_v24  ;;  %v4700_v43 = vrot.slane %v4676_v30, 2 }
 0x4e5   : > { %4727 = vrot.lane.b32.xlu0 %v4699_v47, %s5887_s25  ;;  %v3829_v45 = vpop.permute.xlu1 %3828  ;;  %3901 = vst [vmem:[#allocation2 + $0x630] sm:$0x80] %v3861_v46 }
 0x4e6   : > { %v3862_v5 = vsel %vm766_vm2, %v3827_v24, %v3829_v45  ;;  %v3863_v6 = vsel %vm766_vm2, %v3829_v45, %v3831_v10  ;;  %3921 = vst [vmem:[#allocation2 + $0x50] sm:$0x3] %v3861_v46  ;;  %v4697_v45 = vrot.slane %v4669_v22, 2 }
 0x4e7   : > { %3902 = vst [vmem:[#allocation2 + $0x4f8] sm:$0x80] %v3862_v5 }
 0x4e8   : > { %3903 = vst [vmem:[#allocation2 + $0x530] sm:$0x80] %v3863_v6 }
 0x4e9   : > { %3922 = vst [vmem:[#allocation2 + $0x228] sm:$0x3] %v3862_v5 }
 0x4ea   : > { %3923 = vst [vmem:[#allocation2 + $0xf0] sm:$0x3] %v3863_v6  ;;  %v4680_v28 = vld.sshfl [vmem:[#allocation1 + $0x20] sm:$0xff pattern:$0x75316420] }
 0x4eb   : > { %4533 = vrot.lane.b32.xlu2 %v4512_v32, %s5886_s24  ;;  %4355 = vrot.lane.b32.xlu1 %v7810_v36, %s5885_s23  ;;  %v3837_v36 = vpop.permute.xlu2 %3836  ;;  %v3833_v17 = vpop.permute.xlu0 %3832  ;;  %v4704_v46 = vrot.slane %v4680_v28, 2 }
 0x4ed   : > { %4367 = vrot.lane.b32.xlu0 %v7832_v0, %s5885_s23  ;;  %v3864_v0 = vsel %vm766_vm2, %v3831_v10, %v3833_v17  ;;  %v3835_v8 = vpop.permute.xlu1 %3834  ;;  %v4179_v10 = vrot.slane %v7793_v19, 3  ;;  %v4181_v19 = vrot.slane %v7735_v31, 3  ;;  %v3998_v31 = vrot.slane %v7593_v1, 6 }
 0x4ee   : > { %3904 = vst [vmem:[#allocation2 + $0x600] sm:$0x80] %v3864_v0  ;;  %v3865_v61 = vsel %vm766_vm2, %v3833_v17, %v3835_v8  ;;  %v3866_v3 = vsel %vm766_vm2, %v3835_v8, %v3837_v36  ;;  %v4524_v17 = vrot.slane %v7804_v38, 5 }
 0x4ef   : > { %3924 = vst [vmem:[#allocation2 + $0x658] sm:$0x3] %v3864_v0 }
 0x4f0   : > { %3905 = vst [vmem:[#allocation2 + $0x380] sm:$0x80] %v3865_v61 }
 0x4f1   : > { %3906 = vst [vmem:[#allocation2 + $0x1c8] sm:$0x80] %v3866_v3 }
 0x4f2   : > { %3925 = vst [vmem:[#allocation2 + $0x240] sm:$0x3] %v3865_v61 }
 0x4f3   : > { %4016 = vrot.lane.b32.xlu2 %v3994_v33, %s5883_s21  ;;  %4014 = vrot.lane.b32.xlu1 %v3993_v56, %s5883_s21  ;;  %3926 = vst [vmem:[#allocation2 + $0x238] sm:$0x3] %v3866_v3  ;;  %v3843_v51 = vpop.permute.xlu2 %3842  ;;  %v3839_v44 = vpop.permute.xlu0 %3838  ;;  %v4517_v56 = vrot.slane %v7782_v48, 5 }
 0x4f4   : > { %v3867_v23 = vsel %vm766_vm2, %v3837_v36, %v3839_v44 }
 0x4f5   : > { %4547 = vrot.lane.b32.xlu0 %v4519_v12, %s5886_s24  ;;  %3907 = vst [vmem:[#allocation2 + $0x1e8] sm:$0x80] %v3867_v23  ;;  %v3841_v42 = vpop.permute.xlu1 %3840 }
 0x4f6   : > { %3927 = vst [vmem:[#allocation2 + $0x478] sm:$0x3] %v3867_v23  ;;  %v3868_v14 = vsel %vm766_vm2, %v3839_v44, %v3841_v42  ;;  %v3869_v57 = vsel %vm766_vm2, %v3841_v42, %v3843_v51  ;;  %v8679_v42 = vld [vmem:[#allocation10_spill] sm:$0xff] }
 0x4f7   : > { %3908 = vst [vmem:[#allocation2 + $0x20] sm:$0x80] %v3868_v14 }
 0x4f8   : > { %3909 = vst [vmem:[#allocation2 + $0x28] sm:$0x80] %v3869_v57 }
 0x4f9   : > { %3928 = vst [vmem:[#allocation2 + $0x4c8] sm:$0x3] %v3868_v14  ;;  %v4185_v14 = vrot.slane %v8679_v42, 3 }
 0x4fa   : > { %3929 = vst [vmem:[#allocation2 + $0x6b8] sm:$0x3] %v3869_v57  ;;  %v8680_v57 = vld [vmem:[#allocation37_spill] sm:$0xff] }
 0x4fb   : > { %4725 = vrot.lane.b32.xlu2 %v4698_v21, %s5887_s25  ;;  %4196 = vrot.lane.b32.xlu1 %v4174_v39, %s5884_s22  ;;  %v3845_v54 = vpop.permute.xlu0 %3844  ;;  %v3849_v18 = vpop.permute.xlu2 %3848  ;;  %v4005_v39 = vrot.slane %v7611_v4, 6 }
 0x4fc   : > { %v3870_v29 = vsel %vm766_vm2, %v3843_v51, %v3845_v54 }
 0x4fd   : > { %4028 = vrot.lane.b32.xlu0 %v4000_v49, %s5883_s21  ;;  %3910 = vst [vmem:[#allocation2 + $0x388] sm:$0x80] %v3870_v29  ;;  %v3847_v41 = vpop.permute.xlu1 %3846 }
 0x4fe   : > { %3930 = vst [vmem:[#allocation2 + $0x5a8] sm:$0x3] %v3870_v29  ;;  %v3871_v58 = vsel %vm766_vm2, %v3845_v54, %v3847_v41  ;;  %v3872_v47 = vsel %vm766_vm2, %v3847_v41, %v3849_v18  ;;  %v4523_v41 = vrot.slane %v7907_v55, 5  ;;  %v4960_v55 = vld [vmem:[#allocation2 + $0x398] sm:$0xff] }
 0x4ff   : > { %3911 = vst [vmem:[#allocation2 + $0x170] sm:$0x80] %v3871_v58 }
 0x500   : > { %3912 = vst [vmem:[#allocation2 + $0x1b0] sm:$0x80] %v3872_v47 }
 0x501   : > { %3931 = vst [vmem:[#allocation2 + $0x458] sm:$0x3] %v3871_v58  ;;  %v4522_v58 = vrot.slane %v7905_v34, 5 }
 0x502   : > { %3932 = vst [vmem:[#allocation2 + $0x298] sm:$0x3] %v3872_v47 }
 0x503   : > { %4365 = vrot.lane.b32.xlu2 %v7830_v13, %s5885_s23  ;;  %4729 = vrot.lane.b32.xlu1 %v4700_v43, %s5887_s25  ;;  %v4640_v13 = vld [vmem:[%s5923_s17 + $0x38] sm:$0x77]  ;;  %v8039_v20 = vpop.permute.xlu0 %3850  ;;  %v8681_v43 = vld [vmem:[#allocation36_spill] sm:$0xff] }
 0x504   : > { %4673 = vst [vmem:[#allocation1 + $0x10] ss:$2 sm:$0xff] %v4640_v13  ;;  %v3873_v63 = vsel %vm766_vm2, %v3849_v18, %v8039_v20  ;;  %v8682_v13 = vld [vmem:[#allocation38_spill] sm:$0xff] }
 0x505   : > { %4208 = vrot.lane.b32.xlu0 %v4180_v9, %s5884_s22  ;;  %3913 = vst [vmem:[#allocation2 + $0x438] sm:$0x80] %v3873_v63 }
 0x506   : > { %3933 = vst [vmem:[#allocation2 + $0x4b8] sm:$0x3] %v3873_v63  ;;  %v4521_v63 = vrot.slane %v8682_v13, 5 }
 0x50b   : > { %4545 = vrot.lane.b32.xlu2 %v4518_v2, %s5886_s24  ;;  %4369 = vrot.lane.b32.xlu1 %v7824_v62, %s5885_s23  ;;  %v4178_v62 = vrot.slane %v7654_v37, 3  ;;  %v4679_v25 = vld.sshfl [vmem:[#allocation1 + $0x18] sm:$0xff pattern:$0x75316420] }
 0x50c   : > { %v4678_v0 = vld.sshfl [vmem:[#allocation1 + $0x10] sm:$0xff pattern:$0x75316420]  ;;  %v4703_v48 = vrot.slane %v4679_v25, 2 }
 0x50d   : > { %4363 = vrot.lane.b32.xlu0 %v7715_v52, %s5885_s23  ;;  %v4001_v52 = vrot.slane %v7648_v40, 6  ;;  %v4702_v61 = vrot.slane %v4678_v0, 2 }
 0x513   : > { %4026 = vrot.lane.b32.xlu2 %v3999_v11, %s5883_s21  ;;  %4549 = vrot.lane.b32.xlu1 %v4520_v15, %s5886_s24  ;;  %v4980_v11 = vld [vmem:[#allocation2 + $0x668] sm:$0xff] }
 0x515   : > { %v4720_v32 = vpop.permute.xlu2 %4719  ;;  %4204 = vrot.lane.b32.xlu0 %v4178_v62, %s5884_s22 }
 0x517   : > { %v8054_v24 = vpop.permute.xlu0 %4721 }
 0x518   : > { %v4758_v50 = vsel %vm1650_vm7, %v4720_v32, %v8054_v24 }
 0x519   : > { %4798 = vst [vmem:[#allocation2 + $0x2f8] sm:$0xc0] %v4758_v50 }
 0x51a   : > { %4818 = vst [vmem:[#allocation2 + $0xf8] sm:$0x1] %v4758_v50 }
 0x51b   : > { %4206 = vrot.lane.b32.xlu2 %v4179_v10, %s5884_s22  ;;  %4030 = vrot.lane.b32.xlu1 %v4001_v52, %s5883_s21  ;;  %v8684_v52 = vld [vmem:[#allocation8_spill] sm:$0xff] }
 0x51c   : > { %v4003_v28 = vrot.slane %v8684_v52, 6 }
 0x51d   : > { %v4360_v37 = vpop.permute.xlu2 %4359  ;;  %4737 = vrot.lane.b32.xlu0 %v4704_v46, %s5887_s25 }
 0x51f   : > { %v8062_v40 = vpop.permute.xlu0 %4361 }
 0x520   : > { %v4398_v5 = vsel %vm1309_vm5, %v4360_v37, %v8062_v40 }
 0x521   : > { %4438 = vst [vmem:[#allocation2 + $0x2f8] sm:$0x7] %v4398_v5  ;;  %v5040_v6 = vld [vmem:[#allocation2 + $0xf8] sm:$0x1] }
 0x522   : > { %5785 = vmatpush.msk.msra.mxu3 %vm5064_vm8, %v5040_v6  ;;  %v4920_v5 = vld [vmem:[#allocation2 + $0xb8] sm:$0xff]  ;;  %v4643_v6 = vld [vmem:[%s5923_s17 + $0x50] sm:$0x77] }
 0x523   : > { %4723 = vrot.lane.b32.xlu2 %v4697_v45, %s5887_s25  ;;  %4210 = vrot.lane.b32.xlu1 %v4181_v19, %s5884_s22 }
 0x525   : > { %v4540_v33 = vpop.permute.xlu2 %4539  ;;  %4377 = vrot.lane.b32.xlu0 %v7729_v7, %s5885_s23 }
 0x527   : > { %v8073_v36 = vpop.permute.xlu0 %4541 }
 0x528   : > { %v4578_v12 = vsel %vm1490_vm6, %v4540_v33, %v8073_v36 }
 0x529   : > { %4618 = vst [vmem:[#allocation2 + $0x2f8] sm:$0x38] %v4578_v12 }
 0x52b   : > { %4024 = vrot.lane.b32.xlu2 %v3998_v31, %s5883_s21  ;;  %4543 = vrot.lane.b32.xlu1 %v4517_v56, %s5886_s24  ;;  %v4900_v31 = vld [vmem:[#allocation2 + $0x340] sm:$0xff] }
 0x52d   : > { %v4021_v8 = vpop.permute.xlu2 %4020  ;;  %v4718_v7 = vpop.permute.xlu1 %4717  ;;  %4557 = vrot.lane.b32.xlu0 %v4524_v17, %s5886_s24  ;;  %v4880_v17 = vld [vmem:[#allocation2 + $0x4f0] sm:$0xff] }
 0x52e   : > { %v4757_v1 = vsel %vm1650_vm7, %v4718_v7, %v4720_v32  ;;  %v8683_v32 = vld [vmem:[#allocation9_spill] sm:$0xff] }
 0x52f   : > { %4797 = vst [vmem:[#allocation2 + $0x550] sm:$0xc0] %v4757_v1  ;;  %v8082_v3 = vpop.permute.xlu0 %4022  ;;  %v4004_v10 = vrot.slane %v8683_v32, 6 }
 0x530   : > { %4817 = vst [vmem:[#allocation2 + $0x498] sm:$0x1] %v4757_v1  ;;  %v4059_v38 = vsel %vm927_vm3, %v4021_v8, %v8082_v3  ;;  %v5020_v21 = vld [vmem:[#allocation2 + $0x2f8] sm:$0xff]  ;;  %v8686_v1 = vld [vmem:[#allocation24_spill] sm:$0xff] }
 0x531   : > { %4099 = vst [vmem:[#allocation2 + $0x690] sm:$0x1c] %v4059_v38  ;;  %5200 = vmatpush.msra.mxu3 %v5020_v21 }
 0x533   : > { %4735 = vrot.lane.b32.xlu2 %v4703_v48, %s5887_s25  ;;  %4733 = vrot.lane.b32.xlu1 %v4702_v61, %s5887_s25  ;;  %v4183_v48 = vrot.slane %v8686_v1, 3  ;;  %v4860_v61 = vld [vmem:[#allocation2 + $0x348] sm:$0xff] }
 0x535   : > { %v8089_v49 = vpop.permute.xlu2 %4200  ;;  %v8091_v51 = vpop.permute.xlu1 %4357  ;;  %4038 = vrot.lane.b32.xlu0 %v4005_v39, %s5883_s21 }
 0x536   : > { %v4397_v44 = vsel %vm1309_vm5, %v8091_v51, %v4360_v37  ;;  %v4642_v37 = vld [vmem:[%s5923_s17 + $0x48] sm:$0x77] }
 0x537   : > { %4437 = vst [vmem:[#allocation2 + $0x550] sm:$0x7] %v4397_v44  ;;  %v5039_v30 = vld [vmem:[#allocation2 + $0x498] sm:$0x1]  ;;  %v8097_v23 = vpop.permute.xlu0 %4202 }
 0x538   : > { %5782 = vmatpush.msk.msra.mxu2 %vm5064_vm8, %v5039_v30  ;;  %v4239_v4 = vsel %vm1108_vm4, %v8089_v49, %v8097_v23  ;;  %4675 = vst [vmem:[#allocation1 + $0x30] ss:$2 sm:$0xff] %v4642_v37  ;;  %v4840_v44 = vld [vmem:[#allocation2 + $0x18] sm:$0xff] }
 0x539   : > { %4279 = vst [vmem:[#allocation2 + $0x690] sm:$0xe0] %v4239_v4 }
 0x53b   : > { %4375 = vrot.lane.b32.xlu2 %v8680_v57, %s5885_s23  ;;  %4373 = vrot.lane.b32.xlu1 %v8681_v43, %s5885_s23  ;;  %v4979_v43 = vld [vmem:[#allocation2 + $0x128] sm:$0xff] }
 0x53d   : > { %v8107_v9 = vpop.permute.xlu2 %4715  ;;  %v4538_v54 = vpop.permute.xlu1 %4537  ;;  %4218 = vrot.lane.b32.xlu0 %v4185_v14, %s5884_s22 }
 0x53e   : > { %v4756_v29 = vsel %vm1650_vm7, %v8107_v9, %v4718_v7  ;;  %v4577_v18 = vsel %vm1490_vm6, %v4538_v54, %v4540_v33  ;;  %v4677_v33 = vld.sshfl [vmem:[#allocation1 + $0x8] sm:$0xff pattern:$0x75316420] }
 0x53f   : > { %4796 = vst [vmem:[#allocation2 + $0x6a8] sm:$0xc0] %v4756_v29  ;;  %v8115_v47 = vpop.permute.xlu0 %4353  ;;  %v4682_v38 = vld.sshfl [vmem:[#allocation1 + $0x30] sm:$0xff pattern:$0x75316420]  ;;  %v4701_v14 = vrot.slane %v4677_v33, 2 }
 0x540   : > { %4816 = vst [vmem:[#allocation2 + $0x508] sm:$0x1] %v4756_v29  ;;  %v5000_v2 = vld [vmem:[#allocation2 + $0x690] sm:$0xff]  ;;  %v4706_v39 = vrot.slane %v4682_v38, 2  ;;  %v8687_v29 = vld [vmem:[#allocation31_spill] sm:$0xff] }
 0x541   : > { %4617 = vst [vmem:[#allocation2 + $0x550] sm:$0x38] %v4577_v18  ;;  %5201 = vmatpush.msra.mxu3 %v5000_v2  ;;  %v8688_v18 = vld [vmem:[#allocation34_spill] sm:$0xff] }
 0x542   : > { %4684 = vst [vmem:[#allocation1] ss:$2 sm:$0xff] %v4643_v6 }
 0x543   : > { %4555 = vrot.lane.b32.xlu2 %v4523_v41, %s5886_s24  ;;  %4553 = vrot.lane.b32.xlu1 %v4522_v58, %s5886_s24  ;;  %v4939_v58 = vld [vmem:[#allocation2 + $0x30] sm:$0xff] }
 0x544   : > { %5202 = vmatpush.msra.mxu3 %v4980_v11  ;;  %v4919_v11 = vld [vmem:[#allocation2 + $0x268] sm:$0xff] }
 0x545   : > { %v4534_v15 = vpop.permute.xlu2 %4533  ;;  %v4019_v22 = vpop.permute.xlu1 %4018  ;;  %4551 = vrot.lane.b32.xlu0 %v4521_v63, %s5886_s24 }
 0x546   : > { %v4058_v34 = vsel %vm927_vm3, %v4019_v22, %v4021_v8  ;;  %5203 = vmatpush.msra.mxu3 %v4960_v55  ;;  %v8685_v8 = vld [vmem:[#allocation25_spill] sm:$0xff] }
 0x547   : > { %4098 = vst [vmem:[#allocation2 + $0x558] sm:$0x1c] %v4058_v34  ;;  %v5038_v62 = vld [vmem:[#allocation2 + $0x508] sm:$0x1]  ;;  %v4536_v46 = vpop.permute.xlu0 %4535  ;;  %v4184_v7 = vrot.slane %v8685_v8, 3  ;;  %v8690_v34 = vld [vmem:[#allocation7_spill] sm:$0xff] }
 0x548   : > { %5779 = vmatpush.msk.msra.mxu1 %vm5064_vm8, %v5038_v62  ;;  %v5019_v50 = vld [vmem:[#allocation2 + $0x550] sm:$0xff]  ;;  %5204 = vmatpush.msra.mxu3 %v4940_v60  ;;  %v4575_v45 = vsel %vm1490_vm6, %v4534_v15, %v4536_v46  ;;  %v4576_v19 = vsel %vm1490_vm6, %v4536_v46, %v4538_v54  ;;  %v4002_v60 = vrot.slane %v8690_v34, 6  ;;  %v4526_v62 = vrot.slane %v7966_v59, 5 }
 0x549   : > { %5177 = vmatpush.msra.mxu2 %v5019_v50  ;;  %4615 = vst [vmem:[#allocation2 + $0x568] sm:$0x38] %v4575_v45  ;;  %v4687_v52 = vld.sshfl [vmem:[#allocation1] sm:$0xff pattern:$0x75316420]  ;;  %v4859_v50 = vld [vmem:[#allocation2 + $0x670] sm:$0xff] }
 0x54a   : > { %5205 = vmatpush.msra.mxu3 %v4920_v5  ;;  %4616 = vst [vmem:[#allocation2 + $0x6a8] sm:$0x38] %v4576_v19  ;;  %v4839_v5 = vld [vmem:[#allocation2 + $0x4d8] sm:$0xff]  ;;  %v4708_v6 = vrot.slane %v4687_v52, 2  ;;  %v8695_v52 = vld [vmem:[#allocation12_spill] sm:$0xff] }
 0x54b   : > { %4036 = vrot.lane.b32.xlu2 %v4004_v10, %s5883_s21  ;;  %4034 = vrot.lane.b32.xlu1 %v4003_v28, %s5883_s21  ;;  %v4899_v10 = vld [vmem:[#allocation2 + $0x650] sm:$0xff] }
 0x54c   : > { %5206 = vmatpush.msra.mxu3 %v4900_v31  ;;  %v4683_v28 = vld.sshfl [vmem:[#allocation1 + $0x38] sm:$0xff pattern:$0x75316420] }
 0x54d   : > { %v8131_v56 = vpop.permute.xlu2 %4016  ;;  %v8133_v12 = vpop.permute.xlu1 %4198  ;;  %4741 = vrot.lane.b32.xlu0 %v4706_v39, %s5887_s25  ;;  %v4707_v33 = vrot.slane %v4683_v28, 2  ;;  %v4009_v28 = vrot.slane %v8695_v52, 6 }
 0x54e   : > { %v4057_v25 = vsel %vm927_vm3, %v8131_v56, %v4019_v22  ;;  %v4238_v0 = vsel %vm1108_vm4, %v8133_v12, %v8089_v49  ;;  %5207 = vmatpush.msra.mxu3 %v4880_v17  ;;  %v8689_v22 = vld [vmem:[#allocation18_spill] sm:$0xff]  ;;  %v8691_v17 = vld [vmem:[#allocation20_spill] sm:$0xff] }
 0x54f   : > { %4097 = vst [vmem:[#allocation2 + $0x5a0] sm:$0x1c] %v4057_v25  ;;  %v8142_v21 = vpop.permute.xlu0 %4194  ;;  %v4182_v55 = vrot.slane %v8689_v22, 3  ;;  %v4007_v25 = vrot.slane %v8691_v17, 6  ;;  %v4937_v22 = vld [vmem:[#allocation2 + $0x5c8] sm:$0xff]  ;;  %v4878_v17 = vld [vmem:[#allocation2 + $0x5c0] sm:$0xff] }
 0x550   : > { %4278 = vst [vmem:[#allocation2 + $0x558] sm:$0xe0] %v4238_v0  ;;  %5208 = vmatpush.msra.mxu3 %v4860_v61  ;;  %v8692_v61 = vld [vmem:[#allocation27_spill] sm:$0xff] }
 0x551   : > { %v4187_v38 = vrot.slane %v8692_v61, 3 }
 0x552   : > { %5209 = vmatpush.msra.mxu3 %v4840_v44 }
 0x553   : > { %4216 = vrot.lane.b32.xlu2 %v4184_v7, %s5884_s22  ;;  %4214 = vrot.lane.b32.xlu1 %v4183_v48, %s5884_s22 }
 0x555   : > { %v8147_v49 = vpop.permute.xlu2 %4725  ;;  %v4714_v30 = vpop.permute.xlu1 %4713  ;;  %4381 = vrot.lane.b32.xlu0 %v8688_v18, %s5885_s23  ;;  %v4527_v18 = vrot.slane %v7970_v26, 5  ;;  %v4958_v26 = vld [vmem:[#allocation2 + $0x8] sm:$0xff] }
 0x556   : > { %v4755_v4 = vsel %vm1650_vm7, %v4714_v30, %v8107_v9  ;;  %v4959_v9 = vld [vmem:[#allocation2 + $0x288] sm:$0xff] }
 0x557   : > { %4795 = vst [vmem:[#allocation2 + $0x568] sm:$0xc0] %v4755_v4  ;;  %v4999_v42 = vld [vmem:[#allocation2 + $0x558] sm:$0xff]  ;;  %v8151_v57 = vpop.permute.xlu0 %4727 }
 0x558   : > { %4815 = vst [vmem:[#allocation2 + $0x2e0] sm:$0x1] %v4755_v4  ;;  %5178 = vmatpush.msra.mxu2 %v4999_v42  ;;  %v4761_v54 = vsel %vm1650_vm7, %v8147_v49, %v8151_v57  ;;  %v8693_v4 = vld [vmem:[#allocation32_spill] sm:$0xff] }
 0x559   : > { %4801 = vst [vmem:[#allocation2 + $0x1c0] sm:$0xc0] %v4761_v54 }
 0x55a   : > { %5179 = vmatpush.msra.mxu2 %v4979_v43  ;;  %4821 = vst [vmem:[#allocation2 + $0x390] sm:$0x1] %v4761_v54  ;;  %v4528_v54 = vrot.slane %v7931_v53, 5  ;;  %v4957_v53 = vld [vmem:[#allocation2 + $0x40] sm:$0xff] }
 0x55b   : > { %4371 = vrot.lane.b32.xlu2 %v8687_v29, %s5885_s23  ;;  %4731 = vrot.lane.b32.xlu1 %v4701_v14, %s5887_s25  ;;  %v4681_v29 = vld.sshfl [vmem:[#allocation1 + $0x28] sm:$0xff pattern:$0x75316420] }
 0x55c   : > { %5180 = vmatpush.msra.mxu2 %v4959_v9 }
 0x55d   : > { %v8161_v41 = vpop.permute.xlu2 %4365  ;;  %v4356_v2 = vpop.permute.xlu1 %4355  ;;  %4561 = vrot.lane.b32.xlu0 %v4526_v62, %s5886_s24 }
 0x55e   : > { %5181 = vmatpush.msra.mxu2 %v4939_v58  ;;  %v4395_v13 = vsel %vm1309_vm5, %v8115_v47, %v4356_v2  ;;  %v4396_v63 = vsel %vm1309_vm5, %v4356_v2, %v8091_v51  ;;  %v4879_v47 = vld [vmem:[#allocation2 + $0x5d0] sm:$0xff]  ;;  %v4977_v2 = vld [vmem:[#allocation2 + $0x1b8] sm:$0xff] }
 0x55f   : > { %4435 = vst [vmem:[#allocation2 + $0x568] sm:$0x7] %v4395_v13  ;;  %v5037_v15 = vld [vmem:[#allocation2 + $0x2e0] sm:$0x1]  ;;  %v8171_v32 = vpop.permute.xlu0 %4367  ;;  %v4644_v58 = vld [vmem:[%s5923_s17 + $0x58] sm:$0x77] }
 0x560   : > { %4436 = vst [vmem:[#allocation2 + $0x6a8] sm:$0x7] %v4396_v63  ;;  %5182 = vmatpush.msra.mxu2 %v4919_v11  ;;  %5776 = vmatpush.msk.msra.mxu0 %vm5064_vm8, %v5037_v15  ;;  %v4401_v51 = vsel %vm1309_vm5, %v8161_v41, %v8171_v32  ;;  %v4978_v63 = vld [vmem:[#allocation2 + $0x460] sm:$0xff]  ;;  %v4705_v11 = vrot.slane %v4681_v29, 2 }
 0x561   : > { %4441 = vst [vmem:[#allocation2 + $0x1c0] sm:$0x7] %v4401_v51  ;;  %v5043_v19 = vld [vmem:[#allocation2 + $0x390] sm:$0x1]  ;;  %v4918_v51 = vld [vmem:[#allocation2 + $0x420] sm:$0xff] }
 0x562   : > { %5183 = vmatpush.msra.mxu2 %v4899_v10  ;;  %4685 = vst [vmem:[#allocation1 + $0x10] ss:$2 sm:$0xff] %v4644_v58  ;;  %v4917_v10 = vld [vmem:[#allocation2 + $0x168] sm:$0xff] }
 0x563   : > { %4212 = vrot.lane.b32.xlu2 %v4182_v55, %s5884_s22  ;;  %4032 = vrot.lane.b32.xlu1 %v4002_v60, %s5883_s21  ;;  %v4938_v55 = vld [vmem:[#allocation2 + $0x370] sm:$0xff] }
 0x564   : > { %5184 = vmatpush.msra.mxu2 %v4879_v47 }
 0x565   : > { %v8179_v59 = vpop.permute.xlu2 %4545  ;;  %v4015_v46 = vpop.permute.xlu1 %4014  ;;  %4042 = vrot.lane.b32.xlu0 %v4007_v25, %s5883_s21  ;;  %v4645_v25 = vld [vmem:[%s5923_s17 + $0x60] sm:$0x7] }
 0x566   : > { %5185 = vmatpush.msra.mxu2 %v4859_v50  ;;  %v4056_v37 = vsel %vm927_vm3, %v4015_v46, %v8131_v56  ;;  %v5017_v45 = vld [vmem:[#allocation2 + $0x568] sm:$0xff]  ;;  %v8696_v50 = vld [vmem:[#allocation21_spill] sm:$0xff]  ;;  %4686 = vst [vmem:[#allocation1 + $0x20] ss:$2 sm:$0xff] %v4645_v25 }
 0x567   : > { %4096 = vst [vmem:[#allocation2 + $0x178] sm:$0x1c] %v4056_v37  ;;  %5131 = vmatpush.msra.mxu0 %v5017_v45  ;;  %v5018_v31 = vld [vmem:[#allocation2 + $0x6a8] sm:$0xff]  ;;  %v8184_v0 = vpop.permute.xlu0 %4547  ;;  %v4008_v46 = vrot.slane %v8696_v50, 6  ;;  %v4898_v45 = vld [vmem:[#allocation2 + $0x5d8] sm:$0xff]  ;;  %v4843_v50 = vld [vmem:[#allocation2 + $0x440] sm:$0xff] }
 0x568   : > { %5186 = vmatpush.msra.mxu2 %v4839_v5  ;;  %5154 = vmatpush.msra.mxu1 %v5018_v31  ;;  %v4581_v56 = vsel %vm1490_vm6, %v8179_v59, %v8184_v0  ;;  %v4877_v31 = vld [vmem:[#allocation2 + $0x90] sm:$0xff] }
 0x569   : > { %4621 = vst [vmem:[#allocation2 + $0x1c0] sm:$0x38] %v4581_v56  ;;  %v4984_v25 = vld [vmem:[#allocation2 + $0x530] sm:$0xff] }
 0x56a   : > { %5794 = vmatpush.msk.msrb.mxu2 %vm5064_vm8, %v5043_v19  ;;  %v8697_v19 = vld [vmem:[#allocation5_spill] sm:$0xff] }
 0x56b   : > { %4745 = vrot.lane.b32.xlu2 %v4708_v6, %s5887_s25  ;;  %4743 = vrot.lane.b32.xlu1 %v4707_v33, %s5887_s25  ;;  %v4006_v5 = vrot.slane %v8697_v19, 6  ;;  %v4531_v19 = vrot.slane %v7922_v27, 5 }
 0x56d   : > { %v8193_v8 = vpop.permute.xlu2 %4026  ;;  %v4197_v7 = vpop.permute.xlu1 %4196  ;;  %4222 = vrot.lane.b32.xlu0 %v4187_v38, %s5884_s22  ;;  %v4983_v38 = vld [vmem:[#allocation2 + $0x4f8] sm:$0xff] }
 0x56e   : > { %v4236_v1 = vsel %vm1108_vm4, %v8142_v21, %v4197_v7  ;;  %v4237_v48 = vsel %vm1108_vm4, %v4197_v7, %v8133_v12  ;;  %v8694_v21 = vld [vmem:[#allocation35_spill] sm:$0xff]  ;;  %v4858_v7 = vld [vmem:[#allocation2 + $0x6d8] sm:$0xff] }
 0x56f   : > { %4276 = vst [vmem:[#allocation2 + $0x178] sm:$0xe0] %v4236_v1  ;;  %v8200_v39 = vpop.permute.xlu0 %4028 }
 0x570   : > { %4277 = vst [vmem:[#allocation2 + $0x5a0] sm:$0xe0] %v4237_v48  ;;  %v4062_v44 = vsel %vm927_vm3, %v8193_v8, %v8200_v39  ;;  %v5023_v30 = vld [vmem:[#allocation2 + $0x1c0] sm:$0xff] }
 0x571   : > { %4102 = vst [vmem:[#allocation2 + $0x228] sm:$0x1c] %v4062_v44  ;;  %5269 = vmatpush.msrb.mxu2 %v5023_v30  ;;  %v4690_v44 = vld.sshfl [vmem:[#allocation1 + $0x18] sm:$0xff pattern:$0x75316420] }
 0x572   : > { %v4837_v30 = vld [vmem:[#allocation2 + $0x2b0] sm:$0xff] }
 0x573   : > { %4385 = vrot.lane.b32.xlu2 %v8693_v4, %s5885_s23  ;;  %4383 = vrot.lane.b32.xlu1 %v8694_v21, %s5885_s23  ;;  %v4838_v4 = vld [vmem:[#allocation2 + $0x3b0] sm:$0xff]  ;;  %v8698_v21 = vld [vmem:[#allocation22_spill] sm:$0xff] }
 0x575   : > { %v8210_v12 = vpop.permute.xlu2 %4206  ;;  %v8212_v42 = vpop.permute.xlu1 %4729  ;;  %4739 = vrot.lane.b32.xlu0 %v4705_v11, %s5887_s25 }
 0x576   : > { %v4762_v14 = vsel %vm1650_vm7, %v8151_v57, %v8212_v42  ;;  %v4997_v43 = vld [vmem:[#allocation2 + $0x178] sm:$0xff] }
 0x577   : > { %4802 = vst [vmem:[#allocation2 + $0x638] sm:$0xc0] %v4762_v14  ;;  %5132 = vmatpush.msra.mxu0 %v4997_v43  ;;  %v4998_v9 = vld [vmem:[#allocation2 + $0x5a0] sm:$0xff]  ;;  %v8220_v13 = vpop.permute.xlu0 %4208  ;;  %v8699_v43 = vld [vmem:[#allocation28_spill] sm:$0xff] }
 0x578   : > { %4822 = vst [vmem:[#allocation2 + $0x428] sm:$0x1] %v4762_v14  ;;  %5155 = vmatpush.msra.mxu1 %v4998_v9  ;;  %v4242_v57 = vsel %vm1108_vm4, %v8210_v12, %v8220_v13  ;;  %v4189_v14 = vrot.slane %v8698_v21, 3  ;;  %v4711_v9 = vrot.slane %v4690_v44, 2 }
 0x579   : > { %5133 = vmatpush.msra.mxu0 %v4977_v2  ;;  %4282 = vst [vmem:[#allocation2 + $0x228] sm:$0xe0] %v4242_v57  ;;  %v4943_v2 = vld [vmem:[#allocation2 + $0x160] sm:$0xff]  ;;  %v8700_v57 = vld [vmem:[#allocation26_spill] sm:$0xff] }
 0x57a   : > { %5156 = vmatpush.msra.mxu1 %v4978_v63 }
 0x57b   : > { %4565 = vrot.lane.b32.xlu2 %v4528_v54, %s5886_s24  ;;  %4563 = vrot.lane.b32.xlu1 %v4527_v18, %s5886_s24  ;;  %v4188_v54 = vrot.slane %v8699_v43, 3  ;;  %v4530_v43 = vrot.slane %v7920_v16, 5  ;;  %v8707_v16 = vld [vmem:[#allocation19_spill] sm:$0xff] }
 0x57c   : > { %5134 = vmatpush.msra.mxu0 %v4957_v53  ;;  %5157 = vmatpush.msra.mxu1 %v4958_v26  ;;  %v4525_v53 = vrot.slane %v8700_v57, 5  ;;  %v4903_v26 = vld [vmem:[#allocation2 + $0x5b0] sm:$0xff]  ;;  %v4961_v57 = vld [vmem:[#allocation2 + $0x278] sm:$0xff] }
 0x57d   : > { %v4724_v15 = vpop.permute.xlu2 %4723  ;;  %v8227_v34 = vpop.permute.xlu1 %4369  ;;  %4040 = vrot.lane.b32.xlu0 %v4006_v5, %s5883_s21 }
 0x57e   : > { %v4759_v60 = vsel %vm1650_vm7, %v8054_v24, %v4724_v15  ;;  %v4760_v62 = vsel %vm1650_vm7, %v4724_v15, %v8147_v49  ;;  %5135 = vmatpush.msra.mxu0 %v4937_v22  ;;  %5158 = vmatpush.msra.mxu1 %v4938_v55  ;;  %v4402_v37 = vsel %vm1309_vm5, %v8171_v32, %v8227_v34  ;;  %v4897_v49 = vld [vmem:[#allocation2 + $0x528] sm:$0xff]  ;;  %v8282_v55 = vld [vmem:[%s8637_s1] sm:$0xff] }
 0x57f   : > { %4799 = vst [vmem:[#allocation2 + $0x300] sm:$0xc0] %v4759_v60  ;;  %v5044_v47 = vld [vmem:[#allocation2 + $0x428] sm:$0x1]  ;;  %v4364_v24 = vpop.permute.xlu0 %4363  ;;  %5783 = vmatmul.msk.f32.vlgmr.msra.gmra.mxu2 %vm5057_vm9, %v8282_v55  ;;  %5786 = vmatmul.msk.f32.vlgmr.msra.gmra.mxu3 %vm5057_vm9, %v8282_v55 }
 0x580   : > { %4800 = vst [vmem:[#allocation2 + $0x678] sm:$0xc0] %v4760_v62  ;;  %5136 = vmatpush.msra.mxu0 %v4917_v10  ;;  %5159 = vmatpush.msra.mxu1 %v4918_v51  ;;  %v4399_v6 = vsel %vm1309_vm5, %v8062_v40, %v4364_v24  ;;  %v4400_v32 = vsel %vm1309_vm5, %v4364_v24, %v8161_v41  ;;  %v5003_v33 = vld [vmem:[#allocation2 + $0x228] sm:$0xff]  ;;  %v4863_v10 = vld [vmem:[#allocation2 + $0x1a0] sm:$0xff] }
 0x581   : > { %4819 = vst [vmem:[#allocation2 + $0x190] sm:$0x1] %v4759_v60  ;;  %5797 = vmatpush.msk.msrb.mxu3 %vm5064_vm8, %v5044_v47  ;;  %v4857_v40 = vld [vmem:[#allocation2 + $0x3c8] sm:$0xff]  ;;  %5270 = vmatpush.msrb.mxu2 %v5003_v33  ;;  %v4883_v60 = vld [vmem:[#allocation2 + $0x58] sm:$0xff]  ;;  %v8703_v24 = vld [vmem:[#allocation11_spill] sm:$0xff] }
 0x582   : > { %4820 = vst [vmem:[#allocation2 + $0x148] sm:$0x1] %v4760_v62  ;;  %5137 = vmatpush.msra.mxu0 %v4897_v49  ;;  %5160 = vmatpush.msra.mxu1 %v4898_v45  ;;  %v8701_v62 = vld [vmem:[#allocation17_spill] sm:$0xff]  ;;  %v4689_v51 = vld.sshfl [vmem:[#allocation1 + $0x10] sm:$0xff pattern:$0x75316420] }
 0x583   : > { %4442 = vst [vmem:[#allocation2 + $0x638] sm:$0x7] %v4402_v37  ;;  %4046 = vrot.lane.b32.xlu2 %v4009_v28, %s5883_s21  ;;  %4044 = vrot.lane.b32.xlu1 %v4008_v46, %s5883_s21  ;;  %v8702_v28 = vld [vmem:[#allocation40_spill] sm:$0xff]  ;;  %v4710_v37 = vrot.slane %v4689_v51, 2  ;;  %v4186_v49 = vrot.slane %v8703_v24, 3 }
 0x584   : > { %5138 = vmatpush.msra.mxu0 %v4877_v31  ;;  %5161 = vmatpush.msra.mxu1 %v4878_v17  ;;  %4439 = vst [vmem:[#allocation2 + $0x300] sm:$0x7] %v4399_v6  ;;  %v4691_v6 = vld.sshfl [vmem:[#allocation1 + $0x20] sm:$0xff pattern:$0x75316420] }
 0x585   : > { %v4025_v56 = vpop.permute.xlu2 %4024  ;;  %v8248_v1 = vpop.permute.xlu1 %4549  ;;  %4440 = vst [vmem:[#allocation2 + $0x678] sm:$0x7] %v4400_v32  ;;  %5271 = vmatpush.msrb.mxu2 %v4983_v38  ;;  %4751 = vrot.lane.b32.xlu0 %v4711_v9, %s5887_s25  ;;  %v4712_v17 = vrot.slane %v4691_v6, 2  ;;  %v4922_v6 = vld [vmem:[#allocation2 + $0x448] sm:$0xff] }
 0x586   : > { %v4060_v41 = vsel %vm927_vm3, %v8082_v3, %v4025_v56  ;;  %v4061_v48 = vsel %vm927_vm3, %v4025_v56, %v8193_v8  ;;  %5139 = vmatpush.msra.mxu0 %v4857_v40  ;;  %5162 = vmatpush.msra.mxu1 %v4858_v7  ;;  %v4582_v61 = vsel %vm1490_vm6, %v8184_v0, %v8248_v1  ;;  %v4963_v8 = vld [vmem:[#allocation2 + $0x110] sm:$0xff]  ;;  %v8704_v40 = vld [vmem:[#allocation3_spill] sm:$0xff] }
 0x587   : > { %4100 = vst [vmem:[#allocation2 + $0x560] sm:$0x1c] %v4060_v41  ;;  %v4205_v29 = vpop.permute.xlu0 %4204  ;;  %5272 = vmatpush.msrb.mxu2 %v4963_v8  ;;  %v3813_v7 = vrot.slane %v8704_v40, 1  ;;  %v4904_v8 = vld [vmem:[#allocation2 + $0x98] sm:$0xff] }
 0x588   : > { %4101 = vst [vmem:[#allocation2 + $0x50] sm:$0x1c] %v4061_v48  ;;  %5140 = vmatpush.msra.mxu0 %v4837_v30  ;;  %5163 = vmatpush.msra.mxu1 %v4838_v4  ;;  %v5041_v3 = vld [vmem:[#allocation2 + $0x190] sm:$0x1]  ;;  %v4240_v18 = vsel %vm1108_vm4, %v8097_v23, %v4205_v29  ;;  %v4241_v58 = vsel %vm1108_vm4, %v4205_v29, %v8210_v12  ;;  %v4923_v23 = vld [vmem:[#allocation2] sm:$0xff]  ;;  %v8706_v29 = vld [vmem:[#allocation6_spill] sm:$0xff] }
 0x589   : > { %4622 = vst [vmem:[#allocation2 + $0x638] sm:$0x38] %v4582_v61  ;;  %v5042_v0 = vld [vmem:[#allocation2 + $0x148] sm:$0x1]  ;;  %5273 = vmatpush.msrb.mxu2 %v4943_v2  ;;  %5777 = vmatmul.msk.f32.vlgmr.msra.gmra.mxu0 %vm5057_vm9, %v8282_v55  ;;  %v4982_v2 = vld [vmem:[#allocation2 + $0x630] sm:$0xff] }
 0x58a   : > { %5788 = vmatpush.msk.msrb.mxu0 %vm5064_vm8, %v5041_v3  ;;  %5791 = vmatpush.msk.msrb.mxu1 %vm5064_vm8, %v5042_v0  ;;  %4280 = vst [vmem:[#allocation2 + $0x560] sm:$0xe0] %v4240_v18  ;;  %v4944_v61 = vld [vmem:[#allocation2 + $0x688] sm:$0xff]  ;;  %v4013_v0 = vrot.slane %v8706_v29, 6  ;;  %v4884_v18 = vld [vmem:[#allocation2 + $0x3f0] sm:$0xff] }
 0x58b   : > { %4226 = vrot.lane.b32.xlu2 %v4189_v14, %s5884_s22  ;;  %4224 = vrot.lane.b32.xlu1 %v4188_v54, %s5884_s22  ;;  %4281 = vst [vmem:[#allocation2 + $0x50] sm:$0xe0] %v4241_v58  ;;  %v4924_v14 = vld [vmem:[#allocation2 + $0x2d0] sm:$0xff]  ;;  %v4981_v58 = vld [vmem:[#allocation2 + $0x698] sm:$0xff] }
 0x58c   : > { %5274 = vmatpush.msrb.mxu2 %v4923_v23  ;;  %5780 = vmatmul.msk.f32.vlgmr.msra.gmra.mxu1 %vm5057_vm9, %v8282_v55  ;;  %v4864_v23 = vld [vmem:[#allocation2 + $0x260] sm:$0xff] }
 0x58d   : > { %v8268_v63 = vpop.permute.xlu2 %4735  ;;  %v8270_v11 = vpop.permute.xlu1 %4030  ;;  %4391 = vrot.lane.b32.xlu0 %v8702_v28, %s5885_s23 }
 0x58e   : > { %v4063_v12 = vsel %vm927_vm3, %v8200_v39, %v8270_v11  ;;  %5275 = vmatpush.msrb.mxu2 %v4903_v26  ;;  %v4844_v26 = vld [vmem:[#allocation2 + $0x378] sm:$0xff] }
 0x58f   : > { %4103 = vst [vmem:[#allocation2 + $0xf0] sm:$0x1c] %v4063_v12  ;;  %v8277_v22 = vpop.permute.xlu0 %4737 }
 0x590   : > { %v5024_v15 = vld [vmem:[#allocation2 + $0x638] sm:$0xff]  ;;  %v4766_v39 = vsel %vm1650_vm7, %v8268_v63, %v8277_v22  ;;  %5276 = vmatpush.msrb.mxu2 %v4883_v60 }
 0x591   : > { %5292 = vmatpush.msrb.mxu3 %v5024_v15  ;;  %4806 = vst [vmem:[#allocation2 + $0x3e8] sm:$0xc0] %v4766_v39  ;;  %v5001_v4 = vld [vmem:[#allocation2 + $0x560] sm:$0xff]  ;;  %v8708_v15 = vld [vmem:[#allocation4_spill] sm:$0xff] }
 0x592   : > { %4826 = vst [vmem:[#allocation2 + $0x488] sm:$0x1] %v4766_v39  ;;  %5277 = vmatpush.msrb.mxu2 %v4863_v10  ;;  %v5002_v54 = vld [vmem:[#allocation2 + $0x50] sm:$0xff]  ;;  %v3812_v60 = vrot.slane %v8708_v15, 1 }
 0x593   : > { %4559 = vrot.lane.b32.xlu2 %v4525_v53, %s5886_s24  ;;  %4379 = vrot.lane.b32.xlu1 %v8701_v62, %s5885_s23  ;;  %v8709_v39 = vld [vmem:[#allocation41_spill] sm:$0xff] }
 0x594   : > { %5278 = vmatpush.msrb.mxu2 %v4843_v50  ;;  %v4532_v62 = vrot.slane %v8709_v39, 5  ;;  %v4962_v10 = vld [vmem:[#allocation2 + $0x270] sm:$0xff] }
 0x595   : > { %v8296_v47 = vpop.permute.xlu2 %4375  ;;  %v8298_v52 = vpop.permute.xlu1 %4210  ;;  %4571 = vrot.lane.b32.xlu0 %v4531_v19, %s5886_s24  ;;  %v4941_v50 = vld [vmem:[#allocation2 + $0x590] sm:$0xff] }
 0x596   : > { %v4243_v46 = vsel %vm1108_vm4, %v8220_v13, %v8298_v52  ;;  %v4928_v15 = vld [vmem:[#allocation2 + $0x430] sm:$0xff] }
 0x597   : > { %4283 = vst [vmem:[#allocation2 + $0xf0] sm:$0xe0] %v4243_v46  ;;  %v8308_v45 = vpop.permute.xlu0 %4377  ;;  %v4942_v46 = vld [vmem:[#allocation2 + $0x3e0] sm:$0xff] }
 0x598   : > { %v4406_v5 = vsel %vm1309_vm5, %v8296_v47, %v8308_v45 }
 0x599   : > { %4446 = vst [vmem:[#allocation2 + $0x3e8] sm:$0x7] %v4406_v5  ;;  %v5048_v28 = vld [vmem:[#allocation2 + $0x488] sm:$0x1]  ;;  %v4921_v5 = vld [vmem:[#allocation2 + $0x3b8] sm:$0xff] }
 0x59b   : > { %4749 = vrot.lane.b32.xlu2 %v4710_v37, %s5887_s25  ;;  %4220 = vrot.lane.b32.xlu1 %v4186_v49, %s5884_s22 }
 0x59d   : > { %v8316_v13 = vpop.permute.xlu2 %4555  ;;  %v4544_v32 = vpop.permute.xlu1 %4543  ;;  %3854 = vrot.lane.b32.xlu0 %v3813_v7, %s5882_s20  ;;  %v8711_v7 = vld [vmem:[#allocation15_spill] sm:$0xff] }
 0x59e   : > { %v4579_v33 = vsel %vm1490_vm6, %v8073_v36, %v4544_v32  ;;  %v4580_v27 = vsel %vm1490_vm6, %v4544_v32, %v8179_v59  ;;  %v5004_v31 = vld [vmem:[#allocation2 + $0xf0] sm:$0xff]  ;;  %v8705_v36 = vld [vmem:[#allocation39_spill] sm:$0xff]  ;;  %v4964_v59 = vld [vmem:[#allocation2 + $0x38] sm:$0xff] }
 0x59f   : > { %4619 = vst [vmem:[#allocation2 + $0x300] sm:$0x38] %v4579_v33  ;;  %5293 = vmatpush.msrb.mxu3 %v5004_v31  ;;  %v8323_v56 = vpop.permute.xlu0 %4557  ;;  %v4902_v31 = vld [vmem:[#allocation2 + $0x2b8] sm:$0xff] }
 0x5a0   : > { %4620 = vst [vmem:[#allocation2 + $0x678] sm:$0x38] %v4580_v27  ;;  %v4586_v41 = vsel %vm1490_vm6, %v8316_v13, %v8323_v56  ;;  %v4901_v27 = vld [vmem:[#allocation2 + $0x6b0] sm:$0xff] }
 0x5a1   : > { %5294 = vmatpush.msrb.mxu3 %v4984_v25  ;;  %4626 = vst [vmem:[#allocation2 + $0x3e8] sm:$0x38] %v4586_v41  ;;  %v4012_v41 = vrot.slane %v8711_v7, 6 }
 0x5a3   : > { %4389 = vrot.lane.b32.xlu2 %v8705_v36, %s5885_s23  ;;  %4753 = vrot.lane.b32.xlu1 %v4712_v17, %s5887_s25  ;;  %v8712_v36 = vld [vmem:[#allocation14_spill] sm:$0xff] }
 0x5a4   : > { %5295 = vmatpush.msrb.mxu3 %v4964_v59  ;;  %v4011_v59 = vrot.slane %v8712_v36, 6 }
 0x5a5   : > { %v8332_v48 = vpop.permute.xlu2 %4036  ;;  %v8334_v38 = vpop.permute.xlu1 %4733  ;;  %4054 = vrot.lane.b32.xlu0 %v4013_v0, %s5883_s21 }
 0x5a6   : > { %5296 = vmatpush.msrb.mxu3 %v4944_v61  ;;  %v4765_v44 = vsel %vm1650_vm7, %v8334_v38, %v8268_v63  ;;  %v5021_v30 = vld [vmem:[#allocation2 + $0x300] sm:$0xff]  ;;  %v4881_v61 = vld [vmem:[#allocation2 + $0x610] sm:$0xff] }
 0x5a7   : > { %4805 = vst [vmem:[#allocation2 + $0x4c0] sm:$0xc0] %v4765_v44  ;;  %5223 = vmatpush.msrb.mxu0 %v5021_v30  ;;  %v5022_v21 = vld [vmem:[#allocation2 + $0x678] sm:$0xff]  ;;  %v8341_v3 = vpop.permute.xlu0 %4038 }
 0x5a8   : > { %4825 = vst [vmem:[#allocation2 + $0x218] sm:$0x1] %v4765_v44  ;;  %5246 = vmatpush.msrb.mxu1 %v5022_v21  ;;  %5297 = vmatpush.msrb.mxu3 %v4924_v14  ;;  %v4067_v9 = vsel %vm927_vm3, %v8332_v48, %v8341_v3  ;;  %v5028_v19 = vld [vmem:[#allocation2 + $0x3e8] sm:$0xff]  ;;  %v4882_v44 = vld [vmem:[#allocation2 + $0x220] sm:$0xff]  ;;  %v4529_v21 = vrot.slane %v7934_v35, 5 }
 0x5a9   : > { %5224 = vmatpush.msrb.mxu0 %v5001_v4  ;;  %4107 = vst [vmem:[#allocation2 + $0x478] sm:$0x1c] %v4067_v9  ;;  %v4862_v4 = vld [vmem:[#allocation2 + $0xa0] sm:$0xff]  ;;  %v4988_v9 = vld [vmem:[#allocation2 + $0x1e8] sm:$0xff] }
 0x5aa   : > { %5298 = vmatpush.msrb.mxu3 %v4904_v8  ;;  %5247 = vmatpush.msrb.mxu1 %v5002_v54  ;;  %v4841_v54 = vld [vmem:[#allocation2 + $0x450] sm:$0xff]  ;;  %v4842_v8 = vld [vmem:[#allocation2 + $0x328] sm:$0xff] }
 0x5ab   : > { %4569 = vrot.lane.b32.xlu2 %v4530_v43, %s5886_s24  ;;  %4393 = vrot.lane.b32.xlu1 %v8707_v16, %s5885_s23  ;;  %v8713_v16 = vld [vmem:[#allocation30_spill] sm:$0xff] }
 0x5ac   : > { %5299 = vmatpush.msrb.mxu3 %v4884_v18  ;;  %5225 = vmatpush.msrb.mxu0 %v4981_v58  ;;  %v4192_v18 = vrot.slane %v8713_v16, 3  ;;  %v8714_v58 = vld [vmem:[#allocation29_spill] sm:$0xff] }
 0x5ad   : > { %v8350_v63 = vpop.permute.xlu2 %4216  ;;  %v4374_v12 = vpop.permute.xlu1 %4373  ;;  %5248 = vmatpush.msrb.mxu1 %v4982_v2  ;;  %v4191_v2 = vrot.slane %v8714_v58, 3  ;;  %v4965_v16 = vld [vmem:[#allocation2 + $0x230] sm:$0xff] }
 0x5ae   : > { %5300 = vmatpush.msrb.mxu3 %v4864_v23  ;;  %v4405_v53 = vsel %vm1309_vm5, %v4374_v12, %v8296_v47  ;;  %5226 = vmatpush.msrb.mxu0 %v4961_v57  ;;  %v8710_v47 = vld [vmem:[#allocation16_spill] sm:$0xff]  ;;  %v4688_v57 = vld.sshfl [vmem:[#allocation1 + $0x8] sm:$0xff pattern:$0x75316420]  ;;  %v4945_v58 = vld [vmem:[#allocation2 + $0x350] sm:$0xff] }
 0x5af   : > { %4445 = vst [vmem:[#allocation2 + $0x4c0] sm:$0x7] %v4405_v53  ;;  %v5047_v51 = vld [vmem:[#allocation2 + $0x218] sm:$0x1]  ;;  %5249 = vmatpush.msrb.mxu1 %v4962_v10  ;;  %v8358_v37 = vpop.permute.xlu0 %4218  ;;  %v4193_v24 = vrot.slane %v8710_v47, 3  ;;  %v4709_v10 = vrot.slane %v4688_v57, 2 }
 0x5b0   : > { %5301 = vmatpush.msrb.mxu3 %v4844_v26  ;;  %5806 = vmatpush.msk.msra.mxu2 %vm5064_vm8, %v5047_v51  ;;  %v4247_v49 = vsel %vm1108_vm4, %v8350_v63, %v8358_v37  ;;  %v4908_v51 = vld [vmem:[#allocation2 + $0x1d8] sm:$0xff] }
 0x5b1   : > { %5227 = vmatpush.msrb.mxu0 %v4941_v50  ;;  %5250 = vmatpush.msrb.mxu1 %v4942_v46  ;;  %4287 = vst [vmem:[#allocation2 + $0x478] sm:$0xe0] %v4247_v49  ;;  %v8715_v50 = vld [vmem:[#allocation33_spill] sm:$0xff]  ;;  %v4868_v46 = vld [vmem:[#allocation2 + $0x3c0] sm:$0xff] }
 0x5b2   : > { %5809 = vmatpush.msk.msra.mxu3 %vm5064_vm8, %v5048_v28  ;;  %4234 = vrot.lane.b32.xlu0 %v4193_v24, %s5884_s22  ;;  %v4888_v28 = vld [vmem:[#allocation2 + $0x4b0] sm:$0xff]  ;;  %v4848_v24 = vld [vmem:[#allocation2 + $0x318] sm:$0xff] }
 0x5b3   : > { %3852 = vrot.lane.b32.xlu2 %v3812_v60, %s5882_s20  ;;  %4573 = vrot.lane.b32.xlu1 %v4532_v62, %s5886_s24 }
 0x5b4   : > { %5228 = vmatpush.msrb.mxu0 %v4921_v5  ;;  %5251 = vmatpush.msrb.mxu1 %v4922_v6 }
 0x5b5   : > { %v4372_v32 = vpop.permute.xlu2 %4371  ;;  %v4554_v33 = vpop.permute.xlu1 %4553  ;;  %5384 = vmatpush.msra.mxu3 %v5028_v19 }
 0x5b6   : > { %v4403_v17 = vsel %vm1309_vm5, %v8227_v34, %v4372_v32  ;;  %v4404_v25 = vsel %vm1309_vm5, %v4372_v32, %v4374_v12  ;;  %v4585_v40 = vsel %vm1490_vm6, %v4554_v33, %v8316_v13  ;;  %5229 = vmatpush.msrb.mxu0 %v4901_v27  ;;  %5252 = vmatpush.msrb.mxu1 %v4902_v31  ;;  %v4861_v34 = vld [vmem:[#allocation2 + $0x118] sm:$0xff]  ;;  %v4968_v12 = vld [vmem:[#allocation2 + $0x400] sm:$0xff]  ;;  %v8717_v27 = vld [vmem:[#allocation13_spill] sm:$0xff] }
 0x5b7   : > { %4443 = vst [vmem:[#allocation2 + $0x280] sm:$0x7] %v4403_v17  ;;  %v4552_v30 = vpop.permute.xlu0 %4551  ;;  %v8716_v32 = vld [vmem:[#allocation23_spill] sm:$0xff]  ;;  %v4010_v31 = vrot.slane %v8717_v27, 6  ;;  %v4987_v17 = vld [vmem:[#allocation2 + $0x1c8] sm:$0xff] }
 0x5b8   : > { %4444 = vst [vmem:[#allocation2 + $0x570] sm:$0x7] %v4404_v25  ;;  %5230 = vmatpush.msrb.mxu0 %v4881_v61  ;;  %5253 = vmatpush.msrb.mxu1 %v4882_v44  ;;  %v4583_v13 = vsel %vm1490_vm6, %v8248_v1, %v4552_v30  ;;  %v4584_v14 = vsel %vm1490_vm6, %v4552_v30, %v4554_v33  ;;  %v5008_v43 = vld [vmem:[#allocation2 + $0x478] sm:$0xff]  ;;  %v4190_v33 = vrot.slane %v8716_v32, 3  ;;  %v4947_v25 = vld [vmem:[#allocation2 + $0x2c8] sm:$0xff] }
 0x5b9   : > { %4625 = vst [vmem:[#allocation2 + $0x4c0] sm:$0x38] %v4585_v40  ;;  %5385 = vmatpush.msra.mxu3 %v5008_v43  ;;  %v4907_v30 = vld [vmem:[#allocation2 + $0xc8] sm:$0xff] }
 0x5ba   : > { %5231 = vmatpush.msrb.mxu0 %v4861_v34  ;;  %5254 = vmatpush.msrb.mxu1 %v4862_v4  ;;  %4623 = vst [vmem:[#allocation2 + $0x280] sm:$0x38] %v4583_v13  ;;  %v4887_v4 = vld [vmem:[#allocation2 + $0x368] sm:$0xff]  ;;  %v4867_v13 = vld [vmem:[#allocation2 + $0x538] sm:$0xff] }
 0x5bb   : > { %4052 = vrot.lane.b32.xlu2 %v4012_v41, %s5883_s21  ;;  %4050 = vrot.lane.b32.xlu1 %v4011_v59, %s5883_s21  ;;  %4624 = vst [vmem:[#allocation2 + $0x570] sm:$0x38] %v4584_v14  ;;  %v4927_v59 = vld [vmem:[#allocation2 + $0x5e0] sm:$0xff]  ;;  %v4845_v27 = vld [vmem:[#allocation2 + $0x108] sm:$0xff] }
 0x5bc   : > { %5232 = vmatpush.msrb.mxu0 %v4841_v54  ;;  %5255 = vmatpush.msrb.mxu1 %v4842_v8 }
 0x5bd   : > { %v4213_v29 = vpop.permute.xlu2 %4212  ;;  %v8381_v35 = vpop.permute.xlu1 %4034  ;;  %4567 = vrot.lane.b32.xlu0 %v4529_v21, %s5886_s24  ;;  %5386 = vmatpush.msra.mxu3 %v4988_v9  ;;  %v4986_v9 = vld [vmem:[#allocation2 + $0x380] sm:$0xff] }
 0x5be   : > { %v4244_v1 = vsel %vm1108_vm4, %v8298_v52, %v4213_v29  ;;  %v4066_v0 = vsel %vm927_vm3, %v8381_v35, %v8332_v48  ;;  %v8394_v52 = vld [vmem:[%s8637_s1 + $0x8] sm:$0xff] }
 0x5bf   : > { %4284 = vst [vmem:[#allocation2 + $0x658] sm:$0xe0] %v4244_v1  ;;  %5387 = vmatpush.msra.mxu3 %v4968_v12  ;;  %v4948_v48 = vld [vmem:[#allocation2 + $0x200] sm:$0xff]  ;;  %5784 = vmatmul.msk.f32.gmra.mxu2 %vm5057_vm9, %v8394_v52  ;;  %v8409_v62 = vpop.permute.xlu0 %4741  ;;  %v4946_v12 = vld [vmem:[#allocation2 + $0x618] sm:$0xff] }
 0x5c0   : > { %4106 = vst [vmem:[#allocation2 + $0x238] sm:$0x1c] %v4066_v0  ;;  %v5027_v23 = vld [vmem:[#allocation2 + $0x4c0] sm:$0xff]  ;;  %5787 = vmatmul.msk.f32.gmra.mxu3 %vm5057_vm9, %v8394_v52  ;;  %5778 = vmatmul.msk.f32.gmra.mxu0 %vm5057_vm9, %v8394_v52 }
 0x5c1   : > { %5361 = vmatpush.msra.mxu2 %v5027_v23  ;;  %5388 = vmatpush.msra.mxu3 %v4948_v48  ;;  %v4985_v0 = vld [vmem:[#allocation2 + $0x600] sm:$0xff] }
 0x5c2   : > { %5781 = vmatmul.msk.f32.gmra.mxu1 %vm5057_vm9, %v8394_v52 }
 0x5c3   : > { %4232 = vrot.lane.b32.xlu2 %v4192_v18, %s5884_s22  ;;  %4230 = vrot.lane.b32.xlu1 %v4191_v2, %s5884_s22  ;;  %v4966_v18 = vld [vmem:[#allocation2 + $0x620] sm:$0xff] }
 0x5c4   : > { %5389 = vmatpush.msra.mxu3 %v4928_v15 }
 0x5c5   : > { %v8400_v53 = vpop.permute.xlu2 %4745  ;;  %v4215_v26 = vpop.permute.xlu1 %4214 }
 0x5c6   : > { %v4245_v60 = vsel %vm1108_vm4, %v4213_v29, %v4215_v26  ;;  %v4246_v39 = vsel %vm1108_vm4, %v4215_v26, %v8350_v63  ;;  %5390 = vmatpush.msra.mxu3 %v4908_v51  ;;  %v4925_v26 = vld [vmem:[#allocation2 + $0x10] sm:$0xff] }
 0x5c7   : > { %4285 = vst [vmem:[#allocation2 + $0x240] sm:$0xe0] %v4245_v60  ;;  %5795 = vmatmul.msk.f32.vlgmr.msrb.gmra.mxu2 %vm5057_vm9, %v8282_v55  ;;  %v8428_v5 = vpop.permute.xlu0 %4381  ;;  %v4926_v60 = vld [vmem:[#allocation2 + $0x520] sm:$0xff] }
 0x5c8   : > { %4286 = vst [vmem:[#allocation2 + $0x238] sm:$0xe0] %v4246_v39  ;;  %5391 = vmatpush.msra.mxu3 %v4888_v28  ;;  %5789 = vmatmul.msk.f32.vlgmr.msrb.gmra.mxu0 %vm5057_vm9, %v8282_v55  ;;  %v4906_v28 = vld [vmem:[#allocation2 + $0x1f8] sm:$0xff] }
 0x5c9   : > { %5798 = vmatmul.msk.f32.vlgmr.msrb.gmra.mxu3 %vm5057_vm9, %v8282_v55 }
 0x5ca   : > { %5392 = vmatpush.msra.mxu3 %v4868_v46  ;;  %5792 = vmatmul.msk.f32.vlgmr.msrb.gmra.mxu1 %vm5057_vm9, %v8282_v55  ;;  %v4886_v46 = vld [vmem:[#allocation2 + $0xb0] sm:$0xff] }
 0x5cb   : > { %4387 = vrot.lane.b32.xlu2 %v8715_v50, %s5885_s23  ;;  %4747 = vrot.lane.b32.xlu1 %v4709_v10, %s5887_s25  ;;  %v4905_v10 = vld [vmem:[#allocation2 + $0x120] sm:$0xff]  ;;  %v4885_v50 = vld [vmem:[#allocation2 + $0x5e8] sm:$0xff] }
 0x5cc   : > { %5393 = vmatpush.msra.mxu3 %v4848_v24 }
 0x5cd   : > { %v8418_v63 = vpop.permute.xlu2 %4385  ;;  %v4732_v47 = vpop.permute.xlu1 %4731 }
 0x5ce   : > { %v4763_v49 = vsel %vm1650_vm7, %v8212_v42, %v4732_v47  ;;  %v4764_v19 = vsel %vm1650_vm7, %v4732_v47, %v8334_v38  ;;  %v4967_v42 = vld [vmem:[#allocation2 + $0x3a8] sm:$0xff]  ;;  %v4865_v47 = vld [vmem:[#allocation2 + $0xe0] sm:$0xff] }
 0x5cf   : > { %4803 = vst [vmem:[#allocation2 + $0x280] sm:$0xc0] %v4763_v49  ;;  %v5007_v6 = vld [vmem:[#allocation2 + $0x238] sm:$0xff]  ;;  %5796 = vmatmul.msk.f32.gmra.mxu2 %vm5057_vm9, %v8394_v52  ;;  %v8446_v36 = vpop.permute.xlu0 %4561 }
 0x5d0   : > { %4804 = vst [vmem:[#allocation2 + $0x570] sm:$0xc0] %v4764_v19  ;;  %5362 = vmatpush.msra.mxu2 %v5007_v6  ;;  %5790 = vmatmul.msk.f32.gmra.mxu0 %vm5057_vm9, %v8394_v52 }
 0x5d1   : > { %4823 = vst [vmem:[#allocation2 + $0x88] sm:$0x1] %v4763_v49  ;;  %5799 = vmatmul.msk.f32.gmra.mxu3 %vm5057_vm9, %v8394_v52 }
 0x5d2   : > { %4824 = vst [vmem:[#allocation2 + $0x258] sm:$0x1] %v4764_v19  ;;  %5363 = vmatpush.msra.mxu2 %v4987_v17  ;;  %5793 = vmatmul.msk.f32.gmra.mxu1 %vm5057_vm9, %v8394_v52  ;;  %v4866_v19 = vld [vmem:[#allocation2 + $0x3a0] sm:$0xff]  ;;  %v4846_v17 = vld [vmem:[#allocation2 + $0x510] sm:$0xff] }
 0x5d3   : > { %4228 = vrot.lane.b32.xlu2 %v4190_v33, %s5884_s22  ;;  %4048 = vrot.lane.b32.xlu1 %v4010_v31, %s5883_s21 }
 0x5d4   : > { %5364 = vmatpush.msra.mxu2 %v4967_v42 }
 0x5d5   : > { %v8436_v38 = vpop.permute.xlu2 %4565  ;;  %v4033_v40 = vpop.permute.xlu1 %4032 }
 0x5d6   : > { %5365 = vmatpush.msra.mxu2 %v4947_v25  ;;  %v4064_v7 = vsel %vm927_vm3, %v8270_v11, %v4033_v40  ;;  %v4065_v41 = vsel %vm927_vm3, %v4033_v40, %v8381_v35  ;;  %v5025_v44 = vld [vmem:[#allocation2 + $0x280] sm:$0xff]  ;;  %v4847_v35 = vld [vmem:[#allocation2 + $0x490] sm:$0xff] }
 0x5d7   : > { %4104 = vst [vmem:[#allocation2 + $0x658] sm:$0x1c] %v4064_v7  ;;  %v5026_v34 = vld [vmem:[#allocation2 + $0x570] sm:$0xff]  ;;  %v8462_v29 = vpop.permute.xlu0 %4042 }
 0x5d8   : > { %4105 = vst [vmem:[#allocation2 + $0x240] sm:$0x1c] %v4065_v41  ;;  %v5045_v61 = vld [vmem:[#allocation2 + $0x88] sm:$0x1]  ;;  %5366 = vmatpush.msra.mxu2 %v4927_v59 }
 0x5d9   : > { %5800 = vmatpush.msk.msra.mxu0 %vm5064_vm8, %v5045_v61  ;;  %v5046_v11 = vld [vmem:[#allocation2 + $0x258] sm:$0x1]  ;;  %5810 = vmatmul.msk.f32.vlgmr.msra.gmra.mxu3 %vm5057_vm9, %v8282_v55 }
 0x5da   : > { %5803 = vmatpush.msk.msra.mxu1 %vm5064_vm8, %v5046_v11  ;;  %5367 = vmatpush.msra.mxu2 %v4907_v30 }
 0x5db   : > { %5315 = vmatpush.msra.mxu0 %v5025_v44 }
 0x5dc   : > { %5368 = vmatpush.msra.mxu2 %v4887_v4  ;;  %5338 = vmatpush.msra.mxu1 %v5026_v34 }
 0x5dd   : > { %v8454_v21 = vpop.permute.xlu2 %4046  ;;  %v4744_v14 = vpop.permute.xlu1 %4743 }
 0x5de   : > { %5369 = vmatpush.msra.mxu2 %v4867_v13  ;;  %v4769_v43 = vsel %vm1650_vm7, %v8409_v62, %v4744_v14  ;;  %v4770_v54 = vsel %vm1650_vm7, %v4744_v14, %v8400_v53  ;;  %v5005_v8 = vld [vmem:[#allocation2 + $0x658] sm:$0xff] }
 0x5df   : > { %4809 = vst [vmem:[#allocation2 + $0x1d0] sm:$0xc0] %v4769_v43  ;;  %5316 = vmatpush.msra.mxu0 %v5005_v8  ;;  %v5006_v1 = vld [vmem:[#allocation2 + $0x240] sm:$0xff]  ;;  %v8474_v15 = vpop.permute.xlu0 %4222 }
 0x5e0   : > { %4810 = vst [vmem:[#allocation2 + $0x648] sm:$0xc0] %v4770_v54  ;;  %5370 = vmatpush.msra.mxu2 %v4847_v35  ;;  %5339 = vmatpush.msra.mxu1 %v5006_v1 }
 0x5e1   : > { %4829 = vst [vmem:[#allocation2 + $0x518] sm:$0x1] %v4769_v43  ;;  %5317 = vmatpush.msra.mxu0 %v4985_v0  ;;  %5807 = vmatmul.msk.f32.vlgmr.msra.gmra.mxu2 %vm5057_vm9, %v8282_v55 }
 0x5e2   : > { %4830 = vst [vmem:[#allocation2 + $0xd8] sm:$0x1] %v4770_v54  ;;  %5340 = vmatpush.msra.mxu1 %v4986_v9  ;;  %5811 = vmatmul.msk.f32.gmra.mxu3 %vm5057_vm9, %v8394_v52 }
 0x5e3   : > { %5318 = vmatpush.msra.mxu0 %v4965_v16  ;;  %v4991_v16 = vld [vmem:[#allocation2 + $0x388] sm:$0xff] }
 0x5e4   : > { %5341 = vmatpush.msra.mxu1 %v4966_v18 }
 0x5e5   : > { %v8466_v2 = vpop.permute.xlu2 %4226  ;;  %v4384_v23 = vpop.permute.xlu1 %4383  ;;  %5319 = vmatpush.msra.mxu0 %v4945_v58  ;;  %v4992_v58 = vld [vmem:[#allocation2 + $0x170] sm:$0xff] }
 0x5e6   : > { %v4409_v48 = vsel %vm1309_vm5, %v8428_v5, %v4384_v23  ;;  %v4410_v57 = vsel %vm1309_vm5, %v4384_v23, %v8418_v63  ;;  %5342 = vmatpush.msra.mxu1 %v4946_v12  ;;  %v4951_v23 = vld [vmem:[#allocation2 + $0x418] sm:$0xff] }
 0x5e7   : > { %4449 = vst [vmem:[#allocation2 + $0x1d0] sm:$0x7] %v4409_v48  ;;  %5320 = vmatpush.msra.mxu0 %v4925_v26  ;;  %v4740_v42 = vpop.permute.xlu0 %4739  ;;  %v4952_v48 = vld [vmem:[#allocation2 + $0x308] sm:$0xff] }
 0x5e8   : > { %4450 = vst [vmem:[#allocation2 + $0x648] sm:$0x7] %v4410_v57  ;;  %v5051_v39 = vld [vmem:[#allocation2 + $0x518] sm:$0x1]  ;;  %5343 = vmatpush.msra.mxu1 %v4926_v60  ;;  %v4768_v25 = vsel %vm1650_vm7, %v4740_v42, %v8409_v62 }
 0x5e9   : > { %5818 = vmatpush.msk.msrb.mxu2 %vm5064_vm8, %v5051_v39  ;;  %v5052_v51 = vld [vmem:[#allocation2 + $0xd8] sm:$0x1]  ;;  %5321 = vmatpush.msra.mxu0 %v4905_v10  ;;  %4808 = vst [vmem:[#allocation2 + $0x1e0] sm:$0xc0] %v4768_v25  ;;  %v4931_v39 = vld [vmem:[#allocation2 + $0x210] sm:$0xff] }
 0x5ea   : > { %5821 = vmatpush.msk.msrb.mxu3 %vm5064_vm8, %v5052_v51  ;;  %5344 = vmatpush.msra.mxu1 %v4906_v28  ;;  %4828 = vst [vmem:[#allocation2 + $0x3f8] sm:$0x1] %v4768_v25  ;;  %v4932_v28 = vld [vmem:[#allocation2 + $0x250] sm:$0xff] }
 0x5eb   : > { %5322 = vmatpush.msra.mxu0 %v4885_v50  ;;  %5808 = vmatmul.msk.f32.gmra.mxu2 %vm5057_vm9, %v8394_v52 }
 0x5ec   : > { %5345 = vmatpush.msra.mxu1 %v4886_v46 }
 0x5ed   : > { %v4560_v24 = vpop.permute.xlu2 %4559  ;;  %v4564_v49 = vpop.permute.xlu1 %4563  ;;  %5323 = vmatpush.msra.mxu0 %v4865_v47  ;;  %v4912_v47 = vld [vmem:[#allocation2 + $0x628] sm:$0xff] }
 0x5ee   : > { %v4587_v6 = vsel %vm1490_vm6, %v8323_v56, %v4560_v24  ;;  %v4588_v32 = vsel %vm1490_vm6, %v4560_v24, %v8446_v36  ;;  %v4589_v33 = vsel %vm1490_vm6, %v8446_v36, %v4564_v49  ;;  %5346 = vmatpush.msra.mxu1 %v4866_v19  ;;  %v4590_v31 = vsel %vm1490_vm6, %v4564_v49, %v8436_v38  ;;  %v4892_v24 = vld [vmem:[#allocation2 + $0x4e0] sm:$0xff]  ;;  %v4871_v49 = vld [vmem:[#allocation2 + $0x4e8] sm:$0xff] }
 0x5ef   : > { %4627 = vst [vmem:[#allocation2 + $0x6c8] sm:$0x38] %v4587_v6  ;;  %5324 = vmatpush.msra.mxu0 %v4845_v27  ;;  %v4767_v56 = vsel %vm1650_vm7, %v8277_v22, %v4740_v42  ;;  %v4041_v36 = vpop.permute.xlu0 %4040  ;;  %v4872_v6 = vld [vmem:[#allocation2 + $0x3d8] sm:$0xff] }
 0x5f0   : > { %4628 = vst [vmem:[#allocation2 + $0x1e0] sm:$0x38] %v4588_v32  ;;  %5347 = vmatpush.msra.mxu1 %v4846_v17  ;;  %5801 = vmatmul.msk.f32.vlgmr.msra.gmra.mxu0 %vm5057_vm9, %v8282_v55  ;;  %v4068_v59 = vsel %vm927_vm3, %v8341_v3, %v4041_v36  ;;  %v4069_v61 = vsel %vm927_vm3, %v4041_v36, %v8462_v29  ;;  %v4852_v17 = vld [vmem:[#allocation2 + $0x320] sm:$0xff]  ;;  %v4990_v36 = vld [vmem:[#allocation2 + $0x28] sm:$0xff] }
 0x5f1   : > { %4629 = vst [vmem:[#allocation2 + $0x1d0] sm:$0x38] %v4589_v33  ;;  %5804 = vmatmul.msk.f32.vlgmr.msra.gmra.mxu1 %vm5057_vm9, %v8282_v55  ;;  %v5050_v3 = vld [vmem:[#allocation2 + $0x3f8] sm:$0x1] }
 0x5f2   : > { %4630 = vst [vmem:[#allocation2 + $0x648] sm:$0x38] %v4590_v31  ;;  %5815 = vmatpush.msk.msrb.mxu1 %vm5064_vm8, %v5050_v3  ;;  %v4851_v31 = vld [vmem:[#allocation2 + $0x6d0] sm:$0xff]  ;;  %v4950_v3 = vld [vmem:[#allocation2 + $0x2a8] sm:$0xff] }
 0x5f3   : > { %4807 = vst [vmem:[#allocation2 + $0x6c8] sm:$0xc0] %v4767_v56 }
 0x5f4   : > { %4827 = vst [vmem:[#allocation2 + $0x140] sm:$0x1] %v4767_v56 }
 0x5f5   : > { %v8496_v40 = vpop.permute.xlu2 %4749  ;;  %v4045_v7 = vpop.permute.xlu1 %4044  ;;  %4108 = vst [vmem:[#allocation2 + $0x4c8] sm:$0x1c] %v4068_v59  ;;  %v4970_v59 = vld [vmem:[#allocation2 + $0x78] sm:$0xff] }
 0x5f6   : > { %v4070_v22 = vsel %vm927_vm3, %v8462_v29, %v4045_v7  ;;  %v4071_v41 = vsel %vm927_vm3, %v4045_v7, %v8454_v21  ;;  %4109 = vst [vmem:[#allocation2 + $0x6b8] sm:$0x1c] %v4069_v61 }
 0x5f7   : > { %4110 = vst [vmem:[#allocation2 + $0x5a8] sm:$0x1c] %v4070_v22  ;;  %v8518_v14 = vpop.permute.xlu0 %4751  ;;  %v4989_v22 = vld [vmem:[#allocation2 + $0x20] sm:$0xff] }
 0x5f8   : > { %4111 = vst [vmem:[#allocation2 + $0x458] sm:$0x1c] %v4071_v41  ;;  %v5031_v62 = vld [vmem:[#allocation2 + $0x1d0] sm:$0xff]  ;;  %5802 = vmatmul.msk.f32.gmra.mxu0 %vm5057_vm9, %v8394_v52  ;;  %v4773_v43 = vsel %vm1650_vm7, %v8496_v40, %v8518_v14 }
 0x5f9   : > { %5453 = vmatpush.msrb.mxu2 %v5031_v62  ;;  %v5032_v44 = vld [vmem:[#allocation2 + $0x648] sm:$0xff]  ;;  %5805 = vmatmul.msk.f32.gmra.mxu1 %vm5057_vm9, %v8394_v52  ;;  %4813 = vst [vmem:[#allocation2 + $0x180] sm:$0xc0] %v4773_v43 }
 0x5fa   : > { %5476 = vmatpush.msrb.mxu3 %v5032_v44  ;;  %4833 = vst [vmem:[#allocation2 + $0x608] sm:$0x1] %v4773_v43  ;;  %v4969_v62 = vld [vmem:[#allocation2 + $0x1a8] sm:$0xff] }
 0x5fb   : > { %v5049_v11 = vld [vmem:[#allocation2 + $0x140] sm:$0x1] }
 0x5fc   : > { %5812 = vmatpush.msk.msrb.mxu0 %vm5064_vm8, %v5049_v11  ;;  %v4949_v11 = vld [vmem:[#allocation2 + $0xd0] sm:$0xff] }
 0x5fd   : > { %v8510_v30 = vpop.permute.xlu2 %4389  ;;  %v4225_v34 = vpop.permute.xlu1 %4224 }
 0x5fe   : > { %v4250_v4 = vsel %vm1108_vm4, %v8474_v15, %v4225_v34  ;;  %v4251_v13 = vsel %vm1108_vm4, %v4225_v34, %v8466_v2 }
 0x5ff   : > { %4290 = vst [vmem:[#allocation2 + $0x5a8] sm:$0xe0] %v4250_v4  ;;  %v8529_v9 = vpop.permute.xlu0 %4391 }
 0x600   : > { %4291 = vst [vmem:[#allocation2 + $0x458] sm:$0xe0] %v4251_v13  ;;  %v4413_v18 = vsel %vm1309_vm5, %v8510_v30, %v8529_v9 }
 0x601   : > { %4453 = vst [vmem:[#allocation2 + $0x180] sm:$0x7] %v4413_v18  ;;  %v5055_v33 = vld [vmem:[#allocation2 + $0x608] sm:$0x1] }
 0x605   : > { %v8523_v54 = vpop.permute.xlu2 %4569  ;;  %v4380_v8 = vpop.permute.xlu1 %4379 }
 0x606   : > { %v4407_v29 = vsel %vm1309_vm5, %v8308_v45, %v4380_v8  ;;  %v4408_v35 = vsel %vm1309_vm5, %v4380_v8, %v8428_v5  ;;  %v5011_v1 = vld [vmem:[#allocation2 + $0x5a8] sm:$0xff]  ;;  %v4971_v45 = vld [vmem:[#allocation2 + $0x130] sm:$0xff]  ;;  %v4972_v5 = vld [vmem:[#allocation2 + $0x100] sm:$0xff] }
 0x607   : > { %4447 = vst [vmem:[#allocation2 + $0x6c8] sm:$0x7] %v4407_v29  ;;  %5454 = vmatpush.msrb.mxu2 %v5011_v1  ;;  %v5012_v0 = vld [vmem:[#allocation2 + $0x458] sm:$0xff]  ;;  %v8540_v46 = vpop.permute.xlu0 %4571  ;;  %v4930_v8 = vld [vmem:[#allocation2 + $0xc0] sm:$0xff] }
 0x608   : > { %4448 = vst [vmem:[#allocation2 + $0x1e0] sm:$0x7] %v4408_v35  ;;  %5477 = vmatpush.msrb.mxu3 %v5012_v0  ;;  %v4909_v29 = vld [vmem:[#allocation2 + $0x360] sm:$0xff]  ;;  %v4889_v1 = vld [vmem:[#allocation2 + $0x2d8] sm:$0xff]  ;;  %v4890_v0 = vld [vmem:[#allocation2 + $0x410] sm:$0xff] }
 0x609   : > { %5455 = vmatpush.msrb.mxu2 %v4991_v16  ;;  %v4910_v35 = vld [vmem:[#allocation2 + $0x580] sm:$0xff] }
 0x60a   : > { %5478 = vmatpush.msrb.mxu3 %v4992_v58 }
 0x60b   : > { %5456 = vmatpush.msrb.mxu2 %v4971_v45  ;;  %v4869_v45 = vld [vmem:[#allocation2 + $0x5f8] sm:$0xff] }
 0x60c   : > { %5479 = vmatpush.msrb.mxu3 %v4972_v5 }
 0x60d   : > { %v3853_v12 = vpop.permute.xlu2 %3852  ;;  %5457 = vmatpush.msrb.mxu2 %v4951_v23  ;;  %v4221_v57 = vpop.permute.xlu1 %4220  ;;  %v4870_v23 = vld [vmem:[#allocation2 + $0x4a0] sm:$0xff] }
 0x60e   : > { %v3874_v26 = vsel %vm766_vm2, %v8039_v20, %v3853_v12  ;;  %5480 = vmatpush.msrb.mxu3 %v4952_v48  ;;  %v4248_v60 = vsel %vm1108_vm4, %v8358_v37, %v4221_v57  ;;  %v5029_v10 = vld [vmem:[#allocation2 + $0x6c8] sm:$0xff]  ;;  %v4249_v51 = vsel %vm1108_vm4, %v4221_v57, %v8474_v15  ;;  %v4911_v20 = vld [vmem:[#allocation2 + $0x5b8] sm:$0xff]  ;;  %v4593_v37 = vsel %vm1490_vm6, %v8523_v54, %v8540_v46 }
 0x60f   : > { %3914 = vst [vmem:[#allocation2 + $0x70] sm:$0x80] %v3874_v26  ;;  %5458 = vmatpush.msrb.mxu2 %v4931_v39  ;;  %5407 = vmatpush.msrb.mxu0 %v5029_v10  ;;  %v5030_v50 = vld [vmem:[#allocation2 + $0x1e0] sm:$0xff]  ;;  %v4891_v15 = vld [vmem:[#allocation2 + $0x408] sm:$0xff]  ;;  %v3855_v42 = vpop.permute.xlu0 %3854 }
 0x610   : > { %3934 = vst [vmem:[#allocation2 + $0x4d0] sm:$0x3] %v3874_v26  ;;  %5481 = vmatpush.msrb.mxu3 %v4932_v28  ;;  %5430 = vmatpush.msrb.mxu1 %v5030_v50  ;;  %v3875_v25 = vsel %vm766_vm2, %v3853_v12, %v3855_v42  ;;  %v4849_v48 = vld [vmem:[#allocation2 + $0x548] sm:$0xff] }
 0x611   : > { %4288 = vst [vmem:[#allocation2 + $0x4c8] sm:$0xe0] %v4248_v60  ;;  %5459 = vmatpush.msrb.mxu2 %v4911_v20 }
 0x612   : > { %4289 = vst [vmem:[#allocation2 + $0x6b8] sm:$0xe0] %v4249_v51  ;;  %5482 = vmatpush.msrb.mxu3 %v4912_v47  ;;  %v4936_v47 = vld [vmem:[#allocation2 + $0x1f0] sm:$0xff] }
 0x613   : > { %5460 = vmatpush.msrb.mxu2 %v4891_v15  ;;  %4633 = vst [vmem:[#allocation2 + $0x180] sm:$0x38] %v4593_v37  ;;  %v4956_v37 = vld [vmem:[#allocation2 + $0x290] sm:$0xff] }
 0x614   : > { %5483 = vmatpush.msrb.mxu3 %v4892_v24  ;;  %3915 = vst [vmem:[#allocation2 + $0xe8] sm:$0x80] %v3875_v25  ;;  %v4916_v15 = vld [vmem:[#allocation2 + $0x330] sm:$0xff] }
 0x615   : > { %v8545_v19 = vpop.permute.xlu2 %4052  ;;  %5461 = vmatpush.msrb.mxu2 %v4871_v49  ;;  %v4754_v32 = vpop.permute.xlu1 %4753  ;;  %3935 = vst [vmem:[#allocation2 + $0x540] sm:$0x3] %v3875_v25 }
 0x616   : > { %5484 = vmatpush.msrb.mxu3 %v4872_v6  ;;  %v4774_v27 = vsel %vm1650_vm7, %v8518_v14, %v4754_v32  ;;  %v4929_v14 = vld [vmem:[#allocation2 + $0x470] sm:$0xff]  ;;  %v4896_v6 = vld [vmem:[#allocation2 + $0x640] sm:$0xff] }
 0x617   : > { %4814 = vst [vmem:[#allocation2 + $0x578] sm:$0xc0] %v4774_v27  ;;  %5462 = vmatpush.msrb.mxu2 %v4851_v31  ;;  %v4055_v13 = vpop.permute.xlu0 %4054  ;;  %v4856_v31 = vld [vmem:[#allocation2 + $0x60] sm:$0xff] }
 0x618   : > { %4834 = vst [vmem:[#allocation2 + $0x158] sm:$0x1] %v4774_v27  ;;  %v5009_v56 = vld [vmem:[#allocation2 + $0x4c8] sm:$0xff]  ;;  %5485 = vmatpush.msrb.mxu3 %v4852_v17  ;;  %5819 = vmatmul.msk.f32.vlgmr.msrb.gmra.mxu2 %vm5057_vm9, %v8282_v55  ;;  %v4075_v43 = vsel %vm927_vm3, %v8545_v19, %v4055_v13  ;;  %v4995_v27 = vld [vmem:[#allocation2 + $0x70] sm:$0xff] }
 0x619   : > { %5830 = vmatpush.msk.msra.mxu2 %vm5064_vm8, %v5055_v33  ;;  %5408 = vmatpush.msrb.mxu0 %v5009_v56  ;;  %v5010_v7 = vld [vmem:[#allocation2 + $0x6b8] sm:$0xff]  ;;  %4115 = vst [vmem:[#allocation2 + $0x540] sm:$0x1c] %v4075_v43  ;;  %v4876_v33 = vld [vmem:[#allocation2 + $0x6a0] sm:$0xff]  ;;  %v4975_v17 = vld [vmem:[#allocation2 + $0x4a8] sm:$0xff] }
 0x61a   : > { %5431 = vmatpush.msrb.mxu1 %v5010_v7  ;;  %5822 = vmatmul.msk.f32.vlgmr.msrb.gmra.mxu3 %vm5057_vm9, %v8282_v55  ;;  %v5035_v41 = vld [vmem:[#allocation2 + $0x180] sm:$0xff]  ;;  %v4935_v7 = vld [vmem:[#allocation2 + $0x48] sm:$0xff]  ;;  %v4994_v43 = vld [vmem:[#allocation2 + $0x438] sm:$0xff] }
 0x61b   : > { %5409 = vmatpush.msrb.mxu0 %v4989_v22  ;;  %5545 = vmatpush.msra.mxu2 %v5035_v41 }
 0x61c   : > { %5432 = vmatpush.msrb.mxu1 %v4990_v36 }
 0x61d   : > { %5410 = vmatpush.msrb.mxu0 %v4969_v62  ;;  %v8555_v61 = vpop.permute.xlu2 %4232  ;;  %v4394_v44 = vpop.permute.xlu1 %4393  ;;  %v4915_v62 = vld [vmem:[#allocation2 + $0x338] sm:$0xff] }
 0x61e   : > { %5433 = vmatpush.msrb.mxu1 %v4970_v59  ;;  %v4414_v34 = vsel %vm1309_vm5, %v8529_v9, %v4394_v44  ;;  %v5888_v44 = vmov 0  }
 0x61f   : > { %5411 = vmatpush.msrb.mxu0 %v4949_v11  ;;  %4454 = vst [vmem:[#allocation2 + $0x578] sm:$0x7] %v4414_v34  ;;  %v5056_v4 = vld [vmem:[#allocation2 + $0x158] sm:$0x1]  ;;  %5857 = vset.pattern.permute.xlu0 %v5888_v44  ;;  %v5622_v11 = vld [vmem:[%s8638_s2 + $0x8] sm:$0xff] }
 0x620   : > { %5434 = vmatpush.msrb.mxu1 %v4950_v3  ;;  %5833 = vmatpush.msk.msra.mxu3 %vm5064_vm8, %v5056_v4  ;;  %v4875_v34 = vld [vmem:[#allocation2 + $0x80] sm:$0xff]  ;;  %v4855_v4 = vld [vmem:[#allocation2 + $0x598] sm:$0xff] }
 0x621   : > { %5412 = vmatpush.msrb.mxu0 %v4929_v14  ;;  %5820 = vmatmul.msk.f32.gmra.mxu2 %vm5057_vm9, %v8394_v52  ;;  %v4993_v14 = vld [vmem:[#allocation2 + $0x1b0] sm:$0xff] }
 0x622   : > { %5435 = vmatpush.msrb.mxu1 %v4930_v8  ;;  %5823 = vmatmul.msk.f32.gmra.mxu3 %vm5057_vm9, %v8394_v52  ;;  %v4973_v8 = vld [vmem:[#allocation2 + $0x468] sm:$0xff] }
 0x623   : > { %5413 = vmatpush.msrb.mxu0 %v4909_v29  ;;  %5858 = vset.pattern.permute.xlu1 %v5888_v44  ;;  %v4974_v29 = vld [vmem:[#allocation2 + $0x248] sm:$0xff] }
 0x624   : > { %5436 = vmatpush.msrb.mxu1 %v4910_v35  ;;  %v4235_v12 = vpop.permute.xlu0 %4234  ;;  %5630 = vperm.xlu1 %5858, %v5622_v11   ;;  %v4953_v35 = vld [vmem:[#allocation2 + $0x198] sm:$0xff] }
 0x625   : > { %5414 = vmatpush.msrb.mxu0 %v4889_v1  ;;  %v4388_v9 = vpop.permute.xlu2 %4387  ;;  %v4574_v16 = vpop.permute.xlu1 %4573  ;;  %v4255_v57 = vsel %vm1108_vm4, %v8555_v61, %v4235_v12  ;;  %v4954_v1 = vld [vmem:[#allocation2 + $0x138] sm:$0xff]  ;;  %v4853_v12 = vld [vmem:[#allocation2 + $0x2c0] sm:$0xff] }
 0x626   : > { %5437 = vmatpush.msrb.mxu1 %v4890_v0  ;;  %v4411_v18 = vsel %vm1309_vm5, %v8418_v63, %v4388_v9  ;;  %v4412_v58 = vsel %vm1309_vm5, %v4388_v9, %v8510_v30  ;;  %v4594_v5 = vsel %vm1490_vm6, %v8540_v46, %v4574_v16  ;;  %v4850_v63 = vld [vmem:[#allocation2 + $0x500] sm:$0xff]  ;;  %4295 = vst [vmem:[#allocation2 + $0x540] sm:$0xe0] %v4255_v57  ;;  %v4933_v0 = vld [vmem:[#allocation2 + $0x310] sm:$0xff]  ;;  %v4913_v16 = vld [vmem:[#allocation2 + $0x208] sm:$0xff]  ;;  %v5188_v57 = vpop.f32.mrf.mxu2 }
 0x627   : > { %4451 = vst [vmem:[#allocation2 + $0x480] sm:$0x7] %v4411_v18  ;;  %5415 = vmatpush.msrb.mxu0 %v4869_v45  ;;  %v4934_v9 = vld [vmem:[#allocation2 + $0x2a0] sm:$0xff]  ;;  %v4914_v18 = vld [vmem:[#allocation2 + $0x150] sm:$0xff]  ;;  %v4894_v45 = vld [vmem:[#allocation2 + $0x68] sm:$0xff] }
 0x628   : > { %4452 = vst [vmem:[#allocation2 + $0x660] sm:$0x7] %v4412_v58  ;;  %5438 = vmatpush.msrb.mxu1 %v4870_v23  ;;  %v4893_v58 = vld [vmem:[#allocation2 + $0x358] sm:$0xff]  ;;  %v4874_v23 = vld [vmem:[#allocation2 + $0x3d0] sm:$0xff] }
 0x629   : > { %4634 = vst [vmem:[#allocation2 + $0x578] sm:$0x38] %v4594_v5  ;;  %5416 = vmatpush.msrb.mxu0 %v4849_v48  ;;  %v4873_v5 = vld [vmem:[#allocation2 + $0x680] sm:$0xff]  ;;  %v4854_v48 = vld [vmem:[#allocation2 + $0x588] sm:$0xff] }
 0x62a   : > { %5439 = vmatpush.msrb.mxu1 %v4850_v63  ;;  %5813 = vmatmul.msk.f32.vlgmr.msrb.gmra.mxu0 %vm5057_vm9, %v8282_v55  ;;  %v5211_v63 = vpop.f32.mrf.mxu3 }
 0x62b   : > { %5816 = vmatmul.msk.f32.vlgmr.msrb.gmra.mxu1 %vm5057_vm9, %v8282_v55 }
 0x62d   : > { %v4229_v30 = vpop.permute.xlu2 %4228  ;;  %v4051_v26 = vpop.permute.xlu1 %4050  ;;  %v5016_v55 = vld [vmem:[#allocation2 + $0x540] sm:$0xff] }
 0x62e   : > { %v4252_v60 = vsel %vm1108_vm4, %v8466_v2, %v4229_v30  ;;  %v4074_v39 = vsel %vm927_vm3, %v4051_v26, %v8545_v19  ;;  %v4996_v2 = vld [vmem:[#allocation2 + $0xe8] sm:$0xff] }
 0x62f   : > { %4292 = vst [vmem:[#allocation2 + $0x298] sm:$0xe0] %v4252_v60  ;;  %v4568_v10 = vpop.permute.xlu0 %4567 }
 0x630   : > { %4114 = vst [vmem:[#allocation2 + $0x4d0] sm:$0x1c] %v4074_v39  ;;  %v5036_v51 = vld [vmem:[#allocation2 + $0x578] sm:$0xff]  ;;  %v4591_v28 = vsel %vm1490_vm6, %v8436_v38, %v4568_v10  ;;  %v4592_v50 = vsel %vm1490_vm6, %v4568_v10, %v8523_v54  ;;  %v4976_v54 = vld [vmem:[#allocation2 + $0x6c0] sm:$0xff] }
 0x631   : > { %5568 = vmatpush.msra.mxu3 %v5036_v51  ;;  %4631 = vst [vmem:[#allocation2 + $0x480] sm:$0x38] %v4591_v28 }
 0x632   : > { %5814 = vmatmul.msk.f32.gmra.mxu0 %vm5057_vm9, %v8394_v52  ;;  %4632 = vst [vmem:[#allocation2 + $0x660] sm:$0x38] %v4592_v50 }
 0x633   : > { %5817 = vmatmul.msk.f32.gmra.mxu1 %vm5057_vm9, %v8394_v52  ;;  %5569 = vmatpush.msra.mxu3 %v5016_v55 }
 0x635   : > { %v4231_v46 = vpop.permute.xlu1 %4230  ;;  %5570 = vmatpush.msra.mxu3 %v4996_v2 }
 0x636   : > { %v4253_v20 = vsel %vm1108_vm4, %v4229_v30, %v4231_v46  ;;  %v4254_v38 = vsel %vm1108_vm4, %v4231_v46, %v8555_v61  ;;  %v4895_v61 = vld [vmem:[#allocation2 + $0x188] sm:$0xff]  ;;  %v5142_v30 = vpop.f32.mrf.mxu0 }
 0x637   : > { %4293 = vst [vmem:[#allocation2 + $0x4b8] sm:$0xe0] %v4253_v20  ;;  %5571 = vmatpush.msra.mxu3 %v4976_v54 }
 0x638   : > { %4294 = vst [vmem:[#allocation2 + $0x4d0] sm:$0xe0] %v4254_v38 }
 0x639   : > { %5572 = vmatpush.msra.mxu3 %v4956_v37 }
 0x63b   : > { %5573 = vmatpush.msra.mxu3 %v4936_v47 }
 0x63d   : > { %v4748_v24 = vpop.permute.xlu1 %4747  ;;  %5574 = vmatpush.msra.mxu3 %v4916_v15 }
 0x63e   : > { %v4771_v49 = vsel %vm1650_vm7, %v8400_v53, %v4748_v24  ;;  %v4772_v19 = vsel %vm1650_vm7, %v4748_v24, %v8496_v40  ;;  %v8600_v53 = vld [vmem:[%s8637_s1] sm:$0xff]  ;;  %v4955_v40 = vld [vmem:[#allocation2 + $0xa8] sm:$0xff]  ;;  %v5145_v10 = vpop.f32.mrf.mxu0 }
 0x63f   : > { %4811 = vst [vmem:[#allocation2 + $0x480] sm:$0xc0] %v4771_v49  ;;  %v5015_v32 = vld [vmem:[#allocation2 + $0x4d0] sm:$0xff]  ;;  %5575 = vmatpush.msra.mxu3 %v4896_v6 }
 0x640   : > { %4812 = vst [vmem:[#allocation2 + $0x660] sm:$0xc0] %v4772_v19  ;;  %5546 = vmatpush.msra.mxu2 %v5015_v32  ;;  %v5585_v32 = vmin.f32 %v5142_v30, %v5188_v57 }
 0x641   : > { %4831 = vst [vmem:[#allocation2 + $0x2e8] sm:$0x1] %v4771_v49  ;;  %5576 = vmatpush.msra.mxu3 %v4876_v33 }
 0x642   : > { %4832 = vst [vmem:[#allocation2 + $0x5f0] sm:$0x1] %v4772_v19  ;;  %5547 = vmatpush.msra.mxu2 %v4995_v27  ;;  %v5191_v60 = vpop.f32.mrf.mxu2 }
 0x643   : > { %5577 = vmatpush.msra.mxu3 %v4856_v31  ;;  %v5214_v39 = vpop.f32.mrf.mxu3 }
 0x644   : > { %5548 = vmatpush.msra.mxu2 %v4975_v17  ;;  %5834 = vmatmul.msk.f32.vlgmr.msra.gmra.mxu3 %vm5057_vm9, %v8600_v53 }
 0x645   : > { %v4049_v42 = vpop.permute.xlu1 %4048 }
 0x646   : > { %5549 = vmatpush.msra.mxu2 %v4955_v40  ;;  %v4072_v56 = vsel %vm927_vm3, %v8454_v21, %v4049_v42  ;;  %v4073_v25 = vsel %vm927_vm3, %v4049_v42, %v4051_v26  ;;  %v5033_v41 = vld [vmem:[#allocation2 + $0x480] sm:$0xff]  ;;  %v5621_v21 = vld [vmem:[%s8638_s2] sm:$0xff]  ;;  %v5165_v26 = vpop.f32.mrf.mxu1  ;;  %v5234_v55 = vpop.f32.mrf.mxu0 }
 0x647   : > { %4112 = vst [vmem:[#allocation2 + $0x298] sm:$0x1c] %v4072_v56  ;;  %v5034_v59 = vld [vmem:[#allocation2 + $0x660] sm:$0xff]  ;;  %5625 = vperm.xlu0 %5857, %v5621_v21   ;;  %v5586_v33 = vmin.f32 %v5165_v26, %v5211_v63  ;;  %v5589_v40 = vmin.f32 %v5585_v32, %v5234_v55 }
 0x648   : > { %4113 = vst [vmem:[#allocation2 + $0x4b8] sm:$0x1c] %v4073_v25  ;;  %v5053_v22 = vld [vmem:[#allocation2 + $0x2e8] sm:$0x1]  ;;  %5550 = vmatpush.msra.mxu2 %v4935_v7 }
 0x649   : > { %5824 = vmatpush.msk.msra.mxu0 %vm5064_vm8, %v5053_v22  ;;  %v5054_v36 = vld [vmem:[#allocation2 + $0x5f0] sm:$0x1] }
 0x64a   : > { %5827 = vmatpush.msk.msra.mxu1 %vm5064_vm8, %v5054_v36  ;;  %5551 = vmatpush.msra.mxu2 %v4915_v62  ;;  %v5280_v28 = vpop.f32.mrf.mxu2 }
 0x64b   : > { %5499 = vmatpush.msra.mxu0 %v5033_v41  ;;  %v5593_v7 = vmin.f32 %v5589_v40, %v5280_v28 }
 0x64c   : > { %5552 = vmatpush.msra.mxu2 %v4895_v61  ;;  %5522 = vmatpush.msra.mxu1 %v5034_v59  ;;  %v5303_v50 = vpop.f32.mrf.mxu3 }
 0x64d   : > { %5835 = vmatmul.msk.f32.gmra.mxu3 %vm5057_vm9, %v8394_v52 }
 0x64e   : > { %5553 = vmatpush.msra.mxu2 %v4875_v34  ;;  %v5013_v3 = vld [vmem:[#allocation2 + $0x298] sm:$0xff]  ;;  %v5168_v51 = vpop.f32.mrf.mxu1  ;;  %v5237_v38 = vpop.f32.mrf.mxu0 }
 0x64f   : > { %5500 = vmatpush.msra.mxu0 %v5013_v3  ;;  %v5014_v13 = vld [vmem:[#allocation2 + $0x4b8] sm:$0xff]  ;;  %v5588_v56 = vmin.f32 %v5168_v51, %v5214_v39 }
 0x650   : > { %5554 = vmatpush.msra.mxu2 %v4855_v4  ;;  %5523 = vmatpush.msra.mxu1 %v5014_v13 }
 0x651   : > { %5501 = vmatpush.msra.mxu0 %v4993_v14  ;;  %5831 = vmatmul.msk.f32.vlgmr.msra.gmra.mxu2 %vm5057_vm9, %v8600_v53 }
 0x652   : > { %5524 = vmatpush.msra.mxu1 %v4994_v43  ;;  %v5283_v46 = vpop.f32.mrf.mxu2 }
 0x653   : > { %5502 = vmatpush.msra.mxu0 %v4973_v8 }
 0x654   : > { %5525 = vmatpush.msra.mxu1 %v4974_v29  ;;  %v5306_v20 = vpop.f32.mrf.mxu3 }
 0x655   : > { %5503 = vmatpush.msra.mxu0 %v4953_v35 }
 0x656   : > { %5526 = vmatpush.msra.mxu1 %v4954_v1  ;;  %v5257_v2 = vpop.f32.mrf.mxu1 }
 0x657   : > { %5504 = vmatpush.msra.mxu0 %v4933_v0  ;;  %v5590_v25 = vmin.f32 %v5586_v33, %v5257_v2 }
 0x658   : > { %5527 = vmatpush.msra.mxu1 %v4934_v9 }
 0x659   : > { %5505 = vmatpush.msra.mxu0 %v4913_v16  ;;  %5832 = vmatmul.msk.f32.gmra.mxu2 %vm5057_vm9, %v8394_v52  ;;  %v5594_v41 = vmin.f32 %v5590_v25, %v5303_v50 }
 0x65a   : > { %5528 = vmatpush.msra.mxu1 %v4914_v18 }
 0x65b   : > { %5506 = vmatpush.msra.mxu0 %v4893_v58 }
 0x65c   : > { %5529 = vmatpush.msra.mxu1 %v4894_v45  ;;  %v5395_v47 = vpop.f32.mrf.mxu3 }
 0x65d   : > { %5507 = vmatpush.msra.mxu0 %v4873_v5 }
 0x65e   : > { %5530 = vmatpush.msra.mxu1 %v4874_v23  ;;  %v5260_v54 = vpop.f32.mrf.mxu1 }
 0x65f   : > { %5508 = vmatpush.msra.mxu0 %v4853_v12  ;;  %v5592_v36 = vmin.f32 %v5588_v56, %v5260_v54 }
 0x660   : > { %5531 = vmatpush.msra.mxu1 %v4854_v48  ;;  %5825 = vmatmul.msk.f32.vlgmr.msra.gmra.mxu0 %vm5057_vm9, %v8600_v53 }
 0x661   : > { %5828 = vmatmul.msk.f32.vlgmr.msra.gmra.mxu1 %vm5057_vm9, %v8600_v53  ;;  %v5587_v53 = vmin.f32 %v5145_v10, %v5191_v60  ;;  %v5596_v44 = vmin.f32 %v5592_v36, %v5306_v20 }
 0x663   : > { %v5591_v22 = vmin.f32 %v5587_v53, %v5237_v38 }
 0x664   : > { %v5372_v37 = vpop.f32.mrf.mxu2 }
 0x665   : > { %v5398_v49 = vpop.f32.mrf.mxu3  ;;  %v5595_v59 = vmin.f32 %v5591_v22, %v5283_v46 }
 0x668   : > { %5826 = vmatmul.msk.f32.gmra.mxu0 %vm5057_vm9, %v8394_v52 }
 0x669   : > { %5829 = vmatmul.msk.f32.gmra.mxu1 %vm5057_vm9, %v8394_v52 }
 0x66d   : > { %v5326_v15 = vpop.f32.mrf.mxu0 }
 0x66e   : > { %v5349_v52 = vpop.f32.mrf.mxu1  ;;  %v5375_v24 = vpop.f32.mrf.mxu2  ;;  %v5597_v21 = vmin.f32 %v5593_v7, %v5326_v15 }
 0x66f   : > { %v5598_v11 = vmin.f32 %v5594_v41, %v5349_v52 }
 0x670   : > { %v5601_v4 = vmin.f32 %v5597_v21, %v5372_v37 }
 0x671   : > { %v5602_v14 = vmin.f32 %v5598_v11, %v5395_v47 }
 0x675   : > { %v5329_v19 = vpop.f32.mrf.mxu0 }
 0x676   : > { %v5352_v6 = vpop.f32.mrf.mxu1  ;;  %v5599_v13 = vmin.f32 %v5595_v59, %v5329_v19 }
 0x677   : > { %v5600_v43 = vmin.f32 %v5596_v44, %v5352_v6 }
 0x678   : > { %v5603_v29 = vmin.f32 %v5599_v13, %v5375_v24 }
 0x679   : > { %v5604_v0 = vmin.f32 %v5600_v43, %v5398_v49 }
 0x696   : > { %v5631_v2 = vpop.permute.xlu1 %5630 }
 0x69b   : > { %v5464_v27 = vpop.f32.mrf.mxu2 }
 0x69d   : > { %v5487_v31 = vpop.f32.mrf.mxu3 }
 0x6a4   : > { %v5467_v62 = vpop.f32.mrf.mxu2 }
 0x6a5   : > { %v5490_v61 = vpop.f32.mrf.mxu3 }
 0x6a7   : > { %v5418_v17 = vpop.f32.mrf.mxu0 }
 0x6a8   : > { %v5441_v42 = vpop.f32.mrf.mxu1  ;;  %v5605_v35 = vmin.f32 %v5601_v4, %v5418_v17 }
 0x6a9   : > { %v5606_v9 = vmin.f32 %v5602_v14, %v5441_v42 }
 0x6aa   : > { %v5609_v58 = vmin.f32 %v5605_v35, %v5464_v27 }
 0x6ab   : > { %v5610_v5 = vmin.f32 %v5606_v9, %v5487_v31 }
 0x6af   : > { %v5421_v34 = vpop.f32.mrf.mxu0 }
 0x6b0   : > { %v5444_v3 = vpop.f32.mrf.mxu1  ;;  %v5607_v45 = vmin.f32 %v5603_v29, %v5421_v34 }
 0x6b1   : > { %v5608_v23 = vmin.f32 %v5604_v0, %v5444_v3 }
 0x6b2   : > { %v5611_v57 = vmin.f32 %v5607_v45, %v5467_v62 }
 0x6b3   : > { %v5612_v63 = vmin.f32 %v5608_v23, %v5490_v61 }
 0x6b9   : > { %v5626_v50 = vpop.permute.xlu0 %5625 }
 0x6c7   : > { %v5579_v1 = vpop.f32.mrf.mxu3 }
 0x6d0   : > { %v5582_v51 = vpop.f32.mrf.mxu3 }
 0x6d4   : > { %v5556_v8 = vpop.f32.mrf.mxu2 }
 0x6dc   : > { %v5559_v26 = vpop.f32.mrf.mxu2 }
 0x6dd   : > { %v5510_v16 = vpop.f32.mrf.mxu0 }
 0x6de   : > { %v5533_v18 = vpop.f32.mrf.mxu1  ;;  %v5613_v12 = vmin.f32 %v5609_v58, %v5510_v16 }
 0x6df   : > { %v5614_v48 = vmin.f32 %v5610_v5, %v5533_v18 }
 0x6e0   : > { %v5617_v60 = vmin.f32 %v5613_v12, %v5556_v8 }
 0x6e1   : > { %v5618_v28 = vmin.f32 %v5614_v48, %v5579_v1 }
 0x6e2   : > { %v5633_v38 = vadd.f32 %v5626_v50, %v5617_v60 }
 0x6e3   : > { %v5634_v37 = vadd.f32 %v5626_v50, %v5618_v28 }
 0x6e5   : > { %v5513_v30 = vpop.f32.mrf.mxu0 }
 0x6e6   : > { %v5615_v39 = vmin.f32 %v5611_v57, %v5513_v30  ;;  %v5536_v10 = vpop.f32.mrf.mxu1 }
 0x6e7   : > { %v5616_v55 = vmin.f32 %v5612_v63, %v5536_v10 }
 0x6e8   : > { %v5619_v46 = vmin.f32 %v5615_v39, %v5559_v26 }
 0x6e9   : > { %v5620_v20 = vmin.f32 %v5616_v55, %v5582_v51 }
 0x6ea   : > { %v5635_v54 = vadd.f32 %v5631_v2, %v5619_v46 }
 0x6eb   : > { %v5636_v47 = vadd.f32 %v5631_v2, %v5620_v20 }
 0x6ec   : > { %v5637_v15 = vmax.f32 %v5633_v38, %v5635_v54 }
 0x6ed   : > { %v5644_v52 = vmax.f32 %v5634_v37, %v5636_v47 }
 0x6ee   : > { %v5638_v24 = vrot.slane %v5637_v15, 4 }
 0x6ef   : > { %v5645_v49 = vrot.slane %v5644_v52, 4 }
 0x6f0   : > { %v5639_v19 = vmax.f32 %v5637_v15, %v5638_v24 }
 0x6f1   : > { %v5646_v6 = vmax.f32 %v5644_v52, %v5645_v49 }
 0x6f2   : > { %v5640_v32 = vrot.slane %v5639_v19, 2 }
 0x6f3   : > { %v5647_v33 = vrot.slane %v5646_v6, 2 }
 0x6f4   : > { %v5641_v27 = vmax.f32 %v5639_v19, %v5640_v32 }
 0x6f5   : > { %v5648_v31 = vmax.f32 %v5646_v6, %v5647_v33 }
 0x6f6   : > { %v5642_v17 = vrot.slane %v5641_v27, 1 }
 0x6f7   : > { %v5649_v53 = vrot.slane %v5648_v31, 1 }
 0x6f8   : > { %v5643_v40 = vmax.f32 %v5641_v27, %v5642_v17 }
 0x6f9   : > { %v5650_v42 = vmax.f32 %v5648_v31, %v5649_v53 }
 0x6fa   : > { %v5651_v56 = vsub.f32 %v5633_v38, %v5643_v40  ;;  %v5653_v25 = vsub.f32 %v5635_v54, %v5643_v40 }
 0x6fb   : > { %v5652_v7 = vsub.f32 %v5634_v37, %v5650_v42  ;;  %v5654_v22 = vsub.f32 %v5636_v47, %v5650_v42 }
 0x6fc   : > { %v5655_v41 = vmul.f32 1.442695, %v5651_v56  ;;  %v5659_v36 = vmul.f32 1.442695, %v5653_v25 }
 0x6fd   : > { %v5657_v62 = vmul.f32 1.442695, %v5652_v7  ;;  %v5661_v59 = vmul.f32 1.442695, %v5654_v22 }
 0x6fe   : > { %5859 = vpow2.f32 %v5655_v41 }
 0x6ff   : > { %5861 = vpow2.f32 %v5657_v62 }
 0x700   : > { %5863 = vpow2.f32 %v5659_v36 }
 0x701   : > { %5865 = vpow2.f32 %v5661_v59 }
 0x704   : > { %v5860_v21 = vpop.eup %5859 }
 0x705   : > { %v5862_v61 = vpop.eup %5861 }
 0x706   : > { %v5864_v44 = vpop.eup %5863 }
 0x707   : > { %v5866_v11 = vpop.eup %5865  ;;  %v5663_v34 = vadd.f32 %v5864_v44, %v5860_v21 }
 0x708   : > { %v5670_v3 = vadd.f32 %v5866_v11, %v5862_v61 }
 0x709   : > { %v5664_v4 = vrot.slane %v5663_v34, 4 }
 0x70a   : > { %v5671_v13 = vrot.slane %v5670_v3, 4 }
 0x70b   : > { %v5665_v14 = vadd.f32 %v5664_v4, %v5663_v34 }
 0x70c   : > { %v5672_v43 = vadd.f32 %v5671_v13, %v5670_v3 }
 0x70d   : > { %v5666_v8 = vrot.slane %v5665_v14, 2 }
 0x70e   : > { %v5673_v29 = vrot.slane %v5672_v43, 2 }
 0x70f   : > { %v5667_v35 = vadd.f32 %v5666_v8, %v5665_v14 }
 0x710   : > { %v5674_v1 = vadd.f32 %v5673_v29, %v5672_v43 }
 0x711   : > { %v5668_v0 = vrot.slane %v5667_v35, 1 }
 0x712   : > { %v5675_v9 = vrot.slane %v5674_v1, 1 }
 0x713   : > { %v5669_v16 = vadd.f32 %v5668_v0, %v5667_v35 }
 0x714   : > { %v5676_v18 = vadd.f32 %v5675_v9, %v5674_v1 }
 0x715   : > { %5867 = vrcp.f32 %v5669_v16  ;;  %v5688_v48 = vand.u32 2147483648, %v5669_v16  ;;  %v5686_v30 = vand.u32 2147483647, %v5669_v16  ;;  %vm5682_vm12 = vweird.f32 %v5669_v16 }
 0x716   : > { %5869 = vrcp.f32 %v5676_v18  ;;  %v5703_v26 = vand.u32 2147483648, %v5676_v18  ;;  %v5701_v39 = vand.u32 2147483647, %v5676_v18  ;;  %vm5697_vm14 = vweird.f32 %v5676_v18 }
 0x717   : > { %v5689_v51 = vor.u32 1.1754944e-38, %v5688_v48  ;;  %vm5687_vm15 = vcmp.eq.f32.partialorder %v5686_v30, 8.507059e+37 }
 0x718   : > { %v5704_v55 = vor.u32 1.1754944e-38, %v5703_v26  ;;  %vm5702_vm1 = vcmp.eq.f32.partialorder %v5701_v39, 8.507059e+37 }
 0x71b   : > { %v5868_v58 = vpop.eup %5867 }
 0x71c   : > { %v5870_v45 = vpop.eup %5869  ;;  %v5678_v5 = vmul.f32 %v5868_v58, %v5669_v16  ;;  %vm5683_vm10 = vweird.f32 %v5868_v58 }
 0x71d   : > { %v5693_v23 = vmul.f32 %v5870_v45, %v5676_v18  ;;  %vm5698_vm11 = vweird.f32 %v5870_v45  ;;  %vm5684_vm13 = vmor %vm5682_vm12, %vm5683_vm10 }
 0x71e   : > { %v5679_v12 = vsub.f32 1.0, %v5678_v5  ;;  %vm5699_vm0 = vmor %vm5697_vm14, %vm5698_vm11 }
 0x71f   : > { %v5694_v57 = vsub.f32 1.0, %v5693_v23 }
 0x720   : > { %v5680_v63 = vmul.f32 %v5868_v58, %v5679_v12 }
 0x721   : > { %v5695_v60 = vmul.f32 %v5870_v45, %v5694_v57 }
 0x722   : > { %v5681_v10 = vadd.f32 %v5868_v58, %v5680_v63 }
 0x723   : > { %v5696_v28 = vadd.f32 %v5870_v45, %v5695_v60 }
 0x724   : > { %v5685_v50 = vsel %vm5684_vm13, %v5868_v58, %v5681_v10 }
 0x725   : > { %v5690_v2 = vsel %vm5687_vm15, %v5689_v51, %v5685_v50  ;;  %v5700_v46 = vsel %vm5699_vm0, %v5870_v45, %v5696_v28 }
 0x726   : > { %v5691_v20 = vmul.f32 %v5860_v21, %v5690_v2  ;;  %v5705_v38 = vsel %vm5702_vm1, %v5704_v55, %v5700_v46  ;;  %v5707_v54 = vmul.f32 %v5864_v44, %v5690_v2 }
 0x727   : > { %v5706_v37 = vmul.f32 %v5862_v61, %v5705_v38  ;;  %v5708_v47 = vmul.f32 %v5866_v11, %v5705_v38 }
 0x728   : > { %5709 = vst [vmem:[%s170_s14] sm:$0xff] %v5691_v20 }
 0x729   : > { %5710 = vst [vmem:[%s170_s14 + $0x8] sm:$0xff] %v5706_v37 }
 0x72a   : > { %5711 = vst [vmem:[%s170_s14 + $0x10] sm:$0xff] %v5707_v54 }
 0x72b   : > { %5712 = vst [vmem:[%s170_s14 + $0x18] sm:$0xff] %v5708_v47 }
 0x72c PF: > { %s13_s12 = sadd.s32 1, %s5878_s12  }
 0x72d   : > { %p10_p4 = scmp.ge.s32.totalorder %s13_s12, 4  }
 0x72f   :  { %12 = sbr.rel (!%p10_p4) target bundleno = 1 (0x1), region = 146 }

</bundles_post_ra>
